<compile_context>
chip_gen: v5e
topology: v5e:2x2
jax: 0.10.0
libtpu: 0.0.40
codegen_flags: <defaults>
</compile_context>

<pallas_src>
import functools

import jax
import jax.numpy as jnp
from jax.experimental import pallas as pl
from jax.experimental.pallas import tpu as pltpu

D2 = 512        # LSTM input_size == hidden_size in the PyTorch module
_TB_MAX = 256   # max rows (B) per tile


def _round_up(x, m):
    return (x + m - 1) // m * m


# ----------------------------------------------------------------------------
# Pallas kernel: one LSTM time step for one tile of rows
# ----------------------------------------------------------------------------
def _row_lstm_kernel(x_ref, wih_ref, whh_ref, b_ref, out_ref, h_scr, c_scr):
    """
    x_ref   : (1, tb, H)   bf16  x_t for this row tile
    wih_ref : (H, 4H)      bf16  W_ih^T  (VMEM-resident)
    whh_ref : (H, 4H)      bf16  W_hh^T  (VMEM-resident)
    b_ref   : (1, 4H)      f32   b_ih + b_hh
    out_ref : (tb, H)      f32   final hidden state (written at t == T-1)
    h_scr   : (tb, H)      f32   carried hidden state
    c_scr   : (tb, H)      f32   carried cell state
    """
    t = pl.program_id(1)

    @pl.when(t == 0)
    def _():
        h_scr[...] = jnp.zeros_like(h_scr)
        c_scr[...] = jnp.zeros_like(c_scr)

    hidden = h_scr.shape[-1]

    # gates = x_t @ W_ih^T + h_{t-1} @ W_hh^T + (b_ih + b_hh)   (f32 accumulate)
    gates = (
        jnp.dot(x_ref[0], wih_ref[...], preferred_element_type=jnp.float32)
        + jnp.dot(h_scr[...].astype(jnp.bfloat16), whh_ref[...],
                  preferred_element_type=jnp.float32)
        + b_ref[...]
    )

    # PyTorch gate order: i, f, g, o
    i_g = jax.nn.sigmoid(gates[:, 0 * hidden:1 * hidden])
    f_g = jax.nn.sigmoid(gates[:, 1 * hidden:2 * hidden])
    g_g = jnp.tanh(gates[:, 2 * hidden:3 * hidden])
    o_g = jax.nn.sigmoid(gates[:, 3 * hidden:4 * hidden])

    c_new = f_g * c_scr[...] + i_g * g_g
    h_new = o_g * jnp.tanh(c_new)

    c_scr[...] = c_new
    h_scr[...] = h_new

    @pl.when(t == pl.num_programs(1) - 1)
    def _():
        out_ref[...] = h_new.astype(out_ref.dtype)


# ----------------------------------------------------------------------------
# RowEncoder forward: [N, D2, H', W'] -> [N, H', D2]
# ----------------------------------------------------------------------------
@jax.jit
def row_encoder(x, params):
    N, C, n_rows, width = x.shape
    hidden = params["w_hh"].shape[1]
    assert C == hidden, (C, hidden)

    # PyTorch LSTM parameter layout -> kernel layout (cheap boundary glue).
    wih_t = jnp.transpose(params["w_ih"]).astype(jnp.bfloat16)        # [H, 4H]
    whh_t = jnp.transpose(params["w_hh"]).astype(jnp.bfloat16)        # [H, 4H]
    bias = (params["b_ih"] + params["b_hh"]).astype(jnp.float32)
    bias = bias.reshape(1, 4 * hidden)                                # [1, 4H]

    # Every (n, row) pair is an independent length-W' sequence:
    # [N, C, H', W'] -> [T=W', B=N*H', C]
    B = N * n_rows
    T = width
    x_seq = jnp.transpose(x, (3, 0, 2, 1)).reshape(T, B, C).astype(jnp.bfloat16)

    tb = _TB_MAX if B >= _TB_MAX else _round_up(B, 8)
    Bp = _round_up(B, tb)
    if Bp != B:
        x_seq = jnp.pad(x_seq, ((0, 0), (0, Bp - B), (0, 0)))

    cost = pl.CostEstimate(
        flops=2 * 2 * Bp * T * hidden * (4 * hidden),      # 2 matmuls / step
        transcendentals=5 * Bp * T * hidden,               # 3 sigmoid + 2 tanh
        bytes_accessed=(x_seq.size * 2 + wih_t.size * 2 + whh_t.size * 2
                        + bias.size * 4 + Bp * hidden * 4),
    )

    out = pl.pallas_call(
        _row_lstm_kernel,
        out_shape=jax.ShapeDtypeStruct((Bp, hidden), jnp.float32),
        grid_spec=pltpu.PrefetchScalarGridSpec(
            num_scalar_prefetch=0,
            grid=(Bp // tb, T),
            in_specs=[
                pl.BlockSpec((1, tb, hidden), lambda i, t: (t, i, 0)),       # x_t
                pl.BlockSpec((hidden, 4 * hidden), lambda i, t: (0, 0)),     # W_ih^T
                pl.BlockSpec((hidden, 4 * hidden), lambda i, t: (0, 0)),     # W_hh^T
                pl.BlockSpec((1, 4 * hidden), lambda i, t: (0, 0)),          # bias
            ],
            out_specs=pl.BlockSpec((tb, hidden), lambda i, t: (i, 0)),
            scratch_shapes=[
                pltpu.VMEM((tb, hidden), jnp.float32),   # h
                pltpu.VMEM((tb, hidden), jnp.float32),   # c
            ],
        ),
        compiler_params=pltpu.CompilerParams(
            dimension_semantics=("parallel", "arbitrary"),
        ),
        cost_estimate=cost,
    )(x_seq, wih_t, whh_t, bias)

    return out[:B].reshape(N, n_rows, hidden)


# ----------------------------------------------------------------------------
# Pure-JAX f32 reference (matches torch.nn.LSTM forward, batch_first, h0=c0=0)
# ----------------------------------------------------------------------------
def row_encoder_ref(x, params):
    N, C, n_rows, width = x.shape
    hidden = params["w_hh"].shape[1]
    w_ih, w_hh = params["w_ih"], params["w_hh"]
    b = params["b_ih"] + params["b_hh"]
    xs = jnp.transpose(x, (3, 0, 2, 1)).reshape(width, N * n_rows, C)

    def step(carry, x_t):
        h, c = carry
        gates = x_t @ w_ih.T + h @ w_hh.T + b
        i = jax.nn.sigmoid(gates[:, :hidden])
        f = jax.nn.sigmoid(gates[:, hidden:2 * hidden])
        g = jnp.tanh(gates[:, 2 * hidden:3 * hidden])
        o = jax.nn.sigmoid(gates[:, 3 * hidden:])
        c = f * c + i * g
        h = o * jnp.tanh(c)
        return (h, c), None

    h0 = jnp.zeros((N * n_rows, hidden), jnp.float32)
    (h_fin, _), _ = jax.lax.scan(step, (h0, h0), xs)
    return h_fin.reshape(N, n_rows, hidden)


# ----------------------------------------------------------------------------
# Parameter init (PyTorch nn.LSTM default: U(-1/sqrt(H), 1/sqrt(H)))
# ----------------------------------------------------------------------------
def init_params(key, hidden=D2):
    k = hidden ** -0.5
    k1, k2, k3, k4 = jax.random.split(key, 4)
    return {
        "w_ih": jax.random.uniform(k1, (4 * hidden, hidden), jnp.float32, -k, k),
        "w_hh": jax.random.uniform(k2, (4 * hidden, hidden), jnp.float32, -k, k),
        "b_ih": jax.random.uniform(k3, (4 * hidden,), jnp.float32, -k, k),
        "b_hh": jax.random.uniform(k4, (4 * hidden,), jnp.float32, -k, k),
    }


if __name__ == "__main__":
    key = jax.random.PRNGKey(0)
    kx, kp = jax.random.split(key)

    # Small shapes consistent with the module: D2 is fixed at 512 by the spec.
    N, n_rows, width = 2, 4, 8                      # x: [2, 512, 4, 8]
    x = jax.random.normal(kx, (N, D2, n_rows, width), dtype=jnp.float32)
    params = init_params(kp)

    y = row_encoder(x, params)
    y = jax.block_until_ready(y)

    assert y.shape == (N, n_rows, D2), y.shape
    assert bool(jnp.all(jnp.isfinite(y)))

    # bf16 MXU inputs vs f32 reference -> loose tolerance.
    y_ref = row_encoder_ref(x, params)
    err = float(jnp.max(jnp.abs(y - y_ref)))
    assert err < 1e-1, err

    print("KERNEL_OK")
</pallas_src>

<mosaic_0001>
module attributes {stable_mosaic.version = 11 : i64} {
  func.func @_row_lstm_kernel(%arg0: i32, %arg1: i32, %arg2: memref<1x8x512xbf16, #tpu.memory_space<vmem>>, %arg3: memref<512x2048xbf16, #tpu.memory_space<vmem>>, %arg4: memref<512x2048xbf16, #tpu.memory_space<vmem>>, %arg5: memref<1x2048xf32, #tpu.memory_space<vmem>>, %arg6: memref<8x512xf32, #tpu.memory_space<vmem>>, %arg7: memref<8x512xf32, #tpu.memory_space<vmem>>, %arg8: memref<8x512xf32, #tpu.memory_space<vmem>>) attributes {dimension_semantics = [#tpu.dimension_semantics<parallel>, #tpu.dimension_semantics<arbitrary>], iteration_bounds = array<i64: 1, 8>, scalar_prefetch = 0 : i64, scratch_operands = 2 : i64, tpu.core_type = #tpu.core_type<tc>, window_params = [{transform_indices = @transform_0, window_bounds = array<i64: 1, 8, 512>}, {pipeline_mode = #tpu.pipeline_mode<synchronous>, transform_indices = @transform_1, window_bounds = array<i64: 512, 2048>}, {pipeline_mode = #tpu.pipeline_mode<synchronous>, transform_indices = @transform_2, window_bounds = array<i64: 512, 2048>}, {pipeline_mode = #tpu.pipeline_mode<synchronous>, transform_indices = @transform_3, window_bounds = array<i64: 1, 2048>}, {transform_indices = @transform_4, window_bounds = array<i64: 8, 512>}]} {
    %c0_i32 = arith.constant 0 : i32
    %0 = arith.cmpi eq, %arg1, %c0_i32 : i32
    %1 = arith.extui %0 : i1 to i32
    %c0_i32_0 = arith.constant 0 : i32
    %2 = arith.cmpi ne, %1, %c0_i32_0 : i32
    scf.if %2 {
      %cst_22 = arith.constant 0.000000e+00 : f32
      %46 = vector.broadcast %cst_22 : f32 to vector<8x512xf32>
      %c0_23 = arith.constant 0 : index
      %c0_24 = arith.constant 0 : index
      %47 = vector.load %arg7[%c0_23, %c0_24] : memref<8x512xf32, #tpu.memory_space<vmem>>, vector<8x512xf32>
      tpu.vector_store %arg7[%c0_23, %c0_24], %46 {strides = array<i32>} : memref<8x512xf32, #tpu.memory_space<vmem>>, vector<8x512xf32>,
      %cst_25 = arith.constant 0.000000e+00 : f32
      %48 = vector.broadcast %cst_25 : f32 to vector<8x512xf32>
      %c0_26 = arith.constant 0 : index
      %c0_27 = arith.constant 0 : index
      %49 = vector.load %arg8[%c0_26, %c0_27] : memref<8x512xf32, #tpu.memory_space<vmem>>, vector<8x512xf32>
      tpu.vector_store %arg8[%c0_26, %c0_27], %48 {strides = array<i32>} : memref<8x512xf32, #tpu.memory_space<vmem>>, vector<8x512xf32>,
    } else {
    }
    %c0 = arith.constant 0 : index
    %c0_1 = arith.constant 0 : index
    %c0_2 = arith.constant 0 : index
    %3 = vector.load %arg2[%c0, %c0_1, %c0_2] : memref<1x8x512xbf16, #tpu.memory_space<vmem>>, vector<1x8x512xbf16>
    %4 = vector.shape_cast %3 : vector<1x8x512xbf16> to vector<8x512xbf16>
    %c0_3 = arith.constant 0 : index
    %c0_4 = arith.constant 0 : index
    %5 = vector.load %arg3[%c0_3, %c0_4] : memref<512x2048xbf16, #tpu.memory_space<vmem>>, vector<512x2048xbf16>
    %cst = arith.constant dense<0.000000e+00> : vector<8x2048xf32>
    %6 = tpu.matmul %4, %5, %cst {dimension_numbers = #tpu.dot_dimension_numbers<[1], [0], [0], [1], [0, 0, 1, 1], [], []>} : vector<8x512xbf16>, vector<512x2048xbf16>, vector<8x2048xf32> -> vector<8x2048xf32>
    %c0_5 = arith.constant 0 : index
    %c0_6 = arith.constant 0 : index
    %7 = vector.load %arg7[%c0_5, %c0_6] : memref<8x512xf32, #tpu.memory_space<vmem>>, vector<8x512xf32>
    %8 = arith.truncf %7 : vector<8x512xf32> to vector<8x512xbf16>
    %c0_7 = arith.constant 0 : index
    %c0_8 = arith.constant 0 : index
    %9 = vector.load %arg4[%c0_7, %c0_8] : memref<512x2048xbf16, #tpu.memory_space<vmem>>, vector<512x2048xbf16>
    %cst_9 = arith.constant dense<0.000000e+00> : vector<8x2048xf32>
    %10 = tpu.matmul %8, %9, %cst_9 {dimension_numbers = #tpu.dot_dimension_numbers<[1], [0], [0], [1], [0, 0, 1, 1], [], []>} : vector<8x512xbf16>, vector<512x2048xbf16>, vector<8x2048xf32> -> vector<8x2048xf32>
    %11 = arith.addf %6, %10 : vector<8x2048xf32>
    %c0_10 = arith.constant 0 : index
    %c0_11 = arith.constant 0 : index
    %12 = vector.load %arg5[%c0_10, %c0_11] : memref<1x2048xf32, #tpu.memory_space<vmem>>, vector<1x2048xf32>
    %13 = vector.broadcast %12 : vector<1x2048xf32> to vector<8x2048xf32>
    %14 = arith.addf %11, %13 : vector<8x2048xf32>
    %15 = vector.extract_strided_slice %14 {offsets = [0, 0], sizes = [8, 512], strides = [1, 1]} : vector<8x2048xf32> to vector<8x512xf32>
    %16 = arith.negf %15 : vector<8x512xf32>
    %17 = math.exp %16 : vector<8x512xf32>
    %cst_12 = arith.constant 1.000000e+00 : f32
    %18 = vector.broadcast %cst_12 : f32 to vector<8x512xf32>
    %19 = arith.addf %18, %17 : vector<8x512xf32>
    %20 = arith.divf %18, %19 : vector<8x512xf32>
    %21 = vector.extract_strided_slice %14 {offsets = [0, 512], sizes = [8, 512], strides = [1, 1]} : vector<8x2048xf32> to vector<8x512xf32>
    %22 = arith.negf %21 : vector<8x512xf32>
    %23 = math.exp %22 : vector<8x512xf32>
    %cst_13 = arith.constant 1.000000e+00 : f32
    %24 = vector.broadcast %cst_13 : f32 to vector<8x512xf32>
    %25 = arith.addf %24, %23 : vector<8x512xf32>
    %26 = arith.divf %24, %25 : vector<8x512xf32>
    %27 = vector.extract_strided_slice %14 {offsets = [0, 1024], sizes = [8, 512], strides = [1, 1]} : vector<8x2048xf32> to vector<8x512xf32>
    %28 = math.tanh %27 : vector<8x512xf32>
    %29 = vector.extract_strided_slice %14 {offsets = [0, 1536], sizes = [8, 512], strides = [1, 1]} : vector<8x2048xf32> to vector<8x512xf32>
    %30 = arith.negf %29 : vector<8x512xf32>
    %31 = math.exp %30 : vector<8x512xf32>
    %cst_14 = arith.constant 1.000000e+00 : f32
    %32 = vector.broadcast %cst_14 : f32 to vector<8x512xf32>
    %33 = arith.addf %32, %31 : vector<8x512xf32>
    %34 = arith.divf %32, %33 : vector<8x512xf32>
    %c0_15 = arith.constant 0 : index
    %c0_16 = arith.constant 0 : index
    %35 = vector.load %arg8[%c0_15, %c0_16] : memref<8x512xf32, #tpu.memory_space<vmem>>, vector<8x512xf32>
    %36 = arith.mulf %26, %35 : vector<8x512xf32>
    %37 = arith.mulf %20, %28 : vector<8x512xf32>
    %38 = arith.addf %36, %37 : vector<8x512xf32>
    %39 = math.tanh %38 : vector<8x512xf32>
    %40 = arith.mulf %34, %39 : vector<8x512xf32>
    %c0_17 = arith.constant 0 : index
    %c0_18 = arith.constant 0 : index
    %41 = vector.load %arg8[%c0_17, %c0_18] : memref<8x512xf32, #tpu.memory_space<vmem>>, vector<8x512xf32>
    tpu.vector_store %arg8[%c0_17, %c0_18], %38 {strides = array<i32>} : memref<8x512xf32, #tpu.memory_space<vmem>>, vector<8x512xf32>,
    %c0_19 = arith.constant 0 : index
    %c0_20 = arith.constant 0 : index
    %42 = vector.load %arg7[%c0_19, %c0_20] : memref<8x512xf32, #tpu.memory_space<vmem>>, vector<8x512xf32>
    tpu.vector_store %arg7[%c0_19, %c0_20], %40 {strides = array<i32>} : memref<8x512xf32, #tpu.memory_space<vmem>>, vector<8x512xf32>,
    %c7_i32 = arith.constant 7 : i32
    %43 = arith.cmpi eq, %arg1, %c7_i32 : i32
    %44 = arith.extui %43 : i1 to i32
    %c0_i32_21 = arith.constant 0 : i32
    %45 = arith.cmpi ne, %44, %c0_i32_21 : i32
    scf.if %45 {
      %c0_22 = arith.constant 0 : index
      %c0_23 = arith.constant 0 : index
      %46 = vector.load %arg6[%c0_22, %c0_23] : memref<8x512xf32, #tpu.memory_space<vmem>>, vector<8x512xf32>
      tpu.vector_store %arg6[%c0_22, %c0_23], %40 {strides = array<i32>} : memref<8x512xf32, #tpu.memory_space<vmem>>, vector<8x512xf32>,
    } else {
    }
    return
  }
  func.func @transform_0(%arg0: i32, %arg1: i32) -> (i32, i32, i32) {
    %c0_i32 = arith.constant 0 : i32
    %c0_i32_0 = arith.constant 0 : i32
    return %arg1, %arg0, %c0_i32 : i32, i32, i32
  }
  func.func @transform_1(%arg0: i32, %arg1: i32) -> (i32, i32) {
    %c0_i32 = arith.constant 0 : i32
    %c0_i32_0 = arith.constant 0 : i32
    %c0_i32_1 = arith.constant 0 : i32
    return %c0_i32, %c0_i32_0 : i32, i32
  }
  func.func @transform_2(%arg0: i32, %arg1: i32) -> (i32, i32) {
    %c0_i32 = arith.constant 0 : i32
    %c0_i32_0 = arith.constant 0 : i32
    %c0_i32_1 = arith.constant 0 : i32
    return %c0_i32, %c0_i32_0 : i32, i32
  }
  func.func @transform_3(%arg0: i32, %arg1: i32) -> (i32, i32) {
    %c0_i32 = arith.constant 0 : i32
    %c0_i32_0 = arith.constant 0 : i32
    %c0_i32_1 = arith.constant 0 : i32
    return %c0_i32, %c0_i32_0 : i32, i32
  }
  func.func @transform_4(%arg0: i32, %arg1: i32) -> (i32, i32) {
    %c0_i32 = arith.constant 0 : i32
    %c0_i32_0 = arith.constant 0 : i32
    return %arg0, %c0_i32 : i32, i32
  }
}

</mosaic_0001>

<bundles_post_ra>
// kernel: row_encoder.1
= control target key start
LH: loop header
LB: loop body
LE: loop exit
PB: predicated region body
PF: predicated region fallthrough
CT: control target
= control target key end

     0   :  { %s13747_s15 = smov 0   ;;  %s13749_s16 = smov 0   ;;  %s20385_s0 = inlined_call_operand.vmem [shape: bf16[8,8,512], index: 0, kind: input, shape index: {}]   ;;  %s20386_s1 = inlined_call_operand.vmem [shape: bf16[512,2048], index: 1, kind: input, shape index: {}]   ;;  %s20387_s2 = inlined_call_operand.vmem [shape: bf16[512,2048], index: 2, kind: input, shape index: {}]   ;;  %s20388_s3 = inlined_call_operand.vmem [shape: f32[1,2048], index: 3, kind: input, shape index: {}]   ;;  %s20389_s4 = inlined_call_operand.vmem [shape: f32[8,512], index: 4, kind: output, shape index: {}]  }
   0x1   :  { %s13751_s17 = smov 0  }
   0x2 LB: > { %s23_s18 = sadd.s32 1, %s13715_s16  ;;  %p8465_p0 = scmp.ge.s32.totalorder %s13719_s17, 1  ;;  %s13719_s17 = sphi %s13751_s17, %s14_s17   ;;  %s13715_s16 = sphi %s13749_s16, %s20407_s16   ;;  %s13711_s15 = sphi %s13747_s15, %s20406_s15  }
   0x3   : > { %p24_p1 = scmp.ge.s32.totalorder %s23_s18, 8  ;;  %p180_p2 = scmp.lt.s32.totalorder %s13719_s17, 9 }
   0x5   : > { %s20409_s18 = smov (%p24_p1, %s23_s18), 0  ;;  %p181_p3 = pnand %p8465_p0, %p180_p2 }
   0x6   : > { %p210_p4 = scmp.lt.s32.totalorder (!%p181_p3), %s13711_s15, 7  ;;  %p8468_p5 = scmp.ne.s32.totalorder (!%p181_p3), %s13711_s15, 0 }
   0x7   : > { %184 = sbr.rel (%p181_p3) target bundleno = 1368 (0x558), region = 36 }
   0xc   : > { %s211_s19 = scalar_select %p210_p4, %s13711_s15, 7 }
   0xd   : > { %227 = sbr.rel (%p8468_p5) target bundleno = 27 (0x1b), region = 40 }
   0xe   : > { %s12581_s20 = sshll.u32 %s211_s19, 4 }
   0xf   : > { %s13772_s23 = scalar_lea.vmem %s20385_s0, %s12581_s20 }
  0x12   : > { %v13721_v0 = vmov 0.0  }
  0x13   : > { %228 = vst [vmem:[#allocation2 + $0x10] sm:$0xff] %v13721_v0 }
  0x14   : > { %229 = vst [vmem:[#allocation2] sm:$0xff] %v13721_v0 }
  0x15   : > { %230 = vst [vmem:[#allocation2 + $0x18] sm:$0xff] %v13721_v0 }
  0x16   : > { %231 = vst [vmem:[#allocation2 + $0x8] sm:$0xff] %v13721_v0 }
  0x17   : > { %232 = vst [vmem:[#allocation3] sm:$0xff] %v13721_v0 }
  0x18   : > { %233 = vst [vmem:[#allocation3 + $0x18] sm:$0xff] %v13721_v0 }
  0x19   : > { %234 = vst [vmem:[#allocation3 + $0x8] sm:$0xff] %v13721_v0 }
  0x1a   : > { %235 = vst [vmem:[#allocation3 + $0x10] sm:$0xff] %v13721_v0 }
  0x1b PF: > { %v8919_v1 = vld [vmem:[%s20387_s2 + $0x380] sm:$0xf]  ;;  %p12577_p6 = scmp.ne.s32.totalorder %s13711_s15, 7 }
  0x1c   : > { %v13214_v2 = vld [vmem:[%s20387_s2 + $0x3bc] sm:$0xf0] }
  0x1d   : > { %v9431_v3 = vld [vmem:[%s20387_s2 + $0x780] sm:$0xf]  ;;  %v8920_v4 = vor.u32 %v13214_v2, %v8919_v1 }
  0x1e   : > { %v13342_v5 = vld [vmem:[%s20387_s2 + $0x7bc] sm:$0xf0] }
  0x1f   : > { %v9943_v6 = vld [vmem:[%s20387_s2 + $0xb80] sm:$0xf]  ;;  %v9432_v8 = vor.u32 %v13342_v5, %v9431_v3  ;;  %3830 = vmatpush.bf16.msra.mxu0 %v8920_v4 }
  0x20   : > { %v13470_v7 = vld [vmem:[%s20387_s2 + $0xbbc] sm:$0xf0] }
  0x21   : > { %v9944_v9 = vor.u32 %v13470_v7, %v9943_v6  ;;  %v10455_v10 = vld [vmem:[%s20387_s2 + $0xf80] sm:$0xf]  ;;  %3843 = vmatpush.bf16.msra.mxu1 %v9432_v8 }
  0x22   : > { %v13598_v11 = vld [vmem:[%s20387_s2 + $0xfbc] sm:$0xf0] }
  0x23   : > { %v8855_v12 = vld [vmem:[%s20387_s2 + $0x300] sm:$0xf]  ;;  %v10456_v13 = vor.u32 %v13598_v11, %v10455_v10  ;;  %3856 = vmatpush.bf16.msra.mxu2 %v9944_v9 }
  0x24   : > { %v13198_v14 = vld [vmem:[%s20387_s2 + $0x33c] sm:$0xf0] }
  0x25   : > { %v9367_v15 = vld [vmem:[%s20387_s2 + $0x700] sm:$0xf]  ;;  %v8856_v17 = vor.u32 %v13198_v14, %v8855_v12  ;;  %3869 = vmatpush.bf16.msra.mxu3 %v10456_v13 }
  0x26   : > { %v13326_v16 = vld [vmem:[%s20387_s2 + $0x73c] sm:$0xf0] }
  0x27   : > { %v9368_v18 = vor.u32 %v13326_v16, %v9367_v15  ;;  %v9879_v19 = vld [vmem:[%s20387_s2 + $0xb00] sm:$0xf]  ;;  %3831 = vmatpush.bf16.msra.mxu0 %v8856_v17 }
  0x28   : > { %v13454_v20 = vld [vmem:[%s20387_s2 + $0xb3c] sm:$0xf0] }
  0x29   : > { %v10391_v21 = vld [vmem:[%s20387_s2 + $0xf00] sm:$0xf]  ;;  %v9880_v22 = vor.u32 %v13454_v20, %v9879_v19  ;;  %3844 = vmatpush.bf16.msra.mxu1 %v9368_v18 }
  0x2a   : > { %v13582_v23 = vld [vmem:[%s20387_s2 + $0xf3c] sm:$0xf0] }
  0x2b   : > { %v8791_v24 = vld [vmem:[%s20387_s2 + $0x280] sm:$0xf]  ;;  %v10392_v26 = vor.u32 %v13582_v23, %v10391_v21  ;;  %3857 = vmatpush.bf16.msra.mxu2 %v9880_v22 }
  0x2c   : > { %v13182_v25 = vld [vmem:[%s20387_s2 + $0x2bc] sm:$0xf0] }
  0x2d   : > { %v9303_v27 = vld [vmem:[%s20387_s2 + $0x680] sm:$0xf]  ;;  %v8792_v30 = vor.u32 %v13182_v25, %v8791_v24  ;;  %3870 = vmatpush.bf16.msra.mxu3 %v10392_v26 }
  0x2e   : > { %v13310_v28 = vld [vmem:[%s20387_s2 + $0x6bc] sm:$0xf0] }
  0x2f   : > { %v9815_v29 = vld [vmem:[%s20387_s2 + $0xa80] sm:$0xf]  ;;  %v9304_v34 = vor.u32 %v13310_v28, %v9303_v27  ;;  %3832 = vmatpush.bf16.msra.mxu0 %v8792_v30  ;;  %v8921_v30 = vld [vmem:[%s20387_s2 + $0x3c0] sm:$0xf0] }
  0x30   : > { %v13438_v31 = vld [vmem:[%s20387_s2 + $0xabc] sm:$0xf0] }
  0x31   : > { %v10327_v32 = vld [vmem:[%s20387_s2 + $0xe80] sm:$0xf]  ;;  %v9816_v35 = vor.u32 %v13438_v31, %v9815_v29  ;;  %3845 = vmatpush.bf16.msra.mxu1 %v9304_v34  ;;  %v13206_v29 = vld [vmem:[%s20387_s2 + $0x384] sm:$0xf] }
  0x32   : > { %v13566_v33 = vld [vmem:[%s20387_s2 + $0xebc] sm:$0xf0]  ;;  %v13334_v31 = vld [vmem:[%s20387_s2 + $0x784] sm:$0xf] }
  0x33   : > { %v8727_v36 = vld [vmem:[%s20387_s2 + $0x200] sm:$0xf]  ;;  %v10328_v39 = vor.u32 %v13566_v33, %v10327_v32  ;;  %3858 = vmatpush.bf16.msra.mxu2 %v9816_v35  ;;  %v9433_v33 = vld [vmem:[%s20387_s2 + $0x7c0] sm:$0xf0] }
  0x34   : > { %v13166_v37 = vld [vmem:[%s20387_s2 + $0x23c] sm:$0xf0]  ;;  %v13462_v34 = vld [vmem:[%s20387_s2 + $0xb84] sm:$0xf] }
  0x35   : > { %v9239_v38 = vld [vmem:[%s20387_s2 + $0x600] sm:$0xf]  ;;  %v8728_v45 = vor.u32 %v13166_v37, %v8727_v36  ;;  %3871 = vmatpush.bf16.msra.mxu3 %v10328_v39  ;;  %v9945_v35 = vld [vmem:[%s20387_s2 + $0xbc0] sm:$0xf0] }
  0x36   : > { %v13294_v40 = vld [vmem:[%s20387_s2 + $0x63c] sm:$0xf0]  ;;  %v10457_v39 = vld [vmem:[%s20387_s2 + $0xfc0] sm:$0xf0] }
  0x37   : > { %v9751_v41 = vld [vmem:[%s20387_s2 + $0xa00] sm:$0xf]  ;;  %v9240_v46 = vor.u32 %v13294_v40, %v9239_v38  ;;  %3833 = vmatpush.bf16.msra.mxu0 %v8728_v45  ;;  %v13590_v38 = vld [vmem:[%s20387_s2 + $0xf84] sm:$0xf] }
  0x38   : > { %v13422_v42 = vld [vmem:[%s20387_s2 + $0xa3c] sm:$0xf0]  ;;  %v8857_v45 = vld [vmem:[%s20387_s2 + $0x340] sm:$0xf0] }
  0x39   : > { %v10263_v43 = vld [vmem:[%s20387_s2 + $0xe00] sm:$0xf]  ;;  %v9752_v47 = vor.u32 %v13422_v42, %v9751_v41  ;;  %3846 = vmatpush.bf16.msra.mxu1 %v9240_v46  ;;  %v8924_v41 = vor.u32 %v13206_v29, %v8921_v30  ;;  %v9436_v42 = vor.u32 %v13334_v31, %v9433_v33  ;;  %v13318_v46 = vld [vmem:[%s20387_s2 + $0x704] sm:$0xf] }
  0x3a   : > { %v13550_v44 = vld [vmem:[%s20387_s2 + $0xe3c] sm:$0xf0]  ;;  %v13398_v29 = vld [vmem:[%s20387_s2 + $0x984] sm:$0xf] }
  0x3b   : > { %v8663_v48 = vld [vmem:[%s20387_s2 + $0x180] sm:$0xf]  ;;  %v10264_v51 = vor.u32 %v13550_v44, %v10263_v43  ;;  %3859 = vmatpush.bf16.msra.mxu2 %v9752_v47  ;;  %v9948_v43 = vor.u32 %v13462_v34, %v9945_v35  ;;  %v13190_v44 = vld [vmem:[%s20387_s2 + $0x304] sm:$0xf]  ;;  %v10460_v47 = vor.u32 %v13590_v38, %v10457_v39 }
  0x3c   : > { %v13150_v49 = vld [vmem:[%s20387_s2 + $0x1bc] sm:$0xf0]  ;;  %v9689_v30 = vld [vmem:[%s20387_s2 + $0x9c0] sm:$0xf0] }
  0x3d   : > { %v9175_v50 = vld [vmem:[%s20387_s2 + $0x580] sm:$0xf]  ;;  %v8664_v57 = vor.u32 %v13150_v49, %v8663_v48  ;;  %3872 = vmatpush.bf16.msra.mxu3 %v10264_v51  ;;  %v9369_v48 = vld [vmem:[%s20387_s2 + $0x740] sm:$0xf0]  ;;  %v9692_v35 = vor.u32 %v13398_v29, %v9689_v30  ;;  %v9887_v29 = vld [vmem:[%s20387_s2 + $0xb08] sm:$0xf] }
  0x3e   : > { %v13278_v52 = vld [vmem:[%s20387_s2 + $0x5bc] sm:$0xf0]  ;;  %v13446_v49 = vld [vmem:[%s20387_s2 + $0xb04] sm:$0xf]  ;;  %v13455_v30 = vld [vmem:[%s20387_s2 + $0xb44] sm:$0xf0] }
  0x3f   : > { %v9687_v53 = vld [vmem:[%s20387_s2 + $0x980] sm:$0xf]  ;;  %v9176_v58 = vor.u32 %v13278_v52, %v9175_v50  ;;  %3834 = vmatpush.bf16.msra.mxu0 %v8664_v57  ;;  %v9881_v50 = vld [vmem:[%s20387_s2 + $0xb40] sm:$0xf0] }
  0x40   : > { %v13406_v54 = vld [vmem:[%s20387_s2 + $0x9bc] sm:$0xf0]  ;;  %v13574_v51 = vld [vmem:[%s20387_s2 + $0xf04] sm:$0xf] }
  0x41   : > { %v10199_v55 = vld [vmem:[%s20387_s2 + $0xd80] sm:$0xf]  ;;  %v9688_v59 = vor.u32 %v13406_v54, %v9687_v53  ;;  %3847 = vmatpush.bf16.msra.mxu1 %v9176_v58  ;;  %v10393_v52 = vld [vmem:[%s20387_s2 + $0xf40] sm:$0xf0]  ;;  %v8860_v53 = vor.u32 %v13190_v44, %v8857_v45 }
  0x42   : > { %v13534_v56 = vld [vmem:[%s20387_s2 + $0xdbc] sm:$0xf0]  ;;  %v13174_v54 = vld [vmem:[%s20387_s2 + $0x284] sm:$0xf] }
  0x43   : > { %v8599_v60 = vld [vmem:[%s20387_s2 + $0x100] sm:$0xf]  ;;  %v10200_v63 = vor.u32 %v13534_v56, %v10199_v55  ;;  %3860 = vmatpush.bf16.msra.mxu2 %v9688_v59  ;;  %v9372_v55 = vor.u32 %v13318_v46, %v9369_v48  ;;  %v9884_v56 = vor.u32 %v13446_v49, %v9881_v50  ;;  %v8793_v57 = vld [vmem:[%s20387_s2 + $0x2c0] sm:$0xf0] }
  0x44   : > { %v13134_v61 = vld [vmem:[%s20387_s2 + $0x13c] sm:$0xf0]  ;;  %v13302_v58 = vld [vmem:[%s20387_s2 + $0x684] sm:$0xf] }
  0x45   : > { %v9111_v62 = vld [vmem:[%s20387_s2 + $0x500] sm:$0xf]  ;;  %v8600_v5 = vor.u32 %v13134_v61, %v8599_v60  ;;  %3873 = vmatpush.bf16.msra.mxu3 %v10200_v63  ;;  %v9305_v59 = vld [vmem:[%s20387_s2 + $0x6c0] sm:$0xf0]  ;;  %v10396_v60 = vor.u32 %v13574_v51, %v10393_v52 }
  0x46   : > { %v13262_v0 = vld [vmem:[%s20387_s2 + $0x53c] sm:$0xf0]  ;;  %v13430_v61 = vld [vmem:[%s20387_s2 + $0xa84] sm:$0xf] }
  0x47   : > { %v9623_v1 = vld [vmem:[%s20387_s2 + $0x900] sm:$0xf]  ;;  %v9112_v6 = vor.u32 %v13262_v0, %v9111_v62  ;;  %3835 = vmatpush.bf16.msra.mxu0 %v8600_v5  ;;  %v9817_v62 = vld [vmem:[%s20387_s2 + $0xac0] sm:$0xf0]  ;;  %v750_v5 = vld [vmem:[#allocation2 + $0x10] sm:$0xff] }
  0x48   : > { %v13390_v2 = vld [vmem:[%s20387_s2 + $0x93c] sm:$0xf0]  ;;  %v13558_v63 = vld [vmem:[%s20387_s2 + $0xe84] sm:$0xf] }
  0x49   : > { %v10135_v3 = vld [vmem:[%s20387_s2 + $0xd00] sm:$0xf]  ;;  %v9624_v7 = vor.u32 %v13390_v2, %v9623_v1  ;;  %3848 = vmatpush.bf16.msra.mxu1 %v9112_v6  ;;  %v10329_v0 = vld [vmem:[%s20387_s2 + $0xec0] sm:$0xf0]  ;;  %v8796_v1 = vor.u32 %v13174_v54, %v8793_v57  ;;  %v9308_v2 = vor.u32 %v13302_v58, %v9305_v59  ;;  %v9820_v6 = vor.u32 %v13430_v61, %v9817_v62 }
  0x4a   : > { %v13518_v4 = vld [vmem:[%s20387_s2 + $0xd3c] sm:$0xf0]  ;;  %v13526_v31 = vld [vmem:[%s20387_s2 + $0xd84] sm:$0xf] }
  0x4b   : > { %v8535_v8 = vld [vmem:[%s20387_s2 + $0x80] sm:$0xf]  ;;  %v10136_v11 = vor.u32 %v13518_v4, %v10135_v3  ;;  %3861 = vmatpush.bf16.msra.mxu2 %v9624_v7  ;;  %v13158_v3 = vld [vmem:[%s20387_s2 + $0x204] sm:$0xf]  ;;  %v752_v4 = vld [vmem:[#allocation2 + $0x18] sm:$0xff] }
  0x4c   : > { %v13118_v9 = vld [vmem:[%s20387_s2 + $0xbc] sm:$0xf0]  ;;  %v8729_v7 = vld [vmem:[%s20387_s2 + $0x240] sm:$0xf0] }
  0x4d   : > { %v9047_v10 = vld [vmem:[%s20387_s2 + $0x480] sm:$0xf]  ;;  %v8536_v17 = vor.u32 %v13118_v9, %v8535_v8  ;;  %3874 = vmatpush.bf16.msra.mxu3 %v10136_v11  ;;  %v13286_v8 = vld [vmem:[%s20387_s2 + $0x604] sm:$0xf]  ;;  %v14048_v9 = vpack.c.bf16 %v752_v4, %v752_v4  ;;  %v753_v11 = vld [vmem:[#allocation2 + $0x8] sm:$0xff] }
  0x4e   : > { %v13246_v12 = vld [vmem:[%s20387_s2 + $0x4bc] sm:$0xf0]  ;;  %v13254_v38 = vld [vmem:[%s20387_s2 + $0x504] sm:$0xf] }
  0x4f   : > { %v9559_v13 = vld [vmem:[%s20387_s2 + $0x880] sm:$0xf]  ;;  %v9048_v20 = vor.u32 %v13246_v12, %v9047_v10  ;;  %3836 = vmatpush.bf16.msra.mxu0 %v8536_v17  ;;  %v14050_v10 = vpack.c.bf16 %v750_v5, %v750_v5  ;;  %v10332_v12 = vor.u32 %v13558_v63, %v10329_v0  ;;  %v13542_v17 = vld [vmem:[%s20387_s2 + $0xe04] sm:$0xf]  ;;  %v8927_v5 = vld [vmem:[%s20387_s2 + $0x388] sm:$0xf] }
  0x50   : > { %v13374_v14 = vld [vmem:[%s20387_s2 + $0x8bc] sm:$0xf0]  ;;  %v10137_v44 = vld [vmem:[%s20387_s2 + $0xd40] sm:$0xf0] }
  0x51   : > { %v10071_v15 = vld [vmem:[%s20387_s2 + $0xc80] sm:$0xf]  ;;  %v9560_v21 = vor.u32 %v13374_v14, %v9559_v13  ;;  %3849 = vmatpush.bf16.msra.mxu1 %v9048_v20  ;;  %v9241_v13 = vld [vmem:[%s20387_s2 + $0x640] sm:$0xf0] }
  0x52   : > { %v13502_v16 = vld [vmem:[%s20387_s2 + $0xcbc] sm:$0xf0]  ;;  %v13414_v14 = vld [vmem:[%s20387_s2 + $0xa04] sm:$0xf] }
  0x53   : > { %v8471_v18 = vld [vmem:[%s20387_s2] sm:$0xf]  ;;  %v10072_v25 = vor.u32 %v13502_v16, %v10071_v15  ;;  %3862 = vmatpush.bf16.msra.mxu2 %v9560_v21  ;;  %v9753_v15 = vld [vmem:[%s20387_s2 + $0xa40] sm:$0xf0]  ;;  %v14061_v16 = vpack.c.bf16 %v753_v11, %v753_v11  ;;  %v9244_v21 = vor.u32 %v13286_v8, %v9241_v13  ;;  %v13343_v11 = vld [vmem:[%s20387_s2 + $0x7c4] sm:$0xf0] }
  0x54   : > { %v13102_v19 = vld [vmem:[%s20387_s2 + $0x3c] sm:$0xf0]  ;;  %v13110_v48 = vld [vmem:[%s20387_s2 + $0x84] sm:$0xf]  ;;  %v13471_v13 = vld [vmem:[%s20387_s2 + $0xbc4] sm:$0xf0] }
  0x55   : > { %v8983_v22 = vld [vmem:[%s20387_s2 + $0x400] sm:$0xf]  ;;  %v8472_v32 = vor.u32 %v13102_v19, %v8471_v18  ;;  %3875 = vmatpush.bf16.msra.mxu3 %v10072_v25  ;;  %v10265_v18 = vld [vmem:[%s20387_s2 + $0xe40] sm:$0xf0]  ;;  %v8732_v19 = vor.u32 %v13158_v3, %v8729_v7  ;;  %v9439_v7 = vld [vmem:[%s20387_s2 + $0x788] sm:$0xf] }
  0x56   : > { %v13230_v23 = vld [vmem:[%s20387_s2 + $0x43c] sm:$0xf0]  ;;  %v13270_v25 = vld [vmem:[%s20387_s2 + $0x584] sm:$0xf] }
  0x57   : > { %v9495_v24 = vld [vmem:[%s20387_s2 + $0x800] sm:$0xf]  ;;  %v8984_v36 = vor.u32 %v13230_v23, %v8983_v22  ;;  %3837 = vmatpush.bf16.msra.mxu0 %v8472_v32  ;;  %v9756_v22 = vor.u32 %v13414_v14, %v9753_v15  ;;  %v13142_v23 = vld [vmem:[%s20387_s2 + $0x184] sm:$0xf] }
  0x58   : > { %v13358_v26 = vld [vmem:[%s20387_s2 + $0x83c] sm:$0xf0]  ;;  %v10201_v32 = vld [vmem:[%s20387_s2 + $0xdc0] sm:$0xf0] }
  0x59   : > { %v10007_v27 = vld [vmem:[%s20387_s2 + $0xc00] sm:$0xf]  ;;  %v9496_v37 = vor.u32 %v13358_v26, %v9495_v24  ;;  %3850 = vmatpush.bf16.msra.mxu1 %v8984_v36  ;;  %v8665_v24 = vld [vmem:[%s20387_s2 + $0x1c0] sm:$0xf0]  ;;  %v10204_v39 = vor.u32 %v13526_v31, %v10201_v32  ;;  %v10399_v31 = vld [vmem:[%s20387_s2 + $0xf08] sm:$0xf] }
  0x5a   : > { %v13486_v28 = vld [vmem:[%s20387_s2 + $0xc3c] sm:$0xf0]  ;;  %3838 = vmatmul.bf16.vlgmr.msra.gmra.mxu0 %v14050_v10  ;;  %v8668_v33 = vor.u32 %v13142_v23, %v8665_v24  ;;  %v13126_v36 = vld [vmem:[%s20387_s2 + $0x104] sm:$0xf]  ;;  %v8863_v23 = vld [vmem:[%s20387_s2 + $0x308] sm:$0xf] }
  0x5b   : > { %v10008_v40 = vor.u32 %v13486_v28, %v10007_v27  ;;  %3863 = vmatpush.bf16.msra.mxu2 %v9496_v37  ;;  %3882 = vmatpush.bf16.msrb.mxu0 %v8924_v41  ;;  %v751_v20 = vld [vmem:[#allocation2] sm:$0xff]  ;;  %v10268_v27 = vor.u32 %v13542_v17, %v10265_v18  ;;  %v10463_v17 = vld [vmem:[%s20387_s2 + $0xf88] sm:$0xf] }
  0x5c   : > { %v14081_v26 = vpack.c.bf16 %v751_v20, %v751_v20  ;;  %v9177_v28 = vld [vmem:[%s20387_s2 + $0x5c0] sm:$0xf0]  ;;  %v13599_v18 = vld [vmem:[%s20387_s2 + $0xfc4] sm:$0xf0] }
  0x5d   : > { %3876 = vmatpush.bf16.msra.mxu3 %v10008_v40  ;;  %3895 = vmatpush.bf16.msrb.mxu1 %v9436_v42  ;;  %v9180_v34 = vor.u32 %v13270_v25, %v9177_v28  ;;  %v8601_v37 = vld [vmem:[%s20387_s2 + $0x140] sm:$0xf0]  ;;  %v13199_v24 = vld [vmem:[%s20387_s2 + $0x344] sm:$0xf0] }
  0x5e   : > { %3864 = vmatmul.bf16.vlgmr.msra.gmra.mxu2 %v14048_v9  ;;  %3851 = vmatmul.bf16.vlgmr.msra.gmra.mxu1 %v14081_v26  ;;  %v9113_v40 = vld [vmem:[%s20387_s2 + $0x540] sm:$0xf0]  ;;  %v8604_v45 = vor.u32 %v13126_v36, %v8601_v37  ;;  %v9375_v25 = vld [vmem:[%s20387_s2 + $0x708] sm:$0xf] }
  0x5f   : > { %3908 = vmatpush.bf16.msrb.mxu2 %v9948_v43  ;;  %3883 = vmatpush.bf16.msrb.mxu0 %v8860_v53  ;;  %v13382_v41 = vld [vmem:[%s20387_s2 + $0x904] sm:$0xf]  ;;  %v9116_v46 = vor.u32 %v13254_v38, %v9113_v40  ;;  %v13327_v28 = vld [vmem:[%s20387_s2 + $0x744] sm:$0xf0] }
  0x60   : > { %3877 = vmatmul.bf16.vlgmr.msra.gmra.mxu3 %v14061_v16  ;;  %v9625_v42 = vld [vmem:[%s20387_s2 + $0x940] sm:$0xf0]  ;;  %v13583_v32 = vld [vmem:[%s20387_s2 + $0xf44] sm:$0xf0] }
  0x61   : > { %3921 = vmatpush.bf16.msrb.mxu3 %v10460_v47  ;;  %3896 = vmatpush.bf16.msrb.mxu1 %v9372_v55  ;;  %v13510_v43 = vld [vmem:[%s20387_s2 + $0xd04] sm:$0xf]  ;;  %v9628_v47 = vor.u32 %v13382_v41, %v9625_v42  ;;  %v8799_v36 = vld [vmem:[%s20387_s2 + $0x288] sm:$0xf] }
  0x62   : > { %v8537_v49 = vld [vmem:[%s20387_s2 + $0xc0] sm:$0xf0]  ;;  %v10140_v51 = vor.u32 %v13510_v43, %v10137_v44  ;;  %v13183_v37 = vld [vmem:[%s20387_s2 + $0x2c4] sm:$0xf0] }
  0x63   : > { %3909 = vmatpush.bf16.msrb.mxu2 %v9884_v56  ;;  %3884 = vmatpush.bf16.msrb.mxu0 %v8796_v1  ;;  %v13238_v50 = vld [vmem:[%s20387_s2 + $0x484] sm:$0xf]  ;;  %v8540_v57 = vor.u32 %v13110_v48, %v8537_v49  ;;  %v9311_v38 = vld [vmem:[%s20387_s2 + $0x688] sm:$0xf] }
  0x64   : > { %v9049_v52 = vld [vmem:[%s20387_s2 + $0x4c0] sm:$0xf0]  ;;  %v13311_v40 = vld [vmem:[%s20387_s2 + $0x6c4] sm:$0xf0] }
  0x65   : > { %3922 = vmatpush.bf16.msrb.mxu3 %v10396_v60  ;;  %3897 = vmatpush.bf16.msrb.mxu1 %v9308_v2  ;;  %v13366_v53 = vld [vmem:[%s20387_s2 + $0x884] sm:$0xf]  ;;  %v9052_v60 = vor.u32 %v13238_v50, %v9049_v52  ;;  %v9823_v41 = vld [vmem:[%s20387_s2 + $0xa88] sm:$0xf] }
  0x66   : > { %v9561_v54 = vld [vmem:[%s20387_s2 + $0x8c0] sm:$0xf0]  ;;  %v13439_v42 = vld [vmem:[%s20387_s2 + $0xac4] sm:$0xf0] }
  0x67   : > { %3910 = vmatpush.bf16.msrb.mxu2 %v9820_v6  ;;  %3885 = vmatpush.bf16.msrb.mxu0 %v8732_v19  ;;  %v13494_v55 = vld [vmem:[%s20387_s2 + $0xc84] sm:$0xf]  ;;  %v9564_v61 = vor.u32 %v13366_v53, %v9561_v54  ;;  %v13215_v6 = vld [vmem:[%s20387_s2 + $0x3c4] sm:$0xf0] }
  0x68   : > { %v10073_v56 = vld [vmem:[%s20387_s2 + $0xcc0] sm:$0xf0]  ;;  %v8928_v20 = vor.u32 %v13215_v6, %v8927_v5  ;;  %v10335_v43 = vld [vmem:[%s20387_s2 + $0xe88] sm:$0xf] }
  0x69   : > { %3923 = vmatpush.bf16.msrb.mxu3 %v10332_v12  ;;  %3898 = vmatpush.bf16.msrb.mxu1 %v9244_v21  ;;  %v13094_v58 = vld [vmem:[%s20387_s2 + $0x4] sm:$0xf]  ;;  %v10076_v1 = vor.u32 %v13494_v55, %v10073_v56  ;;  %v9951_v12 = vld [vmem:[%s20387_s2 + $0xb88] sm:$0xf]  ;;  %v9440_v21 = vor.u32 %v13343_v11, %v9439_v7 }
  0x6a   : > { %v8473_v59 = vld [vmem:[%s20387_s2 + $0x40] sm:$0xf0]  ;;  %v13567_v44 = vld [vmem:[%s20387_s2 + $0xec4] sm:$0xf0] }
  0x6b   : > { %3911 = vmatpush.bf16.msrb.mxu2 %v9756_v22  ;;  %3886 = vmatpush.bf16.msrb.mxu0 %v8668_v33  ;;  %v13222_v62 = vld [vmem:[%s20387_s2 + $0x404] sm:$0xf]  ;;  %v8476_v8 = vor.u32 %v13094_v58, %v8473_v59  ;;  %v9952_v22 = vor.u32 %v13471_v13, %v9951_v12  ;;  %v8864_v33 = vor.u32 %v13199_v24, %v8863_v23  ;;  %v8735_v48 = vld [vmem:[%s20387_s2 + $0x208] sm:$0xf] }
  0x6c   : > { %v8985_v63 = vld [vmem:[%s20387_s2 + $0x440] sm:$0xf0]  ;;  %v13167_v49 = vld [vmem:[%s20387_s2 + $0x244] sm:$0xf0] }
  0x6d   : > { %3924 = vmatpush.bf16.msrb.mxu3 %v10268_v27  ;;  %3899 = vmatpush.bf16.msrb.mxu1 %v9180_v34  ;;  %v13350_v0 = vld [vmem:[%s20387_s2 + $0x804] sm:$0xf]  ;;  %v8988_v14 = vor.u32 %v13222_v62, %v8985_v63  ;;  %v10464_v27 = vor.u32 %v13599_v18, %v10463_v17  ;;  %v9376_v34 = vor.u32 %v13327_v28, %v9375_v25  ;;  %v9247_v50 = vld [vmem:[%s20387_s2 + $0x608] sm:$0xf] }
  0x6e   : > { %v9497_v2 = vld [vmem:[%s20387_s2 + $0x840] sm:$0xf0]  ;;  %v13295_v52 = vld [vmem:[%s20387_s2 + $0x644] sm:$0xf0] }
  0x6f   : > { %3912 = vmatpush.bf16.msrb.mxu2 %v9692_v35  ;;  %3887 = vmatpush.bf16.msrb.mxu0 %v8604_v45  ;;  %v13478_v3 = vld [vmem:[%s20387_s2 + $0xc04] sm:$0xf]  ;;  %v9500_v15 = vor.u32 %v13350_v0, %v9497_v2  ;;  %v9888_v35 = vor.u32 %v13455_v30, %v9887_v29  ;;  %v8800_v45 = vor.u32 %v13183_v37, %v8799_v36  ;;  %v9759_v53 = vld [vmem:[%s20387_s2 + $0xa08] sm:$0xf] }
  0x70   : > { %v10009_v4 = vld [vmem:[%s20387_s2 + $0xc40] sm:$0xf0]  ;;  %v13423_v54 = vld [vmem:[%s20387_s2 + $0xa44] sm:$0xf0]  ;;  %v9248_v58 = vor.u32 %v13295_v52, %v9247_v50  ;;  %v13463_v50 = vld [vmem:[%s20387_s2 + $0xb8c] sm:$0xf] }
  0x71   : > { %3925 = vmatpush.bf16.msrb.mxu3 %v10204_v39  ;;  %3900 = vmatpush.bf16.msrb.mxu1 %v9116_v46  ;;  %v10012_v19 = vor.u32 %v13478_v3, %v10009_v4  ;;  %v10400_v39 = vor.u32 %v13583_v32, %v10399_v31  ;;  %v9312_v46 = vor.u32 %v13311_v40, %v9311_v38  ;;  %v10271_v55 = vld [vmem:[%s20387_s2 + $0xe08] sm:$0xf] }
  0x72   : > { %v13551_v56 = vld [vmem:[%s20387_s2 + $0xe44] sm:$0xf0]  ;;  %v9760_v59 = vor.u32 %v13423_v54, %v9759_v53  ;;  %v13591_v54 = vld [vmem:[%s20387_s2 + $0xf8c] sm:$0xf] }
  0x73   : > { %3913 = vmatpush.bf16.msrb.mxu2 %v9628_v47  ;;  %3888 = vmatpush.bf16.msrb.mxu0 %v8540_v57  ;;  %v9824_v47 = vor.u32 %v13439_v42, %v9823_v41  ;;  %v8736_v57 = vor.u32 %v13167_v49, %v8735_v48  ;;  %v9183_v62 = vld [vmem:[%s20387_s2 + $0x588] sm:$0xf]  ;;  %v10272_v63 = vor.u32 %v13551_v56, %v10271_v55  ;;  %v9441_v49 = vld [vmem:[%s20387_s2 + $0x7c8] sm:$0xf0] }
  0x74   : > { %v13279_v0 = vld [vmem:[%s20387_s2 + $0x5c4] sm:$0xf0]  ;;  %v10465_v55 = vld [vmem:[%s20387_s2 + $0xfc8] sm:$0xf0] }
  0x75   : > { %3926 = vmatpush.bf16.msrb.mxu3 %v10140_v51  ;;  %3901 = vmatpush.bf16.msrb.mxu1 %v9052_v60  ;;  %v10336_v51 = vor.u32 %v13567_v44, %v10335_v43  ;;  %v8671_v60 = vld [vmem:[%s20387_s2 + $0x188] sm:$0xf]  ;;  %v9184_v6 = vor.u32 %v13279_v0, %v9183_v62  ;;  %v13319_v62 = vld [vmem:[%s20387_s2 + $0x70c] sm:$0xf] }
  0x76   : > { %v13407_v2 = vld [vmem:[%s20387_s2 + $0x9c4] sm:$0xf0]  ;;  %v9377_v0 = vld [vmem:[%s20387_s2 + $0x748] sm:$0xf0] }
  0x77   : > { %3914 = vmatpush.bf16.msrb.mxu2 %v9564_v61  ;;  %3889 = vmatpush.bf16.msrb.mxu0 %v8476_v8  ;;  %v13151_v61 = vld [vmem:[%s20387_s2 + $0x1c4] sm:$0xf0] }
  0x78   : > { %v10207_v3 = vld [vmem:[%s20387_s2 + $0xd88] sm:$0xf]  ;;  %v8672_v5 = vor.u32 %v13151_v61, %v8671_v60  ;;  %v13191_v60 = vld [vmem:[%s20387_s2 + $0x30c] sm:$0xf] }
  0x79   : > { %3927 = vmatpush.bf16.msrb.mxu3 %v10076_v1  ;;  %3902 = vmatpush.bf16.msrb.mxu1 %v8988_v14  ;;  %v9695_v1 = vld [vmem:[%s20387_s2 + $0x988] sm:$0xf]  ;;  %v8865_v61 = vld [vmem:[%s20387_s2 + $0x348] sm:$0xf0] }
  0x7a   : > { %3890 = vmatmul.bf16.vlgmr.msrb.gmra.mxu0 %v14050_v10  ;;  %v13535_v4 = vld [vmem:[%s20387_s2 + $0xdc4] sm:$0xf0]  ;;  %v9696_v7 = vor.u32 %v13407_v2, %v9695_v1  ;;  %v13447_v1 = vld [vmem:[%s20387_s2 + $0xb0c] sm:$0xf] }
  0x7b   : > { %3915 = vmatpush.bf16.msrb.mxu2 %v9500_v15  ;;  %3934 = vmatpush.bf16.msra.mxu0 %v8928_v20  ;;  %v8607_v8 = vld [vmem:[%s20387_s2 + $0x108] sm:$0xf]  ;;  %v10208_v13 = vor.u32 %v13535_v4, %v10207_v3  ;;  %v9889_v2 = vld [vmem:[%s20387_s2 + $0xb48] sm:$0xf0] }
  0x7c   : > { %3903 = vmatmul.bf16.vlgmr.msrb.gmra.mxu1 %v14081_v26  ;;  %v13135_v11 = vld [vmem:[%s20387_s2 + $0x144] sm:$0xf0]  ;;  %v13575_v3 = vld [vmem:[%s20387_s2 + $0xf0c] sm:$0xf] }
  0x7d   : > { %3928 = vmatpush.bf16.msrb.mxu3 %v10012_v19  ;;  %3947 = vmatpush.bf16.msra.mxu1 %v9440_v21  ;;  %v9119_v12 = vld [vmem:[%s20387_s2 + $0x508] sm:$0xf]  ;;  %v8608_v20 = vor.u32 %v13135_v11, %v8607_v8  ;;  %v10401_v4 = vld [vmem:[%s20387_s2 + $0xf48] sm:$0xf0] }
  0x7e   : > { %3916 = vmatmul.bf16.vlgmr.msrb.gmra.mxu2 %v14048_v9  ;;  %v13263_v14 = vld [vmem:[%s20387_s2 + $0x544] sm:$0xf0]  ;;  %v13175_v8 = vld [vmem:[%s20387_s2 + $0x28c] sm:$0xf] }
  0x7f   : > { %3960 = vmatpush.bf16.msra.mxu2 %v9952_v22  ;;  %3935 = vmatpush.bf16.msra.mxu0 %v8864_v33  ;;  %v9631_v15 = vld [vmem:[%s20387_s2 + $0x908] sm:$0xf]  ;;  %v9120_v21 = vor.u32 %v13263_v14, %v9119_v12  ;;  %v8801_v11 = vld [vmem:[%s20387_s2 + $0x2c8] sm:$0xf0] }
  0x80   : > { %3929 = vmatmul.bf16.vlgmr.msrb.gmra.mxu3 %v14061_v16  ;;  %v13391_v17 = vld [vmem:[%s20387_s2 + $0x944] sm:$0xf0]  ;;  %v13303_v12 = vld [vmem:[%s20387_s2 + $0x68c] sm:$0xf] }
  0x81   : > { %3973 = vmatpush.bf16.msra.mxu3 %v10464_v27  ;;  %3948 = vmatpush.bf16.msra.mxu1 %v9376_v34  ;;  %v10143_v18 = vld [vmem:[%s20387_s2 + $0xd08] sm:$0xf]  ;;  %v9632_v22 = vor.u32 %v13391_v17, %v9631_v15  ;;  %v9313_v14 = vld [vmem:[%s20387_s2 + $0x6c8] sm:$0xf0] }
  0x82   : > { %v13519_v19 = vld [vmem:[%s20387_s2 + $0xd44] sm:$0xf0]  ;;  %v13431_v15 = vld [vmem:[%s20387_s2 + $0xa8c] sm:$0xf] }
  0x83   : > { %3961 = vmatpush.bf16.msra.mxu2 %v9888_v35  ;;  %3936 = vmatpush.bf16.msra.mxu0 %v8800_v45  ;;  %v8543_v23 = vld [vmem:[%s20387_s2 + $0x88] sm:$0xf]  ;;  %v10144_v27 = vor.u32 %v13519_v19, %v10143_v18  ;;  %v13207_v45 = vld [vmem:[%s20387_s2 + $0x38c] sm:$0xf] }
  0x84   : > { %v13119_v24 = vld [vmem:[%s20387_s2 + $0xc4] sm:$0xf0]  ;;  %v9825_v17 = vld [vmem:[%s20387_s2 + $0xac8] sm:$0xf0] }
  0x85   : > { %3974 = vmatpush.bf16.msra.mxu3 %v10400_v39  ;;  %3949 = vmatpush.bf16.msra.mxu1 %v9312_v46  ;;  %v9055_v25 = vld [vmem:[%s20387_s2 + $0x488] sm:$0xf]  ;;  %v8544_v33 = vor.u32 %v13119_v24, %v8543_v23  ;;  %v8929_v46 = vld [vmem:[%s20387_s2 + $0x3c8] sm:$0xf0] }
  0x86   : > { %v13247_v28 = vld [vmem:[%s20387_s2 + $0x4c4] sm:$0xf0]  ;;  %v13559_v18 = vld [vmem:[%s20387_s2 + $0xe8c] sm:$0xf] }
  0x87   : > { %3962 = vmatpush.bf16.msra.mxu2 %v9824_v47  ;;  %3937 = vmatpush.bf16.msra.mxu0 %v8736_v57  ;;  %v9567_v29 = vld [vmem:[%s20387_s2 + $0x888] sm:$0xf]  ;;  %v9056_v36 = vor.u32 %v13247_v28, %v9055_v25  ;;  %v13335_v47 = vld [vmem:[%s20387_s2 + $0x78c] sm:$0xf]  ;;  %v8932_v57 = vor.u32 %v13207_v45, %v8929_v46 }
  0x88   : > { %v13375_v30 = vld [vmem:[%s20387_s2 + $0x8c4] sm:$0xf0]  ;;  %v10337_v19 = vld [vmem:[%s20387_s2 + $0xec8] sm:$0xf0] }
  0x89   : > { %3975 = vmatpush.bf16.msra.mxu3 %v10336_v51  ;;  %3950 = vmatpush.bf16.msra.mxu1 %v9248_v58  ;;  %v10079_v31 = vld [vmem:[%s20387_s2 + $0xc88] sm:$0xf]  ;;  %v9568_v37 = vor.u32 %v13375_v30, %v9567_v29  ;;  %v9953_v51 = vld [vmem:[%s20387_s2 + $0xbc8] sm:$0xf0]  ;;  %v9444_v58 = vor.u32 %v13335_v47, %v9441_v49 }
  0x8a   : > { %v13503_v32 = vld [vmem:[%s20387_s2 + $0xcc4] sm:$0xf0]  ;;  %v13159_v23 = vld [vmem:[%s20387_s2 + $0x20c] sm:$0xf] }
  0x8b   : > { %3963 = vmatpush.bf16.msra.mxu2 %v9760_v59  ;;  %3938 = vmatpush.bf16.msra.mxu0 %v8672_v5  ;;  %v8479_v34 = vld [vmem:[%s20387_s2 + $0x8] sm:$0xf]  ;;  %v10080_v41 = vor.u32 %v13503_v32, %v10079_v31  ;;  %v9956_v59 = vor.u32 %v13463_v50, %v9953_v51  ;;  %v8868_v5 = vor.u32 %v13191_v60, %v8865_v61  ;;  %v8737_v24 = vld [vmem:[%s20387_s2 + $0x248] sm:$0xf0] }
  0x8c   : > { %v13103_v35 = vld [vmem:[%s20387_s2 + $0x44] sm:$0xf0]  ;;  %v13287_v25 = vld [vmem:[%s20387_s2 + $0x60c] sm:$0xf] }
  0x8d   : > { %3976 = vmatpush.bf16.msra.mxu3 %v10272_v63  ;;  %3951 = vmatpush.bf16.msra.mxu1 %v9184_v6  ;;  %v8991_v38 = vld [vmem:[%s20387_s2 + $0x408] sm:$0xf]  ;;  %v8480_v48 = vor.u32 %v13103_v35, %v8479_v34  ;;  %v10468_v63 = vor.u32 %v13591_v54, %v10465_v55  ;;  %v9380_v6 = vor.u32 %v13319_v62, %v9377_v0  ;;  %v9249_v28 = vld [vmem:[%s20387_s2 + $0x648] sm:$0xf0] }
  0x8e   : > { %v13231_v39 = vld [vmem:[%s20387_s2 + $0x444] sm:$0xf0]  ;;  %v13415_v29 = vld [vmem:[%s20387_s2 + $0xa0c] sm:$0xf]  ;;  %v9252_v34 = vor.u32 %v13287_v25, %v9249_v28  ;;  %v9959_v25 = vld [vmem:[%s20387_s2 + $0xb90] sm:$0xf] }
  0x8f   : > { %3964 = vmatpush.bf16.msra.mxu2 %v9696_v7  ;;  %3939 = vmatpush.bf16.msra.mxu0 %v8608_v20  ;;  %v9503_v40 = vld [vmem:[%s20387_s2 + $0x808] sm:$0xf]  ;;  %v8992_v52 = vor.u32 %v13231_v39, %v8991_v38  ;;  %v9892_v7 = vor.u32 %v13447_v1, %v9889_v2  ;;  %v8804_v20 = vor.u32 %v13175_v8, %v8801_v11  ;;  %v9761_v30 = vld [vmem:[%s20387_s2 + $0xa48] sm:$0xf0] }
  0x90   : > { %v13359_v42 = vld [vmem:[%s20387_s2 + $0x844] sm:$0xf0]  ;;  %v13543_v31 = vld [vmem:[%s20387_s2 + $0xe0c] sm:$0xf]  ;;  %v9764_v35 = vor.u32 %v13415_v29, %v9761_v30  ;;  %v10471_v30 = vld [vmem:[%s20387_s2 + $0xf90] sm:$0xf] }
  0x91   : > { %3977 = vmatpush.bf16.msra.mxu3 %v10208_v13  ;;  %3952 = vmatpush.bf16.msra.mxu1 %v9120_v21  ;;  %v10015_v43 = vld [vmem:[%s20387_s2 + $0xc08] sm:$0xf]  ;;  %v9504_v53 = vor.u32 %v13359_v42, %v9503_v40  ;;  %v10404_v13 = vor.u32 %v13575_v3, %v10401_v4  ;;  %v9316_v21 = vor.u32 %v13303_v12, %v9313_v14  ;;  %v10273_v32 = vld [vmem:[%s20387_s2 + $0xe48] sm:$0xf0] }
  0x92   : > { %v13487_v44 = vld [vmem:[%s20387_s2 + $0xc44] sm:$0xf0]  ;;  %v13271_v38 = vld [vmem:[%s20387_s2 + $0x58c] sm:$0xf]  ;;  %v10276_v39 = vor.u32 %v13543_v31, %v10273_v32  ;;  %v13600_v31 = vld [vmem:[%s20387_s2 + $0xfcc] sm:$0xf0] }
  0x93   : > { %3965 = vmatpush.bf16.msra.mxu2 %v9632_v22  ;;  %3940 = vmatpush.bf16.msra.mxu0 %v8544_v33  ;;  %v10016_v56 = vor.u32 %v13487_v44, %v10015_v43  ;;  %v9828_v22 = vor.u32 %v13431_v15, %v9825_v17  ;;  %v8740_v33 = vor.u32 %v13159_v23, %v8737_v24  ;;  %v9185_v40 = vld [vmem:[%s20387_s2 + $0x5c8] sm:$0xf0]  ;;  %v13344_v24 = vld [vmem:[%s20387_s2 + $0x7cc] sm:$0xf0] }
  0x94   : > { %v9697_v42 = vld [vmem:[%s20387_s2 + $0x9c8] sm:$0xf0]  ;;  %v9188_v46 = vor.u32 %v13271_v38, %v9185_v40  ;;  %v9383_v38 = vld [vmem:[%s20387_s2 + $0x710] sm:$0xf] }
  0x95   : > { %3978 = vmatpush.bf16.msra.mxu3 %v10144_v27  ;;  %3953 = vmatpush.bf16.msra.mxu1 %v9056_v36  ;;  %v10340_v27 = vor.u32 %v13559_v18, %v10337_v19  ;;  %v13143_v36 = vld [vmem:[%s20387_s2 + $0x18c] sm:$0xf]  ;;  %v13328_v40 = vld [vmem:[%s20387_s2 + $0x74c] sm:$0xf0] }
  0x96   : > { %v13527_v43 = vld [vmem:[%s20387_s2 + $0xd8c] sm:$0xf] }
  0x97   : > { %3966 = vmatpush.bf16.msra.mxu2 %v9568_v37  ;;  %3941 = vmatpush.bf16.msra.mxu0 %v8480_v48  ;;  %v8673_v37 = vld [vmem:[%s20387_s2 + $0x1c8] sm:$0xf0] }
  0x98   : > { %v10209_v44 = vld [vmem:[%s20387_s2 + $0xdc8] sm:$0xf0]  ;;  %v8676_v45 = vor.u32 %v13143_v36, %v8673_v37  ;;  %v8871_v36 = vld [vmem:[%s20387_s2 + $0x310] sm:$0xf] }
  0x99   : > { %3979 = vmatpush.bf16.msra.mxu3 %v10080_v41  ;;  %3954 = vmatpush.bf16.msra.mxu1 %v8992_v52  ;;  %v13399_v41 = vld [vmem:[%s20387_s2 + $0x98c] sm:$0xf]  ;;  %v10212_v51 = vor.u32 %v13527_v43, %v10209_v44  ;;  %v13200_v37 = vld [vmem:[%s20387_s2 + $0x34c] sm:$0xf0] }
  0x9a   : > { %3942 = vmatmul.bf16.vlgmr.msra.gmra.mxu0 %v14050_v10  ;;  %v9700_v47 = vor.u32 %v13399_v41, %v9697_v42  ;;  %v13127_v48 = vld [vmem:[%s20387_s2 + $0x10c] sm:$0xf]  ;;  %v9895_v41 = vld [vmem:[%s20387_s2 + $0xb10] sm:$0xf] }
  0x9b   : > { %3967 = vmatpush.bf16.msra.mxu2 %v9504_v53  ;;  %3986 = vmatpush.bf16.msrb.mxu0 %v8932_v57  ;;  %v8609_v49 = vld [vmem:[%s20387_s2 + $0x148] sm:$0xf0]  ;;  %v13456_v42 = vld [vmem:[%s20387_s2 + $0xb4c] sm:$0xf0] }
  0x9c   : > { %3955 = vmatmul.bf16.vlgmr.msra.gmra.mxu1 %v14081_v26  ;;  %v13255_v50 = vld [vmem:[%s20387_s2 + $0x50c] sm:$0xf]  ;;  %v8612_v57 = vor.u32 %v13127_v48, %v8609_v49  ;;  %v10407_v43 = vld [vmem:[%s20387_s2 + $0xf10] sm:$0xf] }
  0x9d   : > { %3980 = vmatpush.bf16.msra.mxu3 %v10016_v56  ;;  %3999 = vmatpush.bf16.msrb.mxu1 %v9444_v58  ;;  %v9121_v52 = vld [vmem:[%s20387_s2 + $0x548] sm:$0xf0]  ;;  %v13584_v44 = vld [vmem:[%s20387_s2 + $0xf4c] sm:$0xf0] }
  0x9e   : > { %3968 = vmatmul.bf16.vlgmr.msra.gmra.mxu2 %v14048_v9  ;;  %v13383_v53 = vld [vmem:[%s20387_s2 + $0x90c] sm:$0xf]  ;;  %v9124_v58 = vor.u32 %v13255_v50, %v9121_v52  ;;  %v8807_v48 = vld [vmem:[%s20387_s2 + $0x290] sm:$0xf] }
  0x9f   : > { %4012 = vmatpush.bf16.msrb.mxu2 %v9956_v59  ;;  %3987 = vmatpush.bf16.msrb.mxu0 %v8868_v5  ;;  %v9633_v54 = vld [vmem:[%s20387_s2 + $0x948] sm:$0xf0]  ;;  %v13184_v49 = vld [vmem:[%s20387_s2 + $0x2cc] sm:$0xf0] }
  0xa0   : > { %3981 = vmatmul.bf16.vlgmr.msra.gmra.mxu3 %v14061_v16  ;;  %v13511_v55 = vld [vmem:[%s20387_s2 + $0xd0c] sm:$0xf]  ;;  %v9636_v59 = vor.u32 %v13383_v53, %v9633_v54  ;;  %v9319_v50 = vld [vmem:[%s20387_s2 + $0x690] sm:$0xf] }
  0xa1   : > { %4025 = vmatpush.bf16.msrb.mxu3 %v10468_v63  ;;  %4000 = vmatpush.bf16.msrb.mxu1 %v9380_v6  ;;  %v10145_v56 = vld [vmem:[%s20387_s2 + $0xd48] sm:$0xf0]  ;;  %v13312_v52 = vld [vmem:[%s20387_s2 + $0x6cc] sm:$0xf0] }
  0xa2   : > { %v13111_v60 = vld [vmem:[%s20387_s2 + $0x8c] sm:$0xf]  ;;  %v10148_v63 = vor.u32 %v13511_v55, %v10145_v56  ;;  %v9831_v53 = vld [vmem:[%s20387_s2 + $0xa90] sm:$0xf] }
  0xa3   : > { %4013 = vmatpush.bf16.msrb.mxu2 %v9892_v7  ;;  %3988 = vmatpush.bf16.msrb.mxu0 %v8804_v20  ;;  %v8545_v61 = vld [vmem:[%s20387_s2 + $0xc8] sm:$0xf0]  ;;  %v8935_v20 = vld [vmem:[%s20387_s2 + $0x390] sm:$0xf] }
  0xa4   : > { %v13239_v62 = vld [vmem:[%s20387_s2 + $0x48c] sm:$0xf]  ;;  %v8548_v5 = vor.u32 %v13111_v60, %v8545_v61  ;;  %v13440_v54 = vld [vmem:[%s20387_s2 + $0xacc] sm:$0xf0] }
  0xa5   : > { %4026 = vmatpush.bf16.msrb.mxu3 %v10404_v13  ;;  %4001 = vmatpush.bf16.msrb.mxu1 %v9316_v21  ;;  %v9057_v0 = vld [vmem:[%s20387_s2 + $0x4c8] sm:$0xf0]  ;;  %v13216_v21 = vld [vmem:[%s20387_s2 + $0x3cc] sm:$0xf0] }
  0xa6   : > { %v13367_v1 = vld [vmem:[%s20387_s2 + $0x88c] sm:$0xf]  ;;  %v9060_v8 = vor.u32 %v13239_v62, %v9057_v0  ;;  %v10343_v55 = vld [vmem:[%s20387_s2 + $0xe90] sm:$0xf] }
  0xa7   : > { %4014 = vmatpush.bf16.msrb.mxu2 %v9828_v22  ;;  %3989 = vmatpush.bf16.msrb.mxu0 %v8740_v33  ;;  %v9569_v2 = vld [vmem:[%s20387_s2 + $0x8c8] sm:$0xf0]  ;;  %v9447_v22 = vld [vmem:[%s20387_s2 + $0x790] sm:$0xf]  ;;  %v8936_v33 = vor.u32 %v13216_v21, %v8935_v20 }
  0xa8   : > { %v13495_v3 = vld [vmem:[%s20387_s2 + $0xc8c] sm:$0xf]  ;;  %v9572_v11 = vor.u32 %v13367_v1, %v9569_v2  ;;  %v13568_v56 = vld [vmem:[%s20387_s2 + $0xecc] sm:$0xf0] }
  0xa9   : > { %4027 = vmatpush.bf16.msrb.mxu3 %v10340_v27  ;;  %4002 = vmatpush.bf16.msrb.mxu1 %v9252_v34  ;;  %v10081_v4 = vld [vmem:[%s20387_s2 + $0xcc8] sm:$0xf0]  ;;  %v13472_v27 = vld [vmem:[%s20387_s2 + $0xbcc] sm:$0xf0]  ;;  %v9448_v34 = vor.u32 %v13344_v24, %v9447_v22 }
  0xaa   : > { %v13095_v6 = vld [vmem:[%s20387_s2 + $0xc] sm:$0xf]  ;;  %v10084_v15 = vor.u32 %v13495_v3, %v10081_v4  ;;  %v8743_v60 = vld [vmem:[%s20387_s2 + $0x210] sm:$0xf] }
  0xab   : > { %4015 = vmatpush.bf16.msrb.mxu2 %v9764_v35  ;;  %3990 = vmatpush.bf16.msrb.mxu0 %v8676_v45  ;;  %v8481_v7 = vld [vmem:[%s20387_s2 + $0x48] sm:$0xf0]  ;;  %v9960_v35 = vor.u32 %v13472_v27, %v9959_v25  ;;  %v8872_v45 = vor.u32 %v13200_v37, %v8871_v36  ;;  %v13168_v61 = vld [vmem:[%s20387_s2 + $0x24c] sm:$0xf0] }
  0xac   : > { %v13223_v12 = vld [vmem:[%s20387_s2 + $0x40c] sm:$0xf]  ;;  %v8484_v23 = vor.u32 %v13095_v6, %v8481_v7  ;;  %v9255_v62 = vld [vmem:[%s20387_s2 + $0x610] sm:$0xf] }
  0xad   : > { %4028 = vmatpush.bf16.msrb.mxu3 %v10276_v39  ;;  %4003 = vmatpush.bf16.msrb.mxu1 %v9188_v46  ;;  %v8993_v13 = vld [vmem:[%s20387_s2 + $0x448] sm:$0xf0]  ;;  %v10472_v39 = vor.u32 %v13600_v31, %v10471_v30  ;;  %v9384_v46 = vor.u32 %v13328_v40, %v9383_v38  ;;  %v13296_v0 = vld [vmem:[%s20387_s2 + $0x64c] sm:$0xf0] }
  0xae   : > { %v13351_v14 = vld [vmem:[%s20387_s2 + $0x80c] sm:$0xf]  ;;  %v8996_v28 = vor.u32 %v13223_v12, %v8993_v13  ;;  %v9767_v1 = vld [vmem:[%s20387_s2 + $0xa10] sm:$0xf]  ;;  %v9256_v6 = vor.u32 %v13296_v0, %v9255_v62  ;;  %v13464_v62 = vld [vmem:[%s20387_s2 + $0xb94] sm:$0xf] }
  0xaf   : > { %4016 = vmatpush.bf16.msrb.mxu2 %v9700_v47  ;;  %3991 = vmatpush.bf16.msrb.mxu0 %v8612_v57  ;;  %v9505_v17 = vld [vmem:[%s20387_s2 + $0x848] sm:$0xf0]  ;;  %v9896_v47 = vor.u32 %v13456_v42, %v9895_v41  ;;  %v8808_v57 = vor.u32 %v13184_v49, %v8807_v48  ;;  %v13424_v2 = vld [vmem:[%s20387_s2 + $0xa4c] sm:$0xf0] }
  0xb0   : > { %v13479_v18 = vld [vmem:[%s20387_s2 + $0xc0c] sm:$0xf]  ;;  %v9508_v29 = vor.u32 %v13351_v14, %v9505_v17  ;;  %v10279_v3 = vld [vmem:[%s20387_s2 + $0xe10] sm:$0xf]  ;;  %v9768_v7 = vor.u32 %v13424_v2, %v9767_v1  ;;  %v13592_v2 = vld [vmem:[%s20387_s2 + $0xf94] sm:$0xf] }
  0xb1   : > { %4029 = vmatpush.bf16.msrb.mxu3 %v10212_v51  ;;  %4004 = vmatpush.bf16.msrb.mxu1 %v9124_v58  ;;  %v10017_v19 = vld [vmem:[%s20387_s2 + $0xc48] sm:$0xf0]  ;;  %v10408_v51 = vor.u32 %v13584_v44, %v10407_v43  ;;  %v9320_v58 = vor.u32 %v13312_v52, %v9319_v50  ;;  %v13552_v4 = vld [vmem:[%s20387_s2 + $0xe4c] sm:$0xf0] }
  0xb2   : > { %v10020_v32 = vor.u32 %v13479_v18, %v10017_v19  ;;  %v9191_v12 = vld [vmem:[%s20387_s2 + $0x590] sm:$0xf]  ;;  %v10280_v13 = vor.u32 %v13552_v4, %v10279_v3  ;;  %v10473_v3 = vld [vmem:[%s20387_s2 + $0xfd0] sm:$0xf0] }
  0xb3   : > { %4017 = vmatpush.bf16.msrb.mxu2 %v9636_v59  ;;  %3992 = vmatpush.bf16.msrb.mxu0 %v8548_v5  ;;  %v9832_v59 = vor.u32 %v13440_v54, %v9831_v53  ;;  %v8744_v5 = vor.u32 %v13168_v61, %v8743_v60  ;;  %v13280_v14 = vld [vmem:[%s20387_s2 + $0x5cc] sm:$0xf0]  ;;  %v9449_v61 = vld [vmem:[%s20387_s2 + $0x7d0] sm:$0xf0] }
  0xb4   : > { %v13408_v17 = vld [vmem:[%s20387_s2 + $0x9cc] sm:$0xf0]  ;;  %v9192_v21 = vor.u32 %v13280_v14, %v9191_v12  ;;  %v13320_v12 = vld [vmem:[%s20387_s2 + $0x714] sm:$0xf] }
  0xb5   : > { %4030 = vmatpush.bf16.msrb.mxu3 %v10148_v63  ;;  %4005 = vmatpush.bf16.msrb.mxu1 %v9060_v8  ;;  %v10344_v63 = vor.u32 %v13568_v56, %v10343_v55  ;;  %v8679_v8 = vld [vmem:[%s20387_s2 + $0x190] sm:$0xf]  ;;  %v9385_v14 = vld [vmem:[%s20387_s2 + $0x750] sm:$0xf0] }
  0xb6   : > { %v10215_v18 = vld [vmem:[%s20387_s2 + $0xd90] sm:$0xf] }
  0xb7   : > { %4018 = vmatpush.bf16.msrb.mxu2 %v9572_v11  ;;  %3993 = vmatpush.bf16.msrb.mxu0 %v8484_v23  ;;  %v13152_v11 = vld [vmem:[%s20387_s2 + $0x1cc] sm:$0xf0] }
  0xb8   : > { %v13536_v19 = vld [vmem:[%s20387_s2 + $0xdcc] sm:$0xf0]  ;;  %v8680_v20 = vor.u32 %v13152_v11, %v8679_v8  ;;  %v13192_v8 = vld [vmem:[%s20387_s2 + $0x314] sm:$0xf] }
  0xb9   : > { %4031 = vmatpush.bf16.msrb.mxu3 %v10084_v15  ;;  %4006 = vmatpush.bf16.msrb.mxu1 %v8996_v28  ;;  %v9703_v15 = vld [vmem:[%s20387_s2 + $0x990] sm:$0xf]  ;;  %v10216_v27 = vor.u32 %v13536_v19, %v10215_v18  ;;  %v8873_v11 = vld [vmem:[%s20387_s2 + $0x350] sm:$0xf0] }
  0xba   : > { %3994 = vmatmul.bf16.vlgmr.msrb.gmra.mxu0 %v14050_v10  ;;  %v9704_v22 = vor.u32 %v13408_v17, %v9703_v15  ;;  %v8615_v23 = vld [vmem:[%s20387_s2 + $0x110] sm:$0xf]  ;;  %v13448_v15 = vld [vmem:[%s20387_s2 + $0xb14] sm:$0xf] }
  0xbb   : > { %4019 = vmatpush.bf16.msrb.mxu2 %v9508_v29  ;;  %4038 = vmatpush.bf16.msra.mxu0 %v8936_v33  ;;  %v13136_v24 = vld [vmem:[%s20387_s2 + $0x14c] sm:$0xf0]  ;;  %v9897_v17 = vld [vmem:[%s20387_s2 + $0xb50] sm:$0xf0] }
  0xbc   : > { %4007 = vmatmul.bf16.vlgmr.msrb.gmra.mxu1 %v14081_v26  ;;  %v9127_v25 = vld [vmem:[%s20387_s2 + $0x510] sm:$0xf]  ;;  %v8616_v33 = vor.u32 %v13136_v24, %v8615_v23  ;;  %v13576_v18 = vld [vmem:[%s20387_s2 + $0xf14] sm:$0xf] }
  0xbd   : > { %4032 = vmatpush.bf16.msrb.mxu3 %v10020_v32  ;;  %4051 = vmatpush.bf16.msra.mxu1 %v9448_v34  ;;  %v13264_v28 = vld [vmem:[%s20387_s2 + $0x54c] sm:$0xf0]  ;;  %v10409_v19 = vld [vmem:[%s20387_s2 + $0xf50] sm:$0xf0] }
  0xbe   : > { %4020 = vmatmul.bf16.vlgmr.msrb.gmra.mxu2 %v14048_v9  ;;  %v9639_v29 = vld [vmem:[%s20387_s2 + $0x910] sm:$0xf]  ;;  %v9128_v34 = vor.u32 %v13264_v28, %v9127_v25  ;;  %v13176_v23 = vld [vmem:[%s20387_s2 + $0x294] sm:$0xf] }
  0xbf   : > { %4064 = vmatpush.bf16.msra.mxu2 %v9960_v35  ;;  %4039 = vmatpush.bf16.msra.mxu0 %v8872_v45  ;;  %v13392_v30 = vld [vmem:[%s20387_s2 + $0x94c] sm:$0xf0]  ;;  %v8809_v24 = vld [vmem:[%s20387_s2 + $0x2d0] sm:$0xf0] }
  0xc0   : > { %4033 = vmatmul.bf16.vlgmr.msrb.gmra.mxu3 %v14061_v16  ;;  %v10151_v31 = vld [vmem:[%s20387_s2 + $0xd10] sm:$0xf]  ;;  %v9640_v35 = vor.u32 %v13392_v30, %v9639_v29  ;;  %v13304_v25 = vld [vmem:[%s20387_s2 + $0x694] sm:$0xf] }
  0xc1   : > { %4077 = vmatpush.bf16.msra.mxu3 %v10472_v39  ;;  %4052 = vmatpush.bf16.msra.mxu1 %v9384_v46  ;;  %v13520_v32 = vld [vmem:[%s20387_s2 + $0xd4c] sm:$0xf0]  ;;  %v9321_v28 = vld [vmem:[%s20387_s2 + $0x6d0] sm:$0xf0] }
  0xc2   : > { %v8551_v36 = vld [vmem:[%s20387_s2 + $0x90] sm:$0xf]  ;;  %v10152_v39 = vor.u32 %v13520_v32, %v10151_v31  ;;  %v13432_v29 = vld [vmem:[%s20387_s2 + $0xa94] sm:$0xf] }
  0xc3   : > { %4065 = vmatpush.bf16.msra.mxu2 %v9896_v47  ;;  %4040 = vmatpush.bf16.msra.mxu0 %v8808_v57  ;;  %v13120_v37 = vld [vmem:[%s20387_s2 + $0xcc] sm:$0xf0]  ;;  %v13208_v57 = vld [vmem:[%s20387_s2 + $0x394] sm:$0xf] }
  0xc4   : > { %v9063_v38 = vld [vmem:[%s20387_s2 + $0x490] sm:$0xf]  ;;  %v8552_v45 = vor.u32 %v13120_v37, %v8551_v36  ;;  %v9833_v30 = vld [vmem:[%s20387_s2 + $0xad0] sm:$0xf0] }
  0xc5   : > { %4078 = vmatpush.bf16.msra.mxu3 %v10408_v51  ;;  %4053 = vmatpush.bf16.msra.mxu1 %v9320_v58  ;;  %v13248_v40 = vld [vmem:[%s20387_s2 + $0x4cc] sm:$0xf0]  ;;  %v8937_v58 = vld [vmem:[%s20387_s2 + $0x3d0] sm:$0xf0] }
  0xc6   : > { %v9575_v41 = vld [vmem:[%s20387_s2 + $0x890] sm:$0xf]  ;;  %v9064_v48 = vor.u32 %v13248_v40, %v9063_v38  ;;  %v13560_v31 = vld [vmem:[%s20387_s2 + $0xe94] sm:$0xf] }
  0xc7   : > { %4066 = vmatpush.bf16.msra.mxu2 %v9832_v59  ;;  %4041 = vmatpush.bf16.msra.mxu0 %v8744_v5  ;;  %v13376_v42 = vld [vmem:[%s20387_s2 + $0x8cc] sm:$0xf0]  ;;  %v13336_v59 = vld [vmem:[%s20387_s2 + $0x794] sm:$0xf]  ;;  %v8940_v5 = vor.u32 %v13208_v57, %v8937_v58 }
  0xc8   : > { %v10087_v43 = vld [vmem:[%s20387_s2 + $0xc90] sm:$0xf]  ;;  %v9576_v49 = vor.u32 %v13376_v42, %v9575_v41  ;;  %v10345_v32 = vld [vmem:[%s20387_s2 + $0xed0] sm:$0xf0] }
  0xc9   : > { %4079 = vmatpush.bf16.msra.mxu3 %v10344_v63  ;;  %4054 = vmatpush.bf16.msra.mxu1 %v9256_v6  ;;  %v13504_v44 = vld [vmem:[%s20387_s2 + $0xccc] sm:$0xf0]  ;;  %v9961_v63 = vld [vmem:[%s20387_s2 + $0xbd0] sm:$0xf0]  ;;  %v9452_v6 = vor.u32 %v13336_v59, %v9449_v61 }
  0xca   : > { %v8487_v46 = vld [vmem:[%s20387_s2 + $0x10] sm:$0xf]  ;;  %v10088_v53 = vor.u32 %v13504_v44, %v10087_v43  ;;  %v13160_v36 = vld [vmem:[%s20387_s2 + $0x214] sm:$0xf] }
  0xcb   : > { %4067 = vmatpush.bf16.msra.mxu2 %v9768_v7  ;;  %4042 = vmatpush.bf16.msra.mxu0 %v8680_v20  ;;  %v13104_v47 = vld [vmem:[%s20387_s2 + $0x4c] sm:$0xf0]  ;;  %v9964_v7 = vor.u32 %v13464_v62, %v9961_v63  ;;  %v8876_v20 = vor.u32 %v13192_v8, %v8873_v11  ;;  %v8745_v37 = vld [vmem:[%s20387_s2 + $0x250] sm:$0xf0] }
  0xcc   : > { %v8999_v50 = vld [vmem:[%s20387_s2 + $0x410] sm:$0xf]  ;;  %v8488_v60 = vor.u32 %v13104_v47, %v8487_v46  ;;  %v13288_v38 = vld [vmem:[%s20387_s2 + $0x614] sm:$0xf] }
  0xcd   : > { %4080 = vmatpush.bf16.msra.mxu3 %v10280_v13  ;;  %4055 = vmatpush.bf16.msra.mxu1 %v9192_v21  ;;  %v13232_v51 = vld [vmem:[%s20387_s2 + $0x44c] sm:$0xf0]  ;;  %v10476_v13 = vor.u32 %v13592_v2, %v10473_v3  ;;  %v9388_v21 = vor.u32 %v13320_v12, %v9385_v14  ;;  %v9257_v40 = vld [vmem:[%s20387_s2 + $0x650] sm:$0xf0] }
  0xce   : > { %v9511_v52 = vld [vmem:[%s20387_s2 + $0x810] sm:$0xf]  ;;  %v9000_v0 = vor.u32 %v13232_v51, %v8999_v50  ;;  %v13416_v41 = vld [vmem:[%s20387_s2 + $0xa14] sm:$0xf]  ;;  %v9260_v46 = vor.u32 %v13288_v38, %v9257_v40 }
  0xcf   : > { %4068 = vmatpush.bf16.msra.mxu2 %v9704_v22  ;;  %4043 = vmatpush.bf16.msra.mxu0 %v8616_v33  ;;  %v13360_v54 = vld [vmem:[%s20387_s2 + $0x84c] sm:$0xf0]  ;;  %v9900_v22 = vor.u32 %v13448_v15, %v9897_v17  ;;  %v8812_v33 = vor.u32 %v13176_v23, %v8809_v24  ;;  %v9769_v42 = vld [vmem:[%s20387_s2 + $0xa50] sm:$0xf0] }
  0xd0   : > { %v10023_v55 = vld [vmem:[%s20387_s2 + $0xc10] sm:$0xf]  ;;  %v9512_v1 = vor.u32 %v13360_v54, %v9511_v52  ;;  %v13544_v43 = vld [vmem:[%s20387_s2 + $0xe14] sm:$0xf]  ;;  %v9772_v47 = vor.u32 %v13416_v41, %v9769_v42  ;;  %v8943_v41 = vld [vmem:[%s20387_s2 + $0x398] sm:$0xf] }
  0xd1   : > { %4081 = vmatpush.bf16.msra.mxu3 %v10216_v27  ;;  %4056 = vmatpush.bf16.msra.mxu1 %v9128_v34  ;;  %v13488_v56 = vld [vmem:[%s20387_s2 + $0xc4c] sm:$0xf0]  ;;  %v10412_v27 = vor.u32 %v13576_v18, %v10409_v19  ;;  %v9324_v34 = vor.u32 %v13304_v25, %v9321_v28  ;;  %v10281_v44 = vld [vmem:[%s20387_s2 + $0xe50] sm:$0xf0]  ;;  %v13217_v42 = vld [vmem:[%s20387_s2 + $0x3d4] sm:$0xf0] }
  0xd2   : > { %v10024_v4 = vor.u32 %v13488_v56, %v10023_v55  ;;  %v13272_v50 = vld [vmem:[%s20387_s2 + $0x594] sm:$0xf]  ;;  %v10284_v51 = vor.u32 %v13544_v43, %v10281_v44  ;;  %v9455_v43 = vld [vmem:[%s20387_s2 + $0x798] sm:$0xf] }
  0xd3   : > { %4069 = vmatpush.bf16.msra.mxu2 %v9640_v35  ;;  %4044 = vmatpush.bf16.msra.mxu0 %v8552_v45  ;;  %v9836_v35 = vor.u32 %v13432_v29, %v9833_v30  ;;  %v8748_v45 = vor.u32 %v13160_v36, %v8745_v37  ;;  %v9193_v52 = vld [vmem:[%s20387_s2 + $0x5d0] sm:$0xf0] }
  0xd4   : > { %v9705_v54 = vld [vmem:[%s20387_s2 + $0x9d0] sm:$0xf0]  ;;  %v9196_v59 = vor.u32 %v13272_v50, %v9193_v52  ;;  %v13601_v52 = vld [vmem:[%s20387_s2 + $0xfd4] sm:$0xf0] }
  0xd5   : > { %4082 = vmatpush.bf16.msra.mxu3 %v10152_v39  ;;  %4057 = vmatpush.bf16.msra.mxu1 %v9064_v48  ;;  %v10348_v39 = vor.u32 %v13560_v31, %v10345_v32  ;;  %v13144_v48 = vld [vmem:[%s20387_s2 + $0x194] sm:$0xf] }
  0xd6   : > { %v13528_v55 = vld [vmem:[%s20387_s2 + $0xd94] sm:$0xf] }
  0xd7   : > { %4070 = vmatpush.bf16.msra.mxu2 %v9576_v49  ;;  %4045 = vmatpush.bf16.msra.mxu0 %v8488_v60  ;;  %v8681_v49 = vld [vmem:[%s20387_s2 + $0x1d0] sm:$0xf0]  ;;  %v3839_v58 = vpop.f32.mrf.mxu0 }
  0xd8   : > { %v10217_v56 = vld [vmem:[%s20387_s2 + $0xdd0] sm:$0xf0]  ;;  %v8684_v57 = vor.u32 %v13144_v48, %v8681_v49 }
  0xd9   : > { %4083 = vmatpush.bf16.msra.mxu3 %v10088_v53  ;;  %4058 = vmatpush.bf16.msra.mxu1 %v9000_v0  ;;  %v13400_v53 = vld [vmem:[%s20387_s2 + $0x994] sm:$0xf]  ;;  %v10220_v0 = vor.u32 %v13528_v55, %v10217_v56 }
  0xda   : > { %4046 = vmatmul.bf16.vlgmr.msra.gmra.mxu0 %v14050_v10  ;;  %v9708_v60 = vor.u32 %v13400_v53, %v9705_v54  ;;  %v13128_v61 = vld [vmem:[%s20387_s2 + $0x114] sm:$0xf]  ;;  %v8944_v54 = vor.u32 %v13217_v42, %v8943_v41  ;;  %v13281_v42 = vld [vmem:[%s20387_s2 + $0x5d4] sm:$0xf0] }
  0xdb   : > { %4071 = vmatpush.bf16.msra.mxu2 %v9512_v1  ;;  %4090 = vmatpush.bf16.msrb.mxu0 %v8940_v5  ;;  %v8617_v62 = vld [vmem:[%s20387_s2 + $0x150] sm:$0xf0] }
  0xdc   : > { %4059 = vmatmul.bf16.vlgmr.msra.gmra.mxu1 %v14081_v26  ;;  %v13256_v63 = vld [vmem:[%s20387_s2 + $0x514] sm:$0xf] }
  0xdd   : > { %4084 = vmatpush.bf16.msra.mxu3 %v10024_v4  ;;  %4103 = vmatpush.bf16.msrb.mxu1 %v9452_v6  ;;  %v9129_v1 = vld [vmem:[%s20387_s2 + $0x550] sm:$0xf0]  ;;  %v8620_v6 = vor.u32 %v13128_v61, %v8617_v62 }
  0xde   : > { %4072 = vmatmul.bf16.vlgmr.msra.gmra.mxu2 %v14048_v9  ;;  %v13384_v2 = vld [vmem:[%s20387_s2 + $0x914] sm:$0xf]  ;;  %v9132_v8 = vor.u32 %v13256_v63, %v9129_v1  ;;  %v13329_v63 = vld [vmem:[%s20387_s2 + $0x754] sm:$0xf0] }
  0xdf   : > { %4116 = vmatpush.bf16.msrb.mxu2 %v9964_v7  ;;  %4091 = vmatpush.bf16.msrb.mxu0 %v8876_v20  ;;  %v9641_v3 = vld [vmem:[%s20387_s2 + $0x950] sm:$0xf0]  ;;  %v3852_v7 = vpop.f32.mrf.mxu1  ;;  %v3841_v30 = vpop.f32.mrf.mxu0  ;;  %v13457_v1 = vld [vmem:[%s20387_s2 + $0xb54] sm:$0xf0] }
  0xe0   : > { %4085 = vmatmul.bf16.vlgmr.msra.gmra.mxu3 %v14061_v16  ;;  %v13512_v4 = vld [vmem:[%s20387_s2 + $0xd14] sm:$0xf]  ;;  %v9644_v11 = vor.u32 %v13384_v2, %v9641_v3  ;;  %v3853_v15 = vadd.f32 %v3852_v7, %v3839_v58  ;;  %v8879_v58 = vld [vmem:[%s20387_s2 + $0x318] sm:$0xf] }
  0xe1   : > { %4129 = vmatpush.bf16.msrb.mxu3 %v10476_v13  ;;  %4104 = vmatpush.bf16.msrb.mxu1 %v9388_v21  ;;  %v10153_v5 = vld [vmem:[%s20387_s2 + $0xd50] sm:$0xf0]  ;;  %v3865_v21 = vpop.f32.mrf.mxu2  ;;  %v10415_v2 = vld [vmem:[%s20387_s2 + $0xf18] sm:$0xf] }
  0xe2   : > { %v13112_v12 = vld [vmem:[%s20387_s2 + $0x94] sm:$0xf]  ;;  %v10156_v17 = vor.u32 %v13512_v4, %v10153_v5  ;;  %v3866_v24 = vadd.f32 %v3865_v21, %v3853_v15  ;;  %v13585_v3 = vld [vmem:[%s20387_s2 + $0xf54] sm:$0xf0] }
  0xe3   : > { %4117 = vmatpush.bf16.msrb.mxu2 %v9900_v22  ;;  %4092 = vmatpush.bf16.msrb.mxu0 %v8812_v33  ;;  %v8553_v13 = vld [vmem:[%s20387_s2 + $0xd0] sm:$0xf0]  ;;  %v3878_v25 = vpop.f32.mrf.mxu3  ;;  %v8815_v7 = vld [vmem:[%s20387_s2 + $0x298] sm:$0xf] }
  0xe4   : > { %v13240_v14 = vld [vmem:[%s20387_s2 + $0x494] sm:$0xf]  ;;  %v14946_v36 = vadd.f32 %v3878_v25, %v3866_v24  ;;  %v13441_v15 = vld [vmem:[%s20387_s2 + $0xad4] sm:$0xf0] }
  0xe5   : > { %4130 = vmatpush.bf16.msrb.mxu3 %v10412_v27  ;;  %4105 = vmatpush.bf16.msrb.mxu1 %v9324_v34  ;;  %v9065_v18 = vld [vmem:[%s20387_s2 + $0x4d0] sm:$0xf0]  ;;  %v8556_v27 = vor.u32 %v13112_v12, %v8553_v13  ;;  %v10416_v12 = vor.u32 %v13585_v3, %v10415_v2  ;;  %v13313_v13 = vld [vmem:[%s20387_s2 + $0x6d4] sm:$0xf0] }
  0xe6   : > { %v13368_v19 = vld [vmem:[%s20387_s2 + $0x894] sm:$0xf]  ;;  %v9068_v31 = vor.u32 %v13240_v14, %v9065_v18  ;;  %v9839_v14 = vld [vmem:[%s20387_s2 + $0xa98] sm:$0xf] }
  0xe7   : > { %4118 = vmatpush.bf16.msrb.mxu2 %v9836_v35  ;;  %4093 = vmatpush.bf16.msrb.mxu0 %v8748_v45  ;;  %v9577_v20 = vld [vmem:[%s20387_s2 + $0x8d0] sm:$0xf0]  ;;  %v13345_v45 = vld [vmem:[%s20387_s2 + $0x7d4] sm:$0xf0]  ;;  %v3854_v48 = vpop.f32.mrf.mxu1  ;;  %v9840_v21 = vor.u32 %v13441_v15, %v9839_v14 }
  0xe8   : > { %v13496_v22 = vld [vmem:[%s20387_s2 + $0xc94] sm:$0xf]  ;;  %v9580_v32 = vor.u32 %v13368_v19, %v9577_v20  ;;  %v9456_v56 = vor.u32 %v13345_v45, %v9455_v43  ;;  %v13569_v18 = vld [vmem:[%s20387_s2 + $0xed4] sm:$0xf0] }
  0xe9   : > { %4131 = vmatpush.bf16.msrb.mxu3 %v10348_v39  ;;  %4106 = vmatpush.bf16.msrb.mxu1 %v9260_v46  ;;  %v10089_v23 = vld [vmem:[%s20387_s2 + $0xcd0] sm:$0xf0]  ;;  %v9967_v46 = vld [vmem:[%s20387_s2 + $0xb98] sm:$0xf]  ;;  %v3867_v55 = vpop.f32.mrf.mxu2 }
  0xea   : > { %v13096_v28 = vld [vmem:[%s20387_s2 + $0x14] sm:$0xf]  ;;  %v10092_v37 = vor.u32 %v13496_v22, %v10089_v23  ;;  %v8751_v22 = vld [vmem:[%s20387_s2 + $0x218] sm:$0xf] }
  0xeb   : > { %4119 = vmatpush.bf16.msrb.mxu2 %v9772_v47  ;;  %4094 = vmatpush.bf16.msrb.mxu0 %v8684_v57  ;;  %v8489_v29 = vld [vmem:[%s20387_s2 + $0x50] sm:$0xf0]  ;;  %v13473_v47 = vld [vmem:[%s20387_s2 + $0xbd4] sm:$0xf0]  ;;  %v3880_v61 = vpop.f32.mrf.mxu3 }
  0xec   : > { %v13224_v33 = vld [vmem:[%s20387_s2 + $0x414] sm:$0xf]  ;;  %v8492_v44 = vor.u32 %v13096_v28, %v8489_v29  ;;  %v9968_v57 = vor.u32 %v13473_v47, %v9967_v46  ;;  %v13169_v23 = vld [vmem:[%s20387_s2 + $0x254] sm:$0xf0] }
  0xed   : > { %4132 = vmatpush.bf16.msrb.mxu3 %v10284_v51  ;;  %4107 = vmatpush.bf16.msrb.mxu1 %v9196_v59  ;;  %v9001_v34 = vld [vmem:[%s20387_s2 + $0x450] sm:$0xf0]  ;;  %v10479_v51 = vld [vmem:[%s20387_s2 + $0xf98] sm:$0xf] }
  0xee   : > { %v13352_v35 = vld [vmem:[%s20387_s2 + $0x814] sm:$0xf]  ;;  %v9004_v49 = vor.u32 %v13224_v33, %v9001_v34  ;;  %v13201_v59 = vld [vmem:[%s20387_s2 + $0x354] sm:$0xf0]  ;;  %v10480_v62 = vor.u32 %v13601_v52, %v10479_v51 }
  0xef   : > { %4120 = vmatpush.bf16.msrb.mxu2 %v9708_v60  ;;  %4095 = vmatpush.bf16.msrb.mxu0 %v8620_v6  ;;  %v9513_v38 = vld [vmem:[%s20387_s2 + $0x850] sm:$0xf0]  ;;  %v9391_v60 = vld [vmem:[%s20387_s2 + $0x718] sm:$0xf]  ;;  %v8880_v4 = vor.u32 %v13201_v59, %v8879_v58 }
  0xf0   : > { %v13480_v39 = vld [vmem:[%s20387_s2 + $0xc14] sm:$0xf]  ;;  %v9516_v50 = vor.u32 %v13352_v35, %v9513_v38  ;;  %v9392_v5 = vor.u32 %v13329_v63, %v9391_v60  ;;  %v9263_v24 = vld [vmem:[%s20387_s2 + $0x618] sm:$0xf] }
  0xf1   : > { %4133 = vmatpush.bf16.msrb.mxu3 %v10220_v0  ;;  %4108 = vmatpush.bf16.msrb.mxu1 %v9132_v8  ;;  %v10025_v40 = vld [vmem:[%s20387_s2 + $0xc50] sm:$0xf0]  ;;  %v9903_v0 = vld [vmem:[%s20387_s2 + $0xb18] sm:$0xf] }
  0xf2   : > { %v10028_v53 = vor.u32 %v13480_v39, %v10025_v40  ;;  %v9904_v6 = vor.u32 %v13457_v1, %v9903_v0  ;;  %v13185_v8 = vld [vmem:[%s20387_s2 + $0x2d4] sm:$0xf0] }
  0xf3   : > { %4121 = vmatpush.bf16.msrb.mxu2 %v9644_v11  ;;  %4096 = vmatpush.bf16.msrb.mxu0 %v8556_v27  ;;  %v9327_v11 = vld [vmem:[%s20387_s2 + $0x698] sm:$0xf]  ;;  %v8816_v19 = vor.u32 %v13185_v8, %v8815_v7 }
  0xf4   : > { %v9328_v20 = vor.u32 %v13313_v13, %v9327_v11  ;;  %v13297_v27 = vld [vmem:[%s20387_s2 + $0x654] sm:$0xf0] }
  0xf5   : > { %4134 = vmatpush.bf16.msrb.mxu3 %v10156_v17  ;;  %4109 = vmatpush.bf16.msrb.mxu1 %v9068_v31  ;;  %v10351_v17 = vld [vmem:[%s20387_s2 + $0xe98] sm:$0xf]  ;;  %v9264_v34 = vor.u32 %v13297_v27, %v9263_v24 }
  0xf6   : > { %v10352_v25 = vor.u32 %v13569_v18, %v10351_v17  ;;  %v9775_v28 = vld [vmem:[%s20387_s2 + $0xa18] sm:$0xf] }
  0xf7   : > { %4122 = vmatpush.bf16.msrb.mxu2 %v9580_v32  ;;  %4097 = vmatpush.bf16.msrb.mxu0 %v8492_v44  ;;  %v13425_v29 = vld [vmem:[%s20387_s2 + $0xa54] sm:$0xf0]  ;;  %v8752_v32 = vor.u32 %v13169_v23, %v8751_v22  ;;  %v3891_v33 = vpop.f32.mrf.mxu0 }
  0xf8   : > { %v10287_v30 = vld [vmem:[%s20387_s2 + $0xe18] sm:$0xf]  ;;  %v9776_v35 = vor.u32 %v13425_v29, %v9775_v28 }
  0xf9   : > { %4135 = vmatpush.bf16.msrb.mxu3 %v10092_v37  ;;  %4110 = vmatpush.bf16.msrb.mxu1 %v9004_v49  ;;  %v13553_v31 = vld [vmem:[%s20387_s2 + $0xe54] sm:$0xf0]  ;;  %v3904_v40 = vpop.f32.mrf.mxu1 }
  0xfa   : > { %4098 = vmatmul.bf16.vlgmr.msrb.gmra.mxu0 %v14050_v10  ;;  %v8687_v37 = vld [vmem:[%s20387_s2 + $0x198] sm:$0xf]  ;;  %v10288_v41 = vor.u32 %v13553_v31, %v10287_v30  ;;  %v3905_v45 = vadd.f32 %v3904_v40, %v3891_v33  ;;  %v8945_v33 = vld [vmem:[%s20387_s2 + $0x3d8] sm:$0xf0] }
  0xfb   : > { %4123 = vmatpush.bf16.msrb.mxu2 %v9516_v50  ;;  %4142 = vmatpush.bf16.msra.mxu0 %v8944_v54  ;;  %v13153_v38 = vld [vmem:[%s20387_s2 + $0x1d4] sm:$0xf0] }
  0xfc   : > { %4111 = vmatmul.bf16.vlgmr.msrb.gmra.mxu1 %v14081_v26  ;;  %v9199_v39 = vld [vmem:[%s20387_s2 + $0x598] sm:$0xf]  ;;  %v8688_v48 = vor.u32 %v13153_v38, %v8687_v37  ;;  %v9457_v37 = vld [vmem:[%s20387_s2 + $0x7d8] sm:$0xf0] }
  0xfd   : > { %4136 = vmatpush.bf16.msrb.mxu3 %v10028_v53  ;;  %4155 = vmatpush.bf16.msra.mxu1 %v9456_v56  ;;  %v9711_v43 = vld [vmem:[%s20387_s2 + $0x998] sm:$0xf]  ;;  %v9200_v49 = vor.u32 %v13281_v42, %v9199_v39  ;;  %v13465_v38 = vld [vmem:[%s20387_s2 + $0xb9c] sm:$0xf] }
  0xfe   : > { %4124 = vmatmul.bf16.vlgmr.msrb.gmra.mxu2 %v14048_v9  ;;  %v13409_v44 = vld [vmem:[%s20387_s2 + $0x9d4] sm:$0xf0]  ;;  %v9969_v39 = vld [vmem:[%s20387_s2 + $0xbd8] sm:$0xf0] }
  0xff   : > { %4168 = vmatpush.bf16.msra.mxu2 %v9968_v57  ;;  %4143 = vmatpush.bf16.msra.mxu0 %v8880_v4  ;;  %v10223_v46 = vld [vmem:[%s20387_s2 + $0xd98] sm:$0xf]  ;;  %v9712_v50 = vor.u32 %v13409_v44, %v9711_v43  ;;  %v3893_v1 = vpop.f32.mrf.mxu0  ;;  %v13593_v42 = vld [vmem:[%s20387_s2 + $0xf9c] sm:$0xf] }
 0x100   : > { %4137 = vmatmul.bf16.vlgmr.msrb.gmra.mxu3 %v14061_v16  ;;  %v13537_v47 = vld [vmem:[%s20387_s2 + $0xdd4] sm:$0xf0]  ;;  %v10481_v43 = vld [vmem:[%s20387_s2 + $0xfd8] sm:$0xf0] }
 0x101   : > { %4181 = vmatpush.bf16.msra.mxu3 %v10480_v62  ;;  %4156 = vmatpush.bf16.msra.mxu1 %v9392_v5  ;;  %v8623_v51 = vld [vmem:[%s20387_s2 + $0x118] sm:$0xf]  ;;  %v3917_v54 = vpop.f32.mrf.mxu2  ;;  %v10224_v55 = vor.u32 %v13537_v47, %v10223_v46  ;;  %v3906_v7 = vpop.f32.mrf.mxu1  ;;  %v9972_v47 = vor.u32 %v13465_v38, %v9969_v39  ;;  %v9329_v1 = vld [vmem:[%s20387_s2 + $0x6d8] sm:$0xf0] }
 0x102   : > { %v13137_v52 = vld [vmem:[%s20387_s2 + $0x154] sm:$0xf0]  ;;  %v3918_v59 = vadd.f32 %v3917_v54, %v3905_v45  ;;  %v9905_v54 = vld [vmem:[%s20387_s2 + $0xb58] sm:$0xf0] }
 0x103   : > { %4169 = vmatpush.bf16.msra.mxu2 %v9904_v6  ;;  %4144 = vmatpush.bf16.msra.mxu0 %v8816_v19  ;;  %v9135_v53 = vld [vmem:[%s20387_s2 + $0x518] sm:$0xf]  ;;  %v3930_v60 = vpop.f32.mrf.mxu3  ;;  %v8624_v63 = vor.u32 %v13137_v52, %v8623_v51  ;;  %v10484_v51 = vor.u32 %v13593_v42, %v10481_v43  ;;  %v9393_v52 = vld [vmem:[%s20387_s2 + $0x758] sm:$0xf0] }
 0x104   : > { %v13265_v56 = vld [vmem:[%s20387_s2 + $0x554] sm:$0xf0]  ;;  %v15105_v0 = vadd.f32 %v3930_v60, %v3918_v59  ;;  %v13177_v60 = vld [vmem:[%s20387_s2 + $0x29c] sm:$0xf] }
 0x105   : > { %4182 = vmatpush.bf16.msra.mxu3 %v10416_v12  ;;  %4157 = vmatpush.bf16.msra.mxu1 %v9328_v20  ;;  %v9647_v57 = vld [vmem:[%s20387_s2 + $0x918] sm:$0xf]  ;;  %v9136_v2 = vor.u32 %v13265_v56, %v9135_v53  ;;  %v13449_v53 = vld [vmem:[%s20387_s2 + $0xb1c] sm:$0xf] }
 0x106   : > { %v13393_v58 = vld [vmem:[%s20387_s2 + $0x954] sm:$0xf0]  ;;  %v10417_v56 = vld [vmem:[%s20387_s2 + $0xf58] sm:$0xf0]  ;;  %v9908_v59 = vor.u32 %v13449_v53, %v9905_v54 }
 0x107   : > { %4170 = vmatpush.bf16.msra.mxu2 %v9840_v21  ;;  %4145 = vmatpush.bf16.msra.mxu0 %v8752_v32  ;;  %v10159_v61 = vld [vmem:[%s20387_s2 + $0xd18] sm:$0xf]  ;;  %v9648_v3 = vor.u32 %v13393_v58, %v9647_v57  ;;  %v13209_v32 = vld [vmem:[%s20387_s2 + $0x39c] sm:$0xf] }
 0x108   : > { %v13521_v62 = vld [vmem:[%s20387_s2 + $0xd54] sm:$0xf0]  ;;  %v8948_v45 = vor.u32 %v13209_v32, %v8945_v33  ;;  %v13401_v32 = vld [vmem:[%s20387_s2 + $0x99c] sm:$0xf] }
 0x109   : > { %4183 = vmatpush.bf16.msra.mxu3 %v10352_v25  ;;  %4158 = vmatpush.bf16.msra.mxu1 %v9264_v34  ;;  %v8559_v4 = vld [vmem:[%s20387_s2 + $0x98] sm:$0xf]  ;;  %v10160_v8 = vor.u32 %v13521_v62, %v10159_v61  ;;  %v3919_v25 = vpop.f32.mrf.mxu2  ;;  %v13337_v34 = vld [vmem:[%s20387_s2 + $0x79c] sm:$0xf] }
 0x10a   : > { %v13121_v5 = vld [vmem:[%s20387_s2 + $0xd4] sm:$0xf0]  ;;  %v9460_v46 = vor.u32 %v13337_v34, %v9457_v37  ;;  %v8817_v61 = vld [vmem:[%s20387_s2 + $0x2d8] sm:$0xf0] }
 0x10b   : > { %4171 = vmatpush.bf16.msra.mxu2 %v9776_v35  ;;  %4146 = vmatpush.bf16.msra.mxu0 %v8688_v48  ;;  %v9071_v6 = vld [vmem:[%s20387_s2 + $0x498] sm:$0xf]  ;;  %v8560_v17 = vor.u32 %v13121_v5, %v8559_v4  ;;  %v3932_v31 = vpop.f32.mrf.mxu3  ;;  %v13193_v48 = vld [vmem:[%s20387_s2 + $0x31c] sm:$0xf] }
 0x10c   : > { %v13249_v11 = vld [vmem:[%s20387_s2 + $0x4d4] sm:$0xf0]  ;;  %v13305_v62 = vld [vmem:[%s20387_s2 + $0x69c] sm:$0xf] }
 0x10d   : > { %4184 = vmatpush.bf16.msra.mxu3 %v10288_v41  ;;  %4159 = vmatpush.bf16.msra.mxu1 %v9200_v49  ;;  %v9583_v12 = vld [vmem:[%s20387_s2 + $0x898] sm:$0xf]  ;;  %v9072_v20 = vor.u32 %v13249_v11, %v9071_v6  ;;  %v8881_v49 = vld [vmem:[%s20387_s2 + $0x358] sm:$0xf0]  ;;  %v8820_v6 = vor.u32 %v13177_v60, %v8817_v61  ;;  %v9332_v7 = vor.u32 %v13305_v62, %v9329_v1 }
 0x10e   : > { %v13377_v13 = vld [vmem:[%s20387_s2 + $0x8d4] sm:$0xf0]  ;;  %v8884_v57 = vor.u32 %v13193_v48, %v8881_v49  ;;  %v13561_v4 = vld [vmem:[%s20387_s2 + $0xe9c] sm:$0xf] }
 0x10f   : > { %4172 = vmatpush.bf16.msra.mxu2 %v9712_v50  ;;  %v10095_v14 = vld [vmem:[%s20387_s2 + $0xc98] sm:$0xf]  ;;  %4147 = vmatpush.bf16.msra.mxu0 %v8624_v63  ;;  %v9584_v21 = vor.u32 %v13377_v13, %v9583_v12  ;;  %v13321_v50 = vld [vmem:[%s20387_s2 + $0x71c] sm:$0xf] }
 0x110   : > { %v13505_v15 = vld [vmem:[%s20387_s2 + $0xcd4] sm:$0xf0]  ;;  %v9396_v58 = vor.u32 %v13321_v50, %v9393_v52  ;;  %v10353_v5 = vld [vmem:[%s20387_s2 + $0xed8] sm:$0xf0] }
 0x111   : > { %4185 = vmatpush.bf16.msra.mxu3 %v10224_v55  ;;  %v8495_v18 = vld [vmem:[%s20387_s2 + $0x18] sm:$0xf]  ;;  %4160 = vmatpush.bf16.msra.mxu1 %v9136_v2  ;;  %v10096_v27 = vor.u32 %v13505_v15, %v10095_v14  ;;  %v13577_v55 = vld [vmem:[%s20387_s2 + $0xf1c] sm:$0xf]  ;;  %v10356_v14 = vor.u32 %v13561_v4, %v10353_v5 }
 0x112   : > { %v13105_v19 = vld [vmem:[%s20387_s2 + $0x54] sm:$0xf0]  ;;  %v10420_v63 = vor.u32 %v13577_v55, %v10417_v56  ;;  %v13433_v2 = vld [vmem:[%s20387_s2 + $0xa9c] sm:$0xf] }
 0x113   : > { %4173 = vmatpush.bf16.msra.mxu2 %v9648_v3  ;;  %v9007_v22 = vld [vmem:[%s20387_s2 + $0x418] sm:$0xf]  ;;  %4148 = vmatpush.bf16.msra.mxu0 %v8560_v17  ;;  %v8496_v35 = vor.u32 %v13105_v19, %v8495_v18  ;;  %v9841_v3 = vld [vmem:[%s20387_s2 + $0xad8] sm:$0xf0] }
 0x114   : > { %v13233_v23 = vld [vmem:[%s20387_s2 + $0x454] sm:$0xf0]  ;;  %v13161_v11 = vld [vmem:[%s20387_s2 + $0x21c] sm:$0xf] }
 0x115   : > { %v9519_v24 = vld [vmem:[%s20387_s2 + $0x818] sm:$0xf]  ;;  %4186 = vmatpush.bf16.msra.mxu3 %v10160_v8  ;;  %4161 = vmatpush.bf16.msra.mxu1 %v9072_v20  ;;  %v9008_v40 = vor.u32 %v13233_v23, %v9007_v22  ;;  %v9844_v8 = vor.u32 %v13433_v2, %v9841_v3  ;;  %v8753_v12 = vld [vmem:[%s20387_s2 + $0x258] sm:$0xf0] }
 0x116   : > { %v13361_v28 = vld [vmem:[%s20387_s2 + $0x854] sm:$0xf0]  ;;  %v13289_v13 = vld [vmem:[%s20387_s2 + $0x61c] sm:$0xf] }
 0x117   : > { %v10031_v29 = vld [vmem:[%s20387_s2 + $0xc18] sm:$0xf]  ;;  %4174 = vmatpush.bf16.msra.mxu2 %v9584_v21  ;;  %v9520_v41 = vor.u32 %v13361_v28, %v9519_v24  ;;  %4149 = vmatpush.bf16.msra.mxu0 %v8496_v35  ;;  %v9265_v15 = vld [vmem:[%s20387_s2 + $0x658] sm:$0xf0]  ;;  %v8756_v21 = vor.u32 %v13161_v11, %v8753_v12  ;;  %v3943_v22 = vpop.f32.mrf.mxu0 }
 0x118   : > { %v13489_v30 = vld [vmem:[%s20387_s2 + $0xc54] sm:$0xf0]  ;;  %v13417_v17 = vld [vmem:[%s20387_s2 + $0xa1c] sm:$0xf]  ;;  %v9268_v23 = vor.u32 %v13289_v13, %v9265_v15 }
 0x119   : > { %4187 = vmatpush.bf16.msra.mxu3 %v10096_v27  ;;  %v10032_v44 = vor.u32 %v13489_v30, %v10031_v29  ;;  %4162 = vmatpush.bf16.msra.mxu1 %v9008_v40  ;;  %v9777_v18 = vld [vmem:[%s20387_s2 + $0xa58] sm:$0xf0]  ;;  %v3956_v29 = vpop.f32.mrf.mxu1 }
 0x11a   : > { %4150 = vmatmul.bf16.vlgmr.msra.gmra.mxu0 %v14050_v10  ;;  %v13545_v19 = vld [vmem:[%s20387_s2 + $0xe1c] sm:$0xf]  ;;  %v9780_v24 = vor.u32 %v13417_v17, %v9777_v18  ;;  %v3957_v34 = vadd.f32 %v3956_v29, %v3943_v22  ;;  %v8951_v22 = vld [vmem:[%s20387_s2 + $0x3a0] sm:$0xf] }
 0x11b   : > { %4175 = vmatpush.bf16.msra.mxu2 %v9520_v41  ;;  %4194 = vmatpush.bf16.msrb.mxu0 %v8948_v45  ;;  %v10289_v20 = vld [vmem:[%s20387_s2 + $0xe58] sm:$0xf0]  ;;  %v13474_v29 = vld [vmem:[%s20387_s2 + $0xbdc] sm:$0xf0] }
 0x11c   : > { %4163 = vmatmul.bf16.vlgmr.msra.gmra.mxu1 %v14081_v26  ;;  %v13145_v25 = vld [vmem:[%s20387_s2 + $0x19c] sm:$0xf]  ;;  %v10292_v30 = vor.u32 %v13545_v19, %v10289_v20 }
 0x11d   : > { %4188 = vmatpush.bf16.msra.mxu3 %v10032_v44  ;;  %4207 = vmatpush.bf16.msrb.mxu1 %v9460_v46  ;;  %v8689_v27 = vld [vmem:[%s20387_s2 + $0x1d8] sm:$0xf0] }
 0x11e   : > { %4176 = vmatmul.bf16.vlgmr.msra.gmra.mxu2 %v14048_v9  ;;  %v13273_v28 = vld [vmem:[%s20387_s2 + $0x59c] sm:$0xf]  ;;  %v8692_v38 = vor.u32 %v13145_v25, %v8689_v27  ;;  %v13346_v27 = vld [vmem:[%s20387_s2 + $0x7dc] sm:$0xf0] }
 0x11f   : > { %4220 = vmatpush.bf16.msrb.mxu2 %v9972_v47  ;;  %4195 = vmatpush.bf16.msrb.mxu0 %v8884_v57  ;;  %v9201_v31 = vld [vmem:[%s20387_s2 + $0x5d8] sm:$0xf0]  ;;  %v3945_v55 = vpop.f32.mrf.mxu0 }
 0x120   : > { %4189 = vmatmul.bf16.vlgmr.msra.gmra.mxu3 %v14061_v16  ;;  %v9713_v33 = vld [vmem:[%s20387_s2 + $0x9d8] sm:$0xf0]  ;;  %v9204_v39 = vor.u32 %v13273_v28, %v9201_v31  ;;  %v9975_v28 = vld [vmem:[%s20387_s2 + $0xba0] sm:$0xf] }
 0x121   : > { %4233 = vmatpush.bf16.msrb.mxu3 %v10484_v51  ;;  %4208 = vmatpush.bf16.msrb.mxu1 %v9396_v58  ;;  %v13529_v35 = vld [vmem:[%s20387_s2 + $0xd9c] sm:$0xf]  ;;  %v9716_v40 = vor.u32 %v13401_v32, %v9713_v33  ;;  %v3969_v44 = vpop.f32.mrf.mxu2  ;;  %v3958_v61 = vpop.f32.mrf.mxu1  ;;  %v10487_v32 = vld [vmem:[%s20387_s2 + $0xfa0] sm:$0xf] }
 0x122   : > { %v10225_v37 = vld [vmem:[%s20387_s2 + $0xdd8] sm:$0xf0]  ;;  %v3970_v49 = vadd.f32 %v3969_v44, %v3957_v34  ;;  %v13602_v33 = vld [vmem:[%s20387_s2 + $0xfdc] sm:$0xf0] }
 0x123   : > { %4221 = vmatpush.bf16.msrb.mxu2 %v9908_v59  ;;  %4196 = vmatpush.bf16.msrb.mxu0 %v8820_v6  ;;  %v13129_v41 = vld [vmem:[%s20387_s2 + $0x11c] sm:$0xf]  ;;  %v10228_v45 = vor.u32 %v13529_v35, %v10225_v37  ;;  %v3982_v50 = vpop.f32.mrf.mxu3  ;;  %v9911_v44 = vld [vmem:[%s20387_s2 + $0xb20] sm:$0xf] }
 0x124   : > { %v8625_v42 = vld [vmem:[%s20387_s2 + $0x158] sm:$0xf0]  ;;  %v15303_v54 = vadd.f32 %v3982_v50, %v3970_v49 }
 0x125   : > { %4234 = vmatpush.bf16.msrb.mxu3 %v10420_v63  ;;  %4209 = vmatpush.bf16.msrb.mxu1 %v9332_v7  ;;  %v13257_v43 = vld [vmem:[%s20387_s2 + $0x51c] sm:$0xf]  ;;  %v8628_v53 = vor.u32 %v13129_v41, %v8625_v42  ;;  %v9399_v41 = vld [vmem:[%s20387_s2 + $0x720] sm:$0xf]  ;;  %v10488_v42 = vor.u32 %v13602_v33, %v10487_v32 }
 0x126   : > { %v9137_v46 = vld [vmem:[%s20387_s2 + $0x558] sm:$0xf0]  ;;  %v8631_v32 = vld [vmem:[%s20387_s2 + $0x120] sm:$0xf] }
 0x127   : > { %4222 = vmatpush.bf16.msrb.mxu2 %v9844_v8  ;;  %4197 = vmatpush.bf16.msrb.mxu0 %v8756_v21  ;;  %v13385_v47 = vld [vmem:[%s20387_s2 + $0x91c] sm:$0xf]  ;;  %v9140_v56 = vor.u32 %v13257_v43, %v9137_v46  ;;  %v13330_v43 = vld [vmem:[%s20387_s2 + $0x75c] sm:$0xf0] }
 0x128   : > { %v9649_v48 = vld [vmem:[%s20387_s2 + $0x958] sm:$0xf0]  ;;  %v10423_v46 = vld [vmem:[%s20387_s2 + $0xf20] sm:$0xf]  ;;  %v9400_v49 = vor.u32 %v13330_v43, %v9399_v41 }
 0x129   : > { %4235 = vmatpush.bf16.msrb.mxu3 %v10356_v14  ;;  %4210 = vmatpush.bf16.msrb.mxu1 %v9268_v23  ;;  %v13513_v51 = vld [vmem:[%s20387_s2 + $0xd1c] sm:$0xf]  ;;  %v9652_v57 = vor.u32 %v13385_v47, %v9649_v48  ;;  %v3971_v15 = vpop.f32.mrf.mxu2  ;;  %v13218_v23 = vld [vmem:[%s20387_s2 + $0x3dc] sm:$0xf0] }
 0x12a   : > { %v10161_v52 = vld [vmem:[%s20387_s2 + $0xd58] sm:$0xf0]  ;;  %v8952_v35 = vor.u32 %v13218_v23, %v8951_v22  ;;  %v13586_v47 = vld [vmem:[%s20387_s2 + $0xf5c] sm:$0xf0] }
 0x12b   : > { %4223 = vmatpush.bf16.msrb.mxu2 %v9780_v24  ;;  %4198 = vmatpush.bf16.msrb.mxu0 %v8692_v38  ;;  %v13113_v58 = vld [vmem:[%s20387_s2 + $0x9c] sm:$0xf]  ;;  %v10164_v62 = vor.u32 %v13513_v51, %v10161_v52  ;;  %v3984_v21 = vpop.f32.mrf.mxu3  ;;  %v9463_v24 = vld [vmem:[%s20387_s2 + $0x7a0] sm:$0xf]  ;;  %v9976_v38 = vor.u32 %v13474_v29, %v9975_v28  ;;  %v10424_v55 = vor.u32 %v13586_v47, %v10423_v46 }
 0x12c   : > { %v8561_v59 = vld [vmem:[%s20387_s2 + $0xd8] sm:$0xf0]  ;;  %v9464_v37 = vor.u32 %v13346_v27, %v9463_v24  ;;  %v8823_v51 = vld [vmem:[%s20387_s2 + $0x2a0] sm:$0xf] }
 0x12d   : > { %4236 = vmatpush.bf16.msrb.mxu3 %v10292_v30  ;;  %4211 = vmatpush.bf16.msrb.mxu1 %v9204_v39  ;;  %v13241_v60 = vld [vmem:[%s20387_s2 + $0x49c] sm:$0xf]  ;;  %v8564_v5 = vor.u32 %v13113_v58, %v8561_v59  ;;  %v8887_v39 = vld [vmem:[%s20387_s2 + $0x320] sm:$0xf] }
 0x12e   : > { %v9073_v63 = vld [vmem:[%s20387_s2 + $0x4d8] sm:$0xf0]  ;;  %v13186_v52 = vld [vmem:[%s20387_s2 + $0x2dc] sm:$0xf0] }
 0x12f   : > { %4224 = vmatpush.bf16.msrb.mxu2 %v9716_v40  ;;  %v13369_v1 = vld [vmem:[%s20387_s2 + $0x89c] sm:$0xf]  ;;  %4199 = vmatpush.bf16.msrb.mxu0 %v8628_v53  ;;  %v9076_v8 = vor.u32 %v13241_v60, %v9073_v63  ;;  %v13202_v40 = vld [vmem:[%s20387_s2 + $0x35c] sm:$0xf0]  ;;  %v8824_v61 = vor.u32 %v13186_v52, %v8823_v51 }
 0x130   : > { %v9585_v2 = vld [vmem:[%s20387_s2 + $0x8d8] sm:$0xf0]  ;;  %v8888_v48 = vor.u32 %v13202_v40, %v8887_v39  ;;  %v9335_v53 = vld [vmem:[%s20387_s2 + $0x6a0] sm:$0xf] }
 0x131   : > { %4237 = vmatpush.bf16.msrb.mxu3 %v10228_v45  ;;  %v13497_v3 = vld [vmem:[%s20387_s2 + $0xc9c] sm:$0xf]  ;;  %4212 = vmatpush.bf16.msrb.mxu1 %v9140_v56  ;;  %v9588_v11 = vor.u32 %v13369_v1, %v9585_v2  ;;  %v13458_v45 = vld [vmem:[%s20387_s2 + $0xb5c] sm:$0xf0] }
 0x132   : > { %v10097_v4 = vld [vmem:[%s20387_s2 + $0xcd8] sm:$0xf0]  ;;  %v9912_v50 = vor.u32 %v13458_v45, %v9911_v44  ;;  %v13314_v56 = vld [vmem:[%s20387_s2 + $0x6dc] sm:$0xf0] }
 0x133   : > { %v13097_v6 = vld [vmem:[%s20387_s2 + $0x1c] sm:$0xf]  ;;  %4225 = vmatpush.bf16.msrb.mxu2 %v9652_v57  ;;  %v10100_v17 = vor.u32 %v13497_v3, %v10097_v4  ;;  %4200 = vmatpush.bf16.msrb.mxu0 %v8564_v5  ;;  %v9847_v57 = vld [vmem:[%s20387_s2 + $0xaa0] sm:$0xf] }
 0x134   : > { %v8497_v7 = vld [vmem:[%s20387_s2 + $0x58] sm:$0xf0]  ;;  %v13442_v58 = vld [vmem:[%s20387_s2 + $0xadc] sm:$0xf0] }
 0x135   : > { %v13225_v12 = vld [vmem:[%s20387_s2 + $0x41c] sm:$0xf]  ;;  %4238 = vmatpush.bf16.msrb.mxu3 %v10164_v62  ;;  %v8500_v25 = vor.u32 %v13097_v6, %v8497_v7  ;;  %4213 = vmatpush.bf16.msrb.mxu1 %v9076_v8  ;;  %v10359_v59 = vld [vmem:[%s20387_s2 + $0xea0] sm:$0xf]  ;;  %v9336_v62 = vor.u32 %v13314_v56, %v9335_v53  ;;  %v9848_v63 = vor.u32 %v13442_v58, %v9847_v57 }
 0x136   : > { %v9009_v13 = vld [vmem:[%s20387_s2 + $0x458] sm:$0xf0]  ;;  %v13570_v60 = vld [vmem:[%s20387_s2 + $0xedc] sm:$0xf0] }
 0x137   : > { %v13353_v14 = vld [vmem:[%s20387_s2 + $0x81c] sm:$0xf]  ;;  %4226 = vmatpush.bf16.msrb.mxu2 %v9588_v11  ;;  %v9012_v30 = vor.u32 %v13225_v12, %v9009_v13  ;;  %4201 = vmatpush.bf16.msrb.mxu0 %v8500_v25  ;;  %v8759_v1 = vld [vmem:[%s20387_s2 + $0x220] sm:$0xf]  ;;  %v10360_v4 = vor.u32 %v13570_v60, %v10359_v59  ;;  %v3995_v13 = vpop.f32.mrf.mxu0 }
 0x138   : > { %v9521_v18 = vld [vmem:[%s20387_s2 + $0x858] sm:$0xf0]  ;;  %v13170_v2 = vld [vmem:[%s20387_s2 + $0x25c] sm:$0xf0] }
 0x139   : > { %v13481_v19 = vld [vmem:[%s20387_s2 + $0xc1c] sm:$0xf]  ;;  %v9524_v31 = vor.u32 %v13353_v14, %v9521_v18  ;;  %4239 = vmatpush.bf16.msrb.mxu3 %v10100_v17  ;;  %4214 = vmatpush.bf16.msrb.mxu1 %v9012_v30  ;;  %v9271_v3 = vld [vmem:[%s20387_s2 + $0x620] sm:$0xf]  ;;  %v8760_v12 = vor.u32 %v13170_v2, %v8759_v1 }
 0x13a   : > { %v10033_v20 = vld [vmem:[%s20387_s2 + $0xc58] sm:$0xf0]  ;;  %4202 = vmatmul.bf16.vlgmr.msrb.gmra.mxu0 %v14050_v10  ;;  %v13298_v5 = vld [vmem:[%s20387_s2 + $0x65c] sm:$0xf0] }
 0x13b   : > { %v10036_v34 = vor.u32 %v13481_v19, %v10033_v20  ;;  %4227 = vmatpush.bf16.msrb.mxu2 %v9524_v31  ;;  %4246 = vmatpush.bf16.msra.mxu0 %v8952_v35  ;;  %v9783_v6 = vld [vmem:[%s20387_s2 + $0xa20] sm:$0xf]  ;;  %v9272_v14 = vor.u32 %v13298_v5, %v9271_v3  ;;  %v4008_v20 = vpop.f32.mrf.mxu1 }
 0x13c   : > { %4215 = vmatmul.bf16.vlgmr.msrb.gmra.mxu1 %v14081_v26  ;;  %v13426_v7 = vld [vmem:[%s20387_s2 + $0xa5c] sm:$0xf0]  ;;  %v4009_v25 = vadd.f32 %v4008_v20, %v3995_v13  ;;  %v13466_v20 = vld [vmem:[%s20387_s2 + $0xba4] sm:$0xf] }
 0x13d   : > { %4240 = vmatpush.bf16.msrb.mxu3 %v10036_v34  ;;  %4259 = vmatpush.bf16.msra.mxu1 %v9464_v37  ;;  %v10295_v8 = vld [vmem:[%s20387_s2 + $0xe20] sm:$0xf]  ;;  %v9784_v15 = vor.u32 %v13426_v7, %v9783_v6 }
 0x13e   : > { %4228 = vmatmul.bf16.vlgmr.msrb.gmra.mxu2 %v14048_v9  ;;  %v13554_v11 = vld [vmem:[%s20387_s2 + $0xe5c] sm:$0xf0] }
 0x13f   : > { %4272 = vmatpush.bf16.msra.mxu2 %v9976_v38  ;;  %4247 = vmatpush.bf16.msra.mxu0 %v8888_v48  ;;  %v8695_v17 = vld [vmem:[%s20387_s2 + $0x1a0] sm:$0xf]  ;;  %v10296_v21 = vor.u32 %v13554_v11, %v10295_v8  ;;  %v3997_v47 = vpop.f32.mrf.mxu0 }
 0x140   : > { %4241 = vmatmul.bf16.vlgmr.msrb.gmra.mxu3 %v14061_v16  ;;  %v13154_v18 = vld [vmem:[%s20387_s2 + $0x1dc] sm:$0xf0]  ;;  %v13306_v47 = vld [vmem:[%s20387_s2 + $0x6a4] sm:$0xf] }
 0x141   : > { %4285 = vmatpush.bf16.msra.mxu3 %v10488_v42  ;;  %4260 = vmatpush.bf16.msra.mxu1 %v9400_v49  ;;  %v9207_v19 = vld [vmem:[%s20387_s2 + $0x5a0] sm:$0xf]  ;;  %v8696_v29 = vor.u32 %v13154_v18, %v8695_v17  ;;  %v4021_v35 = vpop.f32.mrf.mxu2  ;;  %v13338_v17 = vld [vmem:[%s20387_s2 + $0x7a4] sm:$0xf] }
 0x142   : > { %v13282_v22 = vld [vmem:[%s20387_s2 + $0x5dc] sm:$0xf0]  ;;  %v4022_v41 = vadd.f32 %v4021_v35, %v4009_v25  ;;  %v10489_v25 = vld [vmem:[%s20387_s2 + $0xfe0] sm:$0xf0] }
 0x143   : > { %4273 = vmatpush.bf16.msra.mxu2 %v9912_v50  ;;  %4248 = vmatpush.bf16.msra.mxu0 %v8824_v61  ;;  %v9719_v23 = vld [vmem:[%s20387_s2 + $0x9a0] sm:$0xf]  ;;  %v9208_v30 = vor.u32 %v13282_v22, %v9207_v19  ;;  %v4034_v42 = vpop.f32.mrf.mxu3  ;;  %v4010_v53 = vpop.f32.mrf.mxu1  ;;  %v9465_v19 = vld [vmem:[%s20387_s2 + $0x7e0] sm:$0xf0] }
 0x144   : > { %v13410_v24 = vld [vmem:[%s20387_s2 + $0x9dc] sm:$0xf0]  ;;  %v15501_v46 = vadd.f32 %v4034_v42, %v4022_v41  ;;  %v9401_v35 = vld [vmem:[%s20387_s2 + $0x760] sm:$0xf0] }
 0x145   : > { %4286 = vmatpush.bf16.msra.mxu3 %v10424_v55  ;;  %4261 = vmatpush.bf16.msra.mxu1 %v9336_v62  ;;  %v10231_v27 = vld [vmem:[%s20387_s2 + $0xda0] sm:$0xf]  ;;  %v9720_v31 = vor.u32 %v13410_v24, %v9719_v23  ;;  %v13594_v24 = vld [vmem:[%s20387_s2 + $0xfa4] sm:$0xf] }
 0x146   : > { %v13538_v28 = vld [vmem:[%s20387_s2 + $0xddc] sm:$0xf0]  ;;  %v10361_v53 = vld [vmem:[%s20387_s2 + $0xee0] sm:$0xf0] }
 0x147   : > { %4274 = vmatpush.bf16.msra.mxu2 %v9848_v63  ;;  %4249 = vmatpush.bf16.msra.mxu0 %v8760_v12  ;;  %v13138_v33 = vld [vmem:[%s20387_s2 + $0x15c] sm:$0xf0]  ;;  %v10232_v37 = vor.u32 %v13538_v28, %v10231_v27 }
 0x148   : > { %v9143_v34 = vld [vmem:[%s20387_s2 + $0x520] sm:$0xf]  ;;  %v8632_v45 = vor.u32 %v13138_v33, %v8631_v32  ;;  %v8889_v32 = vld [vmem:[%s20387_s2 + $0x360] sm:$0xf0] }
 0x149   : > { %4287 = vmatpush.bf16.msra.mxu3 %v10360_v4  ;;  %4262 = vmatpush.bf16.msra.mxu1 %v9272_v14  ;;  %v13266_v38 = vld [vmem:[%s20387_s2 + $0x55c] sm:$0xf0]  ;;  %v4023_v6 = vpop.f32.mrf.mxu2  ;;  %v13210_v14 = vld [vmem:[%s20387_s2 + $0x3a4] sm:$0xf] }
 0x14a   : > { %v9655_v39 = vld [vmem:[%s20387_s2 + $0x920] sm:$0xf]  ;;  %v9144_v48 = vor.u32 %v13266_v38, %v9143_v34  ;;  %v13322_v33 = vld [vmem:[%s20387_s2 + $0x724] sm:$0xf]  ;;  %v10492_v34 = vor.u32 %v13594_v24, %v10489_v25 }
 0x14b   : > { %4275 = vmatpush.bf16.msra.mxu2 %v9784_v15  ;;  %v13394_v40 = vld [vmem:[%s20387_s2 + $0x95c] sm:$0xf0]  ;;  %4250 = vmatpush.bf16.msra.mxu0 %v8696_v29  ;;  %v4036_v13 = vpop.f32.mrf.mxu3  ;;  %v8953_v15 = vld [vmem:[%s20387_s2 + $0x3e0] sm:$0xf0]  ;;  %v9468_v29 = vor.u32 %v13338_v17, %v9465_v19  ;;  %v9404_v42 = vor.u32 %v13322_v33, %v9401_v35 }
 0x14c   : > { %v10167_v43 = vld [vmem:[%s20387_s2 + $0xd20] sm:$0xf]  ;;  %v9656_v49 = vor.u32 %v13394_v40, %v9655_v39  ;;  %v8956_v28 = vor.u32 %v13210_v14, %v8953_v15  ;;  %v9913_v38 = vld [vmem:[%s20387_s2 + $0xb60] sm:$0xf0] }
 0x14d   : > { %4288 = vmatpush.bf16.msra.mxu3 %v10296_v21  ;;  %v13522_v44 = vld [vmem:[%s20387_s2 + $0xd5c] sm:$0xf0]  ;;  %4263 = vmatpush.bf16.msra.mxu1 %v9208_v30  ;;  %v9977_v21 = vld [vmem:[%s20387_s2 + $0xbe0] sm:$0xf0] }
 0x14e   : > { %v8567_v50 = vld [vmem:[%s20387_s2 + $0xa0] sm:$0xf]  ;;  %v10168_v55 = vor.u32 %v13522_v44, %v10167_v43  ;;  %v9980_v30 = vor.u32 %v13466_v20, %v9977_v21  ;;  %v13578_v39 = vld [vmem:[%s20387_s2 + $0xf24] sm:$0xf] }
 0x14f   : > { %4276 = vmatpush.bf16.msra.mxu2 %v9720_v31  ;;  %v13122_v51 = vld [vmem:[%s20387_s2 + $0xdc] sm:$0xf0]  ;;  %4251 = vmatpush.bf16.msra.mxu0 %v8632_v45  ;;  %v13194_v31 = vld [vmem:[%s20387_s2 + $0x324] sm:$0xf] }
 0x150   : > { %v9079_v52 = vld [vmem:[%s20387_s2 + $0x4a0] sm:$0xf]  ;;  %v8568_v61 = vor.u32 %v13122_v51, %v8567_v50  ;;  %v10425_v40 = vld [vmem:[%s20387_s2 + $0xf60] sm:$0xf0]  ;;  %v8892_v41 = vor.u32 %v13194_v31, %v8889_v32 }
 0x151   : > { %4289 = vmatpush.bf16.msra.mxu3 %v10232_v37  ;;  %v13250_v56 = vld [vmem:[%s20387_s2 + $0x4dc] sm:$0xf0]  ;;  %4264 = vmatpush.bf16.msra.mxu1 %v9144_v48  ;;  %v13450_v37 = vld [vmem:[%s20387_s2 + $0xb24] sm:$0xf]  ;;  %v10428_v48 = vor.u32 %v13578_v39, %v10425_v40 }
 0x152   : > { %v9591_v57 = vld [vmem:[%s20387_s2 + $0x8a0] sm:$0xf]  ;;  %v9080_v1 = vor.u32 %v13250_v56, %v9079_v52  ;;  %v9916_v43 = vor.u32 %v13450_v37, %v9913_v38  ;;  %v13178_v44 = vld [vmem:[%s20387_s2 + $0x2a4] sm:$0xf] }
 0x153   : > { %v13378_v58 = vld [vmem:[%s20387_s2 + $0x8dc] sm:$0xf0]  ;;  %4277 = vmatpush.bf16.msra.mxu2 %v9656_v49  ;;  %4252 = vmatpush.bf16.msra.mxu0 %v8568_v61  ;;  %v8825_v45 = vld [vmem:[%s20387_s2 + $0x2e0] sm:$0xf0] }
 0x154   : > { %v10103_v59 = vld [vmem:[%s20387_s2 + $0xca0] sm:$0xf]  ;;  %v9592_v2 = vor.u32 %v13378_v58, %v9591_v57  ;;  %v9337_v49 = vld [vmem:[%s20387_s2 + $0x6e0] sm:$0xf0] }
 0x155   : > { %v13506_v60 = vld [vmem:[%s20387_s2 + $0xcdc] sm:$0xf0]  ;;  %4290 = vmatpush.bf16.msra.mxu3 %v10168_v55  ;;  %4265 = vmatpush.bf16.msra.mxu1 %v9080_v1  ;;  %v13434_v50 = vld [vmem:[%s20387_s2 + $0xaa4] sm:$0xf]  ;;  %v8828_v55 = vor.u32 %v13178_v44, %v8825_v45  ;;  %v9340_v56 = vor.u32 %v13306_v47, %v9337_v49 }
 0x156   : > { %v8503_v62 = vld [vmem:[%s20387_s2 + $0x20] sm:$0xf]  ;;  %v10104_v7 = vor.u32 %v13506_v60, %v10103_v59  ;;  %v9849_v51 = vld [vmem:[%s20387_s2 + $0xae0] sm:$0xf0] }
 0x157   : > { %v13106_v63 = vld [vmem:[%s20387_s2 + $0x5c] sm:$0xf0]  ;;  %4278 = vmatpush.bf16.msra.mxu2 %v9592_v2  ;;  %v13562_v52 = vld [vmem:[%s20387_s2 + $0xea4] sm:$0xf]  ;;  %v9852_v57 = vor.u32 %v13434_v50, %v9849_v51 }
 0x158   : > { %v9015_v3 = vld [vmem:[%s20387_s2 + $0x420] sm:$0xf]  ;;  %v8504_v18 = vor.u32 %v13106_v63, %v8503_v62  ;;  %v13162_v58 = vld [vmem:[%s20387_s2 + $0x224] sm:$0xf]  ;;  %v10364_v61 = vor.u32 %v13562_v52, %v10361_v53 }
 0x159   : > { %v13234_v4 = vld [vmem:[%s20387_s2 + $0x45c] sm:$0xf0]  ;;  %4291 = vmatpush.bf16.msra.mxu3 %v10104_v7  ;;  %v8761_v59 = vld [vmem:[%s20387_s2 + $0x260] sm:$0xf0]  ;;  %v4060_v13 = vpop.f32.mrf.mxu1 }
 0x15a   : > { %v9527_v5 = vld [vmem:[%s20387_s2 + $0x820] sm:$0xf]  ;;  %v9016_v22 = vor.u32 %v13234_v4, %v9015_v3  ;;  %4253 = vmatpush.bf16.msra.mxu0 %v8504_v18  ;;  %v13290_v60 = vld [vmem:[%s20387_s2 + $0x624] sm:$0xf]  ;;  %v8764_v4 = vor.u32 %v13162_v58, %v8761_v59 }
 0x15b   : > { %v13362_v8 = vld [vmem:[%s20387_s2 + $0x85c] sm:$0xf0]  ;;  %v9273_v62 = vld [vmem:[%s20387_s2 + $0x660] sm:$0xf0] }
 0x15c   : > { %v10039_v11 = vld [vmem:[%s20387_s2 + $0xc20] sm:$0xf]  ;;  %v9528_v23 = vor.u32 %v13362_v8, %v9527_v5  ;;  %4266 = vmatpush.bf16.msra.mxu1 %v9016_v22  ;;  %v13418_v63 = vld [vmem:[%s20387_s2 + $0xa24] sm:$0xf]  ;;  %v4047_v5 = vpop.f32.mrf.mxu0  ;;  %v9276_v6 = vor.u32 %v13290_v60, %v9273_v62 }
 0x15d   : > { %v13490_v12 = vld [vmem:[%s20387_s2 + $0xc5c] sm:$0xf0]  ;;  %4254 = vmatmul.bf16.vlgmr.msra.gmra.mxu0 %v14050_v10  ;;  %v9785_v1 = vld [vmem:[%s20387_s2 + $0xa60] sm:$0xf0]  ;;  %v4061_v19 = vadd.f32 %v4060_v13, %v4047_v5  ;;  %v13347_v13 = vld [vmem:[%s20387_s2 + $0x7e4] sm:$0xf0] }
 0x15e   : > { %v10040_v27 = vor.u32 %v13490_v12, %v10039_v11  ;;  %4279 = vmatpush.bf16.msra.mxu2 %v9528_v23  ;;  %4298 = vmatpush.bf16.msrb.mxu0 %v8956_v28  ;;  %v13546_v2 = vld [vmem:[%s20387_s2 + $0xe24] sm:$0xf]  ;;  %v9788_v7 = vor.u32 %v13418_v63, %v9785_v1 }
 0x15f   : > { %4267 = vmatmul.bf16.vlgmr.msra.gmra.mxu1 %v14081_v26  ;;  %v10297_v3 = vld [vmem:[%s20387_s2 + $0xe60] sm:$0xf0] }
 0x160   : > { %4292 = vmatpush.bf16.msra.mxu3 %v10040_v27  ;;  %4311 = vmatpush.bf16.msrb.mxu1 %v9468_v29  ;;  %v13146_v8 = vld [vmem:[%s20387_s2 + $0x1a4] sm:$0xf]  ;;  %v10300_v14 = vor.u32 %v13546_v2, %v10297_v3 }
 0x161   : > { %4280 = vmatmul.bf16.vlgmr.msra.gmra.mxu2 %v14048_v9  ;;  %v8697_v11 = vld [vmem:[%s20387_s2 + $0x1e0] sm:$0xf0]  ;;  %v4073_v29 = vpop.f32.mrf.mxu2 }
 0x162   : > { %4324 = vmatpush.bf16.msrb.mxu2 %v9980_v30  ;;  %4299 = vmatpush.bf16.msrb.mxu0 %v8892_v41  ;;  %v13274_v12 = vld [vmem:[%s20387_s2 + $0x5a4] sm:$0xf]  ;;  %v8700_v22 = vor.u32 %v13146_v8, %v8697_v11  ;;  %v13219_v8 = vld [vmem:[%s20387_s2 + $0x3e4] sm:$0xf0] }
 0x163   : > { %4293 = vmatmul.bf16.vlgmr.msra.gmra.mxu3 %v14061_v16  ;;  %v9209_v15 = vld [vmem:[%s20387_s2 + $0x5e0] sm:$0xf0]  ;;  %v4086_v35 = vpop.f32.mrf.mxu3  ;;  %v9471_v11 = vld [vmem:[%s20387_s2 + $0x7a8] sm:$0xf] }
 0x164   : > { %4337 = vmatpush.bf16.msrb.mxu3 %v10492_v34  ;;  %4312 = vmatpush.bf16.msrb.mxu1 %v9404_v42  ;;  %v13402_v17 = vld [vmem:[%s20387_s2 + $0x9a4] sm:$0xf]  ;;  %v9212_v23 = vor.u32 %v13274_v12, %v9209_v15  ;;  %v4074_v34 = vadd.f32 %v4073_v29, %v4061_v19  ;;  %v4049_v41 = vpop.f32.mrf.mxu0  ;;  %v13475_v15 = vld [vmem:[%s20387_s2 + $0xbe4] sm:$0xf0] }
 0x165   : > { %v9721_v18 = vld [vmem:[%s20387_s2 + $0x9e0] sm:$0xf0]  ;;  %v10495_v19 = vld [vmem:[%s20387_s2 + $0xfa8] sm:$0xf] }
 0x166   : > { %4325 = vmatpush.bf16.msrb.mxu2 %v9916_v43  ;;  %4300 = vmatpush.bf16.msrb.mxu0 %v8828_v55  ;;  %v13530_v20 = vld [vmem:[%s20387_s2 + $0xda4] sm:$0xf]  ;;  %v9724_v24 = vor.u32 %v13402_v17, %v9721_v18  ;;  %v15699_v40 = vadd.f32 %v4086_v35, %v4074_v34  ;;  %v13587_v34 = vld [vmem:[%s20387_s2 + $0xf64] sm:$0xf0] }
 0x167   : > { %v10233_v21 = vld [vmem:[%s20387_s2 + $0xde0] sm:$0xf0]  ;;  %v13187_v41 = vld [vmem:[%s20387_s2 + $0x2e4] sm:$0xf0] }
 0x168   : > { %4338 = vmatpush.bf16.msrb.mxu3 %v10428_v48  ;;  %4313 = vmatpush.bf16.msrb.mxu1 %v9340_v56  ;;  %v13130_v25 = vld [vmem:[%s20387_s2 + $0x124] sm:$0xf]  ;;  %v10236_v30 = vor.u32 %v13530_v20, %v10233_v21  ;;  %v4062_v48 = vpop.f32.mrf.mxu1  ;;  %v13603_v20 = vld [vmem:[%s20387_s2 + $0xfe4] sm:$0xf0] }
 0x169   : > { %v8633_v27 = vld [vmem:[%s20387_s2 + $0x160] sm:$0xf0]  ;;  %v4075_v1 = vpop.f32.mrf.mxu2  ;;  %v10496_v29 = vor.u32 %v13603_v20, %v10495_v19  ;;  %v10367_v48 = vld [vmem:[%s20387_s2 + $0xea8] sm:$0xf] }
 0x16a   : > { %4326 = vmatpush.bf16.msrb.mxu2 %v9852_v57  ;;  %4301 = vmatpush.bf16.msrb.mxu0 %v8764_v4  ;;  %v13258_v28 = vld [vmem:[%s20387_s2 + $0x524] sm:$0xf]  ;;  %v8636_v39 = vor.u32 %v13130_v25, %v8633_v27  ;;  %v8895_v25 = vld [vmem:[%s20387_s2 + $0x328] sm:$0xf] }
 0x16b   : > { %v9145_v31 = vld [vmem:[%s20387_s2 + $0x560] sm:$0xf0]  ;;  %v13203_v27 = vld [vmem:[%s20387_s2 + $0x364] sm:$0xf0] }
 0x16c   : > { %4339 = vmatpush.bf16.msrb.mxu3 %v10364_v61  ;;  %4314 = vmatpush.bf16.msrb.mxu1 %v9276_v6  ;;  %v13386_v32 = vld [vmem:[%s20387_s2 + $0x924] sm:$0xf]  ;;  %v9148_v42 = vor.u32 %v13258_v28, %v9145_v31  ;;  %v4088_v6 = vpop.f32.mrf.mxu3  ;;  %v9407_v28 = vld [vmem:[%s20387_s2 + $0x728] sm:$0xf]  ;;  %v8896_v35 = vor.u32 %v13203_v27, %v8895_v25 }
 0x16d   : > { %v9657_v33 = vld [vmem:[%s20387_s2 + $0x960] sm:$0xf0]  ;;  %v9919_v31 = vld [vmem:[%s20387_s2 + $0xb28] sm:$0xf] }
 0x16e   : > { %4327 = vmatpush.bf16.msrb.mxu2 %v9788_v7  ;;  %v13514_v37 = vld [vmem:[%s20387_s2 + $0xd24] sm:$0xf]  ;;  %4302 = vmatpush.bf16.msrb.mxu0 %v8700_v22  ;;  %v9660_v43 = vor.u32 %v13386_v32, %v9657_v33  ;;  %v8959_v7 = vld [vmem:[%s20387_s2 + $0x3a8] sm:$0xf] }
 0x16f   : > { %v10169_v38 = vld [vmem:[%s20387_s2 + $0xd60] sm:$0xf0]  ;;  %v8960_v22 = vor.u32 %v13219_v8, %v8959_v7  ;;  %v13459_v32 = vld [vmem:[%s20387_s2 + $0xb64] sm:$0xf0] }
 0x170   : > { %4340 = vmatpush.bf16.msrb.mxu3 %v10300_v14  ;;  %4315 = vmatpush.bf16.msrb.mxu1 %v9212_v23  ;;  %v13114_v44 = vld [vmem:[%s20387_s2 + $0xa4] sm:$0xf]  ;;  %v10172_v49 = vor.u32 %v13514_v37, %v10169_v38  ;;  %v9983_v14 = vld [vmem:[%s20387_s2 + $0xba8] sm:$0xf]  ;;  %v9472_v23 = vor.u32 %v13347_v13, %v9471_v11  ;;  %v9920_v38 = vor.u32 %v13459_v32, %v9919_v31 }
 0x171   : > { %v8569_v45 = vld [vmem:[%s20387_s2 + $0xe0] sm:$0xf0]  ;;  %v10431_v33 = vld [vmem:[%s20387_s2 + $0xf28] sm:$0xf] }
 0x172   : > { %4328 = vmatpush.bf16.msrb.mxu2 %v9724_v24  ;;  %v13242_v47 = vld [vmem:[%s20387_s2 + $0x4a4] sm:$0xf]  ;;  %4303 = vmatpush.bf16.msrb.mxu0 %v8636_v39  ;;  %v8572_v56 = vor.u32 %v13114_v44, %v8569_v45  ;;  %v9984_v24 = vor.u32 %v13475_v15, %v9983_v14  ;;  %v8831_v39 = vld [vmem:[%s20387_s2 + $0x2a8] sm:$0xf] }
 0x173   : > { %v9081_v50 = vld [vmem:[%s20387_s2 + $0x4e0] sm:$0xf0]  ;;  %v13315_v44 = vld [vmem:[%s20387_s2 + $0x6e4] sm:$0xf0] }
 0x174   : > { %4341 = vmatpush.bf16.msrb.mxu3 %v10236_v30  ;;  %v13370_v51 = vld [vmem:[%s20387_s2 + $0x8a4] sm:$0xf]  ;;  %4316 = vmatpush.bf16.msrb.mxu1 %v9148_v42  ;;  %v9084_v59 = vor.u32 %v13242_v47, %v9081_v50  ;;  %v13331_v30 = vld [vmem:[%s20387_s2 + $0x764] sm:$0xf0]  ;;  %v8832_v50 = vor.u32 %v13187_v41, %v8831_v39 }
 0x175   : > { %v9593_v52 = vld [vmem:[%s20387_s2 + $0x8e0] sm:$0xf0]  ;;  %v9408_v37 = vor.u32 %v13331_v30, %v9407_v28  ;;  %v9343_v42 = vld [vmem:[%s20387_s2 + $0x6a8] sm:$0xf] }
 0x176   : > { %v13498_v53 = vld [vmem:[%s20387_s2 + $0xca4] sm:$0xf]  ;;  %4329 = vmatpush.bf16.msrb.mxu2 %v9660_v43  ;;  %v9596_v60 = vor.u32 %v13370_v51, %v9593_v52  ;;  %4304 = vmatpush.bf16.msrb.mxu0 %v8572_v56  ;;  %v10432_v43 = vor.u32 %v13587_v34, %v10431_v33  ;;  %v9855_v45 = vld [vmem:[%s20387_s2 + $0xaa8] sm:$0xf]  ;;  %v9344_v51 = vor.u32 %v13315_v44, %v9343_v42 }
 0x177   : > { %v10105_v55 = vld [vmem:[%s20387_s2 + $0xce0] sm:$0xf0]  ;;  %v13443_v47 = vld [vmem:[%s20387_s2 + $0xae4] sm:$0xf0]  ;;  %v4099_v1 = vpop.f32.mrf.mxu0 }
 0x178   : > { %v13098_v57 = vld [vmem:[%s20387_s2 + $0x24] sm:$0xf]  ;;  %4342 = vmatpush.bf16.msrb.mxu3 %v10172_v49  ;;  %v10108_v2 = vor.u32 %v13498_v53, %v10105_v55  ;;  %4317 = vmatpush.bf16.msrb.mxu1 %v9084_v59  ;;  %v13571_v49 = vld [vmem:[%s20387_s2 + $0xee4] sm:$0xf0]  ;;  %v9856_v52 = vor.u32 %v13443_v47, %v9855_v45 }
 0x179   : > { %v8505_v58 = vld [vmem:[%s20387_s2 + $0x60] sm:$0xf0]  ;;  %v8767_v53 = vld [vmem:[%s20387_s2 + $0x228] sm:$0xf]  ;;  %v4112_v7 = vpop.f32.mrf.mxu1 }
 0x17a   : > { %v13226_v61 = vld [vmem:[%s20387_s2 + $0x424] sm:$0xf]  ;;  %v8508_v12 = vor.u32 %v13098_v57, %v8505_v58  ;;  %4330 = vmatpush.bf16.msrb.mxu2 %v9596_v60  ;;  %v13171_v55 = vld [vmem:[%s20387_s2 + $0x264] sm:$0xf0]  ;;  %v10368_v57 = vor.u32 %v13571_v49, %v10367_v48  ;;  %v4113_v14 = vadd.f32 %v4112_v7, %v4099_v1 }
 0x17b   : > { %v9017_v62 = vld [vmem:[%s20387_s2 + $0x460] sm:$0xf0]  ;;  %v9279_v56 = vld [vmem:[%s20387_s2 + $0x628] sm:$0xf] }
 0x17c   : > { %v13354_v63 = vld [vmem:[%s20387_s2 + $0x824] sm:$0xf]  ;;  %v9020_v17 = vor.u32 %v13226_v61, %v9017_v62  ;;  %4343 = vmatpush.bf16.msrb.mxu3 %v10108_v2  ;;  %4305 = vmatpush.bf16.msrb.mxu0 %v8508_v12  ;;  %v13299_v58 = vld [vmem:[%s20387_s2 + $0x664] sm:$0xf0] }
 0x17d   : > { %v9529_v3 = vld [vmem:[%s20387_s2 + $0x860] sm:$0xf0]  ;;  %v9791_v59 = vld [vmem:[%s20387_s2 + $0xa28] sm:$0xf]  ;;  %v9280_v2 = vor.u32 %v13299_v58, %v9279_v56 }
 0x17e   : > { %v13482_v4 = vld [vmem:[%s20387_s2 + $0xc24] sm:$0xf]  ;;  %v9532_v18 = vor.u32 %v13354_v63, %v9529_v3  ;;  %4318 = vmatpush.bf16.msrb.mxu1 %v9020_v17  ;;  %v13427_v60 = vld [vmem:[%s20387_s2 + $0xa64] sm:$0xf0]  ;;  %v8768_v63 = vor.u32 %v13171_v55, %v8767_v53 }
 0x17f   : > { %v10041_v5 = vld [vmem:[%s20387_s2 + $0xc60] sm:$0xf0]  ;;  %4306 = vmatmul.bf16.vlgmr.msrb.gmra.mxu0 %v14050_v10  ;;  %v10303_v61 = vld [vmem:[%s20387_s2 + $0xe28] sm:$0xf]  ;;  %v9792_v3 = vor.u32 %v13427_v60, %v9791_v59 }
 0x180   : > { %v10044_v21 = vor.u32 %v13482_v4, %v10041_v5  ;;  %4331 = vmatpush.bf16.msrb.mxu2 %v9532_v18  ;;  %4350 = vmatpush.bf16.msra.mxu0 %v8960_v22  ;;  %v13555_v62 = vld [vmem:[%s20387_s2 + $0xe64] sm:$0xf0] }
 0x181   : > { %4319 = vmatmul.bf16.vlgmr.msrb.gmra.mxu1 %v14081_v26  ;;  %v8703_v4 = vld [vmem:[%s20387_s2 + $0x1a8] sm:$0xf]  ;;  %v10304_v8 = vor.u32 %v13555_v62, %v10303_v61  ;;  %v4114_v44 = vpop.f32.mrf.mxu1 }
 0x182   : > { %4344 = vmatpush.bf16.msrb.mxu3 %v10044_v21  ;;  %4363 = vmatpush.bf16.msra.mxu1 %v9472_v23  ;;  %v13155_v5 = vld [vmem:[%s20387_s2 + $0x1e4] sm:$0xf0]  ;;  %v9857_v44 = vld [vmem:[%s20387_s2 + $0xae8] sm:$0xf0] }
 0x183   : > { %4332 = vmatmul.bf16.vlgmr.msrb.gmra.mxu2 %v14048_v9  ;;  %v9215_v6 = vld [vmem:[%s20387_s2 + $0x5a8] sm:$0xf]  ;;  %v8704_v18 = vor.u32 %v13155_v5, %v8703_v4  ;;  %v4138_v31 = vpop.f32.mrf.mxu3  ;;  %v13211_v4 = vld [vmem:[%s20387_s2 + $0x3ac] sm:$0xf] }
 0x184   : > { %4376 = vmatpush.bf16.msra.mxu2 %v9984_v24  ;;  %4351 = vmatpush.bf16.msra.mxu0 %v8896_v35  ;;  %v13283_v11 = vld [vmem:[%s20387_s2 + $0x5e4] sm:$0xf0]  ;;  %v4125_v24 = vpop.f32.mrf.mxu2  ;;  %v8961_v5 = vld [vmem:[%s20387_s2 + $0x3e8] sm:$0xf0] }
 0x185   : > { %4345 = vmatmul.bf16.vlgmr.msrb.gmra.mxu3 %v14061_v16  ;;  %v9727_v12 = vld [vmem:[%s20387_s2 + $0x9a8] sm:$0xf]  ;;  %v9216_v19 = vor.u32 %v13283_v11, %v9215_v6  ;;  %v4126_v30 = vadd.f32 %v4125_v24, %v4113_v14  ;;  %v13339_v6 = vld [vmem:[%s20387_s2 + $0x7ac] sm:$0xf] }
 0x186   : > { %4389 = vmatpush.bf16.msra.mxu3 %v10496_v29  ;;  %4364 = vmatpush.bf16.msra.mxu1 %v9408_v37  ;;  %v13411_v13 = vld [vmem:[%s20387_s2 + $0x9e4] sm:$0xf0]  ;;  %v4101_v37 = vpop.f32.mrf.mxu0  ;;  %v13467_v11 = vld [vmem:[%s20387_s2 + $0xbac] sm:$0xf] }
 0x187   : > { %v10239_v15 = vld [vmem:[%s20387_s2 + $0xda8] sm:$0xf]  ;;  %v9728_v20 = vor.u32 %v13411_v13, %v9727_v12  ;;  %v15897_v35 = vadd.f32 %v4138_v31, %v4126_v30  ;;  %v9985_v12 = vld [vmem:[%s20387_s2 + $0xbe8] sm:$0xf0] }
 0x188   : > { %4377 = vmatpush.bf16.msra.mxu2 %v9920_v38  ;;  %4352 = vmatpush.bf16.msra.mxu0 %v8832_v50  ;;  %v13539_v17 = vld [vmem:[%s20387_s2 + $0xde4] sm:$0xf0]  ;;  %v13323_v24 = vld [vmem:[%s20387_s2 + $0x72c] sm:$0xf] }
 0x189   : > { %v8639_v21 = vld [vmem:[%s20387_s2 + $0x128] sm:$0xf]  ;;  %v10240_v25 = vor.u32 %v13539_v17, %v10239_v15  ;;  %v13595_v15 = vld [vmem:[%s20387_s2 + $0xfac] sm:$0xf] }
 0x18a   : > { %4390 = vmatpush.bf16.msra.mxu3 %v10432_v43  ;;  %4365 = vmatpush.bf16.msra.mxu1 %v9344_v51  ;;  %v13139_v22 = vld [vmem:[%s20387_s2 + $0x164] sm:$0xf0]  ;;  %v10497_v17 = vld [vmem:[%s20387_s2 + $0xfe8] sm:$0xf0] }
 0x18b   : > { %v9151_v23 = vld [vmem:[%s20387_s2 + $0x528] sm:$0xf]  ;;  %v8640_v34 = vor.u32 %v13139_v22, %v8639_v21  ;;  %v9988_v21 = vor.u32 %v13467_v11, %v9985_v12  ;;  %v13195_v22 = vld [vmem:[%s20387_s2 + $0x32c] sm:$0xf] }
 0x18c   : > { %4378 = vmatpush.bf16.msra.mxu2 %v9856_v52  ;;  %4353 = vmatpush.bf16.msra.mxu0 %v8768_v63  ;;  %v13267_v27 = vld [vmem:[%s20387_s2 + $0x564] sm:$0xf0]  ;;  %v4127_v61 = vpop.f32.mrf.mxu2  ;;  %v13579_v30 = vld [vmem:[%s20387_s2 + $0xf2c] sm:$0xf] }
 0x18d   : > { %v9663_v28 = vld [vmem:[%s20387_s2 + $0x928] sm:$0xf]  ;;  %v9152_v38 = vor.u32 %v13267_v27, %v9151_v23  ;;  %v8897_v23 = vld [vmem:[%s20387_s2 + $0x368] sm:$0xf0] }
 0x18e   : > { %4391 = vmatpush.bf16.msra.mxu3 %v10368_v57  ;;  %4366 = vmatpush.bf16.msra.mxu1 %v9280_v2  ;;  %v13395_v29 = vld [vmem:[%s20387_s2 + $0x964] sm:$0xf0]  ;;  %v9409_v27 = vld [vmem:[%s20387_s2 + $0x768] sm:$0xf0] }
 0x18f   : > { %v10175_v32 = vld [vmem:[%s20387_s2 + $0xd28] sm:$0xf]  ;;  %v9664_v39 = vor.u32 %v13395_v29, %v9663_v28  ;;  %v13451_v28 = vld [vmem:[%s20387_s2 + $0xb2c] sm:$0xf] }
 0x190   : > { %4379 = vmatpush.bf16.msra.mxu2 %v9792_v3  ;;  %v13523_v33 = vld [vmem:[%s20387_s2 + $0xd64] sm:$0xf0]  ;;  %4354 = vmatpush.bf16.msra.mxu0 %v8704_v18  ;;  %v4140_v3 = vpop.f32.mrf.mxu3  ;;  %v9921_v29 = vld [vmem:[%s20387_s2 + $0xb68] sm:$0xf0] }
 0x191   : > { %v8575_v41 = vld [vmem:[%s20387_s2 + $0xa8] sm:$0xf]  ;;  %v10176_v45 = vor.u32 %v13523_v33, %v10175_v32  ;;  %v10433_v31 = vld [vmem:[%s20387_s2 + $0xf68] sm:$0xf0]  ;;  %v8900_v32 = vor.u32 %v13195_v22, %v8897_v23  ;;  %v9412_v33 = vor.u32 %v13323_v24, %v9409_v27 }
 0x192   : > { %4392 = vmatpush.bf16.msra.mxu3 %v10304_v8  ;;  %4367 = vmatpush.bf16.msra.mxu1 %v9216_v19  ;;  %v13123_v42 = vld [vmem:[%s20387_s2 + $0xe4] sm:$0xf0]  ;;  %v9473_v8 = vld [vmem:[%s20387_s2 + $0x7e8] sm:$0xf0]  ;;  %v8964_v19 = vor.u32 %v13211_v4, %v8961_v5 }
 0x193   : > { %v9087_v43 = vld [vmem:[%s20387_s2 + $0x4a8] sm:$0xf]  ;;  %v8576_v52 = vor.u32 %v13123_v42, %v8575_v41  ;;  %v13179_v37 = vld [vmem:[%s20387_s2 + $0x2ac] sm:$0xf]  ;;  %v10436_v41 = vor.u32 %v13579_v30, %v10433_v31 }
 0x194   : > { %4380 = vmatpush.bf16.msra.mxu2 %v9728_v20  ;;  %v13251_v47 = vld [vmem:[%s20387_s2 + $0x4e4] sm:$0xf0]  ;;  %4355 = vmatpush.bf16.msra.mxu0 %v8640_v34  ;;  %v9476_v20 = vor.u32 %v13339_v6, %v9473_v8  ;;  %v9924_v34 = vor.u32 %v13451_v28, %v9921_v29  ;;  %v9345_v42 = vld [vmem:[%s20387_s2 + $0x6e8] sm:$0xf0] }
 0x195   : > { %v9599_v48 = vld [vmem:[%s20387_s2 + $0x8a8] sm:$0xf]  ;;  %v9088_v56 = vor.u32 %v13251_v47, %v9087_v43  ;;  %v13435_v43 = vld [vmem:[%s20387_s2 + $0xaac] sm:$0xf] }
 0x196   : > { %4393 = vmatpush.bf16.msra.mxu3 %v10240_v25  ;;  %v13379_v49 = vld [vmem:[%s20387_s2 + $0x8e4] sm:$0xf0]  ;;  %4368 = vmatpush.bf16.msra.mxu1 %v9152_v38  ;;  %v10500_v25 = vor.u32 %v13595_v15, %v10497_v17  ;;  %v8833_v38 = vld [vmem:[%s20387_s2 + $0x2e8] sm:$0xf0] }
 0x197   : > { %v10111_v50 = vld [vmem:[%s20387_s2 + $0xca8] sm:$0xf]  ;;  %v9600_v57 = vor.u32 %v13379_v49, %v9599_v48  ;;  %v10369_v47 = vld [vmem:[%s20387_s2 + $0xee8] sm:$0xf0]  ;;  %v8836_v48 = vor.u32 %v13179_v37, %v8833_v38 }
 0x198   : > { %v13507_v51 = vld [vmem:[%s20387_s2 + $0xce4] sm:$0xf0]  ;;  %4381 = vmatpush.bf16.msra.mxu2 %v9664_v39  ;;  %4356 = vmatpush.bf16.msra.mxu0 %v8576_v52  ;;  %v13307_v39 = vld [vmem:[%s20387_s2 + $0x6ac] sm:$0xf] }
 0x199   : > { %v8511_v53 = vld [vmem:[%s20387_s2 + $0x28] sm:$0xf]  ;;  %v10112_v62 = vor.u32 %v13507_v51, %v10111_v50  ;;  %v9348_v49 = vor.u32 %v13307_v39, %v9345_v42  ;;  %v9860_v50 = vor.u32 %v13435_v43, %v9857_v44  ;;  %v13163_v51 = vld [vmem:[%s20387_s2 + $0x22c] sm:$0xf]  ;;  %v4164_v5 = vpop.f32.mrf.mxu1 }
 0x19a   : > { %v13107_v55 = vld [vmem:[%s20387_s2 + $0x64] sm:$0xf0]  ;;  %4394 = vmatpush.bf16.msra.mxu3 %v10176_v45  ;;  %4369 = vmatpush.bf16.msra.mxu1 %v9088_v56  ;;  %v13563_v45 = vld [vmem:[%s20387_s2 + $0xeac] sm:$0xf] }
 0x19b   : > { %v9023_v58 = vld [vmem:[%s20387_s2 + $0x428] sm:$0xf]  ;;  %v8512_v7 = vor.u32 %v13107_v55, %v8511_v53  ;;  %v8769_v52 = vld [vmem:[%s20387_s2 + $0x268] sm:$0xf0]  ;;  %v10372_v55 = vor.u32 %v13563_v45, %v10369_v47 }
 0x19c   : > { %v13235_v59 = vld [vmem:[%s20387_s2 + $0x464] sm:$0xf0]  ;;  %4382 = vmatpush.bf16.msra.mxu2 %v9600_v57  ;;  %v13291_v53 = vld [vmem:[%s20387_s2 + $0x62c] sm:$0xf]  ;;  %v8772_v61 = vor.u32 %v13163_v51, %v8769_v52 }
 0x19d   : > { %v9535_v60 = vld [vmem:[%s20387_s2 + $0x828] sm:$0xf]  ;;  %v9024_v13 = vor.u32 %v13235_v59, %v9023_v58  ;;  %4357 = vmatpush.bf16.msra.mxu0 %v8512_v7  ;;  %v9281_v56 = vld [vmem:[%s20387_s2 + $0x668] sm:$0xf0] }
 0x19e   : > { %v13363_v63 = vld [vmem:[%s20387_s2 + $0x864] sm:$0xf0]  ;;  %4395 = vmatpush.bf16.msra.mxu3 %v10112_v62  ;;  %v13419_v57 = vld [vmem:[%s20387_s2 + $0xa2c] sm:$0xf]  ;;  %v4151_v62 = vpop.f32.mrf.mxu0 }
 0x19f   : > { %v10047_v1 = vld [vmem:[%s20387_s2 + $0xc28] sm:$0xf]  ;;  %v9536_v14 = vor.u32 %v13363_v63, %v9535_v60  ;;  %4370 = vmatpush.bf16.msra.mxu1 %v9024_v13  ;;  %v9793_v58 = vld [vmem:[%s20387_s2 + $0xa68] sm:$0xf0]  ;;  %v9284_v63 = vor.u32 %v13291_v53, %v9281_v56  ;;  %v4165_v12 = vadd.f32 %v4164_v5, %v4151_v62  ;;  %v9479_v5 = vld [vmem:[%s20387_s2 + $0x7b0] sm:$0xf] }
 0x1a0   : > { %v13491_v2 = vld [vmem:[%s20387_s2 + $0xc64] sm:$0xf0]  ;;  %4358 = vmatmul.bf16.vlgmr.msra.gmra.mxu0 %v14050_v10  ;;  %v13547_v59 = vld [vmem:[%s20387_s2 + $0xe2c] sm:$0xf] }
 0x1a1   : > { %v10048_v18 = vor.u32 %v13491_v2, %v10047_v1  ;;  %4383 = vmatpush.bf16.msra.mxu2 %v9536_v14  ;;  %4402 = vmatpush.bf16.msrb.mxu0 %v8964_v19  ;;  %v10305_v60 = vld [vmem:[%s20387_s2 + $0xe68] sm:$0xf0]  ;;  %v9796_v1 = vor.u32 %v13419_v57, %v9793_v58  ;;  %v4177_v22 = vpop.f32.mrf.mxu2  ;;  %v4166_v43 = vpop.f32.mrf.mxu1 }
 0x1a2   : > { %4371 = vmatmul.bf16.vlgmr.msra.gmra.mxu1 %v14081_v26  ;;  %v13147_v2 = vld [vmem:[%s20387_s2 + $0x1ac] sm:$0xf]  ;;  %v10308_v6 = vor.u32 %v13547_v59, %v10305_v60  ;;  %v4178_v28 = vadd.f32 %v4177_v22, %v4165_v12  ;;  %v13204_v22 = vld [vmem:[%s20387_s2 + $0x36c] sm:$0xf0] }
 0x1a3   : > { %4396 = vmatpush.bf16.msra.mxu3 %v10048_v18  ;;  %4415 = vmatpush.bf16.msrb.mxu1 %v9476_v20  ;;  %v8705_v3 = vld [vmem:[%s20387_s2 + $0x1e8] sm:$0xf0]  ;;  %v4190_v29 = vpop.f32.mrf.mxu3  ;;  %v9863_v43 = vld [vmem:[%s20387_s2 + $0xab0] sm:$0xf] }
 0x1a4   : > { %4384 = vmatmul.bf16.vlgmr.msra.gmra.mxu2 %v14048_v9  ;;  %v13275_v4 = vld [vmem:[%s20387_s2 + $0x5ac] sm:$0xf]  ;;  %v8708_v15 = vor.u32 %v13147_v2, %v8705_v3  ;;  %v8967_v3 = vld [vmem:[%s20387_s2 + $0x3b0] sm:$0xf] }
 0x1a5   : > { %4428 = vmatpush.bf16.msrb.mxu2 %v9988_v21  ;;  %4403 = vmatpush.bf16.msrb.mxu0 %v8900_v32  ;;  %v9217_v7 = vld [vmem:[%s20387_s2 + $0x5e8] sm:$0xf0] }
 0x1a6   : > { %4397 = vmatmul.bf16.vlgmr.msra.gmra.mxu3 %v14061_v16  ;;  %v13403_v8 = vld [vmem:[%s20387_s2 + $0x9ac] sm:$0xf]  ;;  %v9220_v17 = vor.u32 %v13275_v4, %v9217_v7  ;;  %v13220_v4 = vld [vmem:[%s20387_s2 + $0x3ec] sm:$0xf0] }
 0x1a7   : > { %4441 = vmatpush.bf16.msrb.mxu3 %v10500_v25  ;;  %4416 = vmatpush.bf16.msrb.mxu1 %v9412_v33  ;;  %v9729_v11 = vld [vmem:[%s20387_s2 + $0x9e8] sm:$0xf0]  ;;  %v16095_v33 = vadd.f32 %v4190_v29, %v4178_v28  ;;  %v13348_v7 = vld [vmem:[%s20387_s2 + $0x7ec] sm:$0xf0] }
 0x1a8   : > { %v13531_v13 = vld [vmem:[%s20387_s2 + $0xdac] sm:$0xf]  ;;  %v9732_v18 = vor.u32 %v13403_v8, %v9729_v11  ;;  %v9991_v8 = vld [vmem:[%s20387_s2 + $0xbb0] sm:$0xf] }
 0x1a9   : > { %4429 = vmatpush.bf16.msrb.mxu2 %v9924_v34  ;;  %4404 = vmatpush.bf16.msrb.mxu0 %v8836_v48  ;;  %v10241_v14 = vld [vmem:[%s20387_s2 + $0xde8] sm:$0xf0]  ;;  %v4153_v34 = vpop.f32.mrf.mxu0  ;;  %v4179_v60 = vpop.f32.mrf.mxu2  ;;  %v13476_v11 = vld [vmem:[%s20387_s2 + $0xbec] sm:$0xf0] }
 0x1aa   : > { %v13131_v19 = vld [vmem:[%s20387_s2 + $0x12c] sm:$0xf]  ;;  %v10244_v23 = vor.u32 %v13531_v13, %v10241_v14  ;;  %v10503_v14 = vld [vmem:[%s20387_s2 + $0xfb0] sm:$0xf] }
 0x1ab   : > { %4442 = vmatpush.bf16.msrb.mxu3 %v10436_v41  ;;  %4417 = vmatpush.bf16.msrb.mxu1 %v9348_v49  ;;  %v8641_v20 = vld [vmem:[%s20387_s2 + $0x168] sm:$0xf0]  ;;  %v4192_v2 = vpop.f32.mrf.mxu3  ;;  %v13460_v28 = vld [vmem:[%s20387_s2 + $0xb6c] sm:$0xf0] }
 0x1ac   : > { %v13259_v21 = vld [vmem:[%s20387_s2 + $0x52c] sm:$0xf]  ;;  %v8644_v32 = vor.u32 %v13131_v19, %v8641_v20  ;;  %v9480_v19 = vor.u32 %v13348_v7, %v9479_v5  ;;  %v9992_v20 = vor.u32 %v13476_v11, %v9991_v8  ;;  %v10439_v29 = vld [vmem:[%s20387_s2 + $0xf30] sm:$0xf] }
 0x1ad   : > { %4430 = vmatpush.bf16.msrb.mxu2 %v9860_v50  ;;  %4405 = vmatpush.bf16.msrb.mxu0 %v8772_v61  ;;  %v9153_v24 = vld [vmem:[%s20387_s2 + $0x568] sm:$0xf0]  ;;  %v13556_v60 = vld [vmem:[%s20387_s2 + $0xe6c] sm:$0xf0] }
 0x1ae   : > { %v13387_v25 = vld [vmem:[%s20387_s2 + $0x92c] sm:$0xf]  ;;  %v9156_v37 = vor.u32 %v13259_v21, %v9153_v24  ;;  %v8903_v21 = vld [vmem:[%s20387_s2 + $0x330] sm:$0xf] }
 0x1af   : > { %4443 = vmatpush.bf16.msrb.mxu3 %v10372_v55  ;;  %4418 = vmatpush.bf16.msrb.mxu1 %v9284_v63  ;;  %v9665_v27 = vld [vmem:[%s20387_s2 + $0x968] sm:$0xf0]  ;;  %v8711_v2 = vld [vmem:[%s20387_s2 + $0x1b0] sm:$0xf] }
 0x1b0   : > { %v13515_v30 = vld [vmem:[%s20387_s2 + $0xd2c] sm:$0xf]  ;;  %v9668_v38 = vor.u32 %v13387_v25, %v9665_v27  ;;  %v13332_v25 = vld [vmem:[%s20387_s2 + $0x76c] sm:$0xf0] }
 0x1b1   : > { %4431 = vmatpush.bf16.msrb.mxu2 %v9796_v1  ;;  %v10177_v31 = vld [vmem:[%s20387_s2 + $0xd68] sm:$0xf0]  ;;  %4406 = vmatpush.bf16.msrb.mxu0 %v8708_v15  ;;  %v13604_v15 = vld [vmem:[%s20387_s2 + $0xfec] sm:$0xf0] }
 0x1b2   : > { %v13115_v39 = vld [vmem:[%s20387_s2 + $0xac] sm:$0xf]  ;;  %v10180_v44 = vor.u32 %v13515_v30, %v10177_v31  ;;  %v10504_v24 = vor.u32 %v13604_v15, %v10503_v14  ;;  %v9927_v27 = vld [vmem:[%s20387_s2 + $0xb30] sm:$0xf]  ;;  %v8904_v31 = vor.u32 %v13204_v22, %v8903_v21 }
 0x1b3   : > { %4444 = vmatpush.bf16.msrb.mxu3 %v10308_v6  ;;  %4419 = vmatpush.bf16.msrb.mxu1 %v9220_v17  ;;  %v8577_v41 = vld [vmem:[%s20387_s2 + $0xe8] sm:$0xf0]  ;;  %v13588_v30 = vld [vmem:[%s20387_s2 + $0xf6c] sm:$0xf0]  ;;  %v9928_v34 = vor.u32 %v13460_v28, %v9927_v27 }
 0x1b4   : > { %v13243_v42 = vld [vmem:[%s20387_s2 + $0x4ac] sm:$0xf]  ;;  %v8580_v51 = vor.u32 %v13115_v39, %v8577_v41  ;;  %v9351_v39 = vld [vmem:[%s20387_s2 + $0x6b0] sm:$0xf]  ;;  %v10440_v41 = vor.u32 %v13588_v30, %v10439_v29 }
 0x1b5   : > { %4432 = vmatpush.bf16.msrb.mxu2 %v9732_v18  ;;  %v9089_v45 = vld [vmem:[%s20387_s2 + $0x4e8] sm:$0xf0]  ;;  %4407 = vmatpush.bf16.msrb.mxu0 %v8644_v32  ;;  %v8968_v18 = vor.u32 %v13220_v4, %v8967_v3  ;;  %v13156_v3 = vld [vmem:[%s20387_s2 + $0x1ec] sm:$0xf0] }
 0x1b6   : > { %v13371_v47 = vld [vmem:[%s20387_s2 + $0x8ac] sm:$0xf]  ;;  %v9092_v55 = vor.u32 %v13243_v42, %v9089_v45  ;;  %v13316_v42 = vld [vmem:[%s20387_s2 + $0x6ec] sm:$0xf0]  ;;  %v8712_v15 = vor.u32 %v13156_v3, %v8711_v2 }
 0x1b7   : > { %4445 = vmatpush.bf16.msrb.mxu3 %v10244_v23  ;;  %v9601_v48 = vld [vmem:[%s20387_s2 + $0x8e8] sm:$0xf0]  ;;  %4420 = vmatpush.bf16.msrb.mxu1 %v9156_v37  ;;  %v9415_v23 = vld [vmem:[%s20387_s2 + $0x730] sm:$0xf] }
 0x1b8   : > { %v13499_v49 = vld [vmem:[%s20387_s2 + $0xcac] sm:$0xf]  ;;  %v9604_v56 = vor.u32 %v13371_v47, %v9601_v48  ;;  %v9416_v32 = vor.u32 %v13332_v25, %v9415_v23  ;;  %v8839_v37 = vld [vmem:[%s20387_s2 + $0x2b0] sm:$0xf] }
 0x1b9   : > { %v10113_v50 = vld [vmem:[%s20387_s2 + $0xce8] sm:$0xf0]  ;;  %4433 = vmatpush.bf16.msrb.mxu2 %v9668_v38  ;;  %4408 = vmatpush.bf16.msrb.mxu0 %v8580_v51  ;;  %v13188_v38 = vld [vmem:[%s20387_s2 + $0x2ec] sm:$0xf0]  ;;  %v4216_v5 = vpop.f32.mrf.mxu1 }
 0x1ba   : > { %v13099_v52 = vld [vmem:[%s20387_s2 + $0x2c] sm:$0xf]  ;;  %v10116_v61 = vor.u32 %v13499_v49, %v10113_v50  ;;  %v10375_v45 = vld [vmem:[%s20387_s2 + $0xeb0] sm:$0xf]  ;;  %v8840_v48 = vor.u32 %v13188_v38, %v8839_v37  ;;  %v9352_v49 = vor.u32 %v13316_v42, %v9351_v39 }
 0x1bb   : > { %v8513_v53 = vld [vmem:[%s20387_s2 + $0x68] sm:$0xf0]  ;;  %4446 = vmatpush.bf16.msrb.mxu3 %v10180_v44  ;;  %4421 = vmatpush.bf16.msrb.mxu1 %v9092_v55  ;;  %v13444_v44 = vld [vmem:[%s20387_s2 + $0xaec] sm:$0xf0] }
 0x1bc   : > { %v13227_v57 = vld [vmem:[%s20387_s2 + $0x42c] sm:$0xf]  ;;  %v8516_v6 = vor.u32 %v13099_v52, %v8513_v53  ;;  %v13572_v47 = vld [vmem:[%s20387_s2 + $0xeec] sm:$0xf0]  ;;  %v9864_v50 = vor.u32 %v13444_v44, %v9863_v43 }
 0x1bd   : > { %v9025_v58 = vld [vmem:[%s20387_s2 + $0x468] sm:$0xf0]  ;;  %4434 = vmatpush.bf16.msrb.mxu2 %v9604_v56  ;;  %v8775_v51 = vld [vmem:[%s20387_s2 + $0x230] sm:$0xf]  ;;  %v10376_v55 = vor.u32 %v13572_v47, %v10375_v45 }
 0x1be   : > { %v13355_v59 = vld [vmem:[%s20387_s2 + $0x82c] sm:$0xf]  ;;  %v9028_v12 = vor.u32 %v13227_v57, %v9025_v58  ;;  %4409 = vmatpush.bf16.msrb.mxu0 %v8516_v6  ;;  %v13172_v52 = vld [vmem:[%s20387_s2 + $0x26c] sm:$0xf0] }
 0x1bf   : > { %v9537_v62 = vld [vmem:[%s20387_s2 + $0x868] sm:$0xf0]  ;;  %4447 = vmatpush.bf16.msrb.mxu3 %v10116_v61  ;;  %v9287_v53 = vld [vmem:[%s20387_s2 + $0x630] sm:$0xf]  ;;  %v8776_v61 = vor.u32 %v13172_v52, %v8775_v51 }
 0x1c0   : > { %v13483_v63 = vld [vmem:[%s20387_s2 + $0xc2c] sm:$0xf]  ;;  %v9540_v13 = vor.u32 %v13355_v59, %v9537_v62  ;;  %4422 = vmatpush.bf16.msrb.mxu1 %v9028_v12  ;;  %v13300_v56 = vld [vmem:[%s20387_s2 + $0x66c] sm:$0xf0]  ;;  %v4203_v62 = vpop.f32.mrf.mxu0 }
 0x1c1   : > { %v10049_v1 = vld [vmem:[%s20387_s2 + $0xc68] sm:$0xf0]  ;;  %4410 = vmatmul.bf16.vlgmr.msrb.gmra.mxu0 %v14050_v10  ;;  %v9799_v57 = vld [vmem:[%s20387_s2 + $0xa30] sm:$0xf]  ;;  %v4217_v12 = vadd.f32 %v4216_v5, %v4203_v62  ;;  %v4229_v22 = vpop.f32.mrf.mxu2  ;;  %v4218_v44 = vpop.f32.mrf.mxu1  ;;  %v8969_v5 = vld [vmem:[%s20387_s2 + $0x3f0] sm:$0xf0] }
 0x1c2   : > { %v10052_v17 = vor.u32 %v13483_v63, %v10049_v1  ;;  %4435 = vmatpush.bf16.msrb.mxu2 %v9540_v13  ;;  %4454 = vmatpush.bf16.msra.mxu0 %v8968_v18  ;;  %v13428_v58 = vld [vmem:[%s20387_s2 + $0xa6c] sm:$0xf0]  ;;  %v9288_v63 = vor.u32 %v13300_v56, %v9287_v53  ;;  %v9353_v44 = vld [vmem:[%s20387_s2 + $0x6f0] sm:$0xf0] }
 0x1c3   : > { %4423 = vmatmul.bf16.vlgmr.msrb.gmra.mxu1 %v14081_v26  ;;  %v10311_v59 = vld [vmem:[%s20387_s2 + $0xe30] sm:$0xf]  ;;  %v9800_v1 = vor.u32 %v13428_v58, %v9799_v57  ;;  %v4230_v28 = vadd.f32 %v4229_v22, %v4217_v12  ;;  %v4242_v29 = vpop.f32.mrf.mxu3  ;;  %v9993_v12 = vld [vmem:[%s20387_s2 + $0xbf0] sm:$0xf0] }
 0x1c4   : > { %4448 = vmatpush.bf16.msrb.mxu3 %v10052_v17  ;;  %4467 = vmatpush.bf16.msra.mxu1 %v9480_v19  ;;  %v9223_v4 = vld [vmem:[%s20387_s2 + $0x5b0] sm:$0xf]  ;;  %v10312_v6 = vor.u32 %v13556_v60, %v10311_v59  ;;  %v13196_v22 = vld [vmem:[%s20387_s2 + $0x334] sm:$0xf] }
 0x1c5   : > { %4436 = vmatmul.bf16.vlgmr.msrb.gmra.mxu2 %v14048_v9  ;;  %v13284_v7 = vld [vmem:[%s20387_s2 + $0x5ec] sm:$0xf0] }
 0x1c6   : > { %4480 = vmatpush.bf16.msra.mxu2 %v9992_v20  ;;  %4455 = vmatpush.bf16.msra.mxu0 %v8904_v31  ;;  %v9735_v8 = vld [vmem:[%s20387_s2 + $0x9b0] sm:$0xf]  ;;  %v9224_v17 = vor.u32 %v13284_v7, %v9223_v4  ;;  %v13212_v4 = vld [vmem:[%s20387_s2 + $0x3b4] sm:$0xf] }
 0x1c7   : > { %4449 = vmatmul.bf16.vlgmr.msrb.gmra.mxu3 %v14061_v16  ;;  %v13412_v11 = vld [vmem:[%s20387_s2 + $0x9ec] sm:$0xf0] }
 0x1c8   : > { %4493 = vmatpush.bf16.msra.mxu3 %v10504_v24  ;;  %4468 = vmatpush.bf16.msra.mxu1 %v9416_v32  ;;  %v10247_v13 = vld [vmem:[%s20387_s2 + $0xdb0] sm:$0xf]  ;;  %v9736_v18 = vor.u32 %v13412_v11, %v9735_v8  ;;  %v4205_v37 = vpop.f32.mrf.mxu0  ;;  %v9481_v8 = vld [vmem:[%s20387_s2 + $0x7f0] sm:$0xf0] }
 0x1c9   : > { %v13540_v14 = vld [vmem:[%s20387_s2 + $0xdec] sm:$0xf0]  ;;  %v13468_v11 = vld [vmem:[%s20387_s2 + $0xbb4] sm:$0xf] }
 0x1ca   : > { %4481 = vmatpush.bf16.msra.mxu2 %v9928_v34  ;;  %4456 = vmatpush.bf16.msra.mxu0 %v8840_v48  ;;  %v8647_v19 = vld [vmem:[%s20387_s2 + $0x130] sm:$0xf]  ;;  %v10248_v23 = vor.u32 %v13540_v14, %v10247_v13  ;;  %v16293_v34 = vadd.f32 %v4242_v29, %v4230_v28  ;;  %v13452_v28 = vld [vmem:[%s20387_s2 + $0xb34] sm:$0xf] }
 0x1cb   : > { %v13140_v20 = vld [vmem:[%s20387_s2 + $0x16c] sm:$0xf0]  ;;  %v4244_v3 = vpop.f32.mrf.mxu3  ;;  %v9929_v29 = vld [vmem:[%s20387_s2 + $0xb70] sm:$0xf0] }
 0x1cc   : > { %4494 = vmatpush.bf16.msra.mxu3 %v10440_v41  ;;  %4469 = vmatpush.bf16.msra.mxu1 %v9352_v49  ;;  %v9159_v21 = vld [vmem:[%s20387_s2 + $0x530] sm:$0xf]  ;;  %v8648_v32 = vor.u32 %v13140_v20, %v8647_v19  ;;  %v8972_v19 = vor.u32 %v13212_v4, %v8969_v5  ;;  %v13148_v4 = vld [vmem:[%s20387_s2 + $0x1b4] sm:$0xf] }
 0x1cd   : > { %v13268_v24 = vld [vmem:[%s20387_s2 + $0x56c] sm:$0xf0]  ;;  %v8713_v5 = vld [vmem:[%s20387_s2 + $0x1f0] sm:$0xf0] }
 0x1ce   : > { %4482 = vmatpush.bf16.msra.mxu2 %v9864_v50  ;;  %4457 = vmatpush.bf16.msra.mxu0 %v8776_v61  ;;  %v9671_v25 = vld [vmem:[%s20387_s2 + $0x930] sm:$0xf]  ;;  %v9160_v38 = vor.u32 %v13268_v24, %v9159_v21  ;;  %v4231_v61 = vpop.f32.mrf.mxu2  ;;  %v9996_v21 = vor.u32 %v13468_v11, %v9993_v12  ;;  %v13324_v24 = vld [vmem:[%s20387_s2 + $0x734] sm:$0xf] }
 0x1cf   : > { %v13396_v27 = vld [vmem:[%s20387_s2 + $0x96c] sm:$0xf0]  ;;  %v13548_v61 = vld [vmem:[%s20387_s2 + $0xe34] sm:$0xf] }
 0x1d0   : > { %4495 = vmatpush.bf16.msra.mxu3 %v10376_v55  ;;  %4470 = vmatpush.bf16.msra.mxu1 %v9288_v63  ;;  %v10183_v30 = vld [vmem:[%s20387_s2 + $0xd30] sm:$0xf]  ;;  %v9672_v39 = vor.u32 %v13396_v27, %v9671_v25  ;;  %v9417_v27 = vld [vmem:[%s20387_s2 + $0x770] sm:$0xf0] }
 0x1d1   : > { %v13524_v31 = vld [vmem:[%s20387_s2 + $0xd6c] sm:$0xf0]  ;;  %v9420_v37 = vor.u32 %v13324_v24, %v9417_v27  ;;  %v9225_v11 = vld [vmem:[%s20387_s2 + $0x5f0] sm:$0xf0] }
 0x1d2   : > { %4483 = vmatpush.bf16.msra.mxu2 %v9800_v1  ;;  %4458 = vmatpush.bf16.msra.mxu0 %v8712_v15  ;;  %v8583_v41 = vld [vmem:[%s20387_s2 + $0xb0] sm:$0xf]  ;;  %v10184_v45 = vor.u32 %v13524_v31, %v10183_v30  ;;  %v13596_v15 = vld [vmem:[%s20387_s2 + $0xfb4] sm:$0xf] }
 0x1d3   : > { %v13124_v42 = vld [vmem:[%s20387_s2 + $0xec] sm:$0xf0]  ;;  %v13580_v30 = vld [vmem:[%s20387_s2 + $0xf34] sm:$0xf] }
 0x1d4   : > { %4496 = vmatpush.bf16.msra.mxu3 %v10312_v6  ;;  %4471 = vmatpush.bf16.msra.mxu1 %v9224_v17  ;;  %v9095_v43 = vld [vmem:[%s20387_s2 + $0x4b0] sm:$0xf]  ;;  %v8584_v52 = vor.u32 %v13124_v42, %v8583_v41  ;;  %v13340_v6 = vld [vmem:[%s20387_s2 + $0x7b4] sm:$0xf] }
 0x1d5   : > { %v13252_v47 = vld [vmem:[%s20387_s2 + $0x4ec] sm:$0xf0]  ;;  %v10505_v17 = vld [vmem:[%s20387_s2 + $0xff0] sm:$0xf0]  ;;  %v9484_v20 = vor.u32 %v13340_v6, %v9481_v8 }
 0x1d6   : > { %4484 = vmatpush.bf16.msra.mxu2 %v9736_v18  ;;  %v9607_v48 = vld [vmem:[%s20387_s2 + $0x8b0] sm:$0xf]  ;;  %4459 = vmatpush.bf16.msra.mxu0 %v8648_v32  ;;  %v9096_v56 = vor.u32 %v13252_v47, %v9095_v43  ;;  %v10508_v25 = vor.u32 %v13596_v15, %v10505_v17  ;;  %v10441_v31 = vld [vmem:[%s20387_s2 + $0xf70] sm:$0xf0] }
 0x1d7   : > { %v13380_v49 = vld [vmem:[%s20387_s2 + $0x8ec] sm:$0xf0]  ;;  %v8841_v41 = vld [vmem:[%s20387_s2 + $0x2f0] sm:$0xf0]  ;;  %v10444_v43 = vor.u32 %v13580_v30, %v10441_v31 }
 0x1d8   : > { %4497 = vmatpush.bf16.msra.mxu3 %v10248_v23  ;;  %v10119_v50 = vld [vmem:[%s20387_s2 + $0xcb0] sm:$0xf]  ;;  %4472 = vmatpush.bf16.msra.mxu1 %v9160_v38  ;;  %v9608_v57 = vor.u32 %v13380_v49, %v9607_v48  ;;  %v8905_v23 = vld [vmem:[%s20387_s2 + $0x370] sm:$0xf0]  ;;  %v9932_v38 = vor.u32 %v13452_v28, %v9929_v29 }
 0x1d9   : > { %v13508_v51 = vld [vmem:[%s20387_s2 + $0xcec] sm:$0xf0]  ;;  %v8908_v32 = vor.u32 %v13196_v22, %v8905_v23  ;;  %v13308_v42 = vld [vmem:[%s20387_s2 + $0x6b4] sm:$0xf] }
 0x1da   : > { %v8519_v53 = vld [vmem:[%s20387_s2 + $0x30] sm:$0xf]  ;;  %4485 = vmatpush.bf16.msra.mxu2 %v9672_v39  ;;  %v10120_v62 = vor.u32 %v13508_v51, %v10119_v50  ;;  %4460 = vmatpush.bf16.msra.mxu0 %v8584_v52  ;;  %v13180_v39 = vld [vmem:[%s20387_s2 + $0x2b4] sm:$0xf]  ;;  %v9356_v51 = vor.u32 %v13308_v42, %v9353_v44 }
 0x1db   : > { %v13108_v55 = vld [vmem:[%s20387_s2 + $0x6c] sm:$0xf0]  ;;  %v9865_v47 = vld [vmem:[%s20387_s2 + $0xaf0] sm:$0xf0]  ;;  %v8844_v50 = vor.u32 %v13180_v39, %v8841_v41 }
 0x1dc   : > { %v9031_v58 = vld [vmem:[%s20387_s2 + $0x430] sm:$0xf]  ;;  %4498 = vmatpush.bf16.msra.mxu3 %v10184_v45  ;;  %v8520_v7 = vor.u32 %v13108_v55, %v8519_v53  ;;  %4473 = vmatpush.bf16.msra.mxu1 %v9096_v56  ;;  %v13436_v45 = vld [vmem:[%s20387_s2 + $0xab4] sm:$0xf] }
 0x1dd   : > { %v13236_v59 = vld [vmem:[%s20387_s2 + $0x46c] sm:$0xf0]  ;;  %v13564_v48 = vld [vmem:[%s20387_s2 + $0xeb4] sm:$0xf]  ;;  %v9868_v52 = vor.u32 %v13436_v45, %v9865_v47 }
 0x1de   : > { %v9543_v60 = vld [vmem:[%s20387_s2 + $0x830] sm:$0xf]  ;;  %4486 = vmatpush.bf16.msra.mxu2 %v9608_v57  ;;  %v9032_v13 = vor.u32 %v13236_v59, %v9031_v58  ;;  %4461 = vmatpush.bf16.msra.mxu0 %v8520_v7  ;;  %v10377_v49 = vld [vmem:[%s20387_s2 + $0xef0] sm:$0xf0]  ;;  %v4268_v7 = vpop.f32.mrf.mxu1 }
 0x1df   : > { %v13364_v63 = vld [vmem:[%s20387_s2 + $0x86c] sm:$0xf0]  ;;  %v13164_v53 = vld [vmem:[%s20387_s2 + $0x234] sm:$0xf]  ;;  %v10380_v57 = vor.u32 %v13564_v48, %v10377_v49 }
 0x1e0   : > { %v10055_v1 = vld [vmem:[%s20387_s2 + $0xc30] sm:$0xf]  ;;  %v9544_v14 = vor.u32 %v13364_v63, %v9543_v60  ;;  %4499 = vmatpush.bf16.msra.mxu3 %v10120_v62  ;;  %4474 = vmatpush.bf16.msra.mxu1 %v9032_v13  ;;  %v8777_v55 = vld [vmem:[%s20387_s2 + $0x270] sm:$0xf0] }
 0x1e1   : > { %v13492_v2 = vld [vmem:[%s20387_s2 + $0xc6c] sm:$0xf0]  ;;  %4462 = vmatmul.bf16.vlgmr.msra.gmra.mxu0 %v14050_v10  ;;  %v13292_v56 = vld [vmem:[%s20387_s2 + $0x634] sm:$0xf]  ;;  %v8780_v63 = vor.u32 %v13164_v53, %v8777_v55 }
 0x1e2   : > { %v10056_v18 = vor.u32 %v13492_v2, %v10055_v1  ;;  %4487 = vmatpush.bf16.msra.mxu2 %v9544_v14  ;;  %4506 = vmatpush.bf16.msrb.mxu0 %v8972_v19  ;;  %v9289_v58 = vld [vmem:[%s20387_s2 + $0x670] sm:$0xf0]  ;;  %v4255_v1 = vpop.f32.mrf.mxu0 }
 0x1e3   : > { %4475 = vmatmul.bf16.vlgmr.msra.gmra.mxu1 %v14081_v26  ;;  %v13420_v59 = vld [vmem:[%s20387_s2 + $0xa34] sm:$0xf]  ;;  %v9292_v2 = vor.u32 %v13292_v56, %v9289_v58  ;;  %v4269_v14 = vadd.f32 %v4268_v7, %v4255_v1  ;;  %v8975_v7 = vld [vmem:[%s20387_s2 + $0x3b8] sm:$0xf] }
 0x1e4   : > { %4500 = vmatpush.bf16.msra.mxu3 %v10056_v18  ;;  %4519 = vmatpush.bf16.msrb.mxu1 %v9484_v20  ;;  %v9801_v60 = vld [vmem:[%s20387_s2 + $0xa70] sm:$0xf0]  ;;  %v8716_v18 = vor.u32 %v13148_v4, %v8713_v5  ;;  %v4281_v24 = vpop.f32.mrf.mxu2 }
 0x1e5   : > { %4488 = vmatmul.bf16.vlgmr.msra.gmra.mxu2 %v14048_v9  ;;  %v10313_v62 = vld [vmem:[%s20387_s2 + $0xe70] sm:$0xf0]  ;;  %v9804_v3 = vor.u32 %v13420_v59, %v9801_v60  ;;  %v4282_v30 = vadd.f32 %v4281_v24, %v4269_v14  ;;  %v9999_v14 = vld [vmem:[%s20387_s2 + $0xbb8] sm:$0xf] }
 0x1e6   : > { %4532 = vmatpush.bf16.msrb.mxu2 %v9996_v21  ;;  %4507 = vmatpush.bf16.msrb.mxu0 %v8908_v32  ;;  %v13276_v6 = vld [vmem:[%s20387_s2 + $0x5b4] sm:$0xf]  ;;  %v10316_v8 = vor.u32 %v13548_v61, %v10313_v62  ;;  %v4294_v31 = vpop.f32.mrf.mxu3  ;;  %v4270_v48 = vpop.f32.mrf.mxu1 }
 0x1e7   : > { %4501 = vmatmul.bf16.vlgmr.msra.gmra.mxu3 %v14061_v16  ;;  %v13404_v12 = vld [vmem:[%s20387_s2 + $0x9b4] sm:$0xf]  ;;  %v9228_v19 = vor.u32 %v13276_v6, %v9225_v11  ;;  %v16491_v39 = vadd.f32 %v4294_v31, %v4282_v30  ;;  %v9487_v11 = vld [vmem:[%s20387_s2 + $0x7b8] sm:$0xf] }
 0x1e8   : > { %4545 = vmatpush.bf16.msrb.mxu3 %v10508_v25  ;;  %4520 = vmatpush.bf16.msrb.mxu1 %v9420_v37  ;;  %v9737_v13 = vld [vmem:[%s20387_s2 + $0x9f0] sm:$0xf0]  ;;  %v13333_v30 = vld [vmem:[%s20387_s2 + $0x774] sm:$0xf0] }
 0x1e9   : > { %v13532_v15 = vld [vmem:[%s20387_s2 + $0xdb4] sm:$0xf]  ;;  %v9740_v20 = vor.u32 %v13404_v12, %v9737_v13  ;;  %v13349_v13 = vld [vmem:[%s20387_s2 + $0x7f4] sm:$0xf0] }
 0x1ea   : > { %4533 = vmatpush.bf16.msrb.mxu2 %v9932_v38  ;;  %4508 = vmatpush.bf16.msrb.mxu0 %v8844_v50  ;;  %v10249_v17 = vld [vmem:[%s20387_s2 + $0xdf0] sm:$0xf0]  ;;  %v4257_v41 = vpop.f32.mrf.mxu0  ;;  %v9935_v31 = vld [vmem:[%s20387_s2 + $0xb38] sm:$0xf] }
 0x1eb   : > { %v13132_v21 = vld [vmem:[%s20387_s2 + $0x134] sm:$0xf]  ;;  %v10252_v25 = vor.u32 %v13532_v15, %v10249_v17  ;;  %v13477_v15 = vld [vmem:[%s20387_s2 + $0xbf4] sm:$0xf0] }
 0x1ec   : > { %4546 = vmatpush.bf16.msrb.mxu3 %v10444_v43  ;;  %4521 = vmatpush.bf16.msrb.mxu1 %v9356_v51  ;;  %v8649_v22 = vld [vmem:[%s20387_s2 + $0x170] sm:$0xf0]  ;;  %v4283_v1 = vpop.f32.mrf.mxu2  ;;  %v10000_v24 = vor.u32 %v13477_v15, %v9999_v14  ;;  %v13285_v15 = vld [vmem:[%s20387_s2 + $0x5f4] sm:$0xf0] }
 0x1ed   : > { %v13260_v23 = vld [vmem:[%s20387_s2 + $0x534] sm:$0xf]  ;;  %v8652_v38 = vor.u32 %v13132_v21, %v8649_v22  ;;  %v13429_v1 = vld [vmem:[%s20387_s2 + $0xa74] sm:$0xf0] }
 0x1ee   : > { %4534 = vmatpush.bf16.msrb.mxu2 %v9868_v52  ;;  %4509 = vmatpush.bf16.msrb.mxu0 %v8780_v63  ;;  %v9161_v27 = vld [vmem:[%s20387_s2 + $0x570] sm:$0xf0]  ;;  %v4296_v6 = vpop.f32.mrf.mxu3 }
 0x1ef   : > { %v13388_v28 = vld [vmem:[%s20387_s2 + $0x934] sm:$0xf]  ;;  %v9164_v42 = vor.u32 %v13260_v23, %v9161_v27  ;;  %v9488_v23 = vor.u32 %v13349_v13, %v9487_v11  ;;  %v13205_v27 = vld [vmem:[%s20387_s2 + $0x374] sm:$0xf0] }
 0x1f0   : > { %4547 = vmatpush.bf16.msrb.mxu3 %v10380_v57  ;;  %4522 = vmatpush.bf16.msrb.mxu1 %v9292_v2  ;;  %v9673_v29 = vld [vmem:[%s20387_s2 + $0x970] sm:$0xf0]  ;;  %v13157_v11 = vld [vmem:[%s20387_s2 + $0x1f4] sm:$0xf0] }
 0x1f1   : > { %v13516_v32 = vld [vmem:[%s20387_s2 + $0xd34] sm:$0xf]  ;;  %v9676_v43 = vor.u32 %v13388_v28, %v9673_v29  ;;  %v9423_v28 = vld [vmem:[%s20387_s2 + $0x738] sm:$0xf] }
 0x1f2   : > { %4535 = vmatpush.bf16.msrb.mxu2 %v9804_v3  ;;  %v10185_v37 = vld [vmem:[%s20387_s2 + $0xd70] sm:$0xf0]  ;;  %4510 = vmatpush.bf16.msrb.mxu0 %v8716_v18 }
 0x1f3   : > { %v13116_v44 = vld [vmem:[%s20387_s2 + $0xb4] sm:$0xf]  ;;  %v10188_v49 = vor.u32 %v13516_v32, %v10185_v37  ;;  %v13461_v32 = vld [vmem:[%s20387_s2 + $0xb74] sm:$0xf0] }
 0x1f4   : > { %4548 = vmatpush.bf16.msrb.mxu3 %v10316_v8  ;;  %4523 = vmatpush.bf16.msrb.mxu1 %v9228_v19  ;;  %v8585_v45 = vld [vmem:[%s20387_s2 + $0xf0] sm:$0xf0]  ;;  %v13221_v8 = vld [vmem:[%s20387_s2 + $0x3f4] sm:$0xf0] }
 0x1f5   : > { %v13244_v47 = vld [vmem:[%s20387_s2 + $0x4b4] sm:$0xf]  ;;  %v8588_v56 = vor.u32 %v13116_v44, %v8585_v45  ;;  %v10511_v19 = vld [vmem:[%s20387_s2 + $0xfb8] sm:$0xf]  ;;  %v8976_v22 = vor.u32 %v13221_v8, %v8975_v7 }
 0x1f6   : > { %4536 = vmatpush.bf16.msrb.mxu2 %v9740_v20  ;;  %v9097_v50 = vld [vmem:[%s20387_s2 + $0x4f0] sm:$0xf0]  ;;  %4511 = vmatpush.bf16.msrb.mxu0 %v8652_v38  ;;  %v13605_v20 = vld [vmem:[%s20387_s2 + $0xff4] sm:$0xf0] }
 0x1f7   : > { %v13372_v51 = vld [vmem:[%s20387_s2 + $0x8b4] sm:$0xf]  ;;  %v9100_v59 = vor.u32 %v13244_v47, %v9097_v50  ;;  %v10512_v29 = vor.u32 %v13605_v20, %v10511_v19  ;;  %v10447_v37 = vld [vmem:[%s20387_s2 + $0xf38] sm:$0xf] }
 0x1f8   : > { %4549 = vmatpush.bf16.msrb.mxu3 %v10252_v25  ;;  %v9609_v52 = vld [vmem:[%s20387_s2 + $0x8f0] sm:$0xf0]  ;;  %4524 = vmatpush.bf16.msrb.mxu1 %v9164_v42  ;;  %v8911_v25 = vld [vmem:[%s20387_s2 + $0x338] sm:$0xf]  ;;  %v9424_v42 = vor.u32 %v13333_v30, %v9423_v28 }
 0x1f9   : > { %v13500_v53 = vld [vmem:[%s20387_s2 + $0xcb4] sm:$0xf]  ;;  %v9612_v60 = vor.u32 %v13372_v51, %v9609_v52  ;;  %v13589_v38 = vld [vmem:[%s20387_s2 + $0xf74] sm:$0xf0]  ;;  %v8912_v41 = vor.u32 %v13205_v27, %v8911_v25 }
 0x1fa   : > { %v10121_v55 = vld [vmem:[%s20387_s2 + $0xcf0] sm:$0xf0]  ;;  %4537 = vmatpush.bf16.msrb.mxu2 %v9676_v43  ;;  %4512 = vmatpush.bf16.msrb.mxu0 %v8588_v56  ;;  %v9936_v43 = vor.u32 %v13461_v32, %v9935_v31  ;;  %v8847_v44 = vld [vmem:[%s20387_s2 + $0x2b8] sm:$0xf]  ;;  %v10448_v48 = vor.u32 %v13589_v38, %v10447_v37 }
 0x1fb   : > { %v13100_v57 = vld [vmem:[%s20387_s2 + $0x34] sm:$0xf]  ;;  %v10124_v2 = vor.u32 %v13500_v53, %v10121_v55  ;;  %v13189_v45 = vld [vmem:[%s20387_s2 + $0x2f4] sm:$0xf0] }
 0x1fc   : > { %v8521_v58 = vld [vmem:[%s20387_s2 + $0x70] sm:$0xf0]  ;;  %4550 = vmatpush.bf16.msrb.mxu3 %v10188_v49  ;;  %4525 = vmatpush.bf16.msrb.mxu1 %v9100_v59  ;;  %v9359_v47 = vld [vmem:[%s20387_s2 + $0x6b8] sm:$0xf]  ;;  %v8848_v55 = vor.u32 %v13189_v45, %v8847_v44 }
 0x1fd   : > { %v13228_v61 = vld [vmem:[%s20387_s2 + $0x434] sm:$0xf]  ;;  %v8524_v12 = vor.u32 %v13100_v57, %v8521_v58  ;;  %v13317_v49 = vld [vmem:[%s20387_s2 + $0x6f4] sm:$0xf0] }
 0x1fe   : > { %v9033_v62 = vld [vmem:[%s20387_s2 + $0x470] sm:$0xf0]  ;;  %4538 = vmatpush.bf16.msrb.mxu2 %v9612_v60  ;;  %v9871_v50 = vld [vmem:[%s20387_s2 + $0xab8] sm:$0xf]  ;;  %v9360_v56 = vor.u32 %v13317_v49, %v9359_v47  ;;  %v4320_v13 = vpop.f32.mrf.mxu1 }
 0x1ff   : > { %v13356_v63 = vld [vmem:[%s20387_s2 + $0x834] sm:$0xf]  ;;  %v9036_v17 = vor.u32 %v13228_v61, %v9033_v62  ;;  %4513 = vmatpush.bf16.msrb.mxu0 %v8524_v12  ;;  %v13445_v51 = vld [vmem:[%s20387_s2 + $0xaf4] sm:$0xf0] }
 0x200   : > { %v9545_v3 = vld [vmem:[%s20387_s2 + $0x870] sm:$0xf0]  ;;  %4551 = vmatpush.bf16.msrb.mxu3 %v10124_v2  ;;  %v10383_v52 = vld [vmem:[%s20387_s2 + $0xeb8] sm:$0xf]  ;;  %v9872_v57 = vor.u32 %v13445_v51, %v9871_v50 }
 0x201   : > { %v13484_v4 = vld [vmem:[%s20387_s2 + $0xc34] sm:$0xf]  ;;  %v9548_v18 = vor.u32 %v13356_v63, %v9545_v3  ;;  %4526 = vmatpush.bf16.msrb.mxu1 %v9036_v17  ;;  %v13573_v53 = vld [vmem:[%s20387_s2 + $0xef4] sm:$0xf0] }
 0x202   : > { %v10057_v5 = vld [vmem:[%s20387_s2 + $0xc70] sm:$0xf0]  ;;  %4514 = vmatmul.bf16.vlgmr.msrb.gmra.mxu0 %v14050_v10  ;;  %v8783_v58 = vld [vmem:[%s20387_s2 + $0x238] sm:$0xf]  ;;  %v10384_v61 = vor.u32 %v13573_v53, %v10383_v52 }
 0x203   : > { %v10060_v21 = vor.u32 %v13484_v4, %v10057_v5  ;;  %4539 = vmatpush.bf16.msrb.mxu2 %v9548_v18  ;;  %4558 = vmatpush.bf16.msra.mxu0 %v8976_v22  ;;  %v13173_v59 = vld [vmem:[%s20387_s2 + $0x274] sm:$0xf0]  ;;  %v4307_v5 = vpop.f32.mrf.mxu0 }
 0x204   : > { %4527 = vmatmul.bf16.vlgmr.msrb.gmra.mxu1 %v14081_v26  ;;  %v9295_v60 = vld [vmem:[%s20387_s2 + $0x638] sm:$0xf]  ;;  %v8784_v4 = vor.u32 %v13173_v59, %v8783_v58  ;;  %v4321_v19 = vadd.f32 %v4320_v13, %v4307_v5 }
 0x205   : > { %4552 = vmatpush.bf16.msrb.mxu3 %v10060_v21  ;;  %4571 = vmatpush.bf16.msra.mxu1 %v9488_v23  ;;  %v13301_v62 = vld [vmem:[%s20387_s2 + $0x674] sm:$0xf0] }
 0x206   : > { %4540 = vmatmul.bf16.vlgmr.msrb.gmra.mxu2 %v14048_v9  ;;  %v9807_v63 = vld [vmem:[%s20387_s2 + $0xa38] sm:$0xf]  ;;  %v9296_v6 = vor.u32 %v13301_v62, %v9295_v60  ;;  %v4322_v53 = vpop.f32.mrf.mxu1 }
 0x207   : > { %4584 = vmatpush.bf16.msra.mxu2 %v10000_v24  ;;  %4559 = vmatpush.bf16.msra.mxu0 %v8912_v41  ;;  %v10319_v2 = vld [vmem:[%s20387_s2 + $0xe38] sm:$0xf]  ;;  %v9808_v7 = vor.u32 %v13429_v1, %v9807_v63  ;;  %v13309_v53 = vld [vmem:[%s20387_s2 + $0x6bc] sm:$0xf] }
 0x208   : > { %4553 = vmatmul.bf16.vlgmr.msrb.gmra.mxu3 %v14061_v16  ;;  %v13557_v3 = vld [vmem:[%s20387_s2 + $0xe74] sm:$0xf0]  ;;  %v4346_v41 = vpop.f32.mrf.mxu3 }
 0x209   : > { %4597 = vmatpush.bf16.msra.mxu3 %v10512_v29  ;;  %4572 = vmatpush.bf16.msra.mxu1 %v9424_v42  ;;  %v8719_v8 = vld [vmem:[%s20387_s2 + $0x1b8] sm:$0xf]  ;;  %v10320_v14 = vor.u32 %v13557_v3, %v10319_v2  ;;  %v4333_v29 = vpop.f32.mrf.mxu2 }
 0x20a   : > { %v9231_v12 = vld [vmem:[%s20387_s2 + $0x5b8] sm:$0xf]  ;;  %v8720_v22 = vor.u32 %v13157_v11, %v8719_v8  ;;  %v4334_v38 = vadd.f32 %v4333_v29, %v4321_v19  ;;  %v9489_v19 = vld [vmem:[%s20387_s2 + $0x7f8] sm:$0xf0] }
 0x20b   : > { %4585 = vmatpush.bf16.msra.mxu2 %v9936_v43  ;;  %4560 = vmatpush.bf16.msra.mxu0 %v8848_v55  ;;  %v9743_v17 = vld [vmem:[%s20387_s2 + $0x9b8] sm:$0xf]  ;;  %v9232_v23 = vor.u32 %v13285_v15, %v9231_v12  ;;  %v4309_v47 = vpop.f32.mrf.mxu0  ;;  %v8977_v15 = vld [vmem:[%s20387_s2 + $0x3f8] sm:$0xf0] }
 0x20c   : > { %v13413_v18 = vld [vmem:[%s20387_s2 + $0x9f4] sm:$0xf0]  ;;  %v16689_v45 = vadd.f32 %v4346_v41, %v4334_v38  ;;  %v9425_v41 = vld [vmem:[%s20387_s2 + $0x778] sm:$0xf0] }
 0x20d   : > { %4598 = vmatpush.bf16.msra.mxu3 %v10448_v48  ;;  %4573 = vmatpush.bf16.msra.mxu1 %v9360_v56  ;;  %v10255_v20 = vld [vmem:[%s20387_s2 + $0xdb8] sm:$0xf]  ;;  %v9744_v24 = vor.u32 %v13413_v18, %v9743_v17  ;;  %v13341_v17 = vld [vmem:[%s20387_s2 + $0x7bc] sm:$0xf] }
 0x20e   : > { %v13541_v21 = vld [vmem:[%s20387_s2 + $0xdf4] sm:$0xf0]  ;;  %v9492_v29 = vor.u32 %v13341_v17, %v9489_v19  ;;  %v10449_v47 = vld [vmem:[%s20387_s2 + $0xf78] sm:$0xf0] }
 0x20f   : > { %4586 = vmatpush.bf16.msra.mxu2 %v9872_v57  ;;  %4561 = vmatpush.bf16.msra.mxu0 %v8784_v4  ;;  %v8655_v25 = vld [vmem:[%s20387_s2 + $0x138] sm:$0xf]  ;;  %v10256_v30 = vor.u32 %v13541_v21, %v10255_v20  ;;  %v13469_v20 = vld [vmem:[%s20387_s2 + $0xbbc] sm:$0xf] }
 0x210   : > { %v13141_v27 = vld [vmem:[%s20387_s2 + $0x174] sm:$0xf0]  ;;  %v4348_v13 = vpop.f32.mrf.mxu3  ;;  %v10001_v21 = vld [vmem:[%s20387_s2 + $0xbf8] sm:$0xf0] }
 0x211   : > { %4599 = vmatpush.bf16.msra.mxu3 %v10384_v61  ;;  %4574 = vmatpush.bf16.msra.mxu1 %v9296_v6  ;;  %v9167_v28 = vld [vmem:[%s20387_s2 + $0x538] sm:$0xf]  ;;  %v8656_v44 = vor.u32 %v13141_v27, %v8655_v25  ;;  %v4335_v6 = vpop.f32.mrf.mxu2  ;;  %v10513_v25 = vld [vmem:[%s20387_s2 + $0xff8] sm:$0xf0] }
 0x212   : > { %v13269_v31 = vld [vmem:[%s20387_s2 + $0x574] sm:$0xf0]  ;;  %v13421_v6 = vld [vmem:[%s20387_s2 + $0xa3c] sm:$0xf] }
 0x213   : > { %4587 = vmatpush.bf16.msra.mxu2 %v9808_v7  ;;  %v9679_v32 = vld [vmem:[%s20387_s2 + $0x938] sm:$0xf]  ;;  %4562 = vmatpush.bf16.msra.mxu0 %v8720_v22  ;;  %v9168_v48 = vor.u32 %v13269_v31, %v9167_v28  ;;  %v13197_v31 = vld [vmem:[%s20387_s2 + $0x33c] sm:$0xf] }
 0x214   : > { %v13397_v37 = vld [vmem:[%s20387_s2 + $0x974] sm:$0xf0]  ;;  %v13149_v17 = vld [vmem:[%s20387_s2 + $0x1bc] sm:$0xf] }
 0x215   : > { %4600 = vmatpush.bf16.msra.mxu3 %v10320_v14  ;;  %v10191_v42 = vld [vmem:[%s20387_s2 + $0xd38] sm:$0xf]  ;;  %4575 = vmatpush.bf16.msra.mxu1 %v9232_v23  ;;  %v9680_v49 = vor.u32 %v13397_v37, %v9679_v32  ;;  %v13213_v14 = vld [vmem:[%s20387_s2 + $0x3bc] sm:$0xf] }
 0x216   : > { %v13525_v43 = vld [vmem:[%s20387_s2 + $0xd74] sm:$0xf0]  ;;  %v8980_v28 = vor.u32 %v13213_v14, %v8977_v15  ;;  %v8913_v32 = vld [vmem:[%s20387_s2 + $0x378] sm:$0xf0] }
 0x217   : > { %4588 = vmatpush.bf16.msra.mxu2 %v9744_v24  ;;  %v8591_v50 = vld [vmem:[%s20387_s2 + $0xb8] sm:$0xf]  ;;  %v10192_v55 = vor.u32 %v13525_v43, %v10191_v42  ;;  %4563 = vmatpush.bf16.msra.mxu0 %v8656_v44  ;;  %v13597_v24 = vld [vmem:[%s20387_s2 + $0xfbc] sm:$0xf] }
 0x218   : > { %v13125_v51 = vld [vmem:[%s20387_s2 + $0xf4] sm:$0xf0]  ;;  %v13325_v37 = vld [vmem:[%s20387_s2 + $0x73c] sm:$0xf]  ;;  %v10516_v38 = vor.u32 %v13597_v24, %v10513_v25 }
 0x219   : > { %v9103_v52 = vld [vmem:[%s20387_s2 + $0x4b8] sm:$0xf]  ;;  %4601 = vmatpush.bf16.msra.mxu3 %v10256_v30  ;;  %v8592_v61 = vor.u32 %v13125_v51, %v8591_v50  ;;  %4576 = vmatpush.bf16.msra.mxu1 %v9168_v48  ;;  %v10004_v30 = vor.u32 %v13469_v20, %v10001_v21  ;;  %v13453_v42 = vld [vmem:[%s20387_s2 + $0xb3c] sm:$0xf]  ;;  %v8916_v48 = vor.u32 %v13197_v31, %v8913_v32 }
 0x21a   : > { %v13253_v56 = vld [vmem:[%s20387_s2 + $0x4f4] sm:$0xf0]  ;;  %v9937_v43 = vld [vmem:[%s20387_s2 + $0xb78] sm:$0xf0] }
 0x21b   : > { %v9615_v57 = vld [vmem:[%s20387_s2 + $0x8b8] sm:$0xf]  ;;  %4589 = vmatpush.bf16.msra.mxu2 %v9680_v49  ;;  %v9104_v1 = vor.u32 %v13253_v56, %v9103_v52  ;;  %4564 = vmatpush.bf16.msra.mxu0 %v8592_v61  ;;  %v13581_v44 = vld [vmem:[%s20387_s2 + $0xf3c] sm:$0xf]  ;;  %v9428_v49 = vor.u32 %v13325_v37, %v9425_v41  ;;  %v9940_v50 = vor.u32 %v13453_v42, %v9937_v43 }
 0x21c   : > { %v13381_v58 = vld [vmem:[%s20387_s2 + $0x8f4] sm:$0xf0]  ;;  %v13181_v51 = vld [vmem:[%s20387_s2 + $0x2bc] sm:$0xf] }
 0x21d   : > { %v10127_v59 = vld [vmem:[%s20387_s2 + $0xcb8] sm:$0xf]  ;;  %v9616_v2 = vor.u32 %v13381_v58, %v9615_v57  ;;  %4602 = vmatpush.bf16.msra.mxu3 %v10192_v55  ;;  %4577 = vmatpush.bf16.msra.mxu1 %v9104_v1  ;;  %v8849_v52 = vld [vmem:[%s20387_s2 + $0x2f8] sm:$0xf0]  ;;  %v10452_v55 = vor.u32 %v13581_v44, %v10449_v47  ;;  %v4359_v13 = vpop.f32.mrf.mxu0 }
 0x21e   : > { %v13509_v60 = vld [vmem:[%s20387_s2 + $0xcf4] sm:$0xf0]  ;;  %v9361_v56 = vld [vmem:[%s20387_s2 + $0x6f8] sm:$0xf0]  ;;  %v8852_v61 = vor.u32 %v13181_v51, %v8849_v52 }
 0x21f   : > { %v8527_v62 = vld [vmem:[%s20387_s2 + $0x38] sm:$0xf]  ;;  %v10128_v7 = vor.u32 %v13509_v60, %v10127_v59  ;;  %4590 = vmatpush.bf16.msra.mxu2 %v9616_v2  ;;  %v13437_v57 = vld [vmem:[%s20387_s2 + $0xabc] sm:$0xf]  ;;  %v4372_v20 = vpop.f32.mrf.mxu1 }
 0x220   : > { %v13109_v63 = vld [vmem:[%s20387_s2 + $0x74] sm:$0xf0]  ;;  %v9873_v58 = vld [vmem:[%s20387_s2 + $0xaf8] sm:$0xf0]  ;;  %v4373_v25 = vadd.f32 %v4372_v20, %v4359_v13 }
 0x221   : > { %v9039_v3 = vld [vmem:[%s20387_s2 + $0x438] sm:$0xf]  ;;  %v8528_v18 = vor.u32 %v13109_v63, %v8527_v62  ;;  %4603 = vmatpush.bf16.msra.mxu3 %v10128_v7  ;;  %v13565_v59 = vld [vmem:[%s20387_s2 + $0xebc] sm:$0xf]  ;;  %v9364_v62 = vor.u32 %v13309_v53, %v9361_v56  ;;  %v9876_v63 = vor.u32 %v13437_v57, %v9873_v58 }
 0x222   : > { %v13237_v4 = vld [vmem:[%s20387_s2 + $0x474] sm:$0xf0]  ;;  %v10385_v60 = vld [vmem:[%s20387_s2 + $0xef8] sm:$0xf0] }
 0x223   : > { %v9551_v5 = vld [vmem:[%s20387_s2 + $0x838] sm:$0xf]  ;;  %v9040_v22 = vor.u32 %v13237_v4, %v9039_v3  ;;  %4565 = vmatpush.bf16.msra.mxu0 %v8528_v18  ;;  %v13165_v1 = vld [vmem:[%s20387_s2 + $0x23c] sm:$0xf]  ;;  %v10388_v4 = vor.u32 %v13565_v59, %v10385_v60 }
 0x224   : > { %v13365_v8 = vld [vmem:[%s20387_s2 + $0x874] sm:$0xf0]  ;;  %v8785_v2 = vld [vmem:[%s20387_s2 + $0x278] sm:$0xf0] }
 0x225   : > { %v10063_v11 = vld [vmem:[%s20387_s2 + $0xc38] sm:$0xf]  ;;  %v9552_v23 = vor.u32 %v13365_v8, %v9551_v5  ;;  %4578 = vmatpush.bf16.msra.mxu1 %v9040_v22  ;;  %v13293_v3 = vld [vmem:[%s20387_s2 + $0x63c] sm:$0xf] }
 0x226   : > { %v13493_v12 = vld [vmem:[%s20387_s2 + $0xc74] sm:$0xf0]  ;;  %4566 = vmatmul.bf16.vlgmr.msra.gmra.mxu0 %v14050_v10  ;;  %v9297_v5 = vld [vmem:[%s20387_s2 + $0x678] sm:$0xf0] }
 0x227   : > { %v10064_v27 = vor.u32 %v13493_v12, %v10063_v11  ;;  %4591 = vmatpush.bf16.msra.mxu2 %v9552_v23  ;;  %4610 = vmatpush.bf16.msrb.mxu0 %v8980_v28  ;;  %v9809_v7 = vld [vmem:[%s20387_s2 + $0xa78] sm:$0xf0]  ;;  %v8788_v12 = vor.u32 %v13165_v1, %v8785_v2  ;;  %v9300_v14 = vor.u32 %v13293_v3, %v9297_v5  ;;  %v4385_v41 = vpop.f32.mrf.mxu2 }
 0x228   : > { %4579 = vmatmul.bf16.vlgmr.msra.gmra.mxu1 %v14081_v26  ;;  %v13549_v8 = vld [vmem:[%s20387_s2 + $0xe3c] sm:$0xf]  ;;  %v9812_v15 = vor.u32 %v13421_v6, %v9809_v7 }
 0x229   : > { %4604 = vmatpush.bf16.msra.mxu3 %v10064_v27  ;;  %4623 = vmatpush.bf16.msrb.mxu1 %v9492_v29  ;;  %v10321_v11 = vld [vmem:[%s20387_s2 + $0xe78] sm:$0xf0] }
 0x22a   : > { %4592 = vmatmul.bf16.vlgmr.msra.gmra.mxu2 %v14048_v9  ;;  %v8721_v18 = vld [vmem:[%s20387_s2 + $0x1f8] sm:$0xf0]  ;;  %v10324_v21 = vor.u32 %v13549_v8, %v10321_v11 }
 0x22b   : > { %4636 = vmatpush.bf16.msrb.mxu2 %v10004_v30  ;;  %4611 = vmatpush.bf16.msrb.mxu0 %v8916_v48  ;;  %v13277_v19 = vld [vmem:[%s20387_s2 + $0x5bc] sm:$0xf]  ;;  %v8724_v29 = vor.u32 %v13149_v17, %v8721_v18  ;;  %v4386_v48 = vadd.f32 %v4385_v41, %v4373_v25 }
 0x22c   : > { %4605 = vmatmul.bf16.vlgmr.msra.gmra.mxu3 %v14061_v16  ;;  %v9233_v22 = vld [vmem:[%s20387_s2 + $0x5f8] sm:$0xf0] }
 0x22d   : > { %4649 = vmatpush.bf16.msrb.mxu3 %v10516_v38  ;;  %4624 = vmatpush.bf16.msrb.mxu1 %v9428_v49  ;;  %v13405_v23 = vld [vmem:[%s20387_s2 + $0x9bc] sm:$0xf]  ;;  %v9236_v30 = vor.u32 %v13277_v19, %v9233_v22  ;;  %v4398_v49 = vpop.f32.mrf.mxu3  ;;  %v10967_v22 = vld [vmem:[%s20386_s1 + $0x380] sm:$0xf] }
 0x22e   : > { %v9745_v24 = vld [vmem:[%s20387_s2 + $0x9f8] sm:$0xf0]  ;;  %v16887_v53 = vadd.f32 %v4398_v49, %v4386_v48  ;;  %v11415_v48 = vld [vmem:[%s20386_s1 + $0x700] sm:$0xf] }
 0x22f   : > { %4637 = vmatpush.bf16.msrb.mxu2 %v9940_v50  ;;  %4612 = vmatpush.bf16.msrb.mxu0 %v8852_v61  ;;  %v13533_v27 = vld [vmem:[%s20387_s2 + $0xdbc] sm:$0xf]  ;;  %v9748_v31 = vor.u32 %v13405_v23, %v9745_v24  ;;  %v4374_v61 = vpop.f32.mrf.mxu1  ;;  %v12702_v23 = vld [vmem:[%s20386_s1 + $0x3bc] sm:$0xf0] }
 0x230   : > { %v10257_v28 = vld [vmem:[%s20387_s2 + $0xdf8] sm:$0xf0]  ;;  %v11479_v24 = vld [vmem:[%s20386_s1 + $0x780] sm:$0xf]  ;;  %v10968_v41 = vor.u32 %v12702_v23, %v10967_v22 }
 0x231   : > { %4650 = vmatpush.bf16.msrb.mxu3 %v10452_v55  ;;  %4625 = vmatpush.bf16.msrb.mxu1 %v9364_v62  ;;  %v13133_v32 = vld [vmem:[%s20387_s2 + $0x13c] sm:$0xf]  ;;  %v10260_v42 = vor.u32 %v13533_v27, %v10257_v28  ;;  %v4361_v55 = vpop.f32.mrf.mxu0  ;;  %v12830_v27 = vld [vmem:[%s20386_s1 + $0x7bc] sm:$0xf0] }
 0x232   : > { %v8657_v37 = vld [vmem:[%s20387_s2 + $0x178] sm:$0xf0]  ;;  %v11991_v28 = vld [vmem:[%s20386_s1 + $0xb80] sm:$0xf] }
 0x233   : > { %4638 = vmatpush.bf16.msrb.mxu2 %v9876_v63  ;;  %4613 = vmatpush.bf16.msrb.mxu0 %v8788_v12  ;;  %v13261_v38 = vld [vmem:[%s20387_s2 + $0x53c] sm:$0xf]  ;;  %v8660_v52 = vor.u32 %v13133_v32, %v8657_v37  ;;  %v12503_v32 = vld [vmem:[%s20386_s1 + $0xf80] sm:$0xf] }
 0x234   : > { %v9169_v43 = vld [vmem:[%s20387_s2 + $0x578] sm:$0xf0]  ;;  %v13086_v37 = vld [vmem:[%s20386_s1 + $0xfbc] sm:$0xf0] }
 0x235   : > { %4651 = vmatpush.bf16.msrb.mxu3 %v10388_v4  ;;  %4626 = vmatpush.bf16.msrb.mxu1 %v9300_v14  ;;  %v13389_v44 = vld [vmem:[%s20387_s2 + $0x93c] sm:$0xf]  ;;  %v9172_v56 = vor.u32 %v13261_v38, %v9169_v43  ;;  %v12504_v49 = vor.u32 %v13086_v37, %v12503_v32  ;;  %v12439_v55 = vld [vmem:[%s20386_s1 + $0xf00] sm:$0xf] }
 0x236   : > { %v9681_v47 = vld [vmem:[%s20387_s2 + $0x978] sm:$0xf0]  ;;  %v12670_v61 = vld [vmem:[%s20386_s1 + $0x2bc] sm:$0xf0] }
 0x237   : > { %4639 = vmatpush.bf16.msrb.mxu2 %v9812_v15  ;;  %v13517_v50 = vld [vmem:[%s20387_s2 + $0xd3c] sm:$0xf]  ;;  %4614 = vmatpush.bf16.msrb.mxu0 %v8724_v29  ;;  %v9684_v57 = vor.u32 %v13389_v44, %v9681_v47  ;;  %v4387_v15 = vpop.f32.mrf.mxu2  ;;  %v12958_v29 = vld [vmem:[%s20386_s1 + $0xbbc] sm:$0xf0] }
 0x238   : > { %v10193_v51 = vld [vmem:[%s20387_s2 + $0xd78] sm:$0xf0]  ;;  %v11992_v43 = vor.u32 %v12958_v29, %v11991_v28  ;;  %v10903_v44 = vld [vmem:[%s20386_s1 + $0x300] sm:$0xf] }
 0x239   : > { %4652 = vmatpush.bf16.msrb.mxu3 %v10324_v21  ;;  %4627 = vmatpush.bf16.msrb.mxu1 %v9236_v30  ;;  %v13117_v58 = vld [vmem:[%s20387_s2 + $0xbc] sm:$0xf]  ;;  %v10196_v62 = vor.u32 %v13517_v50, %v10193_v51  ;;  %v4400_v21 = vpop.f32.mrf.mxu3  ;;  %v12686_v47 = vld [vmem:[%s20386_s1 + $0x33c] sm:$0xf0] }
 0x23a   : > { %v8593_v59 = vld [vmem:[%s20387_s2 + $0xf8] sm:$0xf0]  ;;  %v12814_v50 = vld [vmem:[%s20386_s1 + $0x73c] sm:$0xf0] }
 0x23b   : > { %4640 = vmatpush.bf16.msrb.mxu2 %v9748_v31  ;;  %v13245_v60 = vld [vmem:[%s20387_s2 + $0x4bc] sm:$0xf]  ;;  %4615 = vmatpush.bf16.msrb.mxu0 %v8660_v52  ;;  %v8596_v5 = vor.u32 %v13117_v58, %v8593_v59  ;;  %v11927_v51 = vld [vmem:[%s20386_s1 + $0xb00] sm:$0xf]  ;;  %v11416_v58 = vor.u32 %v12814_v50, %v11415_v48 }
 0x23c   : > { %v9105_v63 = vld [vmem:[%s20387_s2 + $0x4f8] sm:$0xf0]  ;;  %v12942_v52 = vld [vmem:[%s20386_s1 + $0xb3c] sm:$0xf0] }
 0x23d   : > { %4653 = vmatpush.bf16.msrb.mxu3 %v10260_v42  ;;  %v13373_v1 = vld [vmem:[%s20387_s2 + $0x8bc] sm:$0xf]  ;;  %4628 = vmatpush.bf16.msrb.mxu1 %v9172_v56  ;;  %v9108_v8 = vor.u32 %v13245_v60, %v9105_v63  ;;  %v11480_v42 = vor.u32 %v12830_v27, %v11479_v24  ;;  %v13070_v56 = vld [vmem:[%s20386_s1 + $0xf3c] sm:$0xf0]  ;;  %v11928_v59 = vor.u32 %v12942_v52, %v11927_v51 }
 0x23e   : > { %v9617_v2 = vld [vmem:[%s20387_s2 + $0x8f8] sm:$0xf0]  ;;  %v10839_v60 = vld [vmem:[%s20386_s1 + $0x280] sm:$0xf]  ;;  %v12440_v63 = vor.u32 %v13070_v56, %v12439_v55 }
 0x23f   : > { %v13501_v3 = vld [vmem:[%s20387_s2 + $0xcbc] sm:$0xf]  ;;  %4641 = vmatpush.bf16.msrb.mxu2 %v9684_v57  ;;  %v9620_v11 = vor.u32 %v13373_v1, %v9617_v2  ;;  %4616 = vmatpush.bf16.msrb.mxu0 %v8596_v5  ;;  %v10904_v57 = vor.u32 %v12686_v47, %v10903_v44  ;;  %v12798_v1 = vld [vmem:[%s20386_s1 + $0x6bc] sm:$0xf0] }
 0x240   : > { %v10129_v4 = vld [vmem:[%s20387_s2 + $0xcf8] sm:$0xf0]  ;;  %v11863_v2 = vld [vmem:[%s20386_s1 + $0xa80] sm:$0xf]  ;;  %v4424_v24 = vpop.f32.mrf.mxu1 }
 0x241   : > { %v13101_v6 = vld [vmem:[%s20387_s2 + $0x3c] sm:$0xf]  ;;  %4654 = vmatpush.bf16.msrb.mxu3 %v10196_v62  ;;  %v10132_v17 = vor.u32 %v13501_v3, %v10129_v4  ;;  %4629 = vmatpush.bf16.msrb.mxu1 %v9108_v8  ;;  %v11351_v62 = vld [vmem:[%s20386_s1 + $0x680] sm:$0xf] }
 0x242   : > { %v8529_v7 = vld [vmem:[%s20387_s2 + $0x78] sm:$0xf0]  ;;  %v12926_v3 = vld [vmem:[%s20386_s1 + $0xabc] sm:$0xf0] }
 0x243   : > { %v13229_v12 = vld [vmem:[%s20387_s2 + $0x43c] sm:$0xf]  ;;  %v8532_v25 = vor.u32 %v13101_v6, %v8529_v7  ;;  %4642 = vmatpush.bf16.msrb.mxu2 %v9620_v11  ;;  %v12375_v4 = vld [vmem:[%s20386_s1 + $0xe80] sm:$0xf]  ;;  %v10840_v6 = vor.u32 %v12670_v61, %v10839_v60  ;;  %v11352_v7 = vor.u32 %v12798_v1, %v11351_v62 }
 0x244   : > { %v9041_v13 = vld [vmem:[%s20387_s2 + $0x478] sm:$0xf0]  ;;  %v13054_v5 = vld [vmem:[%s20386_s1 + $0xebc] sm:$0xf0] }
 0x245   : > { %v13357_v14 = vld [vmem:[%s20387_s2 + $0x83c] sm:$0xf]  ;;  %v9044_v30 = vor.u32 %v13229_v12, %v9041_v13  ;;  %4655 = vmatpush.bf16.msrb.mxu3 %v10132_v17  ;;  %4617 = vmatpush.bf16.msrb.mxu0 %v8532_v25  ;;  %v10775_v8 = vld [vmem:[%s20386_s1 + $0x200] sm:$0xf] }
 0x246   : > { %v9553_v18 = vld [vmem:[%s20387_s2 + $0x878] sm:$0xf0]  ;;  %v12654_v11 = vld [vmem:[%s20386_s1 + $0x23c] sm:$0xf0] }
 0x247   : > { %v13485_v19 = vld [vmem:[%s20387_s2 + $0xc3c] sm:$0xf]  ;;  %v9556_v31 = vor.u32 %v13357_v14, %v9553_v18  ;;  %4630 = vmatpush.bf16.msrb.mxu1 %v9044_v30  ;;  %v11799_v12 = vld [vmem:[%s20386_s1 + $0xa00] sm:$0xf]  ;;  %v10776_v17 = vor.u32 %v12654_v11, %v10775_v8  ;;  %v4411_v18 = vpop.f32.mrf.mxu0 }
 0x248   : > { %v10065_v20 = vld [vmem:[%s20387_s2 + $0xc78] sm:$0xf0]  ;;  %4618 = vmatmul.bf16.vlgmr.msrb.gmra.mxu0 %v14050_v10  ;;  %v11864_v10 = vor.u32 %v12926_v3, %v11863_v2  ;;  %v12910_v13 = vld [vmem:[%s20386_s1 + $0xa3c] sm:$0xf0]  ;;  %v4425_v30 = vadd.f32 %v4424_v24, %v4411_v18  ;;  %v4437_v47 = vpop.f32.mrf.mxu2  ;;  %v4426_v3 = vpop.f32.mrf.mxu1 }
 0x249   : > { %v10068_v38 = vor.u32 %v13485_v19, %v10065_v20  ;;  %4643 = vmatpush.bf16.msrb.mxu2 %v9556_v31  ;;  %7236 = vmatpush.bf16.msra.mxu0 %v10968_v41  ;;  %v12311_v14 = vld [vmem:[%s20386_s1 + $0xe00] sm:$0xf]  ;;  %v11800_v20 = vor.u32 %v12910_v13, %v11799_v12  ;;  %v13062_v3 = vld [vmem:[%s20386_s1 + $0xf04] sm:$0xf] }
 0x24a   : > { %4631 = vmatmul.bf16.vlgmr.msrb.gmra.mxu1 %v14081_v26  ;;  %v12376_v26 = vor.u32 %v13054_v5, %v12375_v4  ;;  %v13038_v15 = vld [vmem:[%s20386_s1 + $0xe3c] sm:$0xf0]  ;;  %v4438_v52 = vadd.f32 %v4437_v47, %v4425_v30  ;;  %v4450_v55 = vpop.f32.mrf.mxu3  ;;  %v11481_v30 = vld [vmem:[%s20386_s1 + $0x7c0] sm:$0xf0] }
 0x24b   : > { %4656 = vmatpush.bf16.msrb.mxu3 %v10068_v38  ;;  %7249 = vmatpush.bf16.msra.mxu1 %v11480_v42  ;;  %v10711_v21 = vld [vmem:[%s20386_s1 + $0x180] sm:$0xf]  ;;  %v12312_v25 = vor.u32 %v13038_v15, %v12311_v14 }
 0x24c   : > { %4644 = vmatmul.bf16.vlgmr.msrb.gmra.mxu2 %v14048_v9  ;;  %v11287_v9 = vld [vmem:[%s20386_s1 + $0x600] sm:$0xf] }
 0x24d   : > { %7262 = vmatpush.bf16.msra.mxu2 %v11992_v43  ;;  %7237 = vmatpush.bf16.msra.mxu0 %v10904_v57  ;;  %v12638_v22 = vld [vmem:[%s20386_s1 + $0x1bc] sm:$0xf0] }
 0x24e   : > { %4657 = vmatmul.bf16.vlgmr.msrb.gmra.mxu3 %v14061_v16  ;;  %v12782_v16 = vld [vmem:[%s20386_s1 + $0x63c] sm:$0xf0]  ;;  %v10712_v37 = vor.u32 %v12638_v22, %v10711_v21 }
 0x24f   : > { %7275 = vmatpush.bf16.msra.mxu3 %v12504_v49  ;;  %7250 = vmatpush.bf16.msra.mxu1 %v11416_v58  ;;  %v11288_v19 = vor.u32 %v12782_v16, %v11287_v9  ;;  %v11223_v23 = vld [vmem:[%s20386_s1 + $0x580] sm:$0xf]  ;;  %v4413_v60 = vpop.f32.mrf.mxu0 }
 0x250   : > { %v12766_v27 = vld [vmem:[%s20386_s1 + $0x5bc] sm:$0xf0] }
 0x251   : > { %7263 = vmatpush.bf16.msra.mxu2 %v11928_v59  ;;  %7238 = vmatpush.bf16.msra.mxu0 %v10840_v6  ;;  %v11735_v28 = vld [vmem:[%s20386_s1 + $0x980] sm:$0xf]  ;;  %v11224_v38 = vor.u32 %v12766_v27, %v11223_v23  ;;  %v17085_v59 = vadd.f32 %v4450_v55, %v4438_v52  ;;  %v237_v23 = vld [vmem:[%s13772_s23 + $0x8] sm:$0xff]  ;;  %v10969_v27 = vld [vmem:[%s20386_s1 + $0x3c0] sm:$0xf0] }
 0x252   : > { %v12894_v29 = vld [vmem:[%s20386_s1 + $0x9bc] sm:$0xf0]  ;;  %v4452_v24 = vpop.f32.mrf.mxu3  ;;  %v12678_v55 = vld [vmem:[%s20386_s1 + $0x304] sm:$0xf] }
 0x253   : > { %7276 = vmatpush.bf16.msra.mxu3 %v12440_v63  ;;  %7251 = vmatpush.bf16.msra.mxu1 %v11352_v7  ;;  %v12247_v31 = vld [vmem:[%s20386_s1 + $0xd80] sm:$0xf]  ;;  %v11736_v41 = vor.u32 %v12894_v29, %v11735_v28  ;;  %v12822_v28 = vld [vmem:[%s20386_s1 + $0x784] sm:$0xf] }
 0x254   : > { %v13022_v32 = vld [vmem:[%s20386_s1 + $0xdbc] sm:$0xf0]  ;;  %v11289_v24 = vld [vmem:[%s20386_s1 + $0x640] sm:$0xf0] }
 0x255   : > { %7264 = vmatpush.bf16.msra.mxu2 %v11864_v10  ;;  %7239 = vmatpush.bf16.msra.mxu0 %v10776_v17  ;;  %v10647_v42 = vld [vmem:[%s20386_s1 + $0x100] sm:$0xf]  ;;  %v12248_v48 = vor.u32 %v13022_v32, %v12247_v31  ;;  %v12950_v31 = vld [vmem:[%s20386_s1 + $0xb84] sm:$0xf] }
 0x256   : > { %v12622_v43 = vld [vmem:[%s20386_s1 + $0x13c] sm:$0xf0]  ;;  %v11993_v32 = vld [vmem:[%s20386_s1 + $0xbc0] sm:$0xf0] }
 0x257   : > { %7277 = vmatpush.bf16.msra.mxu3 %v12376_v26  ;;  %7252 = vmatpush.bf16.msra.mxu1 %v11288_v19  ;;  %v11159_v44 = vld [vmem:[%s20386_s1 + $0x500] sm:$0xf]  ;;  %v10648_v58 = vor.u32 %v12622_v43, %v10647_v42  ;;  %v4439_v19 = vpop.f32.mrf.mxu2  ;;  %v13078_v42 = vld [vmem:[%s20386_s1 + $0xf84] sm:$0xf]  ;;  %v11996_v52 = vor.u32 %v12950_v31, %v11993_v32 }
 0x258   : > { %v12750_v49 = vld [vmem:[%s20386_s1 + $0x53c] sm:$0xf0]  ;;  %v12505_v43 = vld [vmem:[%s20386_s1 + $0xfc0] sm:$0xf0] }
 0x259   : > { %7265 = vmatpush.bf16.msra.mxu2 %v11800_v20  ;;  %v11671_v50 = vld [vmem:[%s20386_s1 + $0x900] sm:$0xf]  ;;  %7240 = vmatpush.bf16.msra.mxu0 %v10712_v37  ;;  %v11160_v61 = vor.u32 %v12750_v49, %v11159_v44  ;;  %v4666_v44 = vunpack.c.l.b16 %v237_v23 }
 0x25a   : > { %v12878_v51 = vld [vmem:[%s20386_s1 + $0x93c] sm:$0xf0] }
 0x25b   : > { %7278 = vmatpush.bf16.msra.mxu3 %v12312_v25  ;;  %v12183_v56 = vld [vmem:[%s20386_s1 + $0xd00] sm:$0xf]  ;;  %7253 = vmatpush.bf16.msra.mxu1 %v11224_v38  ;;  %v11672_v62 = vor.u32 %v12878_v51, %v11671_v50  ;;  %v12694_v25 = vld [vmem:[%s20386_s1 + $0x384] sm:$0xf]  ;;  %v4667_v50 = vunpack.c.h.b16 %v237_v23  ;;  %v11484_v51 = vor.u32 %v12822_v28, %v11481_v30 }
 0x25c   : > { %v13006_v57 = vld [vmem:[%s20386_s1 + $0xd3c] sm:$0xf0]  ;;  %v10972_v49 = vor.u32 %v12694_v25, %v10969_v27  ;;  %v12902_v25 = vld [vmem:[%s20386_s1 + $0xa04] sm:$0xf] }
 0x25d   : > { %7266 = vmatpush.bf16.msra.mxu2 %v11736_v41  ;;  %v10583_v63 = vld [vmem:[%s20386_s1 + $0x80] sm:$0xf]  ;;  %v12184_v4 = vor.u32 %v13006_v57, %v12183_v56  ;;  %7241 = vmatpush.bf16.msra.mxu0 %v10648_v58  ;;  %v10905_v56 = vld [vmem:[%s20386_s1 + $0x340] sm:$0xf0]  ;;  %v12508_v58 = vor.u32 %v13078_v42, %v12505_v43 }
 0x25e   : > { %v12606_v1 = vld [vmem:[%s20386_s1 + $0xbc] sm:$0xf0]  ;;  %v12806_v57 = vld [vmem:[%s20386_s1 + $0x704] sm:$0xf]  ;;  %v4463_v31 = vpop.f32.mrf.mxu0 }
 0x25f   : > { %v11095_v2 = vld [vmem:[%s20386_s1 + $0x480] sm:$0xf]  ;;  %7279 = vmatpush.bf16.msra.mxu3 %v12248_v48  ;;  %v10584_v9 = vor.u32 %v12606_v1, %v10583_v63  ;;  %7254 = vmatpush.bf16.msra.mxu1 %v11160_v61  ;;  %v11417_v61 = vld [vmem:[%s20386_s1 + $0x740] sm:$0xf0]  ;;  %v17181_v1 = vpack.c.b16 %v4666_v44, %v4666_v44 }
 0x260   : > { %v12734_v5 = vld [vmem:[%s20386_s1 + $0x4bc] sm:$0xf0]  ;;  %v11929_v63 = vld [vmem:[%s20386_s1 + $0xb40] sm:$0xf0]  ;;  %v4476_v43 = vpop.f32.mrf.mxu1 }
 0x261   : > { %v11607_v6 = vld [vmem:[%s20386_s1 + $0x880] sm:$0xf]  ;;  %7267 = vmatpush.bf16.msra.mxu2 %v11672_v62  ;;  %v11096_v13 = vor.u32 %v12734_v5, %v11095_v2  ;;  %7242 = vmatpush.bf16.msra.mxu0 %v10584_v9  ;;  %v12934_v62 = vld [vmem:[%s20386_s1 + $0xb04] sm:$0xf]  ;;  %v17191_v5 = vpack.c.b16 %v4667_v50, %v4667_v50  ;;  %v4477_v50 = vadd.f32 %v4476_v43, %v4463_v31 }
 0x262   : > { %v12862_v7 = vld [vmem:[%s20386_s1 + $0x8bc] sm:$0xf0]  ;;  %v12790_v9 = vld [vmem:[%s20386_s1 + $0x684] sm:$0xf] }
 0x263   : > { %v12119_v10 = vld [vmem:[%s20386_s1 + $0xc80] sm:$0xf]  ;;  %v11608_v14 = vor.u32 %v12862_v7, %v11607_v6  ;;  %7280 = vmatpush.bf16.msra.mxu3 %v12184_v4  ;;  %7255 = vmatpush.bf16.msra.mxu1 %v11096_v13  ;;  %v12441_v4 = vld [vmem:[%s20386_s1 + $0xf40] sm:$0xf0]  ;;  %v10908_v6 = vor.u32 %v12678_v55, %v10905_v56  ;;  %v11420_v7 = vor.u32 %v12806_v57, %v11417_v61 }
 0x264   : > { %v12990_v8 = vld [vmem:[%s20386_s1 + $0xcbc] sm:$0xf0]  ;;  %v11865_v13 = vld [vmem:[%s20386_s1 + $0xac0] sm:$0xf0] }
 0x265   : > { %v10519_v11 = vld [vmem:[%s20386_s1] sm:$0xf]  ;;  %v12120_v20 = vor.u32 %v12990_v8, %v12119_v10  ;;  %7268 = vmatpush.bf16.msra.mxu2 %v11608_v14  ;;  %v11932_v10 = vor.u32 %v12934_v62, %v11929_v63  ;;  %v12662_v8 = vld [vmem:[%s20386_s1 + $0x284] sm:$0xf] }
 0x266   : > { %v12590_v26 = vld [vmem:[%s20386_s1 + $0x3c] sm:$0xf0]  ;;  %v13046_v14 = vld [vmem:[%s20386_s1 + $0xe84] sm:$0xf] }
 0x267   : > { %v11031_v16 = vld [vmem:[%s20386_s1 + $0x400] sm:$0xf]  ;;  %v10520_v29 = vor.u32 %v12590_v26, %v10519_v11  ;;  %7281 = vmatpush.bf16.msra.mxu3 %v12120_v20  ;;  %v10841_v11 = vld [vmem:[%s20386_s1 + $0x2c0] sm:$0xf0]  ;;  %v12444_v26 = vor.u32 %v13062_v3, %v12441_v4 }
 0x268   : > { %v12718_v12 = vld [vmem:[%s20386_s1 + $0x43c] sm:$0xf0]  ;;  %v12646_v20 = vld [vmem:[%s20386_s1 + $0x204] sm:$0xf]  ;;  %v4489_v63 = vpop.f32.mrf.mxu2 }
 0x269   : > { %v11543_v15 = vld [vmem:[%s20386_s1 + $0x800] sm:$0xf]  ;;  %v11032_v38 = vor.u32 %v12718_v12, %v11031_v16  ;;  %7243 = vmatpush.bf16.msra.mxu0 %v10520_v29  ;;  %v11353_v16 = vld [vmem:[%s20386_s1 + $0x6c0] sm:$0xf0] }
 0x26a   : > { %v12846_v17 = vld [vmem:[%s20386_s1 + $0x83c] sm:$0xf0]  ;;  %v12918_v12 = vld [vmem:[%s20386_s1 + $0xa84] sm:$0xf] }
 0x26b   : > { %v236_v18 = vld [vmem:[%s13772_s23] sm:$0xff]  ;;  %v11544_v41 = vor.u32 %v12846_v17, %v11543_v15  ;;  %7256 = vmatpush.bf16.msra.mxu1 %v11032_v38  ;;  %v10844_v17 = vor.u32 %v12662_v8, %v10841_v11  ;;  %v11868_v19 = vor.u32 %v12918_v12, %v11865_v13  ;;  %v4502_v8 = vpop.f32.mrf.mxu3  ;;  %v4465_v12 = vpop.f32.mrf.mxu0 }
 0x26c   : > { %v12055_v21 = vld [vmem:[%s20386_s1 + $0xc00] sm:$0xf]  ;;  %v4664_v37 = vunpack.c.l.b16 %v236_v18  ;;  %v4665_v47 = vunpack.c.h.b16 %v236_v18  ;;  %v12377_v15 = vld [vmem:[%s20386_s1 + $0xec0] sm:$0xf0]  ;;  %v11356_v18 = vor.u32 %v12790_v9, %v11353_v16  ;;  %v11935_v12 = vld [vmem:[%s20386_s1 + $0xb08] sm:$0xf] }
 0x26d   : > { %v12974_v22 = vld [vmem:[%s20386_s1 + $0xc3c] sm:$0xf0]  ;;  %7269 = vmatpush.bf16.msra.mxu2 %v11544_v41  ;;  %7288 = vmatpush.bf16.msrb.mxu0 %v10972_v49  ;;  %v12380_v23 = vor.u32 %v13046_v14, %v12377_v15  ;;  %v11801_v27 = vld [vmem:[%s20386_s1 + $0xa40] sm:$0xf0] }
 0x26e   : > { %v12056_v48 = vor.u32 %v12974_v22, %v12055_v21  ;;  %v17170_v60 = vpack.c.b16 %v4664_v37, %v4664_v37  ;;  %v17183_v2 = vpack.c.b16 %v4665_v47, %v4665_v47  ;;  %v10777_v21 = vld [vmem:[%s20386_s1 + $0x240] sm:$0xf0]  ;;  %v11804_v37 = vor.u32 %v12902_v25, %v11801_v27 }
 0x26f   : > { %7301 = vmatpush.bf16.msrb.mxu1 %v11484_v51  ;;  %v12774_v22 = vld [vmem:[%s20386_s1 + $0x604] sm:$0xf]  ;;  %v10780_v30 = vor.u32 %v12646_v20, %v10777_v21 }
 0x270   : > { %7282 = vmatpush.bf16.msra.mxu3 %v12056_v48  ;;  %7244 = vmatmul.bf16.vlgmr.msra.gmra.mxu0 %v17170_v60  ;;  %v13030_v28 = vld [vmem:[%s20386_s1 + $0xe04] sm:$0xf]  ;;  %v11292_v32 = vor.u32 %v12774_v22, %v11289_v24 }
 0x271   : > { %7314 = vmatpush.bf16.msrb.mxu2 %v11996_v52  ;;  %7257 = vmatmul.bf16.vlgmr.msra.gmra.mxu1 %v17183_v2  ;;  %v12313_v29 = vld [vmem:[%s20386_s1 + $0xe40] sm:$0xf0] }
 0x272   : > { %7270 = vmatmul.bf16.vlgmr.msra.gmra.mxu2 %v17181_v1  ;;  %7289 = vmatpush.bf16.msrb.mxu0 %v10908_v6  ;;  %v12630_v38 = vld [vmem:[%s20386_s1 + $0x184] sm:$0xf]  ;;  %v12316_v44 = vor.u32 %v13030_v28, %v12313_v29 }
 0x273   : > { %7283 = vmatmul.bf16.vlgmr.msra.gmra.mxu3 %v17191_v5  ;;  %7302 = vmatpush.bf16.msrb.mxu1 %v11420_v7  ;;  %v10713_v41 = vld [vmem:[%s20386_s1 + $0x1c0] sm:$0xf0] }
 0x274   : > { %7327 = vmatpush.bf16.msrb.mxu3 %v12508_v58  ;;  %v12758_v42 = vld [vmem:[%s20386_s1 + $0x584] sm:$0xf]  ;;  %v10716_v55 = vor.u32 %v12630_v38, %v10713_v41  ;;  %v4491_v41 = vpop.f32.mrf.mxu2 }
 0x275   : > { %7315 = vmatpush.bf16.msrb.mxu2 %v11932_v10  ;;  %v11225_v47 = vld [vmem:[%s20386_s1 + $0x5c0] sm:$0xf0]  ;;  %v4490_v10 = vadd.f32 %v4489_v63, %v4477_v50  ;;  %v12703_v50 = vld [vmem:[%s20386_s1 + $0x3c4] sm:$0xf0] }
 0x276   : > { %7290 = vmatpush.bf16.msrb.mxu0 %v10844_v17  ;;  %v12886_v48 = vld [vmem:[%s20386_s1 + $0x984] sm:$0xf]  ;;  %v11228_v56 = vor.u32 %v12758_v42, %v11225_v47  ;;  %v13087_v63 = vld [vmem:[%s20386_s1 + $0xfc4] sm:$0xf0] }
 0x277   : > { %7303 = vmatpush.bf16.msrb.mxu1 %v11356_v18  ;;  %v11737_v49 = vld [vmem:[%s20386_s1 + $0x9c0] sm:$0xf0]  ;;  %v17293_v16 = vadd.f32 %v4502_v8, %v4490_v10  ;;  %v10911_v10 = vld [vmem:[%s20386_s1 + $0x308] sm:$0xf] }
 0x278   : > { %7328 = vmatpush.bf16.msrb.mxu3 %v12444_v26  ;;  %v13014_v51 = vld [vmem:[%s20386_s1 + $0xd84] sm:$0xf]  ;;  %v11740_v57 = vor.u32 %v12886_v48, %v11737_v49  ;;  %v4504_v48 = vpop.f32.mrf.mxu3  ;;  %v10975_v49 = vld [vmem:[%s20386_s1 + $0x388] sm:$0xf] }
 0x279   : > { %7316 = vmatpush.bf16.msrb.mxu2 %v11868_v19  ;;  %v12249_v52 = vld [vmem:[%s20386_s1 + $0xdc0] sm:$0xf0]  ;;  %v4478_v19 = vpop.f32.mrf.mxu1  ;;  %v12687_v8 = vld [vmem:[%s20386_s1 + $0x344] sm:$0xf0] }
 0x27a   : > { %7291 = vmatpush.bf16.msrb.mxu0 %v10780_v30  ;;  %v12614_v58 = vld [vmem:[%s20386_s1 + $0x104] sm:$0xf]  ;;  %v12252_v3 = vor.u32 %v13014_v51, %v12249_v52  ;;  %v11487_v51 = vld [vmem:[%s20386_s1 + $0x788] sm:$0xf] }
 0x27b   : > { %7304 = vmatpush.bf16.msrb.mxu1 %v11292_v32  ;;  %v10649_v61 = vld [vmem:[%s20386_s1 + $0x140] sm:$0xf0]  ;;  %v11295_v41 = vld [vmem:[%s20386_s1 + $0x608] sm:$0xf] }
 0x27c   : > { %7329 = vmatpush.bf16.msrb.mxu3 %v12380_v23  ;;  %v12742_v62 = vld [vmem:[%s20386_s1 + $0x504] sm:$0xf]  ;;  %v10652_v26 = vor.u32 %v12614_v58, %v10649_v61  ;;  %v12319_v48 = vld [vmem:[%s20386_s1 + $0xe08] sm:$0xf] }
 0x27d   : > { %7317 = vmatpush.bf16.msrb.mxu2 %v11804_v37  ;;  %v11161_v4 = vld [vmem:[%s20386_s1 + $0x540] sm:$0xf0] }
 0x27e   : > { %v12870_v6 = vld [vmem:[%s20386_s1 + $0x904] sm:$0xf]  ;;  %7292 = vmatpush.bf16.msrb.mxu0 %v10716_v55  ;;  %v11164_v13 = vor.u32 %v12742_v62, %v11161_v4  ;;  %v12831_v55 = vld [vmem:[%s20386_s1 + $0x7c4] sm:$0xf0]  ;;  %v10976_v4 = vor.u32 %v12703_v50, %v10975_v49 }
 0x27f   : > { %v11673_v7 = vld [vmem:[%s20386_s1 + $0x940] sm:$0xf0]  ;;  %7305 = vmatpush.bf16.msrb.mxu1 %v11228_v56  ;;  %v11999_v56 = vld [vmem:[%s20386_s1 + $0xb88] sm:$0xf] }
 0x280   : > { %7330 = vmatpush.bf16.msrb.mxu3 %v12316_v44  ;;  %v12998_v11 = vld [vmem:[%s20386_s1 + $0xd04] sm:$0xf]  ;;  %v11676_v14 = vor.u32 %v12870_v6, %v11673_v7  ;;  %v12511_v62 = vld [vmem:[%s20386_s1 + $0xf88] sm:$0xf]  ;;  %v11488_v6 = vor.u32 %v12831_v55, %v11487_v51  ;;  %v4515_v51 = vpop.f32.mrf.mxu0 }
 0x281   : > { %v12185_v9 = vld [vmem:[%s20386_s1 + $0xd40] sm:$0xf0]  ;;  %7318 = vmatpush.bf16.msrb.mxu2 %v11740_v57  ;;  %v12959_v57 = vld [vmem:[%s20386_s1 + $0xbc4] sm:$0xf0] }
 0x282   : > { %v12598_v15 = vld [vmem:[%s20386_s1 + $0x84] sm:$0xf]  ;;  %v12188_v20 = vor.u32 %v12998_v11, %v12185_v9  ;;  %7293 = vmatpush.bf16.msrb.mxu0 %v10652_v26  ;;  %v12000_v7 = vor.u32 %v12959_v57, %v11999_v56  ;;  %v11423_v11 = vld [vmem:[%s20386_s1 + $0x708] sm:$0xf]  ;;  %v12512_v9 = vor.u32 %v13087_v63, %v12511_v62 }
 0x283   : > { %v10585_v17 = vld [vmem:[%s20386_s1 + $0xc0] sm:$0xf0]  ;;  %7306 = vmatpush.bf16.msrb.mxu1 %v11164_v13  ;;  %v12815_v26 = vld [vmem:[%s20386_s1 + $0x744] sm:$0xf0] }
 0x284   : > { %v12726_v18 = vld [vmem:[%s20386_s1 + $0x484] sm:$0xf]  ;;  %7331 = vmatpush.bf16.msrb.mxu3 %v12252_v3  ;;  %v10588_v27 = vor.u32 %v12598_v15, %v10585_v17  ;;  %v12943_v13 = vld [vmem:[%s20386_s1 + $0xb44] sm:$0xf0]  ;;  %v10912_v17 = vor.u32 %v12687_v8, %v10911_v10 }
 0x285   : > { %v11097_v21 = vld [vmem:[%s20386_s1 + $0x4c0] sm:$0xf0]  ;;  %7319 = vmatpush.bf16.msrb.mxu2 %v11676_v14  ;;  %v12447_v14 = vld [vmem:[%s20386_s1 + $0xf08] sm:$0xf]  ;;  %v11936_v19 = vor.u32 %v12943_v13, %v11935_v12 }
 0x286   : > { %v12854_v22 = vld [vmem:[%s20386_s1 + $0x884] sm:$0xf]  ;;  %v11100_v30 = vor.u32 %v12726_v18, %v11097_v21  ;;  %7294 = vmatpush.bf16.msrb.mxu0 %v10588_v27  ;;  %v13071_v15 = vld [vmem:[%s20386_s1 + $0xf44] sm:$0xf0]  ;;  %v11424_v18 = vor.u32 %v12815_v26, %v11423_v11 }
 0x287   : > { %v11609_v23 = vld [vmem:[%s20386_s1 + $0x8c0] sm:$0xf0]  ;;  %v12671_v21 = vld [vmem:[%s20386_s1 + $0x2c4] sm:$0xf0] }
 0x288   : > { %v12982_v24 = vld [vmem:[%s20386_s1 + $0xc84] sm:$0xf]  ;;  %v11612_v31 = vor.u32 %v12854_v22, %v11609_v23  ;;  %7332 = vmatpush.bf16.msrb.mxu3 %v12188_v20  ;;  %7307 = vmatpush.bf16.msrb.mxu1 %v11100_v30  ;;  %v10847_v20 = vld [vmem:[%s20386_s1 + $0x288] sm:$0xf]  ;;  %v12448_v23 = vor.u32 %v13071_v15, %v12447_v14 }
 0x289   : > { %v12121_v25 = vld [vmem:[%s20386_s1 + $0xcc0] sm:$0xf0]  ;;  %v11359_v22 = vld [vmem:[%s20386_s1 + $0x688] sm:$0xf]  ;;  %v10848_v30 = vor.u32 %v12671_v21, %v10847_v20  ;;  %v4541_v14 = vpop.f32.mrf.mxu2 }
 0x28a   : > { %v12582_v28 = vld [vmem:[%s20386_s1 + $0x4] sm:$0xf]  ;;  %v12124_v42 = vor.u32 %v12982_v24, %v12121_v25  ;;  %7320 = vmatpush.bf16.msrb.mxu2 %v11612_v31  ;;  %v12799_v24 = vld [vmem:[%s20386_s1 + $0x6c4] sm:$0xf0] }
 0x28b   : > { %v10521_v29 = vld [vmem:[%s20386_s1 + $0x40] sm:$0xf0]  ;;  %v11871_v25 = vld [vmem:[%s20386_s1 + $0xa88] sm:$0xf]  ;;  %v11360_v31 = vor.u32 %v12799_v24, %v11359_v22  ;;  %v4554_v21 = vpop.f32.mrf.mxu3 }
 0x28c   : > { %v12710_v32 = vld [vmem:[%s20386_s1 + $0x404] sm:$0xf]  ;;  %v10524_v52 = vor.u32 %v12582_v28, %v10521_v29  ;;  %7333 = vmatpush.bf16.msrb.mxu3 %v12124_v42  ;;  %v12927_v27 = vld [vmem:[%s20386_s1 + $0xac4] sm:$0xf0] }
 0x28d   : > { %v11033_v37 = vld [vmem:[%s20386_s1 + $0x440] sm:$0xf0]  ;;  %v12383_v28 = vld [vmem:[%s20386_s1 + $0xe88] sm:$0xf] }
 0x28e   : > { %v12838_v38 = vld [vmem:[%s20386_s1 + $0x804] sm:$0xf]  ;;  %v11036_v58 = vor.u32 %v12710_v32, %v11033_v37  ;;  %7295 = vmatpush.bf16.msrb.mxu0 %v10524_v52  ;;  %v13055_v29 = vld [vmem:[%s20386_s1 + $0xec4] sm:$0xf0]  ;;  %v11872_v32 = vor.u32 %v12927_v27, %v11871_v25  ;;  %v4517_v27 = vpop.f32.mrf.mxu0 }
 0x28f   : > { %v11545_v43 = vld [vmem:[%s20386_s1 + $0x840] sm:$0xf0]  ;;  %v10783_v37 = vld [vmem:[%s20386_s1 + $0x208] sm:$0xf]  ;;  %v12384_v42 = vor.u32 %v13055_v29, %v12383_v28  ;;  %v11425_v27 = vld [vmem:[%s20386_s1 + $0x748] sm:$0xf0] }
 0x290   : > { %v12966_v44 = vld [vmem:[%s20386_s1 + $0xc04] sm:$0xf]  ;;  %v11548_v61 = vor.u32 %v12838_v38, %v11545_v43  ;;  %7308 = vmatpush.bf16.msrb.mxu1 %v11036_v58  ;;  %v12655_v38 = vld [vmem:[%s20386_s1 + $0x244] sm:$0xf0] }
 0x291   : > { %v12057_v47 = vld [vmem:[%s20386_s1 + $0xc40] sm:$0xf0]  ;;  %7296 = vmatmul.bf16.vlgmr.msrb.gmra.mxu0 %v17170_v60  ;;  %v12783_v43 = vld [vmem:[%s20386_s1 + $0x644] sm:$0xf0]  ;;  %v10784_v50 = vor.u32 %v12655_v38, %v10783_v37 }
 0x292   : > { %v12060_v3 = vor.u32 %v12966_v44, %v12057_v47  ;;  %7321 = vmatpush.bf16.msrb.mxu2 %v11548_v61  ;;  %7340 = vmatpush.bf16.msra.mxu0 %v10976_v4  ;;  %v11807_v44 = vld [vmem:[%s20386_s1 + $0xa08] sm:$0xf]  ;;  %v11296_v52 = vor.u32 %v12783_v43, %v11295_v41  ;;  %v4528_v61 = vpop.f32.mrf.mxu1 }
 0x293   : > { %7309 = vmatmul.bf16.vlgmr.msrb.gmra.mxu1 %v17183_v2  ;;  %v12911_v47 = vld [vmem:[%s20386_s1 + $0xa44] sm:$0xf0] }
 0x294   : > { %7334 = vmatpush.bf16.msrb.mxu3 %v12060_v3  ;;  %7353 = vmatpush.bf16.msra.mxu1 %v11488_v6  ;;  %v13039_v49 = vld [vmem:[%s20386_s1 + $0xe44] sm:$0xf0]  ;;  %v11808_v55 = vor.u32 %v12911_v47, %v11807_v44  ;;  %v4529_v6 = vadd.f32 %v4528_v61, %v4515_v51 }
 0x295   : > { %7322 = vmatmul.bf16.vlgmr.msrb.gmra.mxu2 %v17181_v1  ;;  %v10719_v56 = vld [vmem:[%s20386_s1 + $0x188] sm:$0xf]  ;;  %v12320_v62 = vor.u32 %v13039_v49, %v12319_v48 }
 0x296   : > { %7366 = vmatpush.bf16.msra.mxu2 %v12000_v7  ;;  %7341 = vmatpush.bf16.msra.mxu0 %v10912_v17  ;;  %v12639_v57 = vld [vmem:[%s20386_s1 + $0x1c4] sm:$0xf0]  ;;  %v4542_v20 = vadd.f32 %v4541_v14, %v4529_v6  ;;  %v12695_v6 = vld [vmem:[%s20386_s1 + $0x38c] sm:$0xf] }
 0x297   : > { %7335 = vmatmul.bf16.vlgmr.msrb.gmra.mxu3 %v17191_v5  ;;  %v11231_v58 = vld [vmem:[%s20386_s1 + $0x588] sm:$0xf]  ;;  %v10720_v8 = vor.u32 %v12639_v57, %v10719_v56  ;;  %v13079_v14 = vld [vmem:[%s20386_s1 + $0xf8c] sm:$0xf] }
 0x298   : > { %7379 = vmatpush.bf16.msra.mxu3 %v12512_v9  ;;  %7354 = vmatpush.bf16.msra.mxu1 %v11424_v18  ;;  %v12767_v63 = vld [vmem:[%s20386_s1 + $0x5c4] sm:$0xf0]  ;;  %v17491_v25 = vadd.f32 %v4554_v21, %v4542_v20  ;;  %v12679_v21 = vld [vmem:[%s20386_s1 + $0x30c] sm:$0xf] }
 0x299   : > { %v11743_v3 = vld [vmem:[%s20386_s1 + $0x988] sm:$0xf]  ;;  %v11232_v11 = vor.u32 %v12767_v63, %v11231_v58  ;;  %v4543_v58 = vpop.f32.mrf.mxu2 }
 0x29a   : > { %7367 = vmatpush.bf16.msra.mxu2 %v11936_v19  ;;  %7342 = vmatpush.bf16.msra.mxu0 %v10848_v30  ;;  %v12895_v4 = vld [vmem:[%s20386_s1 + $0x9c4] sm:$0xf0]  ;;  %v4530_v37 = vpop.f32.mrf.mxu1  ;;  %v10785_v58 = vld [vmem:[%s20386_s1 + $0x248] sm:$0xf0] }
 0x29b   : > { %v12255_v7 = vld [vmem:[%s20386_s1 + $0xd88] sm:$0xf]  ;;  %v11744_v9 = vor.u32 %v12895_v4, %v11743_v3  ;;  %v4556_v4 = vpop.f32.mrf.mxu3 }
 0x29c   : > { %7380 = vmatpush.bf16.msra.mxu3 %v12448_v23  ;;  %7355 = vmatpush.bf16.msra.mxu1 %v11360_v31  ;;  %v13023_v10 = vld [vmem:[%s20386_s1 + $0xdc4] sm:$0xf0]  ;;  %v11809_v4 = vld [vmem:[%s20386_s1 + $0xa48] sm:$0xf0] }
 0x29d   : > { %v10655_v26 = vld [vmem:[%s20386_s1 + $0x108] sm:$0xf]  ;;  %v12256_v15 = vor.u32 %v13023_v10, %v12255_v7  ;;  %v10977_v7 = vld [vmem:[%s20386_s1 + $0x3c8] sm:$0xf0] }
 0x29e   : > { %7368 = vmatpush.bf16.msra.mxu2 %v11872_v32  ;;  %7343 = vmatpush.bf16.msra.mxu0 %v10784_v50  ;;  %v12623_v12 = vld [vmem:[%s20386_s1 + $0x144] sm:$0xf0]  ;;  %v12823_v10 = vld [vmem:[%s20386_s1 + $0x78c] sm:$0xf] }
 0x29f   : > { %v11167_v13 = vld [vmem:[%s20386_s1 + $0x508] sm:$0xf]  ;;  %v10656_v24 = vor.u32 %v12623_v12, %v10655_v26  ;;  %v12001_v26 = vld [vmem:[%s20386_s1 + $0xbc8] sm:$0xf0] }
 0x2a0   : > { %7381 = vmatpush.bf16.msra.mxu3 %v12384_v42  ;;  %7356 = vmatpush.bf16.msra.mxu1 %v11296_v52  ;;  %v12751_v17 = vld [vmem:[%s20386_s1 + $0x544] sm:$0xf0] }
 0x2a1   : > { %v11679_v18 = vld [vmem:[%s20386_s1 + $0x908] sm:$0xf]  ;;  %v11168_v28 = vor.u32 %v12751_v17, %v11167_v13 }
 0x2a2   : > { %7369 = vmatpush.bf16.msra.mxu2 %v11808_v55  ;;  %v12879_v19 = vld [vmem:[%s20386_s1 + $0x944] sm:$0xf0]  ;;  %7344 = vmatpush.bf16.msra.mxu0 %v10720_v8 }
 0x2a3   : > { %v12191_v22 = vld [vmem:[%s20386_s1 + $0xd08] sm:$0xf]  ;;  %v11680_v29 = vor.u32 %v12879_v19, %v11679_v18  ;;  %v10980_v18 = vor.u32 %v12695_v6, %v10977_v7  ;;  %v13031_v6 = vld [vmem:[%s20386_s1 + $0xe0c] sm:$0xf] }
 0x2a4   : > { %7382 = vmatpush.bf16.msra.mxu3 %v12320_v62  ;;  %v13007_v23 = vld [vmem:[%s20386_s1 + $0xd44] sm:$0xf0]  ;;  %7357 = vmatpush.bf16.msra.mxu1 %v11232_v11  ;;  %v11489_v11 = vld [vmem:[%s20386_s1 + $0x7c8] sm:$0xf0] }
 0x2a5   : > { %v10591_v30 = vld [vmem:[%s20386_s1 + $0x88] sm:$0xf]  ;;  %v12192_v38 = vor.u32 %v13007_v23, %v12191_v22  ;;  %v11492_v19 = vor.u32 %v12823_v10, %v11489_v11  ;;  %v10913_v22 = vld [vmem:[%s20386_s1 + $0x348] sm:$0xf0] }
 0x2a6   : > { %7370 = vmatpush.bf16.msra.mxu2 %v11744_v9  ;;  %v12607_v31 = vld [vmem:[%s20386_s1 + $0xc4] sm:$0xf0]  ;;  %7345 = vmatpush.bf16.msra.mxu0 %v10656_v24  ;;  %v12951_v9 = vld [vmem:[%s20386_s1 + $0xb8c] sm:$0xf] }
 0x2a7   : > { %v11103_v32 = vld [vmem:[%s20386_s1 + $0x488] sm:$0xf]  ;;  %v10592_v48 = vor.u32 %v12607_v31, %v10591_v30  ;;  %v12004_v20 = vor.u32 %v12951_v9, %v12001_v26  ;;  %v12807_v23 = vld [vmem:[%s20386_s1 + $0x70c] sm:$0xf] }
 0x2a8   : > { %7383 = vmatpush.bf16.msra.mxu3 %v12256_v15  ;;  %v12735_v41 = vld [vmem:[%s20386_s1 + $0x4c4] sm:$0xf0]  ;;  %7358 = vmatpush.bf16.msra.mxu1 %v11168_v28  ;;  %v12513_v15 = vld [vmem:[%s20386_s1 + $0xfc8] sm:$0xf0]  ;;  %v11428_v37 = vor.u32 %v12807_v23, %v11425_v27 }
 0x2a9   : > { %v11615_v42 = vld [vmem:[%s20386_s1 + $0x888] sm:$0xf]  ;;  %v11104_v51 = vor.u32 %v12735_v41, %v11103_v32  ;;  %v12516_v24 = vor.u32 %v13079_v14, %v12513_v15  ;;  %v12935_v28 = vld [vmem:[%s20386_s1 + $0xb0c] sm:$0xf]  ;;  %v10916_v32 = vor.u32 %v12679_v21, %v10913_v22  ;;  %v4580_v14 = vpop.f32.mrf.mxu1 }
 0x2aa   : > { %v12863_v43 = vld [vmem:[%s20386_s1 + $0x8c4] sm:$0xf0]  ;;  %7371 = vmatpush.bf16.msra.mxu2 %v11680_v29  ;;  %7346 = vmatpush.bf16.msra.mxu0 %v10592_v48  ;;  %v11937_v29 = vld [vmem:[%s20386_s1 + $0xb48] sm:$0xf0] }
 0x2ab   : > { %v12127_v44 = vld [vmem:[%s20386_s1 + $0xc88] sm:$0xf]  ;;  %v11616_v52 = vor.u32 %v12863_v43, %v11615_v42  ;;  %v13063_v30 = vld [vmem:[%s20386_s1 + $0xf0c] sm:$0xf] }
 0x2ac   : > { %v12991_v47 = vld [vmem:[%s20386_s1 + $0xcc4] sm:$0xf0]  ;;  %7384 = vmatpush.bf16.msra.mxu3 %v12192_v38  ;;  %7359 = vmatpush.bf16.msra.mxu1 %v11104_v51  ;;  %v12449_v31 = vld [vmem:[%s20386_s1 + $0xf48] sm:$0xf0]  ;;  %v11940_v38 = vor.u32 %v12935_v28, %v11937_v29 }
 0x2ad   : > { %v10527_v49 = vld [vmem:[%s20386_s1 + $0x8] sm:$0xf]  ;;  %v12128_v61 = vor.u32 %v12991_v47, %v12127_v44  ;;  %v12663_v41 = vld [vmem:[%s20386_s1 + $0x28c] sm:$0xf]  ;;  %v12452_v44 = vor.u32 %v13063_v30, %v12449_v31  ;;  %v4593_v31 = vpop.f32.mrf.mxu2 }
 0x2ae   : > { %v12591_v50 = vld [vmem:[%s20386_s1 + $0x44] sm:$0xf0]  ;;  %7372 = vmatpush.bf16.msra.mxu2 %v11616_v52  ;;  %v10849_v42 = vld [vmem:[%s20386_s1 + $0x2c8] sm:$0xf0] }
 0x2af   : > { %v11039_v55 = vld [vmem:[%s20386_s1 + $0x408] sm:$0xf]  ;;  %v10528_v8 = vor.u32 %v12591_v50, %v10527_v49  ;;  %v12791_v43 = vld [vmem:[%s20386_s1 + $0x68c] sm:$0xf]  ;;  %v10852_v52 = vor.u32 %v12663_v41, %v10849_v42 }
 0x2b0   : > { %v12719_v56 = vld [vmem:[%s20386_s1 + $0x444] sm:$0xf0]  ;;  %7385 = vmatpush.bf16.msra.mxu3 %v12128_v61  ;;  %v11361_v47 = vld [vmem:[%s20386_s1 + $0x6c8] sm:$0xf0] }
 0x2b1   : > { %v11551_v57 = vld [vmem:[%s20386_s1 + $0x808] sm:$0xf]  ;;  %v11040_v12 = vor.u32 %v12719_v56, %v11039_v55  ;;  %7347 = vmatpush.bf16.msra.mxu0 %v10528_v8  ;;  %v12919_v48 = vld [vmem:[%s20386_s1 + $0xa8c] sm:$0xf]  ;;  %v11364_v55 = vor.u32 %v12791_v43, %v11361_v47  ;;  %v4567_v8 = vpop.f32.mrf.mxu0  ;;  %v4606_v43 = vpop.f32.mrf.mxu3 }
 0x2b2   : > { %v12847_v62 = vld [vmem:[%s20386_s1 + $0x844] sm:$0xf0]  ;;  %v11873_v49 = vld [vmem:[%s20386_s1 + $0xac8] sm:$0xf0] }
 0x2b3   : > { %v12063_v63 = vld [vmem:[%s20386_s1 + $0xc08] sm:$0xf]  ;;  %v11552_v13 = vor.u32 %v12847_v62, %v11551_v57  ;;  %7360 = vmatpush.bf16.msra.mxu1 %v11040_v12  ;;  %v13047_v50 = vld [vmem:[%s20386_s1 + $0xe8c] sm:$0xf]  ;;  %v11876_v56 = vor.u32 %v12919_v48, %v11873_v49 }
 0x2b4   : > { %v12975_v3 = vld [vmem:[%s20386_s1 + $0xc44] sm:$0xf0]  ;;  %7348 = vmatmul.bf16.vlgmr.msra.gmra.mxu0 %v17170_v60  ;;  %v12385_v51 = vld [vmem:[%s20386_s1 + $0xec8] sm:$0xf0] }
 0x2b5   : > { %v12064_v17 = vor.u32 %v12975_v3, %v12063_v63  ;;  %7373 = vmatpush.bf16.msra.mxu2 %v11552_v13  ;;  %7392 = vmatpush.bf16.msrb.mxu0 %v10980_v18  ;;  %v12647_v57 = vld [vmem:[%s20386_s1 + $0x20c] sm:$0xf]  ;;  %v12388_v62 = vor.u32 %v13047_v50, %v12385_v51 }
 0x2b6   : > { %7361 = vmatmul.bf16.vlgmr.msra.gmra.mxu1 %v17183_v2  ;;  %v12775_v61 = vld [vmem:[%s20386_s1 + $0x60c] sm:$0xf]  ;;  %v10788_v10 = vor.u32 %v12647_v57, %v10785_v58  ;;  %v4582_v58 = vpop.f32.mrf.mxu1 }
 0x2b7   : > { %7386 = vmatpush.bf16.msra.mxu3 %v12064_v17  ;;  %7405 = vmatpush.bf16.msrb.mxu1 %v11492_v19  ;;  %v11297_v63 = vld [vmem:[%s20386_s1 + $0x648] sm:$0xf0] }
 0x2b8   : > { %7374 = vmatmul.bf16.vlgmr.msra.gmra.mxu2 %v17181_v1  ;;  %v12903_v3 = vld [vmem:[%s20386_s1 + $0xa0c] sm:$0xf]  ;;  %v11300_v11 = vor.u32 %v12775_v61, %v11297_v63 }
 0x2b9   : > { %7418 = vmatpush.bf16.msrb.mxu2 %v12004_v20  ;;  %7393 = vmatpush.bf16.msrb.mxu0 %v10916_v32  ;;  %v12321_v7 = vld [vmem:[%s20386_s1 + $0xe48] sm:$0xf0]  ;;  %v11812_v9 = vor.u32 %v12903_v3, %v11809_v4  ;;  %v4581_v20 = vadd.f32 %v4580_v14, %v4567_v8  ;;  %v4569_v50 = vpop.f32.mrf.mxu0  ;;  %v4595_v14 = vpop.f32.mrf.mxu2 }
 0x2ba   : > { %7387 = vmatmul.bf16.vlgmr.msra.gmra.mxu3 %v17191_v5  ;;  %v12631_v26 = vld [vmem:[%s20386_s1 + $0x18c] sm:$0xf]  ;;  %v12324_v15 = vor.u32 %v13031_v6, %v12321_v7  ;;  %v10791_v14 = vld [vmem:[%s20386_s1 + $0x210] sm:$0xf] }
 0x2bb   : > { %7431 = vmatpush.bf16.msrb.mxu3 %v12516_v24  ;;  %7406 = vmatpush.bf16.msrb.mxu1 %v11428_v37  ;;  %v10721_v12 = vld [vmem:[%s20386_s1 + $0x1c8] sm:$0xf0]  ;;  %v4594_v42 = vadd.f32 %v4593_v31, %v4581_v20  ;;  %v4608_v20 = vpop.f32.mrf.mxu3 }
 0x2bc   : > { %v12759_v13 = vld [vmem:[%s20386_s1 + $0x58c] sm:$0xf]  ;;  %v10724_v23 = vor.u32 %v12631_v26, %v10721_v12  ;;  %v11815_v20 = vld [vmem:[%s20386_s1 + $0xa10] sm:$0xf] }
 0x2bd   : > { %7419 = vmatpush.bf16.msrb.mxu2 %v11940_v38  ;;  %7394 = vmatpush.bf16.msrb.mxu0 %v10852_v52  ;;  %v11233_v17 = vld [vmem:[%s20386_s1 + $0x5c8] sm:$0xf0]  ;;  %v17689_v49 = vadd.f32 %v4606_v43, %v4594_v42 }
 0x2be   : > { %v12887_v18 = vld [vmem:[%s20386_s1 + $0x98c] sm:$0xf]  ;;  %v11236_v24 = vor.u32 %v12759_v13, %v11233_v17 }
 0x2bf   : > { %7432 = vmatpush.bf16.msrb.mxu3 %v12452_v44  ;;  %7407 = vmatpush.bf16.msrb.mxu1 %v11364_v55  ;;  %v11745_v19 = vld [vmem:[%s20386_s1 + $0x9c8] sm:$0xf0] }
 0x2c0   : > { %v13015_v21 = vld [vmem:[%s20386_s1 + $0xd8c] sm:$0xf]  ;;  %v11748_v27 = vor.u32 %v12887_v18, %v11745_v19 }
 0x2c1   : > { %7420 = vmatpush.bf16.msrb.mxu2 %v11876_v56  ;;  %v12257_v22 = vld [vmem:[%s20386_s1 + $0xdc8] sm:$0xf0]  ;;  %7395 = vmatpush.bf16.msrb.mxu0 %v10788_v10 }
 0x2c2   : > { %v12615_v28 = vld [vmem:[%s20386_s1 + $0x10c] sm:$0xf]  ;;  %v12260_v32 = vor.u32 %v13015_v21, %v12257_v22  ;;  %v10983_v21 = vld [vmem:[%s20386_s1 + $0x390] sm:$0xf] }
 0x2c3   : > { %7433 = vmatpush.bf16.msrb.mxu3 %v12388_v62  ;;  %7408 = vmatpush.bf16.msrb.mxu1 %v11300_v11  ;;  %v10657_v29 = vld [vmem:[%s20386_s1 + $0x148] sm:$0xf0]  ;;  %v12704_v22 = vld [vmem:[%s20386_s1 + $0x3cc] sm:$0xf0] }
 0x2c4   : > { %v12743_v30 = vld [vmem:[%s20386_s1 + $0x50c] sm:$0xf]  ;;  %v10660_v48 = vor.u32 %v12615_v28, %v10657_v29  ;;  %v12007_v28 = vld [vmem:[%s20386_s1 + $0xb90] sm:$0xf] }
 0x2c5   : > { %7421 = vmatpush.bf16.msrb.mxu2 %v11812_v9  ;;  %v11169_v37 = vld [vmem:[%s20386_s1 + $0x548] sm:$0xf0]  ;;  %7396 = vmatpush.bf16.msrb.mxu0 %v10724_v23  ;;  %v11495_v23 = vld [vmem:[%s20386_s1 + $0x790] sm:$0xf] }
 0x2c6   : > { %v12871_v38 = vld [vmem:[%s20386_s1 + $0x90c] sm:$0xf]  ;;  %v11172_v51 = vor.u32 %v12743_v30, %v11169_v37  ;;  %v12960_v29 = vld [vmem:[%s20386_s1 + $0xbcc] sm:$0xf0] }
 0x2c7   : > { %7434 = vmatpush.bf16.msrb.mxu3 %v12324_v15  ;;  %v11681_v41 = vld [vmem:[%s20386_s1 + $0x948] sm:$0xf0]  ;;  %7409 = vmatpush.bf16.msrb.mxu1 %v11236_v24  ;;  %v13088_v37 = vld [vmem:[%s20386_s1 + $0xfcc] sm:$0xf0]  ;;  %v12008_v43 = vor.u32 %v12960_v29, %v12007_v28  ;;  %v4632_v28 = vpop.f32.mrf.mxu1 }
 0x2c8   : > { %v12999_v44 = vld [vmem:[%s20386_s1 + $0xd0c] sm:$0xf]  ;;  %v11684_v52 = vor.u32 %v12871_v38, %v11681_v41  ;;  %v10984_v41 = vor.u32 %v12704_v22, %v10983_v21  ;;  %v12912_v21 = vld [vmem:[%s20386_s1 + $0xa4c] sm:$0xf0] }
 0x2c9   : > { %v12193_v47 = vld [vmem:[%s20386_s1 + $0xd48] sm:$0xf0]  ;;  %7422 = vmatpush.bf16.msrb.mxu2 %v11748_v27  ;;  %7397 = vmatpush.bf16.msrb.mxu0 %v10660_v48  ;;  %v12832_v27 = vld [vmem:[%s20386_s1 + $0x7cc] sm:$0xf0] }
 0x2ca   : > { %v12599_v55 = vld [vmem:[%s20386_s1 + $0x8c] sm:$0xf]  ;;  %v12196_v61 = vor.u32 %v12999_v44, %v12193_v47  ;;  %v11496_v42 = vor.u32 %v12832_v27, %v11495_v23  ;;  %v10919_v44 = vld [vmem:[%s20386_s1 + $0x310] sm:$0xf] }
 0x2cb   : > { %v10593_v56 = vld [vmem:[%s20386_s1 + $0xc8] sm:$0xf0]  ;;  %7435 = vmatpush.bf16.msrb.mxu3 %v12260_v32  ;;  %7410 = vmatpush.bf16.msrb.mxu1 %v11172_v51  ;;  %v12519_v32 = vld [vmem:[%s20386_s1 + $0xf90] sm:$0xf] }
 0x2cc   : > { %v12727_v57 = vld [vmem:[%s20386_s1 + $0x48c] sm:$0xf]  ;;  %v10596_v7 = vor.u32 %v12599_v55, %v10593_v56  ;;  %v12688_v47 = vld [vmem:[%s20386_s1 + $0x34c] sm:$0xf0]  ;;  %v12520_v50 = vor.u32 %v13088_v37, %v12519_v32 }
 0x2cd   : > { %v11105_v62 = vld [vmem:[%s20386_s1 + $0x4c8] sm:$0xf0]  ;;  %7423 = vmatpush.bf16.msrb.mxu2 %v11684_v52  ;;  %v11431_v48 = vld [vmem:[%s20386_s1 + $0x710] sm:$0xf]  ;;  %v10920_v58 = vor.u32 %v12688_v47, %v10919_v44 }
 0x2ce   : > { %v12855_v63 = vld [vmem:[%s20386_s1 + $0x88c] sm:$0xf]  ;;  %v11108_v11 = vor.u32 %v12727_v57, %v11105_v62  ;;  %7398 = vmatpush.bf16.msrb.mxu0 %v10596_v7  ;;  %v12816_v51 = vld [vmem:[%s20386_s1 + $0x74c] sm:$0xf0] }
 0x2cf   : > { %v11617_v3 = vld [vmem:[%s20386_s1 + $0x8c8] sm:$0xf0]  ;;  %7436 = vmatpush.bf16.msrb.mxu3 %v12196_v61  ;;  %v11943_v52 = vld [vmem:[%s20386_s1 + $0xb10] sm:$0xf]  ;;  %v11432_v61 = vor.u32 %v12816_v51, %v11431_v48 }
 0x2d0   : > { %v12983_v4 = vld [vmem:[%s20386_s1 + $0xc8c] sm:$0xf]  ;;  %v11620_v9 = vor.u32 %v12855_v63, %v11617_v3  ;;  %7411 = vmatpush.bf16.msrb.mxu1 %v11108_v11  ;;  %v12944_v55 = vld [vmem:[%s20386_s1 + $0xb4c] sm:$0xf0] }
 0x2d1   : > { %v12129_v6 = vld [vmem:[%s20386_s1 + $0xcc8] sm:$0xf0]  ;;  %v12455_v56 = vld [vmem:[%s20386_s1 + $0xf10] sm:$0xf]  ;;  %v11944_v62 = vor.u32 %v12944_v55, %v11943_v52 }
 0x2d2   : > { %v12583_v10 = vld [vmem:[%s20386_s1 + $0xc] sm:$0xf]  ;;  %v12132_v15 = vor.u32 %v12983_v4, %v12129_v6  ;;  %7424 = vmatpush.bf16.msrb.mxu2 %v11620_v9  ;;  %v13072_v57 = vld [vmem:[%s20386_s1 + $0xf4c] sm:$0xf0] }
 0x2d3   : > { %v10529_v8 = vld [vmem:[%s20386_s1 + $0x48] sm:$0xf0]  ;;  %v10855_v63 = vld [vmem:[%s20386_s1 + $0x290] sm:$0xf]  ;;  %v12456_v6 = vor.u32 %v13072_v57, %v12455_v56 }
 0x2d4   : > { %v12711_v26 = vld [vmem:[%s20386_s1 + $0x40c] sm:$0xf]  ;;  %v10532_v24 = vor.u32 %v12583_v10, %v10529_v8  ;;  %7437 = vmatpush.bf16.msrb.mxu3 %v12132_v15  ;;  %v12672_v3 = vld [vmem:[%s20386_s1 + $0x2cc] sm:$0xf0] }
 0x2d5   : > { %v11041_v12 = vld [vmem:[%s20386_s1 + $0x448] sm:$0xf0]  ;;  %v11367_v4 = vld [vmem:[%s20386_s1 + $0x690] sm:$0xf] }
 0x2d6   : > { %v12839_v13 = vld [vmem:[%s20386_s1 + $0x80c] sm:$0xf]  ;;  %v11044_v30 = vor.u32 %v12711_v26, %v11041_v12  ;;  %7399 = vmatpush.bf16.msrb.mxu0 %v10532_v24  ;;  %v12800_v7 = vld [vmem:[%s20386_s1 + $0x6cc] sm:$0xf0]  ;;  %v10856_v26 = vor.u32 %v12672_v3, %v10855_v63  ;;  %v4619_v24 = vpop.f32.mrf.mxu0  ;;  %v4645_v3 = vpop.f32.mrf.mxu2 }
 0x2d7   : > { %v11553_v17 = vld [vmem:[%s20386_s1 + $0x848] sm:$0xf0]  ;;  %v11879_v10 = vld [vmem:[%s20386_s1 + $0xa90] sm:$0xf]  ;;  %v11368_v12 = vor.u32 %v12800_v7, %v11367_v4 }
 0x2d8   : > { %v12967_v18 = vld [vmem:[%s20386_s1 + $0xc0c] sm:$0xf]  ;;  %v11556_v31 = vor.u32 %v12839_v13, %v11553_v17  ;;  %7412 = vmatpush.bf16.msrb.mxu1 %v11044_v30  ;;  %v12928_v8 = vld [vmem:[%s20386_s1 + $0xacc] sm:$0xf0]  ;;  %v11816_v30 = vor.u32 %v12912_v21, %v11815_v20 }
 0x2d9   : > { %v12065_v19 = vld [vmem:[%s20386_s1 + $0xc48] sm:$0xf0]  ;;  %7400 = vmatmul.bf16.vlgmr.msrb.gmra.mxu0 %v17170_v60  ;;  %v12391_v11 = vld [vmem:[%s20386_s1 + $0xe90] sm:$0xf]  ;;  %v11880_v13 = vor.u32 %v12928_v8, %v11879_v10  ;;  %v4658_v8 = vpop.f32.mrf.mxu3 }
 0x2da   : > { %v12068_v38 = vor.u32 %v12967_v18, %v12065_v19  ;;  %7425 = vmatpush.bf16.msrb.mxu2 %v11556_v31  ;;  %7444 = vmatpush.bf16.msra.mxu0 %v10984_v41  ;;  %v13056_v9 = vld [vmem:[%s20386_s1 + $0xecc] sm:$0xf0] }
 0x2db   : > { %7413 = vmatmul.bf16.vlgmr.msrb.gmra.mxu1 %v17183_v2  ;;  %v12656_v15 = vld [vmem:[%s20386_s1 + $0x24c] sm:$0xf0]  ;;  %v12392_v18 = vor.u32 %v13056_v9, %v12391_v11  ;;  %v4634_v9 = vpop.f32.mrf.mxu1 }
 0x2dc   : > { %7438 = vmatpush.bf16.msrb.mxu3 %v12068_v38  ;;  %7457 = vmatpush.bf16.msra.mxu1 %v11496_v42  ;;  %v11303_v17 = vld [vmem:[%s20386_s1 + $0x610] sm:$0xf]  ;;  %v10792_v27 = vor.u32 %v12656_v15, %v10791_v14  ;;  %v4633_v38 = vadd.f32 %v4632_v28, %v4619_v24 }
 0x2dd   : > { %7426 = vmatmul.bf16.vlgmr.msrb.gmra.mxu2 %v17181_v1  ;;  %v12784_v19 = vld [vmem:[%s20386_s1 + $0x64c] sm:$0xf0] }
 0x2de   : > { %7470 = vmatpush.bf16.msra.mxu2 %v12008_v43  ;;  %7445 = vmatpush.bf16.msra.mxu0 %v10920_v58  ;;  %v12327_v22 = vld [vmem:[%s20386_s1 + $0xe10] sm:$0xf]  ;;  %v11304_v29 = vor.u32 %v12784_v19, %v11303_v17  ;;  %v4646_v7 = vadd.f32 %v4645_v3, %v4633_v38  ;;  %v4621_v10 = vpop.f32.mrf.mxu0 }
 0x2df   : > { %7439 = vmatmul.bf16.vlgmr.msrb.gmra.mxu3 %v17191_v5  ;;  %v13040_v23 = vld [vmem:[%s20386_s1 + $0xe4c] sm:$0xf0]  ;;  %v12680_v10 = vld [vmem:[%s20386_s1 + $0x314] sm:$0xf] }
 0x2e0   : > { %7483 = vmatpush.bf16.msra.mxu3 %v12520_v50  ;;  %7458 = vmatpush.bf16.msra.mxu1 %v11432_v61  ;;  %v10727_v31 = vld [vmem:[%s20386_s1 + $0x190] sm:$0xf]  ;;  %v12328_v41 = vor.u32 %v13040_v23, %v12327_v22  ;;  %v17896_v17 = vadd.f32 %v4658_v8, %v4646_v7  ;;  %v10921_v8 = vld [vmem:[%s20386_s1 + $0x350] sm:$0xf0] }
 0x2e1   : > { %v12640_v32 = vld [vmem:[%s20386_s1 + $0x1cc] sm:$0xf0] }
 0x2e2   : > { %7471 = vmatpush.bf16.msra.mxu2 %v11944_v62  ;;  %7446 = vmatpush.bf16.msra.mxu0 %v10856_v26  ;;  %v11239_v37 = vld [vmem:[%s20386_s1 + $0x590] sm:$0xf]  ;;  %v10728_v50 = vor.u32 %v12640_v32, %v10727_v31 }
 0x2e3   : > { %v12768_v42 = vld [vmem:[%s20386_s1 + $0x5cc] sm:$0xf0] }
 0x2e4   : > { %7484 = vmatpush.bf16.msra.mxu3 %v12456_v6  ;;  %7459 = vmatpush.bf16.msra.mxu1 %v11368_v12  ;;  %v11751_v43 = vld [vmem:[%s20386_s1 + $0x990] sm:$0xf]  ;;  %v11240_v51 = vor.u32 %v12768_v42, %v11239_v37 }
 0x2e5   : > { %v12896_v44 = vld [vmem:[%s20386_s1 + $0x9cc] sm:$0xf0] }
 0x2e6   : > { %7472 = vmatpush.bf16.msra.mxu2 %v11880_v13  ;;  %v12263_v47 = vld [vmem:[%s20386_s1 + $0xd90] sm:$0xf]  ;;  %7447 = vmatpush.bf16.msra.mxu0 %v10792_v27  ;;  %v11752_v52 = vor.u32 %v12896_v44, %v11751_v43  ;;  %v4647_v44 = vpop.f32.mrf.mxu2 }
 0x2e7   : > { %v13024_v48 = vld [vmem:[%s20386_s1 + $0xdcc] sm:$0xf0] }
 0x2e8   : > { %7485 = vmatpush.bf16.msra.mxu3 %v12392_v18  ;;  %7460 = vmatpush.bf16.msra.mxu1 %v11304_v29  ;;  %v10663_v55 = vld [vmem:[%s20386_s1 + $0x110] sm:$0xf]  ;;  %v12264_v58 = vor.u32 %v13024_v48, %v12263_v47  ;;  %v12696_v47 = vld [vmem:[%s20386_s1 + $0x394] sm:$0xf] }
 0x2e9   : > { %v12624_v56 = vld [vmem:[%s20386_s1 + $0x14c] sm:$0xf0]  ;;  %v10985_v48 = vld [vmem:[%s20386_s1 + $0x3d0] sm:$0xf0] }
 0x2ea   : > { %7473 = vmatpush.bf16.msra.mxu2 %v11816_v30  ;;  %v11175_v57 = vld [vmem:[%s20386_s1 + $0x510] sm:$0xf]  ;;  %7448 = vmatpush.bf16.msra.mxu0 %v10728_v50  ;;  %v10664_v11 = vor.u32 %v12624_v56, %v10663_v55  ;;  %v12824_v50 = vld [vmem:[%s20386_s1 + $0x794] sm:$0xf] }
 0x2eb   : > { %v12752_v61 = vld [vmem:[%s20386_s1 + $0x54c] sm:$0xf0]  ;;  %v11497_v55 = vld [vmem:[%s20386_s1 + $0x7d0] sm:$0xf0] }
 0x2ec   : > { %7486 = vmatpush.bf16.msra.mxu3 %v12328_v41  ;;  %v11687_v62 = vld [vmem:[%s20386_s1 + $0x910] sm:$0xf]  ;;  %7461 = vmatpush.bf16.msra.mxu1 %v11240_v51  ;;  %v11176_v26 = vor.u32 %v12752_v61, %v11175_v57  ;;  %v4660_v51 = vpop.f32.mrf.mxu3  ;;  %v12952_v56 = vld [vmem:[%s20386_s1 + $0xb94] sm:$0xf] }
 0x2ed   : > { %v12880_v63 = vld [vmem:[%s20386_s1 + $0x94c] sm:$0xf0]  ;;  %v12009_v57 = vld [vmem:[%s20386_s1 + $0xbd0] sm:$0xf0]  ;;  %v7245_v51 = vpop.f32.mrf.mxu0 }
 0x2ee   : > { %v12199_v4 = vld [vmem:[%s20386_s1 + $0xd10] sm:$0xf]  ;;  %7474 = vmatpush.bf16.msra.mxu2 %v11752_v52  ;;  %v11688_v12 = vor.u32 %v12880_v63, %v11687_v62  ;;  %7449 = vmatpush.bf16.msra.mxu0 %v10664_v11  ;;  %v13080_v62 = vld [vmem:[%s20386_s1 + $0xf94] sm:$0xf]  ;;  %v12012_v7 = vor.u32 %v12952_v56, %v12009_v57  ;;  %v7246_v56 = vadd.f32 %v7245_v51, %v14946_v36 }
 0x2ef   : > { %v13008_v6 = vld [vmem:[%s20386_s1 + $0xd4c] sm:$0xf0]  ;;  %v12521_v63 = vld [vmem:[%s20386_s1 + $0xfd0] sm:$0xf0] }
 0x2f0   : > { %v10599_v13 = vld [vmem:[%s20386_s1 + $0x90] sm:$0xf]  ;;  %7487 = vmatpush.bf16.msra.mxu3 %v12264_v58  ;;  %v12200_v18 = vor.u32 %v13008_v6, %v12199_v4  ;;  %7462 = vmatpush.bf16.msra.mxu1 %v11176_v26  ;;  %v10988_v4 = vor.u32 %v12696_v47, %v10985_v48  ;;  %v11500_v6 = vor.u32 %v12824_v50, %v11497_v55  ;;  %v12808_v11 = vld [vmem:[%s20386_s1 + $0x714] sm:$0xf] }
 0x2f1   : > { %v12608_v14 = vld [vmem:[%s20386_s1 + $0xcc] sm:$0xf0]  ;;  %v12524_v9 = vor.u32 %v13080_v62, %v12521_v63  ;;  %v11433_v26 = vld [vmem:[%s20386_s1 + $0x750] sm:$0xf0] }
 0x2f2   : > { %v11111_v15 = vld [vmem:[%s20386_s1 + $0x490] sm:$0xf]  ;;  %v10600_v24 = vor.u32 %v12608_v14, %v10599_v13  ;;  %7475 = vmatpush.bf16.msra.mxu2 %v11688_v12  ;;  %v12936_v12 = vld [vmem:[%s20386_s1 + $0xb14] sm:$0xf] }
 0x2f3   : > { %v12736_v19 = vld [vmem:[%s20386_s1 + $0x4cc] sm:$0xf0]  ;;  %v11945_v13 = vld [vmem:[%s20386_s1 + $0xb50] sm:$0xf0] }
 0x2f4   : > { %v11623_v20 = vld [vmem:[%s20386_s1 + $0x890] sm:$0xf]  ;;  %v11112_v29 = vor.u32 %v12736_v19, %v11111_v15  ;;  %7488 = vmatpush.bf16.msra.mxu3 %v12200_v18  ;;  %7450 = vmatpush.bf16.msra.mxu0 %v10600_v24  ;;  %v13064_v14 = vld [vmem:[%s20386_s1 + $0xf14] sm:$0xf]  ;;  %v10924_v18 = vor.u32 %v12680_v10, %v10921_v8  ;;  %v11436_v19 = vor.u32 %v12808_v11, %v11433_v26 }
 0x2f5   : > { %v12864_v21 = vld [vmem:[%s20386_s1 + $0x8cc] sm:$0xf0]  ;;  %v12457_v15 = vld [vmem:[%s20386_s1 + $0xf50] sm:$0xf0] }
 0x2f6   : > { %v12135_v22 = vld [vmem:[%s20386_s1 + $0xc90] sm:$0xf]  ;;  %v11624_v30 = vor.u32 %v12864_v21, %v11623_v20  ;;  %7463 = vmatpush.bf16.msra.mxu1 %v11112_v29  ;;  %v11948_v20 = vor.u32 %v12936_v12, %v11945_v13  ;;  %v12664_v21 = vld [vmem:[%s20386_s1 + $0x294] sm:$0xf]  ;;  %v12460_v24 = vor.u32 %v13064_v14, %v12457_v15 }
 0x2f7   : > { %v12992_v23 = vld [vmem:[%s20386_s1 + $0xccc] sm:$0xf0]  ;;  %v11881_v29 = vld [vmem:[%s20386_s1 + $0xad0] sm:$0xf0] }
 0x2f8   : > { %v10535_v27 = vld [vmem:[%s20386_s1 + $0x10] sm:$0xf]  ;;  %v12136_v38 = vor.u32 %v12992_v23, %v12135_v22  ;;  %7476 = vmatpush.bf16.msra.mxu2 %v11624_v30  ;;  %v10857_v22 = vld [vmem:[%s20386_s1 + $0x2d0] sm:$0xf0] }
 0x2f9   : > { %v12592_v28 = vld [vmem:[%s20386_s1 + $0x4c] sm:$0xf0]  ;;  %v12792_v23 = vld [vmem:[%s20386_s1 + $0x694] sm:$0xf] }
 0x2fa   : > { %v11047_v31 = vld [vmem:[%s20386_s1 + $0x410] sm:$0xf]  ;;  %v10536_v52 = vor.u32 %v12592_v28, %v10535_v27  ;;  %7489 = vmatpush.bf16.msra.mxu3 %v12136_v38  ;;  %v11369_v27 = vld [vmem:[%s20386_s1 + $0x6d0] sm:$0xf0] }
 0x2fb   : > { %v12720_v32 = vld [vmem:[%s20386_s1 + $0x44c] sm:$0xf0]  ;;  %v12920_v28 = vld [vmem:[%s20386_s1 + $0xa94] sm:$0xf] }
 0x2fc   : > { %v11559_v37 = vld [vmem:[%s20386_s1 + $0x810] sm:$0xf]  ;;  %v11048_v58 = vor.u32 %v12720_v32, %v11047_v31  ;;  %7451 = vmatpush.bf16.msra.mxu0 %v10536_v52  ;;  %v13048_v30 = vld [vmem:[%s20386_s1 + $0xe94] sm:$0xf]  ;;  %v10860_v32 = vor.u32 %v12664_v21, %v10857_v22  ;;  %v11884_v38 = vor.u32 %v12920_v28, %v11881_v29 }
 0x2fd   : > { %v12848_v41 = vld [vmem:[%s20386_s1 + $0x84c] sm:$0xf0]  ;;  %v12393_v31 = vld [vmem:[%s20386_s1 + $0xed0] sm:$0xf0] }
 0x2fe   : > { %v12071_v42 = vld [vmem:[%s20386_s1 + $0xc10] sm:$0xf]  ;;  %v11560_v61 = vor.u32 %v12848_v41, %v11559_v37  ;;  %7464 = vmatpush.bf16.msra.mxu1 %v11048_v58  ;;  %v11372_v37 = vor.u32 %v12792_v23, %v11369_v27  ;;  %v12648_v41 = vld [vmem:[%s20386_s1 + $0x214] sm:$0xf]  ;;  %v12396_v44 = vor.u32 %v13048_v30, %v12393_v31  ;;  %v7258_v58 = vpop.f32.mrf.mxu1  ;;  %v7284_v27 = vpop.f32.mrf.mxu3 }
 0x2ff   : > { %v12976_v43 = vld [vmem:[%s20386_s1 + $0xc4c] sm:$0xf0]  ;;  %7452 = vmatmul.bf16.vlgmr.msra.gmra.mxu0 %v17170_v60  ;;  %v11305_v47 = vld [vmem:[%s20386_s1 + $0x650] sm:$0xf0]  ;;  %v7247_v30 = vpop.f32.mrf.mxu0 }
 0x300   : > { %v12072_v3 = vor.u32 %v12976_v43, %v12071_v42  ;;  %7477 = vmatpush.bf16.msra.mxu2 %v11560_v61  ;;  %7496 = vmatpush.bf16.msrb.mxu0 %v10988_v4  ;;  %v10793_v42 = vld [vmem:[%s20386_s1 + $0x250] sm:$0xf0]  ;;  %v12689_v30 = vld [vmem:[%s20386_s1 + $0x354] sm:$0xf0] }
 0x301   : > { %7465 = vmatmul.bf16.vlgmr.msra.gmra.mxu1 %v17183_v2  ;;  %v12776_v43 = vld [vmem:[%s20386_s1 + $0x614] sm:$0xf]  ;;  %v10796_v57 = vor.u32 %v12648_v41, %v10793_v42 }
 0x302   : > { %7490 = vmatpush.bf16.msra.mxu3 %v12072_v3  ;;  %7509 = vmatpush.bf16.msrb.mxu1 %v11500_v6  ;;  %v12904_v48 = vld [vmem:[%s20386_s1 + $0xa14] sm:$0xf]  ;;  %v11308_v61 = vor.u32 %v12776_v43, %v11305_v47  ;;  %v7259_v6 = vadd.f32 %v7258_v58, %v7246_v56 }
 0x303   : > { %7478 = vmatmul.bf16.vlgmr.msra.gmra.mxu2 %v17181_v1  ;;  %v11817_v50 = vld [vmem:[%s20386_s1 + $0xa50] sm:$0xf0] }
 0x304   : > { %7522 = vmatpush.bf16.msrb.mxu2 %v12012_v7  ;;  %7497 = vmatpush.bf16.msrb.mxu0 %v10924_v18  ;;  %v13032_v52 = vld [vmem:[%s20386_s1 + $0xe14] sm:$0xf]  ;;  %v11820_v62 = vor.u32 %v12904_v48, %v11817_v50 }
 0x305   : > { %7491 = vmatmul.bf16.vlgmr.msra.gmra.mxu3 %v17191_v5  ;;  %v12329_v55 = vld [vmem:[%s20386_s1 + $0xe50] sm:$0xf0] }
 0x306   : > { %7535 = vmatpush.bf16.msrb.mxu3 %v12524_v9  ;;  %7510 = vmatpush.bf16.msrb.mxu1 %v11436_v19  ;;  %v12632_v63 = vld [vmem:[%s20386_s1 + $0x194] sm:$0xf]  ;;  %v12332_v36 = vor.u32 %v13032_v52, %v12329_v55 }
 0x307   : > { %v10729_v3 = vld [vmem:[%s20386_s1 + $0x1d0] sm:$0xf0] }
 0x308   : > { %7523 = vmatpush.bf16.msrb.mxu2 %v11948_v20  ;;  %7498 = vmatpush.bf16.msrb.mxu0 %v10860_v32  ;;  %v12760_v4 = vld [vmem:[%s20386_s1 + $0x594] sm:$0xf]  ;;  %v10732_v26 = vor.u32 %v12632_v63, %v10729_v3  ;;  %v7271_v20 = vpop.f32.mrf.mxu2  ;;  %v7260_v32 = vpop.f32.mrf.mxu1 }
 0x309   : > { %v11241_v7 = vld [vmem:[%s20386_s1 + $0x5d0] sm:$0xf0] }
 0x30a   : > { %7536 = vmatpush.bf16.msrb.mxu3 %v12460_v24  ;;  %7511 = vmatpush.bf16.msrb.mxu1 %v11372_v37  ;;  %v12888_v10 = vld [vmem:[%s20386_s1 + $0x994] sm:$0xf]  ;;  %v11244_v12 = vor.u32 %v12760_v4, %v11241_v7  ;;  %v7272_v24 = vadd.f32 %v7271_v20, %v7259_v6 }
 0x30b   : > { %v11753_v8 = vld [vmem:[%s20386_s1 + $0x9d0] sm:$0xf0] }
 0x30c   : > { %7524 = vmatpush.bf16.msrb.mxu2 %v11884_v38  ;;  %v13016_v11 = vld [vmem:[%s20386_s1 + $0xd94] sm:$0xf]  ;;  %7499 = vmatpush.bf16.msrb.mxu0 %v10796_v57  ;;  %v11756_v13 = vor.u32 %v12888_v10, %v11753_v8  ;;  %v18086_v37 = vadd.f32 %v7284_v27, %v7272_v24 }
 0x30d   : > { %v12265_v9 = vld [vmem:[%s20386_s1 + $0xdd0] sm:$0xf0] }
 0x30e   : > { %7537 = vmatpush.bf16.msrb.mxu3 %v12396_v44  ;;  %7512 = vmatpush.bf16.msrb.mxu1 %v11308_v61  ;;  %v12616_v14 = vld [vmem:[%s20386_s1 + $0x114] sm:$0xf]  ;;  %v12268_v19 = vor.u32 %v13016_v11, %v12265_v9  ;;  %v10991_v11 = vld [vmem:[%s20386_s1 + $0x398] sm:$0xf] }
 0x30f   : > { %v10665_v15 = vld [vmem:[%s20386_s1 + $0x150] sm:$0xf0]  ;;  %v12705_v9 = vld [vmem:[%s20386_s1 + $0x3d4] sm:$0xf0] }
 0x310   : > { %7525 = vmatpush.bf16.msrb.mxu2 %v11820_v62  ;;  %v12744_v18 = vld [vmem:[%s20386_s1 + $0x514] sm:$0xf]  ;;  %7500 = vmatpush.bf16.msrb.mxu0 %v10732_v26  ;;  %v10668_v31 = vor.u32 %v12616_v14, %v10665_v15  ;;  %v7273_v8 = vpop.f32.mrf.mxu2  ;;  %v11503_v26 = vld [vmem:[%s20386_s1 + $0x798] sm:$0xf]  ;;  %v10992_v24 = vor.u32 %v12705_v9, %v10991_v11 }
 0x311   : > { %v11177_v21 = vld [vmem:[%s20386_s1 + $0x550] sm:$0xf0]  ;;  %v12833_v14 = vld [vmem:[%s20386_s1 + $0x7d4] sm:$0xf0] }
 0x312   : > { %7538 = vmatpush.bf16.msrb.mxu3 %v12332_v36  ;;  %v12872_v22 = vld [vmem:[%s20386_s1 + $0x914] sm:$0xf]  ;;  %7513 = vmatpush.bf16.msrb.mxu1 %v11244_v12  ;;  %v11180_v38 = vor.u32 %v12744_v18, %v11177_v21  ;;  %v7286_v12 = vpop.f32.mrf.mxu3  ;;  %v12015_v15 = vld [vmem:[%s20386_s1 + $0xb98] sm:$0xf]  ;;  %v11504_v27 = vor.u32 %v12833_v14, %v11503_v26 }
 0x313   : > { %v11689_v23 = vld [vmem:[%s20386_s1 + $0x950] sm:$0xf0]  ;;  %v12961_v18 = vld [vmem:[%s20386_s1 + $0xbd4] sm:$0xf0]  ;;  %v7297_v12 = vpop.f32.mrf.mxu0 }
 0x314   : > { %v13000_v28 = vld [vmem:[%s20386_s1 + $0xd14] sm:$0xf]  ;;  %7526 = vmatpush.bf16.msrb.mxu2 %v11756_v13  ;;  %v11692_v41 = vor.u32 %v12872_v22, %v11689_v23  ;;  %7501 = vmatpush.bf16.msrb.mxu0 %v10668_v31  ;;  %v12527_v21 = vld [vmem:[%s20386_s1 + $0xf98] sm:$0xf] }
 0x315   : > { %v12201_v29 = vld [vmem:[%s20386_s1 + $0xd50] sm:$0xf0]  ;;  %v13089_v22 = vld [vmem:[%s20386_s1 + $0xfd4] sm:$0xf0] }
 0x316   : > { %v12600_v42 = vld [vmem:[%s20386_s1 + $0x94] sm:$0xf]  ;;  %7539 = vmatpush.bf16.msrb.mxu3 %v12268_v19  ;;  %v12204_v47 = vor.u32 %v13000_v28, %v12201_v29  ;;  %7514 = vmatpush.bf16.msrb.mxu1 %v11180_v38  ;;  %v12016_v28 = vor.u32 %v12961_v18, %v12015_v15  ;;  %v10927_v29 = vld [vmem:[%s20386_s1 + $0x318] sm:$0xf]  ;;  %v12528_v32 = vor.u32 %v13089_v22, %v12527_v21 }
 0x317   : > { %v10601_v43 = vld [vmem:[%s20386_s1 + $0xd0] sm:$0xf0]  ;;  %v11439_v31 = vld [vmem:[%s20386_s1 + $0x718] sm:$0xf]  ;;  %v7298_v15 = vadd.f32 %v7297_v12, %v15105_v0 }
 0x318   : > { %v12728_v44 = vld [vmem:[%s20386_s1 + $0x494] sm:$0xf]  ;;  %v10604_v56 = vor.u32 %v12600_v42, %v10601_v43  ;;  %7527 = vmatpush.bf16.msrb.mxu2 %v11692_v41  ;;  %v12817_v38 = vld [vmem:[%s20386_s1 + $0x754] sm:$0xf0] }
 0x319   : > { %v11113_v48 = vld [vmem:[%s20386_s1 + $0x4d0] sm:$0xf0]  ;;  %v11951_v41 = vld [vmem:[%s20386_s1 + $0xb18] sm:$0xf] }
 0x31a   : > { %v12856_v50 = vld [vmem:[%s20386_s1 + $0x894] sm:$0xf]  ;;  %v11116_v61 = vor.u32 %v12728_v44, %v11113_v48  ;;  %7540 = vmatpush.bf16.msrb.mxu3 %v12204_v47  ;;  %7502 = vmatpush.bf16.msrb.mxu0 %v10604_v56  ;;  %v12945_v42 = vld [vmem:[%s20386_s1 + $0xb54] sm:$0xf0]  ;;  %v10928_v47 = vor.u32 %v12689_v30, %v10927_v29  ;;  %v11440_v48 = vor.u32 %v12817_v38, %v11439_v31 }
 0x31b   : > { %v11625_v51 = vld [vmem:[%s20386_s1 + $0x8d0] sm:$0xf0]  ;;  %v12463_v43 = vld [vmem:[%s20386_s1 + $0xf18] sm:$0xf] }
 0x31c   : > { %v12984_v52 = vld [vmem:[%s20386_s1 + $0xc94] sm:$0xf]  ;;  %v11628_v62 = vor.u32 %v12856_v50, %v11625_v51  ;;  %7515 = vmatpush.bf16.msrb.mxu1 %v11116_v61  ;;  %v13073_v44 = vld [vmem:[%s20386_s1 + $0xf54] sm:$0xf0]  ;;  %v11952_v50 = vor.u32 %v12945_v42, %v11951_v41 }
 0x31d   : > { %v12137_v55 = vld [vmem:[%s20386_s1 + $0xcd0] sm:$0xf0]  ;;  %v10863_v51 = vld [vmem:[%s20386_s1 + $0x298] sm:$0xf]  ;;  %v12464_v56 = vor.u32 %v13073_v44, %v12463_v43 }
 0x31e   : > { %v12584_v57 = vld [vmem:[%s20386_s1 + $0x14] sm:$0xf]  ;;  %v12140_v36 = vor.u32 %v12984_v52, %v12137_v55  ;;  %7528 = vmatpush.bf16.msrb.mxu2 %v11628_v62  ;;  %v12673_v52 = vld [vmem:[%s20386_s1 + $0x2d4] sm:$0xf0] }
 0x31f   : > { %v10537_v58 = vld [vmem:[%s20386_s1 + $0x50] sm:$0xf0]  ;;  %v11375_v55 = vld [vmem:[%s20386_s1 + $0x698] sm:$0xf] }
 0x320   : > { %v12712_v63 = vld [vmem:[%s20386_s1 + $0x414] sm:$0xf]  ;;  %v10540_v13 = vor.u32 %v12584_v57, %v10537_v58  ;;  %7541 = vmatpush.bf16.msrb.mxu3 %v12140_v36  ;;  %v12801_v57 = vld [vmem:[%s20386_s1 + $0x6d4] sm:$0xf0] }
 0x321   : > { %v11049_v3 = vld [vmem:[%s20386_s1 + $0x450] sm:$0xf0]  ;;  %v11887_v58 = vld [vmem:[%s20386_s1 + $0xa98] sm:$0xf] }
 0x322   : > { %v12840_v4 = vld [vmem:[%s20386_s1 + $0x814] sm:$0xf]  ;;  %v11052_v19 = vor.u32 %v12712_v63, %v11049_v3  ;;  %7503 = vmatpush.bf16.msrb.mxu0 %v10540_v13  ;;  %v12929_v61 = vld [vmem:[%s20386_s1 + $0xad4] sm:$0xf0]  ;;  %v10864_v3 = vor.u32 %v12673_v52, %v10863_v51 }
 0x323   : > { %v11561_v6 = vld [vmem:[%s20386_s1 + $0x850] sm:$0xf0]  ;;  %v12399_v62 = vld [vmem:[%s20386_s1 + $0xe98] sm:$0xf]  ;;  %v11888_v36 = vor.u32 %v12929_v61, %v11887_v58 }
 0x324   : > { %v12968_v7 = vld [vmem:[%s20386_s1 + $0xc14] sm:$0xf]  ;;  %v11564_v20 = vor.u32 %v12840_v4, %v11561_v6  ;;  %7516 = vmatpush.bf16.msrb.mxu1 %v11052_v19  ;;  %v13057_v63 = vld [vmem:[%s20386_s1 + $0xed4] sm:$0xf0]  ;;  %v11376_v4 = vor.u32 %v12801_v57, %v11375_v55  ;;  %v7310_v19 = vpop.f32.mrf.mxu1  ;;  %v7336_v57 = vpop.f32.mrf.mxu3 }
 0x325   : > { %v12073_v10 = vld [vmem:[%s20386_s1 + $0xc50] sm:$0xf0]  ;;  %7504 = vmatmul.bf16.vlgmr.msrb.gmra.mxu0 %v17170_v60  ;;  %v10799_v6 = vld [vmem:[%s20386_s1 + $0x218] sm:$0xf]  ;;  %v12400_v8 = vor.u32 %v13057_v63, %v12399_v62  ;;  %v7299_v62 = vpop.f32.mrf.mxu0 }
 0x326   : > { %v12076_v23 = vor.u32 %v12968_v7, %v12073_v10  ;;  %7529 = vmatpush.bf16.msrb.mxu2 %v11564_v20  ;;  %7548 = vmatpush.bf16.msra.mxu0 %v10992_v24  ;;  %v12657_v7 = vld [vmem:[%s20386_s1 + $0x254] sm:$0xf0]  ;;  %v10929_v62 = vld [vmem:[%s20386_s1 + $0x358] sm:$0xf0] }
 0x327   : > { %7517 = vmatmul.bf16.vlgmr.msrb.gmra.mxu1 %v17183_v2  ;;  %v11311_v10 = vld [vmem:[%s20386_s1 + $0x618] sm:$0xf]  ;;  %v10800_v18 = vor.u32 %v12657_v7, %v10799_v6 }
 0x328   : > { %7542 = vmatpush.bf16.msrb.mxu3 %v12076_v23  ;;  %7561 = vmatpush.bf16.msra.mxu1 %v11504_v27  ;;  %v12785_v11 = vld [vmem:[%s20386_s1 + $0x654] sm:$0xf0]  ;;  %v7311_v27 = vadd.f32 %v7310_v19, %v7298_v15 }
 0x329   : > { %7530 = vmatmul.bf16.vlgmr.msrb.gmra.mxu2 %v17181_v1  ;;  %v11823_v9 = vld [vmem:[%s20386_s1 + $0xa18] sm:$0xf]  ;;  %v11312_v20 = vor.u32 %v12785_v11, %v11311_v10 }
 0x32a   : > { %7574 = vmatpush.bf16.msra.mxu2 %v12016_v28  ;;  %7549 = vmatpush.bf16.msra.mxu0 %v10928_v47  ;;  %v12913_v26 = vld [vmem:[%s20386_s1 + $0xa54] sm:$0xf0] }
 0x32b   : > { %7543 = vmatmul.bf16.vlgmr.msrb.gmra.mxu3 %v17191_v5  ;;  %v12335_v13 = vld [vmem:[%s20386_s1 + $0xe18] sm:$0xf]  ;;  %v11824_v21 = vor.u32 %v12913_v26, %v11823_v9 }
 0x32c   : > { %7587 = vmatpush.bf16.msra.mxu3 %v12528_v32  ;;  %7562 = vmatpush.bf16.msra.mxu1 %v11440_v48  ;;  %v13041_v14 = vld [vmem:[%s20386_s1 + $0xe54] sm:$0xf0] }
 0x32d   : > { %v10735_v22 = vld [vmem:[%s20386_s1 + $0x198] sm:$0xf]  ;;  %v12336_v0 = vor.u32 %v13041_v14, %v12335_v13 }
 0x32e   : > { %7575 = vmatpush.bf16.msra.mxu2 %v11952_v50  ;;  %7550 = vmatpush.bf16.msra.mxu0 %v10864_v3  ;;  %v12641_v23 = vld [vmem:[%s20386_s1 + $0x1d4] sm:$0xf0]  ;;  %v7323_v50 = vpop.f32.mrf.mxu2  ;;  %v7312_v3 = vpop.f32.mrf.mxu1 }
 0x32f   : > { %v11247_v24 = vld [vmem:[%s20386_s1 + $0x598] sm:$0xf]  ;;  %v10736_v38 = vor.u32 %v12641_v23, %v10735_v22 }
 0x330   : > { %7588 = vmatpush.bf16.msra.mxu3 %v12464_v56  ;;  %7563 = vmatpush.bf16.msra.mxu1 %v11376_v4  ;;  %v12769_v28 = vld [vmem:[%s20386_s1 + $0x5d4] sm:$0xf0]  ;;  %v7324_v56 = vadd.f32 %v7323_v50, %v7311_v27 }
 0x331   : > { %v11759_v29 = vld [vmem:[%s20386_s1 + $0x998] sm:$0xf]  ;;  %v11248_v41 = vor.u32 %v12769_v28, %v11247_v24 }
 0x332   : > { %7576 = vmatpush.bf16.msra.mxu2 %v11888_v36  ;;  %v12897_v30 = vld [vmem:[%s20386_s1 + $0x9d4] sm:$0xf0]  ;;  %7551 = vmatpush.bf16.msra.mxu0 %v10800_v18  ;;  %v18285_v4 = vadd.f32 %v7336_v57, %v7324_v56 }
 0x333   : > { %v12271_v31 = vld [vmem:[%s20386_s1 + $0xd98] sm:$0xf]  ;;  %v11760_v42 = vor.u32 %v12897_v30, %v11759_v29 }
 0x334   : > { %7589 = vmatpush.bf16.msra.mxu3 %v12400_v8  ;;  %v13025_v32 = vld [vmem:[%s20386_s1 + $0xdd4] sm:$0xf0]  ;;  %7564 = vmatpush.bf16.msra.mxu1 %v11312_v20 }
 0x335   : > { %v10671_v43 = vld [vmem:[%s20386_s1 + $0x118] sm:$0xf]  ;;  %v12272_v48 = vor.u32 %v13025_v32, %v12271_v31  ;;  %v12697_v31 = vld [vmem:[%s20386_s1 + $0x39c] sm:$0xf] }
 0x336   : > { %7577 = vmatpush.bf16.msra.mxu2 %v11824_v21  ;;  %v12625_v44 = vld [vmem:[%s20386_s1 + $0x154] sm:$0xf0]  ;;  %7552 = vmatpush.bf16.msra.mxu0 %v10736_v38  ;;  %v7325_v30 = vpop.f32.mrf.mxu2  ;;  %v10993_v32 = vld [vmem:[%s20386_s1 + $0x3d8] sm:$0xf0] }
 0x337   : > { %v11183_v47 = vld [vmem:[%s20386_s1 + $0x518] sm:$0xf]  ;;  %v10672_v63 = vor.u32 %v12625_v44, %v10671_v43  ;;  %v12825_v38 = vld [vmem:[%s20386_s1 + $0x79c] sm:$0xf]  ;;  %v10996_v56 = vor.u32 %v12697_v31, %v10993_v32 }
 0x338   : > { %7590 = vmatpush.bf16.msra.mxu3 %v12336_v0  ;;  %v12753_v51 = vld [vmem:[%s20386_s1 + $0x554] sm:$0xf0]  ;;  %7565 = vmatpush.bf16.msra.mxu1 %v11248_v41  ;;  %v7338_v41 = vpop.f32.mrf.mxu3  ;;  %v11505_v43 = vld [vmem:[%s20386_s1 + $0x7d8] sm:$0xf0] }
 0x339   : > { %v11695_v52 = vld [vmem:[%s20386_s1 + $0x918] sm:$0xf]  ;;  %v11184_v36 = vor.u32 %v12753_v51, %v11183_v47  ;;  %v12953_v44 = vld [vmem:[%s20386_s1 + $0xb9c] sm:$0xf]  ;;  %v11508_v57 = vor.u32 %v12825_v38, %v11505_v43  ;;  %v7349_v41 = vpop.f32.mrf.mxu0 }
 0x33a   : > { %v12881_v55 = vld [vmem:[%s20386_s1 + $0x954] sm:$0xf0]  ;;  %7578 = vmatpush.bf16.msra.mxu2 %v11760_v42  ;;  %7553 = vmatpush.bf16.msra.mxu0 %v10672_v63  ;;  %v12017_v47 = vld [vmem:[%s20386_s1 + $0xbd8] sm:$0xf0] }
 0x33b   : > { %v12207_v58 = vld [vmem:[%s20386_s1 + $0xd18] sm:$0xf]  ;;  %v11696_v6 = vor.u32 %v12881_v55, %v11695_v52  ;;  %v13081_v51 = vld [vmem:[%s20386_s1 + $0xf9c] sm:$0xf] }
 0x33c   : > { %v13009_v61 = vld [vmem:[%s20386_s1 + $0xd54] sm:$0xf0]  ;;  %7591 = vmatpush.bf16.msra.mxu3 %v12272_v48  ;;  %7566 = vmatpush.bf16.msra.mxu1 %v11184_v36  ;;  %v12529_v52 = vld [vmem:[%s20386_s1 + $0xfd8] sm:$0xf0] }
 0x33d   : > { %v10607_v7 = vld [vmem:[%s20386_s1 + $0x98] sm:$0xf]  ;;  %v12208_v11 = vor.u32 %v13009_v61, %v12207_v58  ;;  %v12020_v58 = vor.u32 %v12953_v44, %v12017_v47  ;;  %v12681_v61 = vld [vmem:[%s20386_s1 + $0x31c] sm:$0xf]  ;;  %v12532_v3 = vor.u32 %v13081_v51, %v12529_v52  ;;  %v7350_v44 = vadd.f32 %v7349_v41, %v15303_v54 }
 0x33e   : > { %v12609_v10 = vld [vmem:[%s20386_s1 + $0xd4] sm:$0xf0]  ;;  %7579 = vmatpush.bf16.msra.mxu2 %v11696_v6  ;;  %v12809_v63 = vld [vmem:[%s20386_s1 + $0x71c] sm:$0xf] }
 0x33f   : > { %v11119_v8 = vld [vmem:[%s20386_s1 + $0x498] sm:$0xf]  ;;  %v10608_v15 = vor.u32 %v12609_v10, %v10607_v7  ;;  %v11441_v36 = vld [vmem:[%s20386_s1 + $0x758] sm:$0xf0] }
 0x340   : > { %v12737_v9 = vld [vmem:[%s20386_s1 + $0x4d4] sm:$0xf0]  ;;  %7592 = vmatpush.bf16.msra.mxu3 %v12208_v11  ;;  %v12937_v6 = vld [vmem:[%s20386_s1 + $0xb1c] sm:$0xf]  ;;  %v10932_v11 = vor.u32 %v12681_v61, %v10929_v62 }
 0x341   : > { %v11631_v26 = vld [vmem:[%s20386_s1 + $0x898] sm:$0xf]  ;;  %v11120_v20 = vor.u32 %v12737_v9, %v11119_v8  ;;  %7554 = vmatpush.bf16.msra.mxu0 %v10608_v15  ;;  %v11953_v7 = vld [vmem:[%s20386_s1 + $0xb58] sm:$0xf0]  ;;  %v11444_v9 = vor.u32 %v12809_v63, %v11441_v36 }
 0x342   : > { %v12865_v12 = vld [vmem:[%s20386_s1 + $0x8d4] sm:$0xf0]  ;;  %v13065_v10 = vld [vmem:[%s20386_s1 + $0xf1c] sm:$0xf] }
 0x343   : > { %v12143_v13 = vld [vmem:[%s20386_s1 + $0xc98] sm:$0xf]  ;;  %v11632_v21 = vor.u32 %v12865_v12, %v11631_v26  ;;  %7567 = vmatpush.bf16.msra.mxu1 %v11120_v20  ;;  %v12465_v8 = vld [vmem:[%s20386_s1 + $0xf58] sm:$0xf0]  ;;  %v11956_v26 = vor.u32 %v12937_v6, %v11953_v7 }
 0x344   : > { %v12993_v14 = vld [vmem:[%s20386_s1 + $0xcd4] sm:$0xf0]  ;;  %v12665_v12 = vld [vmem:[%s20386_s1 + $0x29c] sm:$0xf]  ;;  %v12468_v15 = vor.u32 %v13065_v10, %v12465_v8 }
 0x345   : > { %v10543_v18 = vld [vmem:[%s20386_s1 + $0x18] sm:$0xf]  ;;  %v12144_v0 = vor.u32 %v12993_v14, %v12143_v13  ;;  %7580 = vmatpush.bf16.msra.mxu2 %v11632_v21  ;;  %v10865_v13 = vld [vmem:[%s20386_s1 + $0x2d8] sm:$0xf0] }
 0x346   : > { %v12593_v19 = vld [vmem:[%s20386_s1 + $0x54] sm:$0xf0]  ;;  %v12793_v14 = vld [vmem:[%s20386_s1 + $0x69c] sm:$0xf] }
 0x347   : > { %v11055_v22 = vld [vmem:[%s20386_s1 + $0x418] sm:$0xf]  ;;  %v10544_v42 = vor.u32 %v12593_v19, %v10543_v18  ;;  %7593 = vmatpush.bf16.msra.mxu3 %v12144_v0  ;;  %v11377_v18 = vld [vmem:[%s20386_s1 + $0x6d8] sm:$0xf0] }
 0x348   : > { %v12721_v23 = vld [vmem:[%s20386_s1 + $0x454] sm:$0xf0]  ;;  %v12921_v19 = vld [vmem:[%s20386_s1 + $0xa9c] sm:$0xf] }
 0x349   : > { %v11567_v24 = vld [vmem:[%s20386_s1 + $0x818] sm:$0xf]  ;;  %v11056_v48 = vor.u32 %v12721_v23, %v11055_v22  ;;  %7555 = vmatpush.bf16.msra.mxu0 %v10544_v42  ;;  %v11889_v20 = vld [vmem:[%s20386_s1 + $0xad8] sm:$0xf0]  ;;  %v10868_v23 = vor.u32 %v12665_v12, %v10865_v13 }
 0x34a   : > { %v12849_v27 = vld [vmem:[%s20386_s1 + $0x854] sm:$0xf0]  ;;  %v13049_v21 = vld [vmem:[%s20386_s1 + $0xe9c] sm:$0xf]  ;;  %v11892_v0 = vor.u32 %v12921_v19, %v11889_v20 }
 0x34b   : > { %v12079_v28 = vld [vmem:[%s20386_s1 + $0xc18] sm:$0xf]  ;;  %v11568_v50 = vor.u32 %v12849_v27, %v11567_v24  ;;  %7568 = vmatpush.bf16.msra.mxu1 %v11056_v48  ;;  %v12401_v22 = vld [vmem:[%s20386_s1 + $0xed8] sm:$0xf0]  ;;  %v11380_v24 = vor.u32 %v12793_v14, %v11377_v18  ;;  %v7362_v48 = vpop.f32.mrf.mxu1  ;;  %v7388_v18 = vpop.f32.mrf.mxu3 }
 0x34c   : > { %v12977_v29 = vld [vmem:[%s20386_s1 + $0xc54] sm:$0xf0]  ;;  %7556 = vmatmul.bf16.vlgmr.msra.gmra.mxu0 %v17170_v60  ;;  %v12649_v27 = vld [vmem:[%s20386_s1 + $0x21c] sm:$0xf]  ;;  %v12404_v30 = vor.u32 %v13049_v21, %v12401_v22  ;;  %v7351_v21 = vpop.f32.mrf.mxu0 }
 0x34d   : > { %v12080_v55 = vor.u32 %v12977_v29, %v12079_v28  ;;  %7581 = vmatpush.bf16.msra.mxu2 %v11568_v50  ;;  %7600 = vmatpush.bf16.msrb.mxu0 %v10996_v56  ;;  %v10801_v28 = vld [vmem:[%s20386_s1 + $0x258] sm:$0xf0]  ;;  %v12690_v21 = vld [vmem:[%s20386_s1 + $0x35c] sm:$0xf0] }
 0x34e   : > { %7569 = vmatmul.bf16.vlgmr.msra.gmra.mxu1 %v17183_v2  ;;  %v12777_v29 = vld [vmem:[%s20386_s1 + $0x61c] sm:$0xf]  ;;  %v10804_v47 = vor.u32 %v12649_v27, %v10801_v28 }
 0x34f   : > { %7594 = vmatpush.bf16.msra.mxu3 %v12080_v55  ;;  %7613 = vmatpush.bf16.msrb.mxu1 %v11508_v57  ;;  %v11313_v31 = vld [vmem:[%s20386_s1 + $0x658] sm:$0xf0]  ;;  %v7363_v57 = vadd.f32 %v7362_v48, %v7350_v44 }
 0x350   : > { %7582 = vmatmul.bf16.vlgmr.msra.gmra.mxu2 %v17181_v1  ;;  %v12905_v32 = vld [vmem:[%s20386_s1 + $0xa1c] sm:$0xf]  ;;  %v11316_v50 = vor.u32 %v12777_v29, %v11313_v31 }
 0x351   : > { %7626 = vmatpush.bf16.msrb.mxu2 %v12020_v58  ;;  %7601 = vmatpush.bf16.msrb.mxu0 %v10932_v11  ;;  %v11825_v38 = vld [vmem:[%s20386_s1 + $0xa58] sm:$0xf0] }
 0x352   : > { %7595 = vmatmul.bf16.vlgmr.msra.gmra.mxu3 %v17191_v5  ;;  %v13033_v42 = vld [vmem:[%s20386_s1 + $0xe1c] sm:$0xf]  ;;  %v11828_v51 = vor.u32 %v12905_v32, %v11825_v38 }
 0x353   : > { %7639 = vmatpush.bf16.msrb.mxu3 %v12532_v3  ;;  %7614 = vmatpush.bf16.msrb.mxu1 %v11444_v9  ;;  %v12337_v43 = vld [vmem:[%s20386_s1 + $0xe58] sm:$0xf0] }
 0x354   : > { %v12633_v52 = vld [vmem:[%s20386_s1 + $0x19c] sm:$0xf]  ;;  %v12340_v54 = vor.u32 %v13033_v42, %v12337_v43 }
 0x355   : > { %7627 = vmatpush.bf16.msrb.mxu2 %v11956_v26  ;;  %7602 = vmatpush.bf16.msrb.mxu0 %v10868_v23  ;;  %v10737_v55 = vld [vmem:[%s20386_s1 + $0x1d8] sm:$0xf0]  ;;  %v7375_v26 = vpop.f32.mrf.mxu2  ;;  %v7364_v23 = vpop.f32.mrf.mxu1 }
 0x356   : > { %v12761_v56 = vld [vmem:[%s20386_s1 + $0x59c] sm:$0xf]  ;;  %v10740_v36 = vor.u32 %v12633_v52, %v10737_v55 }
 0x357   : > { %7640 = vmatpush.bf16.msrb.mxu3 %v12468_v15  ;;  %7615 = vmatpush.bf16.msrb.mxu1 %v11380_v24  ;;  %v11249_v58 = vld [vmem:[%s20386_s1 + $0x5d8] sm:$0xf0]  ;;  %v7376_v15 = vadd.f32 %v7375_v26, %v7363_v57 }
 0x358   : > { %v12889_v61 = vld [vmem:[%s20386_s1 + $0x99c] sm:$0xf]  ;;  %v11252_v6 = vor.u32 %v12761_v56, %v11249_v58 }
 0x359   : > { %7628 = vmatpush.bf16.msrb.mxu2 %v11892_v0  ;;  %v11761_v62 = vld [vmem:[%s20386_s1 + $0x9d8] sm:$0xf0]  ;;  %7603 = vmatpush.bf16.msrb.mxu0 %v10804_v47  ;;  %v18484_v24 = vadd.f32 %v7388_v18, %v7376_v15 }
 0x35a   : > { %v13017_v63 = vld [vmem:[%s20386_s1 + $0xd9c] sm:$0xf]  ;;  %v11764_v7 = vor.u32 %v12889_v61, %v11761_v62 }
 0x35b   : > { %7641 = vmatpush.bf16.msrb.mxu3 %v12404_v30  ;;  %v12273_v3 = vld [vmem:[%s20386_s1 + $0xdd8] sm:$0xf0]  ;;  %7616 = vmatpush.bf16.msrb.mxu1 %v11316_v50 }
 0x35c   : > { %v12617_v10 = vld [vmem:[%s20386_s1 + $0x11c] sm:$0xf]  ;;  %v12276_v9 = vor.u32 %v13017_v63, %v12273_v3  ;;  %v10999_v63 = vld [vmem:[%s20386_s1 + $0x3a0] sm:$0xf] }
 0x35d   : > { %7629 = vmatpush.bf16.msrb.mxu2 %v11828_v51  ;;  %v10673_v8 = vld [vmem:[%s20386_s1 + $0x158] sm:$0xf0]  ;;  %7604 = vmatpush.bf16.msrb.mxu0 %v10740_v36  ;;  %v7377_v62 = vpop.f32.mrf.mxu2  ;;  %v12706_v3 = vld [vmem:[%s20386_s1 + $0x3dc] sm:$0xf0] }
 0x35e   : > { %v12745_v11 = vld [vmem:[%s20386_s1 + $0x51c] sm:$0xf]  ;;  %v10676_v22 = vor.u32 %v12617_v10, %v10673_v8  ;;  %v11511_v36 = vld [vmem:[%s20386_s1 + $0x7a0] sm:$0xf]  ;;  %v11000_v15 = vor.u32 %v12706_v3, %v10999_v63 }
 0x35f   : > { %7642 = vmatpush.bf16.msrb.mxu3 %v12340_v54  ;;  %v11185_v12 = vld [vmem:[%s20386_s1 + $0x558] sm:$0xf0]  ;;  %7617 = vmatpush.bf16.msrb.mxu1 %v11252_v6  ;;  %v7390_v6 = vpop.f32.mrf.mxu3  ;;  %v12834_v10 = vld [vmem:[%s20386_s1 + $0x7dc] sm:$0xf0] }
 0x360   : > { %v12873_v13 = vld [vmem:[%s20386_s1 + $0x91c] sm:$0xf]  ;;  %v11188_v0 = vor.u32 %v12745_v11, %v11185_v12  ;;  %v12023_v8 = vld [vmem:[%s20386_s1 + $0xba0] sm:$0xf]  ;;  %v11512_v18 = vor.u32 %v12834_v10, %v11511_v36  ;;  %v7401_v6 = vpop.f32.mrf.mxu0 }
 0x361   : > { %v11697_v14 = vld [vmem:[%s20386_s1 + $0x958] sm:$0xf0]  ;;  %7630 = vmatpush.bf16.msrb.mxu2 %v11764_v7  ;;  %7605 = vmatpush.bf16.msrb.mxu0 %v10676_v22  ;;  %v12962_v11 = vld [vmem:[%s20386_s1 + $0xbdc] sm:$0xf0] }
 0x362   : > { %v13001_v19 = vld [vmem:[%s20386_s1 + $0xd1c] sm:$0xf]  ;;  %v11700_v27 = vor.u32 %v12873_v13, %v11697_v14  ;;  %v12535_v12 = vld [vmem:[%s20386_s1 + $0xfa0] sm:$0xf] }
 0x363   : > { %v12209_v20 = vld [vmem:[%s20386_s1 + $0xd58] sm:$0xf0]  ;;  %7643 = vmatpush.bf16.msrb.mxu3 %v12276_v9  ;;  %7618 = vmatpush.bf16.msrb.mxu1 %v11188_v0  ;;  %v13090_v13 = vld [vmem:[%s20386_s1 + $0xfdc] sm:$0xf0] }
 0x364   : > { %v12601_v28 = vld [vmem:[%s20386_s1 + $0x9c] sm:$0xf]  ;;  %v12212_v31 = vor.u32 %v13001_v19, %v12209_v20  ;;  %v12024_v19 = vor.u32 %v12962_v11, %v12023_v8  ;;  %v10935_v20 = vld [vmem:[%s20386_s1 + $0x320] sm:$0xf]  ;;  %v12536_v23 = vor.u32 %v13090_v13, %v12535_v12  ;;  %v7402_v8 = vadd.f32 %v7401_v6, %v15501_v46 }
 0x365   : > { %v10609_v29 = vld [vmem:[%s20386_s1 + $0xd8] sm:$0xf0]  ;;  %7631 = vmatpush.bf16.msrb.mxu2 %v11700_v27  ;;  %v11447_v22 = vld [vmem:[%s20386_s1 + $0x720] sm:$0xf] }
 0x366   : > { %v12729_v30 = vld [vmem:[%s20386_s1 + $0x49c] sm:$0xf]  ;;  %v10612_v44 = vor.u32 %v12601_v28, %v10609_v29  ;;  %v12818_v0 = vld [vmem:[%s20386_s1 + $0x75c] sm:$0xf0] }
 0x367   : > { %v11121_v32 = vld [vmem:[%s20386_s1 + $0x4d8] sm:$0xf0]  ;;  %7644 = vmatpush.bf16.msrb.mxu3 %v12212_v31  ;;  %v11959_v27 = vld [vmem:[%s20386_s1 + $0xb20] sm:$0xf]  ;;  %v10936_v31 = vor.u32 %v12690_v21, %v10935_v20 }
 0x368   : > { %v12857_v38 = vld [vmem:[%s20386_s1 + $0x89c] sm:$0xf]  ;;  %v11124_v50 = vor.u32 %v12729_v30, %v11121_v32  ;;  %7606 = vmatpush.bf16.msrb.mxu0 %v10612_v44  ;;  %v12946_v28 = vld [vmem:[%s20386_s1 + $0xb5c] sm:$0xf0]  ;;  %v11448_v32 = vor.u32 %v12818_v0, %v11447_v22 }
 0x369   : > { %v11633_v41 = vld [vmem:[%s20386_s1 + $0x8d8] sm:$0xf0]  ;;  %v12471_v29 = vld [vmem:[%s20386_s1 + $0xf20] sm:$0xf] }
 0x36a   : > { %v12985_v42 = vld [vmem:[%s20386_s1 + $0xc9c] sm:$0xf]  ;;  %v11636_v51 = vor.u32 %v12857_v38, %v11633_v41  ;;  %7619 = vmatpush.bf16.msrb.mxu1 %v11124_v50  ;;  %v13074_v30 = vld [vmem:[%s20386_s1 + $0xf5c] sm:$0xf0]  ;;  %v11960_v38 = vor.u32 %v12946_v28, %v11959_v27 }
 0x36b   : > { %v12145_v43 = vld [vmem:[%s20386_s1 + $0xcd8] sm:$0xf0]  ;;  %v10871_v41 = vld [vmem:[%s20386_s1 + $0x2a0] sm:$0xf]  ;;  %v12472_v44 = vor.u32 %v13074_v30, %v12471_v29 }
 0x36c   : > { %v12585_v47 = vld [vmem:[%s20386_s1 + $0x1c] sm:$0xf]  ;;  %v12148_v54 = vor.u32 %v12985_v42, %v12145_v43  ;;  %7632 = vmatpush.bf16.msrb.mxu2 %v11636_v51  ;;  %v12674_v42 = vld [vmem:[%s20386_s1 + $0x2dc] sm:$0xf0] }
 0x36d   : > { %v10545_v48 = vld [vmem:[%s20386_s1 + $0x58] sm:$0xf0]  ;;  %v11383_v43 = vld [vmem:[%s20386_s1 + $0x6a0] sm:$0xf] }
 0x36e   : > { %v12713_v52 = vld [vmem:[%s20386_s1 + $0x41c] sm:$0xf]  ;;  %v10548_v7 = vor.u32 %v12585_v47, %v10545_v48  ;;  %7645 = vmatpush.bf16.msrb.mxu3 %v12148_v54  ;;  %v12802_v47 = vld [vmem:[%s20386_s1 + $0x6dc] sm:$0xf0] }
 0x36f   : > { %v11057_v55 = vld [vmem:[%s20386_s1 + $0x458] sm:$0xf0]  ;;  %v11895_v48 = vld [vmem:[%s20386_s1 + $0xaa0] sm:$0xf] }
 0x370   : > { %v12841_v56 = vld [vmem:[%s20386_s1 + $0x81c] sm:$0xf]  ;;  %v11060_v9 = vor.u32 %v12713_v52, %v11057_v55  ;;  %7607 = vmatpush.bf16.msrb.mxu0 %v10548_v7  ;;  %v12930_v50 = vld [vmem:[%s20386_s1 + $0xadc] sm:$0xf0]  ;;  %v10872_v55 = vor.u32 %v12674_v42, %v10871_v41 }
 0x371   : > { %v11569_v57 = vld [vmem:[%s20386_s1 + $0x858] sm:$0xf0]  ;;  %v12407_v51 = vld [vmem:[%s20386_s1 + $0xea0] sm:$0xf]  ;;  %v11896_v54 = vor.u32 %v12930_v50, %v11895_v48 }
 0x372   : > { %v12969_v58 = vld [vmem:[%s20386_s1 + $0xc1c] sm:$0xf]  ;;  %v11572_v26 = vor.u32 %v12841_v56, %v11569_v57  ;;  %7620 = vmatpush.bf16.msrb.mxu1 %v11060_v9  ;;  %v13058_v52 = vld [vmem:[%s20386_s1 + $0xedc] sm:$0xf0]  ;;  %v11384_v56 = vor.u32 %v12802_v47, %v11383_v43  ;;  %v7414_v9 = vpop.f32.mrf.mxu1  ;;  %v7440_v47 = vpop.f32.mrf.mxu3 }
 0x373   : > { %v12081_v61 = vld [vmem:[%s20386_s1 + $0xc58] sm:$0xf0]  ;;  %7608 = vmatmul.bf16.vlgmr.msrb.gmra.mxu0 %v17170_v60  ;;  %v10807_v57 = vld [vmem:[%s20386_s1 + $0x220] sm:$0xf]  ;;  %v12408_v62 = vor.u32 %v13058_v52, %v12407_v51  ;;  %v7403_v51 = vpop.f32.mrf.mxu0 }
 0x374   : > { %v12084_v14 = vor.u32 %v12969_v58, %v12081_v61  ;;  %7633 = vmatpush.bf16.msrb.mxu2 %v11572_v26  ;;  %7652 = vmatpush.bf16.msra.mxu0 %v11000_v15  ;;  %v12658_v58 = vld [vmem:[%s20386_s1 + $0x25c] sm:$0xf0]  ;;  %v10937_v51 = vld [vmem:[%s20386_s1 + $0x360] sm:$0xf0] }
 0x375   : > { %7621 = vmatmul.bf16.vlgmr.msrb.gmra.mxu1 %v17183_v2  ;;  %v11319_v61 = vld [vmem:[%s20386_s1 + $0x620] sm:$0xf]  ;;  %v10808_v11 = vor.u32 %v12658_v58, %v10807_v57 }
 0x376   : > { %7646 = vmatpush.bf16.msrb.mxu3 %v12084_v14  ;;  %7665 = vmatpush.bf16.msra.mxu1 %v11512_v18  ;;  %v12786_v63 = vld [vmem:[%s20386_s1 + $0x65c] sm:$0xf0]  ;;  %v7415_v18 = vadd.f32 %v7414_v9, %v7402_v8 }
 0x377   : > { %7634 = vmatmul.bf16.vlgmr.msrb.gmra.mxu2 %v17181_v1  ;;  %v11831_v3 = vld [vmem:[%s20386_s1 + $0xa20] sm:$0xf]  ;;  %v11320_v26 = vor.u32 %v12786_v63, %v11319_v61 }
 0x378   : > { %7678 = vmatpush.bf16.msra.mxu2 %v12024_v19  ;;  %7653 = vmatpush.bf16.msra.mxu0 %v10936_v31  ;;  %v12914_v36 = vld [vmem:[%s20386_s1 + $0xa5c] sm:$0xf0] }
 0x379   : > { %7647 = vmatmul.bf16.vlgmr.msrb.gmra.mxu3 %v17191_v5  ;;  %v12343_v7 = vld [vmem:[%s20386_s1 + $0xe20] sm:$0xf]  ;;  %v11832_v12 = vor.u32 %v12914_v36, %v11831_v3 }
 0x37a   : > { %7691 = vmatpush.bf16.msra.mxu3 %v12536_v23  ;;  %7666 = vmatpush.bf16.msra.mxu1 %v11448_v32  ;;  %v13042_v10 = vld [vmem:[%s20386_s1 + $0xe5c] sm:$0xf0] }
 0x37b   : > { %v10743_v13 = vld [vmem:[%s20386_s1 + $0x1a0] sm:$0xf]  ;;  %v12344_v46 = vor.u32 %v13042_v10, %v12343_v7 }
 0x37c   : > { %7679 = vmatpush.bf16.msra.mxu2 %v11960_v38  ;;  %7654 = vmatpush.bf16.msra.mxu0 %v10872_v55  ;;  %v12642_v14 = vld [vmem:[%s20386_s1 + $0x1dc] sm:$0xf0]  ;;  %v7427_v38 = vpop.f32.mrf.mxu2  ;;  %v7416_v55 = vpop.f32.mrf.mxu1 }
 0x37d   : > { %v11255_v15 = vld [vmem:[%s20386_s1 + $0x5a0] sm:$0xf]  ;;  %v10744_v0 = vor.u32 %v12642_v14, %v10743_v13 }
 0x37e   : > { %7692 = vmatpush.bf16.msra.mxu3 %v12472_v44  ;;  %7667 = vmatpush.bf16.msra.mxu1 %v11384_v56  ;;  %v12770_v19 = vld [vmem:[%s20386_s1 + $0x5dc] sm:$0xf0]  ;;  %v7428_v44 = vadd.f32 %v7427_v38, %v7415_v18 }
 0x37f   : > { %v11767_v20 = vld [vmem:[%s20386_s1 + $0x9a0] sm:$0xf]  ;;  %v11256_v27 = vor.u32 %v12770_v19, %v11255_v15 }
 0x380   : > { %7680 = vmatpush.bf16.msra.mxu2 %v11896_v54  ;;  %v12898_v21 = vld [vmem:[%s20386_s1 + $0x9dc] sm:$0xf0]  ;;  %7655 = vmatpush.bf16.msra.mxu0 %v10808_v11  ;;  %v18683_v56 = vadd.f32 %v7440_v47, %v7428_v44 }
 0x381   : > { %v12279_v22 = vld [vmem:[%s20386_s1 + $0xda0] sm:$0xf]  ;;  %v11768_v28 = vor.u32 %v12898_v21, %v11767_v20 }
 0x382   : > { %7693 = vmatpush.bf16.msra.mxu3 %v12408_v62  ;;  %v13026_v23 = vld [vmem:[%s20386_s1 + $0xddc] sm:$0xf0]  ;;  %7668 = vmatpush.bf16.msra.mxu1 %v11320_v26 }
 0x383   : > { %v10679_v29 = vld [vmem:[%s20386_s1 + $0x120] sm:$0xf]  ;;  %v12280_v32 = vor.u32 %v13026_v23, %v12279_v22  ;;  %v12698_v22 = vld [vmem:[%s20386_s1 + $0x3a4] sm:$0xf] }
 0x384   : > { %7681 = vmatpush.bf16.msra.mxu2 %v11832_v12  ;;  %v12626_v30 = vld [vmem:[%s20386_s1 + $0x15c] sm:$0xf0]  ;;  %7656 = vmatpush.bf16.msra.mxu0 %v10744_v0  ;;  %v7429_v21 = vpop.f32.mrf.mxu2  ;;  %v11001_v23 = vld [vmem:[%s20386_s1 + $0x3e0] sm:$0xf0] }
 0x385   : > { %v11191_v31 = vld [vmem:[%s20386_s1 + $0x520] sm:$0xf]  ;;  %v10680_v52 = vor.u32 %v12626_v30, %v10679_v29  ;;  %v12826_v0 = vld [vmem:[%s20386_s1 + $0x7a4] sm:$0xf]  ;;  %v11004_v44 = vor.u32 %v12698_v22, %v11001_v23 }
 0x386   : > { %7694 = vmatpush.bf16.msra.mxu3 %v12344_v46  ;;  %v12754_v41 = vld [vmem:[%s20386_s1 + $0x55c] sm:$0xf0]  ;;  %7669 = vmatpush.bf16.msra.mxu1 %v11256_v27  ;;  %v7442_v27 = vpop.f32.mrf.mxu3  ;;  %v11513_v29 = vld [vmem:[%s20386_s1 + $0x7e0] sm:$0xf0] }
 0x387   : > { %v11703_v42 = vld [vmem:[%s20386_s1 + $0x920] sm:$0xf]  ;;  %v11192_v54 = vor.u32 %v12754_v41, %v11191_v31  ;;  %v12954_v30 = vld [vmem:[%s20386_s1 + $0xba4] sm:$0xf]  ;;  %v11516_v47 = vor.u32 %v12826_v0, %v11513_v29  ;;  %v7453_v27 = vpop.f32.mrf.mxu0 }
 0x388   : > { %v12882_v43 = vld [vmem:[%s20386_s1 + $0x95c] sm:$0xf0]  ;;  %7682 = vmatpush.bf16.msra.mxu2 %v11768_v28  ;;  %7657 = vmatpush.bf16.msra.mxu0 %v10680_v52  ;;  %v12025_v31 = vld [vmem:[%s20386_s1 + $0xbe0] sm:$0xf0] }
 0x389   : > { %v12215_v48 = vld [vmem:[%s20386_s1 + $0xd20] sm:$0xf]  ;;  %v11704_v57 = vor.u32 %v12882_v43, %v11703_v42  ;;  %v13082_v41 = vld [vmem:[%s20386_s1 + $0xfa4] sm:$0xf] }
 0x38a   : > { %v13010_v50 = vld [vmem:[%s20386_s1 + $0xd5c] sm:$0xf0]  ;;  %7695 = vmatpush.bf16.msra.mxu3 %v12280_v32  ;;  %7670 = vmatpush.bf16.msra.mxu1 %v11192_v54  ;;  %v12537_v42 = vld [vmem:[%s20386_s1 + $0xfe0] sm:$0xf0] }
 0x38b   : > { %v10615_v58 = vld [vmem:[%s20386_s1 + $0xa0] sm:$0xf]  ;;  %v12216_v63 = vor.u32 %v13010_v50, %v12215_v48  ;;  %v12028_v48 = vor.u32 %v12954_v30, %v12025_v31  ;;  %v12682_v50 = vld [vmem:[%s20386_s1 + $0x324] sm:$0xf]  ;;  %v12540_v55 = vor.u32 %v13082_v41, %v12537_v42  ;;  %v7454_v30 = vadd.f32 %v7453_v27, %v15699_v40 }
 0x38c   : > { %v12610_v61 = vld [vmem:[%s20386_s1 + $0xdc] sm:$0xf0]  ;;  %7683 = vmatpush.bf16.msra.mxu2 %v11704_v57  ;;  %v12810_v52 = vld [vmem:[%s20386_s1 + $0x724] sm:$0xf] }
 0x38d   : > { %v11127_v62 = vld [vmem:[%s20386_s1 + $0x4a0] sm:$0xf]  ;;  %v10616_v8 = vor.u32 %v12610_v61, %v10615_v58  ;;  %v11449_v54 = vld [vmem:[%s20386_s1 + $0x760] sm:$0xf0] }
 0x38e   : > { %v12738_v3 = vld [vmem:[%s20386_s1 + $0x4dc] sm:$0xf0]  ;;  %7696 = vmatpush.bf16.msra.mxu3 %v12216_v63  ;;  %v12938_v57 = vld [vmem:[%s20386_s1 + $0xb24] sm:$0xf]  ;;  %v10940_v63 = vor.u32 %v12682_v50, %v10937_v51 }
 0x38f   : > { %v11639_v36 = vld [vmem:[%s20386_s1 + $0x8a0] sm:$0xf]  ;;  %v11128_v26 = vor.u32 %v12738_v3, %v11127_v62  ;;  %7658 = vmatpush.bf16.msra.mxu0 %v10616_v8  ;;  %v11961_v58 = vld [vmem:[%s20386_s1 + $0xb60] sm:$0xf0]  ;;  %v11452_v3 = vor.u32 %v12810_v52, %v11449_v54 }
 0x390   : > { %v12866_v6 = vld [vmem:[%s20386_s1 + $0x8dc] sm:$0xf0]  ;;  %v13066_v61 = vld [vmem:[%s20386_s1 + $0xf24] sm:$0xf] }
 0x391   : > { %v12151_v7 = vld [vmem:[%s20386_s1 + $0xca0] sm:$0xf]  ;;  %v11640_v12 = vor.u32 %v12866_v6, %v11639_v36  ;;  %7671 = vmatpush.bf16.msra.mxu1 %v11128_v26  ;;  %v12473_v62 = vld [vmem:[%s20386_s1 + $0xf60] sm:$0xf0]  ;;  %v11964_v36 = vor.u32 %v12938_v57, %v11961_v58 }
 0x392   : > { %v12994_v10 = vld [vmem:[%s20386_s1 + $0xcdc] sm:$0xf0]  ;;  %v12666_v6 = vld [vmem:[%s20386_s1 + $0x2a4] sm:$0xf]  ;;  %v12476_v8 = vor.u32 %v13066_v61, %v12473_v62 }
 0x393   : > { %v10551_v11 = vld [vmem:[%s20386_s1 + $0x20] sm:$0xf]  ;;  %v12152_v46 = vor.u32 %v12994_v10, %v12151_v7  ;;  %7684 = vmatpush.bf16.msra.mxu2 %v11640_v12  ;;  %v10873_v7 = vld [vmem:[%s20386_s1 + $0x2e0] sm:$0xf0] }
 0x394   : > { %v12594_v9 = vld [vmem:[%s20386_s1 + $0x5c] sm:$0xf0]  ;;  %v12794_v10 = vld [vmem:[%s20386_s1 + $0x6a4] sm:$0xf] }
 0x395   : > { %v11063_v13 = vld [vmem:[%s20386_s1 + $0x420] sm:$0xf]  ;;  %v10552_v28 = vor.u32 %v12594_v9, %v10551_v11  ;;  %7697 = vmatpush.bf16.msra.mxu3 %v12152_v46  ;;  %v11385_v11 = vld [vmem:[%s20386_s1 + $0x6e0] sm:$0xf0] }
 0x396   : > { %v12722_v14 = vld [vmem:[%s20386_s1 + $0x45c] sm:$0xf0]  ;;  %v12922_v9 = vld [vmem:[%s20386_s1 + $0xaa4] sm:$0xf] }
 0x397   : > { %v11575_v15 = vld [vmem:[%s20386_s1 + $0x820] sm:$0xf]  ;;  %v11064_v32 = vor.u32 %v12722_v14, %v11063_v13  ;;  %7659 = vmatpush.bf16.msra.mxu0 %v10552_v28  ;;  %v11897_v26 = vld [vmem:[%s20386_s1 + $0xae0] sm:$0xf0]  ;;  %v10876_v14 = vor.u32 %v12666_v6, %v10873_v7 }
 0x398   : > { %v12850_v18 = vld [vmem:[%s20386_s1 + $0x85c] sm:$0xf0]  ;;  %v13050_v12 = vld [vmem:[%s20386_s1 + $0xea4] sm:$0xf]  ;;  %v11900_v46 = vor.u32 %v12922_v9, %v11897_v26 }
 0x399   : > { %v12087_v19 = vld [vmem:[%s20386_s1 + $0xc20] sm:$0xf]  ;;  %v11576_v38 = vor.u32 %v12850_v18, %v11575_v15  ;;  %7672 = vmatpush.bf16.msra.mxu1 %v11064_v32  ;;  %v12409_v13 = vld [vmem:[%s20386_s1 + $0xee0] sm:$0xf0]  ;;  %v11388_v15 = vor.u32 %v12794_v10, %v11385_v11  ;;  %v7466_v32 = vpop.f32.mrf.mxu1  ;;  %v7492_v11 = vpop.f32.mrf.mxu3 }
 0x39a   : > { %v12978_v20 = vld [vmem:[%s20386_s1 + $0xc5c] sm:$0xf0]  ;;  %7660 = vmatmul.bf16.vlgmr.msra.gmra.mxu0 %v17170_v60  ;;  %v12650_v18 = vld [vmem:[%s20386_s1 + $0x224] sm:$0xf]  ;;  %v12412_v21 = vor.u32 %v13050_v12, %v12409_v13  ;;  %v7455_v12 = vpop.f32.mrf.mxu0 }
 0x39b   : > { %v12088_v43 = vor.u32 %v12978_v20, %v12087_v19  ;;  %7685 = vmatpush.bf16.msra.mxu2 %v11576_v38  ;;  %7704 = vmatpush.bf16.msrb.mxu0 %v11004_v44  ;;  %v10809_v19 = vld [vmem:[%s20386_s1 + $0x260] sm:$0xf0]  ;;  %v12691_v12 = vld [vmem:[%s20386_s1 + $0x364] sm:$0xf0] }
 0x39c   : > { %7673 = vmatmul.bf16.vlgmr.msra.gmra.mxu1 %v17183_v2  ;;  %v12778_v20 = vld [vmem:[%s20386_s1 + $0x624] sm:$0xf]  ;;  %v10812_v31 = vor.u32 %v12650_v18, %v10809_v19 }
 0x39d   : > { %7698 = vmatpush.bf16.msra.mxu3 %v12088_v43  ;;  %7717 = vmatpush.bf16.msrb.mxu1 %v11516_v47  ;;  %v11321_v22 = vld [vmem:[%s20386_s1 + $0x660] sm:$0xf0]  ;;  %v7467_v47 = vadd.f32 %v7466_v32, %v7454_v30 }
 0x39e   : > { %7686 = vmatmul.bf16.vlgmr.msra.gmra.mxu2 %v17181_v1  ;;  %v12906_v23 = vld [vmem:[%s20386_s1 + $0xa24] sm:$0xf]  ;;  %v11324_v38 = vor.u32 %v12778_v20, %v11321_v22 }
 0x39f   : > { %7730 = vmatpush.bf16.msrb.mxu2 %v12028_v48  ;;  %7705 = vmatpush.bf16.msrb.mxu0 %v10940_v63  ;;  %v11833_v0 = vld [vmem:[%s20386_s1 + $0xa60] sm:$0xf0] }
 0x3a0   : > { %7699 = vmatmul.bf16.vlgmr.msra.gmra.mxu3 %v17191_v5  ;;  %v13034_v28 = vld [vmem:[%s20386_s1 + $0xe24] sm:$0xf]  ;;  %v11836_v41 = vor.u32 %v12906_v23, %v11833_v0 }
 0x3a1   : > { %7743 = vmatpush.bf16.msrb.mxu3 %v12540_v55  ;;  %7718 = vmatpush.bf16.msrb.mxu1 %v11452_v3  ;;  %v12345_v29 = vld [vmem:[%s20386_s1 + $0xe60] sm:$0xf0] }
 0x3a2   : > { %v12634_v42 = vld [vmem:[%s20386_s1 + $0x1a4] sm:$0xf]  ;;  %v12348_v40 = vor.u32 %v13034_v28, %v12345_v29 }
 0x3a3   : > { %7731 = vmatpush.bf16.msrb.mxu2 %v11964_v36  ;;  %7706 = vmatpush.bf16.msrb.mxu0 %v10876_v14  ;;  %v10745_v43 = vld [vmem:[%s20386_s1 + $0x1e0] sm:$0xf0]  ;;  %v7479_v36 = vpop.f32.mrf.mxu2  ;;  %v7468_v14 = vpop.f32.mrf.mxu1 }
 0x3a4   : > { %v12762_v44 = vld [vmem:[%s20386_s1 + $0x5a4] sm:$0xf]  ;;  %v10748_v54 = vor.u32 %v12634_v42, %v10745_v43 }
 0x3a5   : > { %7744 = vmatpush.bf16.msrb.mxu3 %v12476_v8  ;;  %7719 = vmatpush.bf16.msrb.mxu1 %v11388_v15  ;;  %v11257_v48 = vld [vmem:[%s20386_s1 + $0x5e0] sm:$0xf0]  ;;  %v7480_v8 = vadd.f32 %v7479_v36, %v7467_v47 }
 0x3a6   : > { %v12890_v50 = vld [vmem:[%s20386_s1 + $0x9a4] sm:$0xf]  ;;  %v11260_v57 = vor.u32 %v12762_v44, %v11257_v48 }
 0x3a7   : > { %7732 = vmatpush.bf16.msrb.mxu2 %v11900_v46  ;;  %v11769_v51 = vld [vmem:[%s20386_s1 + $0x9e0] sm:$0xf0]  ;;  %7707 = vmatpush.bf16.msrb.mxu0 %v10812_v31  ;;  %v18882_v15 = vadd.f32 %v7492_v11, %v7480_v8 }
 0x3a8   : > { %v13018_v52 = vld [vmem:[%s20386_s1 + $0xda4] sm:$0xf]  ;;  %v11772_v58 = vor.u32 %v12890_v50, %v11769_v51 }
 0x3a9   : > { %7745 = vmatpush.bf16.msrb.mxu3 %v12412_v21  ;;  %v12281_v55 = vld [vmem:[%s20386_s1 + $0xde0] sm:$0xf0]  ;;  %7720 = vmatpush.bf16.msrb.mxu1 %v11324_v38 }
 0x3aa   : > { %v12618_v61 = vld [vmem:[%s20386_s1 + $0x124] sm:$0xf]  ;;  %v12284_v3 = vor.u32 %v13018_v52, %v12281_v55  ;;  %v11007_v52 = vld [vmem:[%s20386_s1 + $0x3a8] sm:$0xf] }
 0x3ab   : > { %7733 = vmatpush.bf16.msrb.mxu2 %v11836_v41  ;;  %v10681_v62 = vld [vmem:[%s20386_s1 + $0x160] sm:$0xf0]  ;;  %7708 = vmatpush.bf16.msrb.mxu0 %v10748_v54  ;;  %v7481_v51 = vpop.f32.mrf.mxu2  ;;  %v12707_v55 = vld [vmem:[%s20386_s1 + $0x3e4] sm:$0xf0] }
 0x3ac   : > { %v12746_v63 = vld [vmem:[%s20386_s1 + $0x524] sm:$0xf]  ;;  %v10684_v13 = vor.u32 %v12618_v61, %v10681_v62  ;;  %v11519_v54 = vld [vmem:[%s20386_s1 + $0x7a8] sm:$0xf]  ;;  %v11008_v8 = vor.u32 %v12707_v55, %v11007_v52 }
 0x3ad   : > { %7746 = vmatpush.bf16.msrb.mxu3 %v12348_v40  ;;  %v11193_v6 = vld [vmem:[%s20386_s1 + $0x560] sm:$0xf0]  ;;  %7721 = vmatpush.bf16.msrb.mxu1 %v11260_v57  ;;  %v7494_v57 = vpop.f32.mrf.mxu3  ;;  %v12835_v61 = vld [vmem:[%s20386_s1 + $0x7e4] sm:$0xf0] }
 0x3ae   : > { %v12874_v7 = vld [vmem:[%s20386_s1 + $0x924] sm:$0xf]  ;;  %v11196_v46 = vor.u32 %v12746_v63, %v11193_v6  ;;  %v12031_v62 = vld [vmem:[%s20386_s1 + $0xba8] sm:$0xf]  ;;  %v11520_v11 = vor.u32 %v12835_v61, %v11519_v54  ;;  %v7505_v57 = vpop.f32.mrf.mxu0 }
 0x3af   : > { %v11705_v10 = vld [vmem:[%s20386_s1 + $0x960] sm:$0xf0]  ;;  %7734 = vmatpush.bf16.msrb.mxu2 %v11772_v58  ;;  %7709 = vmatpush.bf16.msrb.mxu0 %v10684_v13  ;;  %v12963_v63 = vld [vmem:[%s20386_s1 + $0xbe4] sm:$0xf0] }
 0x3b0   : > { %v13002_v9 = vld [vmem:[%s20386_s1 + $0xd24] sm:$0xf]  ;;  %v11708_v18 = vor.u32 %v12874_v7, %v11705_v10  ;;  %v12543_v6 = vld [vmem:[%s20386_s1 + $0xfa8] sm:$0xf] }
 0x3b1   : > { %v12217_v26 = vld [vmem:[%s20386_s1 + $0xd60] sm:$0xf0]  ;;  %7747 = vmatpush.bf16.msrb.mxu3 %v12284_v3  ;;  %7722 = vmatpush.bf16.msrb.mxu1 %v11196_v46  ;;  %v13091_v7 = vld [vmem:[%s20386_s1 + $0xfe4] sm:$0xf0] }
 0x3b2   : > { %v12602_v19 = vld [vmem:[%s20386_s1 + $0xa4] sm:$0xf]  ;;  %v12220_v22 = vor.u32 %v13002_v9, %v12217_v26  ;;  %v12032_v9 = vor.u32 %v12963_v63, %v12031_v62  ;;  %v10943_v26 = vld [vmem:[%s20386_s1 + $0x328] sm:$0xf]  ;;  %v12544_v14 = vor.u32 %v13091_v7, %v12543_v6  ;;  %v7506_v62 = vadd.f32 %v7505_v57, %v15897_v35 }
 0x3b3   : > { %v10617_v20 = vld [vmem:[%s20386_s1 + $0xe0] sm:$0xf0]  ;;  %7735 = vmatpush.bf16.msrb.mxu2 %v11708_v18  ;;  %v11455_v13 = vld [vmem:[%s20386_s1 + $0x728] sm:$0xf] }
 0x3b4   : > { %v12730_v21 = vld [vmem:[%s20386_s1 + $0x4a4] sm:$0xf]  ;;  %v10620_v30 = vor.u32 %v12602_v19, %v10617_v20  ;;  %v12819_v46 = vld [vmem:[%s20386_s1 + $0x764] sm:$0xf0] }
 0x3b5   : > { %v11129_v23 = vld [vmem:[%s20386_s1 + $0x4e0] sm:$0xf0]  ;;  %7748 = vmatpush.bf16.msrb.mxu3 %v12220_v22  ;;  %v11967_v18 = vld [vmem:[%s20386_s1 + $0xb28] sm:$0xf]  ;;  %v10944_v22 = vor.u32 %v12691_v12, %v10943_v26 }
 0x3b6   : > { %v12858_v0 = vld [vmem:[%s20386_s1 + $0x8a4] sm:$0xf]  ;;  %v11132_v38 = vor.u32 %v12730_v21, %v11129_v23  ;;  %7710 = vmatpush.bf16.msrb.mxu0 %v10620_v30  ;;  %v12947_v19 = vld [vmem:[%s20386_s1 + $0xb64] sm:$0xf0]  ;;  %v11456_v23 = vor.u32 %v12819_v46, %v11455_v13 }
 0x3b7   : > { %v11641_v27 = vld [vmem:[%s20386_s1 + $0x8e0] sm:$0xf0]  ;;  %v12479_v20 = vld [vmem:[%s20386_s1 + $0xf28] sm:$0xf] }
 0x3b8   : > { %v12986_v28 = vld [vmem:[%s20386_s1 + $0xca4] sm:$0xf]  ;;  %v11644_v41 = vor.u32 %v12858_v0, %v11641_v27  ;;  %7723 = vmatpush.bf16.msrb.mxu1 %v11132_v38  ;;  %v13075_v21 = vld [vmem:[%s20386_s1 + $0xf64] sm:$0xf0]  ;;  %v11968_v0 = vor.u32 %v12947_v19, %v11967_v18 }
 0x3b9   : > { %v12153_v29 = vld [vmem:[%s20386_s1 + $0xce0] sm:$0xf0]  ;;  %v10879_v27 = vld [vmem:[%s20386_s1 + $0x2a8] sm:$0xf]  ;;  %v12480_v30 = vor.u32 %v13075_v21, %v12479_v20 }
 0x3ba   : > { %v12586_v31 = vld [vmem:[%s20386_s1 + $0x24] sm:$0xf]  ;;  %v12156_v40 = vor.u32 %v12986_v28, %v12153_v29  ;;  %7736 = vmatpush.bf16.msrb.mxu2 %v11644_v41  ;;  %v12675_v28 = vld [vmem:[%s20386_s1 + $0x2e4] sm:$0xf0] }
 0x3bb   : > { %v10553_v32 = vld [vmem:[%s20386_s1 + $0x60] sm:$0xf0]  ;;  %v11391_v29 = vld [vmem:[%s20386_s1 + $0x6a8] sm:$0xf] }
 0x3bc   : > { %v12714_v42 = vld [vmem:[%s20386_s1 + $0x424] sm:$0xf]  ;;  %v10556_v58 = vor.u32 %v12586_v31, %v10553_v32  ;;  %7749 = vmatpush.bf16.msrb.mxu3 %v12156_v40  ;;  %v12803_v31 = vld [vmem:[%s20386_s1 + $0x6e4] sm:$0xf0] }
 0x3bd   : > { %v11065_v43 = vld [vmem:[%s20386_s1 + $0x460] sm:$0xf0]  ;;  %v11903_v32 = vld [vmem:[%s20386_s1 + $0xaa8] sm:$0xf] }
 0x3be   : > { %v12842_v44 = vld [vmem:[%s20386_s1 + $0x824] sm:$0xf]  ;;  %v11068_v3 = vor.u32 %v12714_v42, %v11065_v43  ;;  %7711 = vmatpush.bf16.msrb.mxu0 %v10556_v58  ;;  %v12931_v38 = vld [vmem:[%s20386_s1 + $0xae4] sm:$0xf0]  ;;  %v10880_v43 = vor.u32 %v12675_v28, %v10879_v27 }
 0x3bf   : > { %v11577_v47 = vld [vmem:[%s20386_s1 + $0x860] sm:$0xf0]  ;;  %v12415_v41 = vld [vmem:[%s20386_s1 + $0xea8] sm:$0xf]  ;;  %v11904_v40 = vor.u32 %v12931_v38, %v11903_v32 }
 0x3c0   : > { %v12970_v48 = vld [vmem:[%s20386_s1 + $0xc24] sm:$0xf]  ;;  %v11580_v36 = vor.u32 %v12842_v44, %v11577_v47  ;;  %7724 = vmatpush.bf16.msrb.mxu1 %v11068_v3  ;;  %v13059_v42 = vld [vmem:[%s20386_s1 + $0xee4] sm:$0xf0]  ;;  %v11392_v44 = vor.u32 %v12803_v31, %v11391_v29  ;;  %v7518_v3 = vpop.f32.mrf.mxu1  ;;  %v7544_v31 = vpop.f32.mrf.mxu3 }
 0x3c1   : > { %v12089_v50 = vld [vmem:[%s20386_s1 + $0xc60] sm:$0xf0]  ;;  %7712 = vmatmul.bf16.vlgmr.msrb.gmra.mxu0 %v17170_v60  ;;  %v10815_v47 = vld [vmem:[%s20386_s1 + $0x228] sm:$0xf]  ;;  %v12416_v51 = vor.u32 %v13059_v42, %v12415_v41  ;;  %v7507_v41 = vpop.f32.mrf.mxu0 }
 0x3c2   : > { %v12092_v10 = vor.u32 %v12970_v48, %v12089_v50  ;;  %7737 = vmatpush.bf16.msrb.mxu2 %v11580_v36  ;;  %7756 = vmatpush.bf16.msra.mxu0 %v11008_v8  ;;  %v12659_v48 = vld [vmem:[%s20386_s1 + $0x264] sm:$0xf0]  ;;  %v10945_v41 = vld [vmem:[%s20386_s1 + $0x368] sm:$0xf0] }
 0x3c3   : > { %7725 = vmatmul.bf16.vlgmr.msrb.gmra.mxu1 %v17183_v2  ;;  %v11327_v50 = vld [vmem:[%s20386_s1 + $0x628] sm:$0xf]  ;;  %v10816_v63 = vor.u32 %v12659_v48, %v10815_v47 }
 0x3c4   : > { %7750 = vmatpush.bf16.msrb.mxu3 %v12092_v10  ;;  %7769 = vmatpush.bf16.msra.mxu1 %v11520_v11  ;;  %v12787_v52 = vld [vmem:[%s20386_s1 + $0x664] sm:$0xf0]  ;;  %v7519_v11 = vadd.f32 %v7518_v3, %v7506_v62 }
 0x3c5   : > { %7738 = vmatmul.bf16.vlgmr.msrb.gmra.mxu2 %v17181_v1  ;;  %v11839_v55 = vld [vmem:[%s20386_s1 + $0xa28] sm:$0xf]  ;;  %v11328_v36 = vor.u32 %v12787_v52, %v11327_v50 }
 0x3c6   : > { %7782 = vmatpush.bf16.msra.mxu2 %v12032_v9  ;;  %7757 = vmatpush.bf16.msra.mxu0 %v10944_v22  ;;  %v12915_v54 = vld [vmem:[%s20386_s1 + $0xa64] sm:$0xf0] }
 0x3c7   : > { %7751 = vmatmul.bf16.vlgmr.msrb.gmra.mxu3 %v17191_v5  ;;  %v12351_v58 = vld [vmem:[%s20386_s1 + $0xe28] sm:$0xf]  ;;  %v11840_v6 = vor.u32 %v12915_v54, %v11839_v55 }
 0x3c8   : > { %7795 = vmatpush.bf16.msra.mxu3 %v12544_v14  ;;  %7770 = vmatpush.bf16.msra.mxu1 %v11456_v23  ;;  %v13043_v61 = vld [vmem:[%s20386_s1 + $0xe64] sm:$0xf0] }
 0x3c9   : > { %v10751_v7 = vld [vmem:[%s20386_s1 + $0x1a8] sm:$0xf]  ;;  %v12352_v35 = vor.u32 %v13043_v61, %v12351_v58 }
 0x3ca   : > { %7783 = vmatpush.bf16.msra.mxu2 %v11968_v0  ;;  %7758 = vmatpush.bf16.msra.mxu0 %v10880_v43  ;;  %v12643_v10 = vld [vmem:[%s20386_s1 + $0x1e4] sm:$0xf0]  ;;  %v7531_v0 = vpop.f32.mrf.mxu2  ;;  %v7520_v43 = vpop.f32.mrf.mxu1 }
 0x3cb   : > { %v11263_v8 = vld [vmem:[%s20386_s1 + $0x5a8] sm:$0xf]  ;;  %v10752_v46 = vor.u32 %v12643_v10, %v10751_v7 }
 0x3cc   : > { %7796 = vmatpush.bf16.msra.mxu3 %v12480_v30  ;;  %7771 = vmatpush.bf16.msra.mxu1 %v11392_v44  ;;  %v12771_v9 = vld [vmem:[%s20386_s1 + $0x5e4] sm:$0xf0]  ;;  %v7532_v30 = vadd.f32 %v7531_v0, %v7519_v11 }
 0x3cd   : > { %v11775_v26 = vld [vmem:[%s20386_s1 + $0x9a8] sm:$0xf]  ;;  %v11264_v18 = vor.u32 %v12771_v9, %v11263_v8 }
 0x3ce   : > { %7784 = vmatpush.bf16.msra.mxu2 %v11904_v40  ;;  %v12899_v12 = vld [vmem:[%s20386_s1 + $0x9e4] sm:$0xf0]  ;;  %7759 = vmatpush.bf16.msra.mxu0 %v10816_v63  ;;  %v19081_v44 = vadd.f32 %v7544_v31, %v7532_v30 }
 0x3cf   : > { %v12287_v13 = vld [vmem:[%s20386_s1 + $0xda8] sm:$0xf]  ;;  %v11776_v19 = vor.u32 %v12899_v12, %v11775_v26 }
 0x3d0   : > { %7797 = vmatpush.bf16.msra.mxu3 %v12416_v51  ;;  %v13027_v14 = vld [vmem:[%s20386_s1 + $0xde4] sm:$0xf0]  ;;  %7772 = vmatpush.bf16.msra.mxu1 %v11328_v36 }
 0x3d1   : > { %v10687_v20 = vld [vmem:[%s20386_s1 + $0x128] sm:$0xf]  ;;  %v12288_v23 = vor.u32 %v13027_v14, %v12287_v13  ;;  %v12699_v13 = vld [vmem:[%s20386_s1 + $0x3ac] sm:$0xf] }
 0x3d2   : > { %7785 = vmatpush.bf16.msra.mxu2 %v11840_v6  ;;  %v12627_v21 = vld [vmem:[%s20386_s1 + $0x164] sm:$0xf0]  ;;  %7760 = vmatpush.bf16.msra.mxu0 %v10752_v46  ;;  %v7533_v12 = vpop.f32.mrf.mxu2  ;;  %v11009_v14 = vld [vmem:[%s20386_s1 + $0x3e8] sm:$0xf0] }
 0x3d3   : > { %v11199_v22 = vld [vmem:[%s20386_s1 + $0x528] sm:$0xf]  ;;  %v10688_v42 = vor.u32 %v12627_v21, %v10687_v20  ;;  %v12827_v46 = vld [vmem:[%s20386_s1 + $0x7ac] sm:$0xf]  ;;  %v11012_v30 = vor.u32 %v12699_v13, %v11009_v14 }
 0x3d4   : > { %7798 = vmatpush.bf16.msra.mxu3 %v12352_v35  ;;  %v12755_v27 = vld [vmem:[%s20386_s1 + $0x564] sm:$0xf0]  ;;  %7773 = vmatpush.bf16.msra.mxu1 %v11264_v18  ;;  %v7546_v18 = vpop.f32.mrf.mxu3  ;;  %v11521_v20 = vld [vmem:[%s20386_s1 + $0x7e8] sm:$0xf0] }
 0x3d5   : > { %v11711_v28 = vld [vmem:[%s20386_s1 + $0x928] sm:$0xf]  ;;  %v11200_v40 = vor.u32 %v12755_v27, %v11199_v22  ;;  %v12955_v21 = vld [vmem:[%s20386_s1 + $0xbac] sm:$0xf]  ;;  %v11524_v31 = vor.u32 %v12827_v46, %v11521_v20  ;;  %v7557_v18 = vpop.f32.mrf.mxu0 }
 0x3d6   : > { %v12883_v29 = vld [vmem:[%s20386_s1 + $0x964] sm:$0xf0]  ;;  %7786 = vmatpush.bf16.msra.mxu2 %v11776_v19  ;;  %7761 = vmatpush.bf16.msra.mxu0 %v10688_v42  ;;  %v12033_v22 = vld [vmem:[%s20386_s1 + $0xbe8] sm:$0xf0] }
 0x3d7   : > { %v12223_v32 = vld [vmem:[%s20386_s1 + $0xd28] sm:$0xf]  ;;  %v11712_v47 = vor.u32 %v12883_v29, %v11711_v28  ;;  %v13083_v27 = vld [vmem:[%s20386_s1 + $0xfac] sm:$0xf] }
 0x3d8   : > { %v13011_v38 = vld [vmem:[%s20386_s1 + $0xd64] sm:$0xf0]  ;;  %7799 = vmatpush.bf16.msra.mxu3 %v12288_v23  ;;  %7774 = vmatpush.bf16.msra.mxu1 %v11200_v40  ;;  %v12545_v28 = vld [vmem:[%s20386_s1 + $0xfe8] sm:$0xf0] }
 0x3d9   : > { %v10623_v48 = vld [vmem:[%s20386_s1 + $0xa8] sm:$0xf]  ;;  %v12224_v52 = vor.u32 %v13011_v38, %v12223_v32  ;;  %v12036_v32 = vor.u32 %v12955_v21, %v12033_v22  ;;  %v12683_v38 = vld [vmem:[%s20386_s1 + $0x32c] sm:$0xf]  ;;  %v12548_v43 = vor.u32 %v13083_v27, %v12545_v28  ;;  %v7558_v21 = vadd.f32 %v7557_v18, %v16095_v33 }
 0x3da   : > { %v12611_v50 = vld [vmem:[%s20386_s1 + $0xe4] sm:$0xf0]  ;;  %7787 = vmatpush.bf16.msra.mxu2 %v11712_v47  ;;  %v12811_v42 = vld [vmem:[%s20386_s1 + $0x72c] sm:$0xf] }
 0x3db   : > { %v11135_v51 = vld [vmem:[%s20386_s1 + $0x4a8] sm:$0xf]  ;;  %v10624_v62 = vor.u32 %v12611_v50, %v10623_v48  ;;  %v11457_v40 = vld [vmem:[%s20386_s1 + $0x768] sm:$0xf0] }
 0x3dc   : > { %v12739_v55 = vld [vmem:[%s20386_s1 + $0x4e4] sm:$0xf0]  ;;  %7800 = vmatpush.bf16.msra.mxu3 %v12224_v52  ;;  %v12939_v47 = vld [vmem:[%s20386_s1 + $0xb2c] sm:$0xf]  ;;  %v10948_v52 = vor.u32 %v12683_v38, %v10945_v41 }
 0x3dd   : > { %v11647_v54 = vld [vmem:[%s20386_s1 + $0x8a8] sm:$0xf]  ;;  %v11136_v36 = vor.u32 %v12739_v55, %v11135_v51  ;;  %7762 = vmatpush.bf16.msra.mxu0 %v10624_v62  ;;  %v11969_v48 = vld [vmem:[%s20386_s1 + $0xb68] sm:$0xf0]  ;;  %v11460_v55 = vor.u32 %v12811_v42, %v11457_v40 }
 0x3de   : > { %v12867_v57 = vld [vmem:[%s20386_s1 + $0x8e4] sm:$0xf0]  ;;  %v13067_v50 = vld [vmem:[%s20386_s1 + $0xf2c] sm:$0xf] }
 0x3df   : > { %v12159_v58 = vld [vmem:[%s20386_s1 + $0xca8] sm:$0xf]  ;;  %v11648_v6 = vor.u32 %v12867_v57, %v11647_v54  ;;  %7775 = vmatpush.bf16.msra.mxu1 %v11136_v36  ;;  %v12481_v51 = vld [vmem:[%s20386_s1 + $0xf68] sm:$0xf0]  ;;  %v11972_v54 = vor.u32 %v12939_v47, %v11969_v48 }
 0x3e0   : > { %v12995_v61 = vld [vmem:[%s20386_s1 + $0xce4] sm:$0xf0]  ;;  %v12667_v57 = vld [vmem:[%s20386_s1 + $0x2ac] sm:$0xf]  ;;  %v12484_v62 = vor.u32 %v13067_v50, %v12481_v51 }
 0x3e1   : > { %v10559_v63 = vld [vmem:[%s20386_s1 + $0x28] sm:$0xf]  ;;  %v12160_v35 = vor.u32 %v12995_v61, %v12159_v58  ;;  %7788 = vmatpush.bf16.msra.mxu2 %v11648_v6  ;;  %v10881_v58 = vld [vmem:[%s20386_s1 + $0x2e8] sm:$0xf0] }
 0x3e2   : > { %v12595_v3 = vld [vmem:[%s20386_s1 + $0x64] sm:$0xf0]  ;;  %v12795_v61 = vld [vmem:[%s20386_s1 + $0x6ac] sm:$0xf] }
 0x3e3   : > { %v11071_v7 = vld [vmem:[%s20386_s1 + $0x428] sm:$0xf]  ;;  %v10560_v19 = vor.u32 %v12595_v3, %v10559_v63  ;;  %7801 = vmatpush.bf16.msra.mxu3 %v12160_v35  ;;  %v11393_v63 = vld [vmem:[%s20386_s1 + $0x6e8] sm:$0xf0] }
 0x3e4   : > { %v12723_v10 = vld [vmem:[%s20386_s1 + $0x464] sm:$0xf0]  ;;  %v12923_v3 = vld [vmem:[%s20386_s1 + $0xaac] sm:$0xf] }
 0x3e5   : > { %v11583_v8 = vld [vmem:[%s20386_s1 + $0x828] sm:$0xf]  ;;  %v11072_v23 = vor.u32 %v12723_v10, %v11071_v7  ;;  %7763 = vmatpush.bf16.msra.mxu0 %v10560_v19  ;;  %v11905_v36 = vld [vmem:[%s20386_s1 + $0xae8] sm:$0xf0]  ;;  %v10884_v10 = vor.u32 %v12667_v57, %v10881_v58 }
 0x3e6   : > { %v12851_v11 = vld [vmem:[%s20386_s1 + $0x864] sm:$0xf0]  ;;  %v13051_v6 = vld [vmem:[%s20386_s1 + $0xeac] sm:$0xf]  ;;  %v11908_v35 = vor.u32 %v12923_v3, %v11905_v36 }
 0x3e7   : > { %v12095_v9 = vld [vmem:[%s20386_s1 + $0xc28] sm:$0xf]  ;;  %v11584_v0 = vor.u32 %v12851_v11, %v11583_v8  ;;  %7776 = vmatpush.bf16.msra.mxu1 %v11072_v23  ;;  %v12417_v7 = vld [vmem:[%s20386_s1 + $0xee8] sm:$0xf0]  ;;  %v11396_v8 = vor.u32 %v12795_v61, %v11393_v63  ;;  %v7570_v23 = vpop.f32.mrf.mxu1  ;;  %v7596_v63 = vpop.f32.mrf.mxu3 }
 0x3e8   : > { %v12979_v26 = vld [vmem:[%s20386_s1 + $0xc64] sm:$0xf0]  ;;  %7764 = vmatmul.bf16.vlgmr.msra.gmra.mxu0 %v17170_v60  ;;  %v12651_v11 = vld [vmem:[%s20386_s1 + $0x22c] sm:$0xf]  ;;  %v12420_v12 = vor.u32 %v13051_v6, %v12417_v7  ;;  %v7559_v6 = vpop.f32.mrf.mxu0 }
 0x3e9   : > { %v12096_v29 = vor.u32 %v12979_v26, %v12095_v9  ;;  %7789 = vmatpush.bf16.msra.mxu2 %v11584_v0  ;;  %7808 = vmatpush.bf16.msrb.mxu0 %v11012_v30  ;;  %v10817_v9 = vld [vmem:[%s20386_s1 + $0x268] sm:$0xf0]  ;;  %v10951_v6 = vld [vmem:[%s20386_s1 + $0x330] sm:$0xf] }
 0x3ea   : > { %7777 = vmatmul.bf16.vlgmr.msra.gmra.mxu1 %v17183_v2  ;;  %v12779_v26 = vld [vmem:[%s20386_s1 + $0x62c] sm:$0xf]  ;;  %v10820_v22 = vor.u32 %v12651_v11, %v10817_v9 }
 0x3eb   : > { %7802 = vmatpush.bf16.msra.mxu3 %v12096_v29  ;;  %7821 = vmatpush.bf16.msrb.mxu1 %v11524_v31  ;;  %v11329_v13 = vld [vmem:[%s20386_s1 + $0x668] sm:$0xf0]  ;;  %v7571_v31 = vadd.f32 %v7570_v23, %v7558_v21 }
 0x3ec   : > { %7790 = vmatmul.bf16.vlgmr.msra.gmra.mxu2 %v17181_v1  ;;  %v12907_v14 = vld [vmem:[%s20386_s1 + $0xa2c] sm:$0xf]  ;;  %v11332_v0 = vor.u32 %v12779_v26, %v11329_v13 }
 0x3ed   : > { %7834 = vmatpush.bf16.msrb.mxu2 %v12036_v32  ;;  %7809 = vmatpush.bf16.msrb.mxu0 %v10948_v52  ;;  %v11841_v46 = vld [vmem:[%s20386_s1 + $0xa68] sm:$0xf0] }
 0x3ee   : > { %7803 = vmatmul.bf16.vlgmr.msra.gmra.mxu3 %v17191_v5  ;;  %v13035_v19 = vld [vmem:[%s20386_s1 + $0xe2c] sm:$0xf]  ;;  %v11844_v27 = vor.u32 %v12907_v14, %v11841_v46 }
 0x3ef   : > { %7847 = vmatpush.bf16.msrb.mxu3 %v12548_v43  ;;  %7822 = vmatpush.bf16.msrb.mxu1 %v11460_v55  ;;  %v12353_v20 = vld [vmem:[%s20386_s1 + $0xe68] sm:$0xf0] }
 0x3f0   : > { %v12635_v28 = vld [vmem:[%s20386_s1 + $0x1ac] sm:$0xf]  ;;  %v12356_v33 = vor.u32 %v13035_v19, %v12353_v20 }
 0x3f1   : > { %7835 = vmatpush.bf16.msrb.mxu2 %v11972_v54  ;;  %7810 = vmatpush.bf16.msrb.mxu0 %v10884_v10  ;;  %v10753_v29 = vld [vmem:[%s20386_s1 + $0x1e8] sm:$0xf0]  ;;  %v7583_v54 = vpop.f32.mrf.mxu2  ;;  %v7572_v10 = vpop.f32.mrf.mxu1 }
 0x3f2   : > { %v12763_v30 = vld [vmem:[%s20386_s1 + $0x5ac] sm:$0xf]  ;;  %v10756_v40 = vor.u32 %v12635_v28, %v10753_v29  ;;  %v11463_v10 = vld [vmem:[%s20386_s1 + $0x730] sm:$0xf] }
 0x3f3   : > { %7848 = vmatpush.bf16.msrb.mxu3 %v12484_v62  ;;  %7823 = vmatpush.bf16.msrb.mxu1 %v11396_v8  ;;  %v11265_v32 = vld [vmem:[%s20386_s1 + $0x5e8] sm:$0xf0]  ;;  %v7584_v62 = vadd.f32 %v7583_v54, %v7571_v31 }
 0x3f4   : > { %v12891_v38 = vld [vmem:[%s20386_s1 + $0x9ac] sm:$0xf]  ;;  %v11268_v47 = vor.u32 %v12763_v30, %v11265_v32 }
 0x3f5   : > { %7836 = vmatpush.bf16.msrb.mxu2 %v11908_v35  ;;  %v11777_v41 = vld [vmem:[%s20386_s1 + $0x9e8] sm:$0xf0]  ;;  %7811 = vmatpush.bf16.msrb.mxu0 %v10820_v22  ;;  %v19280_v8 = vadd.f32 %v7596_v63, %v7584_v62 }
 0x3f6   : > { %v13019_v42 = vld [vmem:[%s20386_s1 + $0xdac] sm:$0xf]  ;;  %v11780_v48 = vor.u32 %v12891_v38, %v11777_v41 }
 0x3f7   : > { %7849 = vmatpush.bf16.msrb.mxu3 %v12420_v12  ;;  %v12289_v43 = vld [vmem:[%s20386_s1 + $0xde8] sm:$0xf0]  ;;  %7824 = vmatpush.bf16.msrb.mxu1 %v11332_v0 }
 0x3f8   : > { %v12619_v50 = vld [vmem:[%s20386_s1 + $0x12c] sm:$0xf]  ;;  %v12292_v55 = vor.u32 %v13019_v42, %v12289_v43  ;;  %v11015_v42 = vld [vmem:[%s20386_s1 + $0x3b0] sm:$0xf] }
 0x3f9   : > { %7837 = vmatpush.bf16.msrb.mxu2 %v11844_v27  ;;  %v10689_v51 = vld [vmem:[%s20386_s1 + $0x168] sm:$0xf0]  ;;  %7812 = vmatpush.bf16.msrb.mxu0 %v10756_v40  ;;  %v7585_v41 = vpop.f32.mrf.mxu2  ;;  %v12708_v43 = vld [vmem:[%s20386_s1 + $0x3ec] sm:$0xf0] }
 0x3fa   : > { %v12747_v52 = vld [vmem:[%s20386_s1 + $0x52c] sm:$0xf]  ;;  %v10692_v7 = vor.u32 %v12619_v50, %v10689_v51  ;;  %v11527_v40 = vld [vmem:[%s20386_s1 + $0x7b0] sm:$0xf]  ;;  %v11016_v63 = vor.u32 %v12708_v43, %v11015_v42 }
 0x3fb   : > { %7850 = vmatpush.bf16.msrb.mxu3 %v12356_v33  ;;  %v11201_v57 = vld [vmem:[%s20386_s1 + $0x568] sm:$0xf0]  ;;  %7825 = vmatpush.bf16.msrb.mxu1 %v11268_v47  ;;  %v7598_v47 = vpop.f32.mrf.mxu3  ;;  %v12836_v50 = vld [vmem:[%s20386_s1 + $0x7ec] sm:$0xf0] }
 0x3fc   : > { %v12875_v58 = vld [vmem:[%s20386_s1 + $0x92c] sm:$0xf]  ;;  %v11204_v35 = vor.u32 %v12747_v52, %v11201_v57  ;;  %v12039_v51 = vld [vmem:[%s20386_s1 + $0xbb0] sm:$0xf] }
 0x3fd   : > { %v11713_v61 = vld [vmem:[%s20386_s1 + $0x968] sm:$0xf0]  ;;  %7838 = vmatpush.bf16.msrb.mxu2 %v11780_v48  ;;  %7813 = vmatpush.bf16.msrb.mxu0 %v10692_v7  ;;  %v12964_v52 = vld [vmem:[%s20386_s1 + $0xbec] sm:$0xf0] }
 0x3fe   : > { %v13003_v3 = vld [vmem:[%s20386_s1 + $0xd2c] sm:$0xf]  ;;  %v11716_v11 = vor.u32 %v12875_v58, %v11713_v61  ;;  %v12551_v57 = vld [vmem:[%s20386_s1 + $0xfb0] sm:$0xf]  ;;  %v19357_v61 = vld [vmem:[%s20388_s3] sm:$0xff] }
 0x3ff   : > { %v12225_v36 = vld [vmem:[%s20386_s1 + $0xd68] sm:$0xf0]  ;;  %7851 = vmatpush.bf16.msrb.mxu3 %v12292_v55  ;;  %7826 = vmatpush.bf16.msrb.mxu1 %v11204_v35  ;;  %v13092_v58 = vld [vmem:[%s20386_s1 + $0xfec] sm:$0xf0] }
 0x400   : > { %v12603_v9 = vld [vmem:[%s20386_s1 + $0xac] sm:$0xf]  ;;  %v12228_v13 = vor.u32 %v13003_v3, %v12225_v36  ;;  %v11528_v3 = vor.u32 %v12836_v50, %v11527_v40  ;;  %v12040_v36 = vor.u32 %v12964_v52, %v12039_v51  ;;  %v12692_v7 = vld [vmem:[%s20386_s1 + $0x36c] sm:$0xf0]  ;;  %v12552_v35 = vor.u32 %v13092_v58, %v12551_v57  ;;  %v7609_v52 = vpop.f32.mrf.mxu0 }
 0x401   : > { %v10625_v26 = vld [vmem:[%s20386_s1 + $0xe8] sm:$0xf0]  ;;  %7839 = vmatpush.bf16.msrb.mxu2 %v11716_v11  ;;  %v12820_v11 = vld [vmem:[%s20386_s1 + $0x76c] sm:$0xf0]  ;;  %v7610_v58 = vadd.f32 %v7609_v52, %v16293_v34 }
 0x402   : > { %v12731_v12 = vld [vmem:[%s20386_s1 + $0x4ac] sm:$0xf]  ;;  %v10628_v21 = vor.u32 %v12603_v9, %v10625_v26  ;;  %v11975_v9 = vld [vmem:[%s20386_s1 + $0xb30] sm:$0xf] }
 0x403   : > { %v11137_v14 = vld [vmem:[%s20386_s1 + $0x4e8] sm:$0xf0]  ;;  %7852 = vmatpush.bf16.msrb.mxu3 %v12228_v13  ;;  %v12948_v26 = vld [vmem:[%s20386_s1 + $0xb6c] sm:$0xf0] }
 0x404   : > { %v12859_v46 = vld [vmem:[%s20386_s1 + $0x8ac] sm:$0xf]  ;;  %v11140_v0 = vor.u32 %v12731_v12, %v11137_v14  ;;  %7814 = vmatpush.bf16.msrb.mxu0 %v10628_v21  ;;  %v8076_v12 = vperm.slane %v19357_v61, 4  ;;  %v12487_v13 = vld [vmem:[%s20386_s1 + $0xf30] sm:$0xf] }
 0x405   : > { %v11649_v18 = vld [vmem:[%s20386_s1 + $0x8e8] sm:$0xf0]  ;;  %v13076_v14 = vld [vmem:[%s20386_s1 + $0xf6c] sm:$0xf0] }
 0x406   : > { %v12987_v19 = vld [vmem:[%s20386_s1 + $0xcac] sm:$0xf]  ;;  %v11652_v27 = vor.u32 %v12859_v46, %v11649_v18  ;;  %7827 = vmatpush.bf16.msrb.mxu1 %v11140_v0  ;;  %v10952_v46 = vor.u32 %v12692_v7, %v10951_v6  ;;  %v11464_v18 = vor.u32 %v12820_v11, %v11463_v10  ;;  %v12676_v21 = vld [vmem:[%s20386_s1 + $0x2ec] sm:$0xf0] }
 0x407   : > { %v12161_v20 = vld [vmem:[%s20386_s1 + $0xce8] sm:$0xf0]  ;;  %v12804_v0 = vld [vmem:[%s20386_s1 + $0x6ec] sm:$0xf0] }
 0x408   : > { %v12587_v22 = vld [vmem:[%s20386_s1 + $0x2c] sm:$0xf]  ;;  %v12164_v33 = vor.u32 %v12987_v19, %v12161_v20  ;;  %7840 = vmatpush.bf16.msrb.mxu2 %v11652_v27  ;;  %v11976_v19 = vor.u32 %v12948_v26, %v11975_v9  ;;  %v10887_v20 = vld [vmem:[%s20386_s1 + $0x2b0] sm:$0xf] }
 0x409   : > { %v10561_v23 = vld [vmem:[%s20386_s1 + $0x68] sm:$0xf0]  ;;  %v11911_v27 = vld [vmem:[%s20386_s1 + $0xab0] sm:$0xf] }
 0x40a   : > { %v12715_v28 = vld [vmem:[%s20386_s1 + $0x42c] sm:$0xf]  ;;  %v10564_v48 = vor.u32 %v12587_v22, %v10561_v23  ;;  %7853 = vmatpush.bf16.msrb.mxu3 %v12164_v33  ;;  %v11399_v22 = vld [vmem:[%s20386_s1 + $0x6b0] sm:$0xf]  ;;  %v12488_v23 = vor.u32 %v13076_v14, %v12487_v13 }
 0x40b   : > { %v11073_v29 = vld [vmem:[%s20386_s1 + $0x468] sm:$0xf0]  ;;  %v13060_v33 = vld [vmem:[%s20386_s1 + $0xeec] sm:$0xf0] }
 0x40c   : > { %v12843_v30 = vld [vmem:[%s20386_s1 + $0x82c] sm:$0xf]  ;;  %v11076_v55 = vor.u32 %v12715_v28, %v11073_v29  ;;  %7815 = vmatpush.bf16.msrb.mxu0 %v10564_v48  ;;  %v12932_v28 = vld [vmem:[%s20386_s1 + $0xaec] sm:$0xf0]  ;;  %v8108_v29 = vadd.f32 %v8076_v12, %v18882_v15  ;;  %v11400_v15 = vor.u32 %v12804_v0, %v11399_v22 }
 0x40d   : > { %v11585_v31 = vld [vmem:[%s20386_s1 + $0x868] sm:$0xf0]  ;;  %v10823_v41 = vld [vmem:[%s20386_s1 + $0x230] sm:$0xf] }
 0x40e   : > { %v12971_v32 = vld [vmem:[%s20386_s1 + $0xc2c] sm:$0xf]  ;;  %v11588_v54 = vor.u32 %v12843_v30, %v11585_v31  ;;  %7828 = vmatpush.bf16.msrb.mxu1 %v11076_v55  ;;  %v12423_v30 = vld [vmem:[%s20386_s1 + $0xeb0] sm:$0xf]  ;;  %v8072_v31 = vperm.slane %v19357_v61, 0 }
 0x40f   : > { %v12097_v38 = vld [vmem:[%s20386_s1 + $0xc68] sm:$0xf0]  ;;  %7816 = vmatmul.bf16.vlgmr.msrb.gmra.mxu0 %v17170_v60  ;;  %v12660_v42 = vld [vmem:[%s20386_s1 + $0x26c] sm:$0xf0]  ;;  %v12424_v40 = vor.u32 %v13060_v33, %v12423_v30  ;;  %v12569_v51 = vmul.f32 -1.442695, %v8108_v29  ;;  %v7648_v30 = vpop.f32.mrf.mxu3 }
 0x410   : > { %v12100_v62 = vor.u32 %v12971_v32, %v12097_v38  ;;  %7841 = vmatpush.bf16.msrb.mxu2 %v11588_v54  ;;  %7860 = vmatpush.bf16.msra.mxu0 %v11016_v63  ;;  %v10888_v32 = vor.u32 %v12676_v21, %v10887_v20  ;;  %v11912_v38 = vor.u32 %v12932_v28, %v11911_v27  ;;  %v11335_v43 = vld [vmem:[%s20386_s1 + $0x630] sm:$0xf]  ;;  %v7622_v63 = vpop.f32.mrf.mxu1 }
 0x411   : > { %7829 = vmatmul.bf16.vlgmr.msrb.gmra.mxu1 %v17183_v2  ;;  %v12788_v47 = vld [vmem:[%s20386_s1 + $0x66c] sm:$0xf0]  ;;  %v8104_v57 = vadd.f32 %v8072_v31, %v18086_v37  ;;  %v7623_v10 = vadd.f32 %v7622_v63, %v7610_v58  ;;  %13631 = vpow2.f32 %v12569_v51 }
 0x412   : > { %7854 = vmatpush.bf16.msrb.mxu3 %v12100_v62  ;;  %7873 = vmatpush.bf16.msra.mxu1 %v11528_v3  ;;  %v11847_v48 = vld [vmem:[%s20386_s1 + $0xa30] sm:$0xf]  ;;  %v10824_v62 = vor.u32 %v12660_v42, %v10823_v41  ;;  %v11336_v3 = vor.u32 %v12788_v47, %v11335_v43 }
 0x413   : > { %7842 = vmatmul.bf16.vlgmr.msrb.gmra.mxu2 %v17181_v1  ;;  %v12916_v50 = vld [vmem:[%s20386_s1 + $0xa6c] sm:$0xf0]  ;;  %v12565_v13 = vmul.f32 -1.442695, %v8104_v57 }
 0x414   : > { %7886 = vmatpush.bf16.msra.mxu2 %v12040_v36  ;;  %7861 = vmatpush.bf16.msra.mxu0 %v10952_v46  ;;  %v12359_v55 = vld [vmem:[%s20386_s1 + $0xe30] sm:$0xf]  ;;  %v11848_v36 = vor.u32 %v12916_v50, %v11847_v48 }
 0x415   : > { %7855 = vmatmul.bf16.vlgmr.msrb.gmra.mxu3 %v17191_v5  ;;  %v13044_v54 = vld [vmem:[%s20386_s1 + $0xe6c] sm:$0xf0]  ;;  %13633 = vpow2.f32 %v12565_v13 }
 0x416   : > { %7899 = vmatpush.bf16.msra.mxu3 %v12552_v35  ;;  %7874 = vmatpush.bf16.msra.mxu1 %v11464_v18  ;;  %v10759_v6 = vld [vmem:[%s20386_s1 + $0x1b0] sm:$0xf]  ;;  %v12360_v34 = vor.u32 %v13044_v54, %v12359_v55 }
 0x417   : > { %v12644_v7 = vld [vmem:[%s20386_s1 + $0x1ec] sm:$0xf0]  ;;  %v13632_v41 = vpop.eup %13631 }
 0x418   : > { %7887 = vmatpush.bf16.msra.mxu2 %v11976_v19  ;;  %7862 = vmatpush.bf16.msra.mxu0 %v10888_v32  ;;  %v11271_v37 = vld [vmem:[%s20386_s1 + $0x5b0] sm:$0xf]  ;;  %v10760_v14 = vor.u32 %v12644_v7, %v10759_v6  ;;  %v7611_v32 = vpop.f32.mrf.mxu0 }
 0x419   : > { %v12772_v35 = vld [vmem:[%s20386_s1 + $0x5ec] sm:$0xf0] }
 0x41a   : > { %7900 = vmatpush.bf16.msra.mxu3 %v12488_v23  ;;  %7875 = vmatpush.bf16.msra.mxu1 %v11400_v15  ;;  %v11783_v11 = vld [vmem:[%s20386_s1 + $0x9b0] sm:$0xf]  ;;  %v11272_v46 = vor.u32 %v12772_v35, %v11271_v37  ;;  %v7635_v23 = vpop.f32.mrf.mxu2 }
 0x41b   : > { %v12900_v9 = vld [vmem:[%s20386_s1 + $0x9ec] sm:$0xf0]  ;;  %v7636_v29 = vadd.f32 %v7635_v23, %v7623_v10  ;;  %v13634_v35 = vpop.eup %13633  ;;  %v12041_v23 = vld [vmem:[%s20386_s1 + $0xbf0] sm:$0xf0] }
 0x41c   : > { %7888 = vmatpush.bf16.msra.mxu2 %v11912_v38  ;;  %v12295_v26 = vld [vmem:[%s20386_s1 + $0xdb0] sm:$0xf]  ;;  %7863 = vmatpush.bf16.msra.mxu0 %v10824_v62  ;;  %v11784_v18 = vor.u32 %v12900_v9, %v11783_v11  ;;  %v7624_v38 = vpop.f32.mrf.mxu1  ;;  %v19514_v62 = vadd.f32 1.0, %v13632_v41  ;;  %v12684_v41 = vld [vmem:[%s20386_s1 + $0x334] sm:$0xf] }
 0x41d   : > { %v13028_v12 = vld [vmem:[%s20386_s1 + $0xdec] sm:$0xf0]  ;;  %v19488_v42 = vadd.f32 %v7648_v30, %v7636_v29  ;;  %v13084_v29 = vld [vmem:[%s20386_s1 + $0xfb4] sm:$0xf] }
 0x41e   : > { %7901 = vmatpush.bf16.msra.mxu3 %v12424_v40  ;;  %7876 = vmatpush.bf16.msra.mxu1 %v11336_v3  ;;  %v10695_v19 = vld [vmem:[%s20386_s1 + $0x130] sm:$0xf]  ;;  %v12296_v22 = vor.u32 %v13028_v12, %v12295_v26  ;;  %13635 = vrcp.f32 %v19514_v62  ;;  %v12553_v30 = vld [vmem:[%s20386_s1 + $0xff0] sm:$0xf0]  ;;  %vm8217_vm3 = vweird.f32 %v19514_v62 }
 0x41f   : > { %v12628_v20 = vld [vmem:[%s20386_s1 + $0x16c] sm:$0xf0] }
 0x420   : > { %7889 = vmatpush.bf16.msra.mxu2 %v11848_v36  ;;  %v11207_v21 = vld [vmem:[%s20386_s1 + $0x530] sm:$0xf]  ;;  %7864 = vmatpush.bf16.msra.mxu0 %v10760_v14  ;;  %v10696_v15 = vor.u32 %v12628_v20, %v10695_v19  ;;  %v12700_v14 = vld [vmem:[%s20386_s1 + $0x3b4] sm:$0xf]  ;;  %v7650_v19 = vpop.f32.mrf.mxu3 }
 0x421   : > { %v12756_v0 = vld [vmem:[%s20386_s1 + $0x56c] sm:$0xf0]  ;;  %v12652_v19 = vld [vmem:[%s20386_s1 + $0x234] sm:$0xf] }
 0x422   : > { %7902 = vmatpush.bf16.msra.mxu3 %v12360_v34  ;;  %v11719_v27 = vld [vmem:[%s20386_s1 + $0x930] sm:$0xf]  ;;  %7877 = vmatpush.bf16.msra.mxu1 %v11272_v46  ;;  %v11208_v43 = vor.u32 %v12756_v0, %v11207_v21  ;;  %v7637_v13 = vpop.f32.mrf.mxu2  ;;  %v11017_v46 = vld [vmem:[%s20386_s1 + $0x3f0] sm:$0xf0]  ;;  %v19558_v0 = vadd.f32 1.0, %v13634_v35 }
 0x423   : > { %v12884_v28 = vld [vmem:[%s20386_s1 + $0x96c] sm:$0xf0]  ;;  %v11529_v21 = vld [vmem:[%s20386_s1 + $0x7f0] sm:$0xf0]  ;;  %v11020_v32 = vor.u32 %v12700_v14, %v11017_v46 }
 0x424   : > { %v12231_v33 = vld [vmem:[%s20386_s1 + $0xd30] sm:$0xf]  ;;  %7890 = vmatpush.bf16.msra.mxu2 %v11784_v18  ;;  %v11720_v40 = vor.u32 %v12884_v28, %v11719_v27  ;;  %7865 = vmatpush.bf16.msra.mxu0 %v10696_v15  ;;  %v12828_v18 = vld [vmem:[%s20386_s1 + $0x7b4] sm:$0xf]  ;;  %13637 = vrcp.f32 %v19558_v0  ;;  %vm8141_vm2 = vweird.f32 %v19558_v0 }
 0x425   : > { %v13012_v31 = vld [vmem:[%s20386_s1 + $0xd6c] sm:$0xf0]  ;;  %v11532_v15 = vor.u32 %v12828_v18, %v11529_v21  ;;  %v11913_v35 = vld [vmem:[%s20386_s1 + $0xaf0] sm:$0xf0] }
 0x426   : > { %v10631_v47 = vld [vmem:[%s20386_s1 + $0xb0] sm:$0xf]  ;;  %7903 = vmatpush.bf16.msra.mxu3 %v12296_v22  ;;  %v12232_v51 = vor.u32 %v13012_v31, %v12231_v33  ;;  %7878 = vmatpush.bf16.msra.mxu1 %v11208_v43  ;;  %v12956_v22 = vld [vmem:[%s20386_s1 + $0xbb4] sm:$0xf]  ;;  %v8073_v33 = vperm.slane %v19357_v61, 1 }
 0x427   : > { %v12612_v48 = vld [vmem:[%s20386_s1 + $0xec] sm:$0xf0]  ;;  %v12044_v38 = vor.u32 %v12956_v22, %v12041_v23  ;;  %v10953_v43 = vld [vmem:[%s20386_s1 + $0x370] sm:$0xf0] }
 0x428   : > { %v11143_v50 = vld [vmem:[%s20386_s1 + $0x4b0] sm:$0xf]  ;;  %v10632_v63 = vor.u32 %v12612_v48, %v10631_v47  ;;  %7891 = vmatpush.bf16.msra.mxu2 %v11720_v40  ;;  %v12812_v40 = vld [vmem:[%s20386_s1 + $0x734] sm:$0xf]  ;;  %v12556_v47 = vor.u32 %v13084_v29, %v12553_v30  ;;  %v7661_v30 = vpop.f32.mrf.mxu0 }
 0x429   : > { %v12740_v52 = vld [vmem:[%s20386_s1 + $0x4ec] sm:$0xf0]  ;;  %v11465_v48 = vld [vmem:[%s20386_s1 + $0x770] sm:$0xf0] }
 0x42a   : > { %v11655_v55 = vld [vmem:[%s20386_s1 + $0x8b0] sm:$0xf]  ;;  %v11144_v6 = vor.u32 %v12740_v52, %v11143_v50  ;;  %7904 = vmatpush.bf16.msra.mxu3 %v12232_v51  ;;  %7866 = vmatpush.bf16.msra.mxu0 %v10632_v63  ;;  %v12940_v50 = vld [vmem:[%s20386_s1 + $0xb34] sm:$0xf]  ;;  %v8077_v52 = vperm.slane %v19357_v61, 5  ;;  %v19595_v63 = vpop.eup %13635 }
 0x42b   : > { %v12868_v54 = vld [vmem:[%s20386_s1 + $0x8ec] sm:$0xf0]  ;;  %v11977_v51 = vld [vmem:[%s20386_s1 + $0xb70] sm:$0xf0]  ;;  %v8213_v13 = vmul.f32 %v19595_v63, %v19514_v62  ;;  %v19628_v14 = vpop.eup %13637  ;;  %vm8218_vm1 = vweird.f32 %v19595_v63 }
 0x42c   : > { %v12167_v57 = vld [vmem:[%s20386_s1 + $0xcb0] sm:$0xf]  ;;  %v11656_v7 = vor.u32 %v12868_v54, %v11655_v55  ;;  %7879 = vmatpush.bf16.msra.mxu1 %v11144_v6  ;;  %v13068_v55 = vld [vmem:[%s20386_s1 + $0xf34] sm:$0xf]  ;;  %vm8142_vm0 = vweird.f32 %v19628_v14  ;;  %vm19758_vm5 = vmor %vm8217_vm3, %vm8218_vm1 }
 0x42d   : > { %v12996_v58 = vld [vmem:[%s20386_s1 + $0xcec] sm:$0xf0]  ;;  %v12489_v54 = vld [vmem:[%s20386_s1 + $0xf70] sm:$0xf0]  ;;  %vm19746_vm4 = vmor %vm8141_vm2, %vm8142_vm0 }
 0x42e   : > { %v10567_v3 = vld [vmem:[%s20386_s1 + $0x30] sm:$0xf]  ;;  %v12168_v11 = vor.u32 %v12996_v58, %v12167_v57  ;;  %7892 = vmatpush.bf16.msra.mxu2 %v11656_v7  ;;  %v8105_v57 = vadd.f32 %v8073_v33, %v18285_v4  ;;  %v10956_v58 = vor.u32 %v12684_v41, %v10953_v43  ;;  %v12668_v6 = vld [vmem:[%s20386_s1 + $0x2b4] sm:$0xf]  ;;  %v7674_v41 = vpop.f32.mrf.mxu1  ;;  %v8147_v43 = vand.u32 2147483648, %v19558_v0 }
 0x42f   : > { %v12596_v36 = vld [vmem:[%s20386_s1 + $0x6c] sm:$0xf0]  ;;  %v10889_v7 = vld [vmem:[%s20386_s1 + $0x2f0] sm:$0xf0] }
 0x430   : > { %v11079_v37 = vld [vmem:[%s20386_s1 + $0x430] sm:$0xf]  ;;  %v10568_v20 = vor.u32 %v12596_v36, %v10567_v3  ;;  %7905 = vmatpush.bf16.msra.mxu3 %v12168_v11  ;;  %v11468_v3 = vor.u32 %v12812_v40, %v11465_v48  ;;  %v11980_v36 = vor.u32 %v12940_v50, %v11977_v51  ;;  %v12796_v4 = vld [vmem:[%s20386_s1 + $0x6b4] sm:$0xf]  ;;  %v8109_v11 = vadd.f32 %v8077_v52, %v19081_v44 }
 0x431   : > { %v12724_v34 = vld [vmem:[%s20386_s1 + $0x46c] sm:$0xf0]  ;;  %v10892_v44 = vor.u32 %v12668_v6, %v10889_v7  ;;  %v12780_v21 = vld [vmem:[%s20386_s1 + $0x634] sm:$0xf]  ;;  %v7662_v40 = vadd.f32 %v7661_v30, %v16491_v39  ;;  %v19685_v7 = vld [vmem:[%s20388_s3 + $0x8] sm:$0xff] }
 0x432   : > { %v11591_v10 = vld [vmem:[%s20386_s1 + $0x830] sm:$0xf]  ;;  %v11080_v27 = vor.u32 %v12724_v34, %v11079_v37  ;;  %7867 = vmatpush.bf16.msra.mxu0 %v10568_v20  ;;  %v12492_v37 = vor.u32 %v13068_v55, %v12489_v54  ;;  %v11401_v34 = vld [vmem:[%s20386_s1 + $0x6f0] sm:$0xf0]  ;;  %v12570_v29 = vmul.f32 -1.442695, %v8109_v11 }
 0x433   : > { %v12852_v9 = vld [vmem:[%s20386_s1 + $0x86c] sm:$0xf0]  ;;  %v11404_v46 = vor.u32 %v12796_v4, %v11401_v34  ;;  %v10825_v20 = vld [vmem:[%s20386_s1 + $0x270] sm:$0xf0]  ;;  %v8145_v4 = vand.u32 2147483647, %v19558_v0  ;;  %v7675_v34 = vadd.f32 %v7674_v41, %v7662_v40 }
 0x434   : > { %v12103_v26 = vld [vmem:[%s20386_s1 + $0xc30] sm:$0xf]  ;;  %v11592_v28 = vor.u32 %v12852_v9, %v11591_v10  ;;  %7880 = vmatpush.bf16.msra.mxu1 %v11080_v27  ;;  %v12924_v10 = vld [vmem:[%s20386_s1 + $0xab4] sm:$0xf] }
 0x435   : > { %v12980_v12 = vld [vmem:[%s20386_s1 + $0xc6c] sm:$0xf0]  ;;  %7868 = vmatmul.bf16.vlgmr.msra.gmra.mxu0 %v17170_v60  ;;  %v13052_v9 = vld [vmem:[%s20386_s1 + $0xeb4] sm:$0xf]  ;;  %v11916_v18 = vor.u32 %v12924_v10, %v11913_v35  ;;  %vm8146_vm7 = vcmp.eq.f32.partialorder %v8145_v4, 8.507059e+37 }
 0x436   : > { %v12104_v31 = vor.u32 %v12980_v12, %v12103_v26  ;;  %7893 = vmatpush.bf16.msra.mxu2 %v11592_v28  ;;  %7912 = vmatpush.bf16.msrb.mxu0 %v11020_v32  ;;  %v12425_v26 = vld [vmem:[%s20386_s1 + $0xef0] sm:$0xf0]  ;;  %v12566_v12 = vmul.f32 -1.442695, %v8105_v57  ;;  %v8137_v32 = vmul.f32 %v19628_v14, %v19558_v0  ;;  %v11471_v0 = vld [vmem:[%s20386_s1 + $0x738] sm:$0xf] }
 0x437   : > { %7881 = vmatmul.bf16.vlgmr.msra.gmra.mxu1 %v17183_v2  ;;  %v12428_v22 = vor.u32 %v13052_v9, %v12425_v26  ;;  %v11337_v23 = vld [vmem:[%s20386_s1 + $0x670] sm:$0xf0] }
 0x438   : > { %7906 = vmatpush.bf16.msra.mxu3 %v12104_v31  ;;  %7925 = vmatpush.bf16.msrb.mxu1 %v11532_v15  ;;  %v12908_v27 = vld [vmem:[%s20386_s1 + $0xa34] sm:$0xf]  ;;  %v8214_v15 = vsub.f32 1.0, %v8213_v13  ;;  %13639 = vpow2.f32 %v12566_v12 }
 0x439   : > { %7894 = vmatmul.bf16.vlgmr.msra.gmra.mxu2 %v17181_v1  ;;  %v11849_v28 = vld [vmem:[%s20386_s1 + $0xa70] sm:$0xf0]  ;;  %13641 = vpow2.f32 %v12570_v29  ;;  %v7663_v29 = vpop.f32.mrf.mxu0 }
 0x43a   : > { %7938 = vmatpush.bf16.msrb.mxu2 %v12044_v38  ;;  %7913 = vmatpush.bf16.msrb.mxu0 %v10956_v58  ;;  %v13036_v33 = vld [vmem:[%s20386_s1 + $0xe34] sm:$0xf]  ;;  %v10828_v38 = vor.u32 %v12652_v19, %v10825_v20  ;;  %v11852_v48 = vor.u32 %v12908_v27, %v11849_v28  ;;  %v8215_v12 = vmul.f32 %v19595_v63, %v8214_v15  ;;  %v8223_v20 = vand.u32 2147483648, %v19514_v62  ;;  %v7676_v15 = vpop.f32.mrf.mxu1  ;;  %v11023_v29 = vld [vmem:[%s20386_s1 + $0x3b8] sm:$0xf] }
 0x43b   : > { %7907 = vmatmul.bf16.vlgmr.msra.gmra.mxu3 %v17191_v5  ;;  %v12361_v31 = vld [vmem:[%s20386_s1 + $0xe70] sm:$0xf0]  ;;  %v12837_v15 = vld [vmem:[%s20386_s1 + $0x7f4] sm:$0xf0] }
 0x43c   : > { %7951 = vmatpush.bf16.msrb.mxu3 %v12556_v47  ;;  %7926 = vmatpush.bf16.msrb.mxu1 %v11468_v3  ;;  %v11340_v47 = vor.u32 %v12780_v21, %v11337_v23  ;;  %v12636_v50 = vld [vmem:[%s20386_s1 + $0x1b4] sm:$0xf]  ;;  %v12364_v55 = vor.u32 %v13036_v33, %v12361_v31  ;;  %v8080_v23 = vperm.slane %v19685_v7, 0  ;;  %v8221_v31 = vand.u32 2147483647, %v19514_v62 }
 0x43d   : > { %v10761_v51 = vld [vmem:[%s20386_s1 + $0x1f0] sm:$0xf0] }
 0x43e   : > { %7939 = vmatpush.bf16.msrb.mxu2 %v11980_v36  ;;  %7914 = vmatpush.bf16.msrb.mxu0 %v10892_v44  ;;  %v12764_v52 = vld [vmem:[%s20386_s1 + $0x5b4] sm:$0xf]  ;;  %v8138_v36 = vsub.f32 1.0, %v8137_v32  ;;  %v10764_v6 = vor.u32 %v12636_v50, %v10761_v51  ;;  %v7687_v44 = vpop.f32.mrf.mxu2  ;;  %v13640_v30 = vpop.eup %13639  ;;  %v8216_v51 = vadd.f32 %v19595_v63, %v8215_v12  ;;  %vm19765_vm6 = vcmp.eq.f32.partialorder %v8221_v31, 8.507059e+37 }
 0x43f   : > { %v11273_v39 = vld [vmem:[%s20386_s1 + $0x5f0] sm:$0xf0]  ;;  %v7688_v21 = vadd.f32 %v7687_v44, %v7675_v34 }
 0x440   : > { %7952 = vmatpush.bf16.msrb.mxu3 %v12492_v37  ;;  %7927 = vmatpush.bf16.msrb.mxu1 %v11404_v46  ;;  %v12892_v54 = vld [vmem:[%s20386_s1 + $0x9b4] sm:$0xf]  ;;  %v19688_v37 = vor.u32 1.1754944e-38, %v8147_v43  ;;  %v11276_v10 = vor.u32 %v12764_v52, %v11273_v39  ;;  %v8139_v33 = vmul.f32 %v19628_v14, %v8138_v36  ;;  %v10959_v36 = vld [vmem:[%s20386_s1 + $0x338] sm:$0xf] }
 0x441   : > { %v11785_v57 = vld [vmem:[%s20386_s1 + $0x9f0] sm:$0xf0] }
 0x442   : > { %7940 = vmatpush.bf16.msrb.mxu2 %v11916_v18  ;;  %v13020_v58 = vld [vmem:[%s20386_s1 + $0xdb4] sm:$0xf]  ;;  %7915 = vmatpush.bf16.msrb.mxu0 %v10828_v38  ;;  %v11788_v35 = vor.u32 %v12892_v54, %v11785_v57  ;;  %v13642_v38 = vpop.eup %13641  ;;  %v19741_v57 = vadd.f32 1.0, %v13640_v30  ;;  %v11535_v30 = vld [vmem:[%s20386_s1 + $0x7b8] sm:$0xf] }
 0x443   : > { %v12297_v3 = vld [vmem:[%s20386_s1 + $0xdf0] sm:$0xf0] }
 0x444   : > { %7953 = vmatpush.bf16.msrb.mxu3 %v12428_v22  ;;  %7928 = vmatpush.bf16.msrb.mxu1 %v11340_v47  ;;  %v12620_v11 = vld [vmem:[%s20386_s1 + $0x134] sm:$0xf]  ;;  %v12300_v13 = vor.u32 %v13020_v58, %v12297_v3  ;;  %v7700_v22 = vpop.f32.mrf.mxu3  ;;  %v8224_v58 = vor.u32 1.1754944e-38, %v8223_v20  ;;  %v8220_v20 = vsel %vm19758_vm5, %v19595_v63, %v8216_v51  ;;  %v12709_v63 = vld [vmem:[%s20386_s1 + $0x3f4] sm:$0xf0]  ;;  %v8074_v51 = vperm.slane %v19357_v61, 2 }
 0x445   : > { %v10697_v9 = vld [vmem:[%s20386_s1 + $0x170] sm:$0xf0]  ;;  %v7701_v41 = vadd.f32 %v7700_v22, %v7688_v21  ;;  %vm8156_vm10 = vweird.f32 %v19741_v57 }
 0x446   : > { %7941 = vmatpush.bf16.msrb.mxu2 %v11852_v48  ;;  %v12748_v26 = vld [vmem:[%s20386_s1 + $0x534] sm:$0xf]  ;;  %7916 = vmatpush.bf16.msrb.mxu0 %v10764_v6  ;;  %v10700_v32 = vor.u32 %v12620_v11, %v10697_v9  ;;  %v12949_v11 = vld [vmem:[%s20386_s1 + $0xb74] sm:$0xf0] }
 0x447   : > { %v11209_v46 = vld [vmem:[%s20386_s1 + $0x570] sm:$0xf0]  ;;  %v8112_v3 = vadd.f32 %v8080_v23, %v7701_v41  ;;  %v12965_v41 = vld [vmem:[%s20386_s1 + $0xbf4] sm:$0xf0] }
 0x448   : > { %7954 = vmatpush.bf16.msrb.mxu3 %v12364_v55  ;;  %v12876_v18 = vld [vmem:[%s20386_s1 + $0x934] sm:$0xf]  ;;  %7929 = vmatpush.bf16.msrb.mxu1 %v11276_v10  ;;  %v11212_v43 = vor.u32 %v12748_v26, %v11209_v46  ;;  %v19762_v10 = vadd.f32 1.0, %v13642_v38  ;;  %v12047_v38 = vld [vmem:[%s20386_s1 + $0xbb8] sm:$0xf] }
 0x449   : > { %v11721_v19 = vld [vmem:[%s20386_s1 + $0x970] sm:$0xf0]  ;;  %13643 = vtanh.f32 %v8112_v3  ;;  %v12048_v3 = vor.u32 %v12965_v41, %v12047_v38  ;;  %v10831_v41 = vld [vmem:[%s20386_s1 + $0x238] sm:$0xf] }
 0x44a   : > { %v13004_v27 = vld [vmem:[%s20386_s1 + $0xd34] sm:$0xf]  ;;  %7942 = vmatpush.bf16.msrb.mxu2 %v11788_v35  ;;  %v11724_v40 = vor.u32 %v12876_v18, %v11721_v19  ;;  %v8140_v35 = vadd.f32 %v19628_v14, %v8139_v33  ;;  %7917 = vmatpush.bf16.msrb.mxu0 %v10700_v32  ;;  %13645 = vrcp.f32 %v19762_v10  ;;  %vm8232_vm11 = vweird.f32 %v19762_v10 }
 0x44b   : > { %v12233_v28 = vld [vmem:[%s20386_s1 + $0xd70] sm:$0xf0]  ;;  %13647 = vrcp.f32 %v19741_v57 }
 0x44c   : > { %v12604_v47 = vld [vmem:[%s20386_s1 + $0xb4] sm:$0xf]  ;;  %7955 = vmatpush.bf16.msrb.mxu3 %v12300_v13  ;;  %v12236_v52 = vor.u32 %v13004_v27, %v12233_v28  ;;  %7930 = vmatpush.bf16.msrb.mxu1 %v11212_v43  ;;  %v7689_v28 = vpop.f32.mrf.mxu2  ;;  %v7702_v33 = vpop.f32.mrf.mxu3  ;;  %v8144_v31 = vsel %vm19746_vm4, %v19628_v14, %v8140_v35  ;;  %v8225_v43 = vsel %vm19765_vm6, %v8224_v58, %v8220_v20  ;;  %v8352_v14 = vld [vmem:[#allocation3] sm:$0xff]  ;;  %v11983_v35 = vld [vmem:[%s20386_s1 + $0xb38] sm:$0xf] }
 0x44d   : > { %v10633_v48 = vld [vmem:[%s20386_s1 + $0xf0] sm:$0xf0]  ;;  %v11536_v58 = vor.u32 %v12837_v15, %v11535_v30  ;;  %v8356_v4 = vmul.f32 %v8352_v14, %v8225_v43  ;;  %v11984_v20 = vor.u32 %v12949_v11, %v11983_v35  ;;  %v12933_v28 = vld [vmem:[%s20386_s1 + $0xaf4] sm:$0xf0] }
 0x44e   : > { %v12732_v50 = vld [vmem:[%s20386_s1 + $0x4b4] sm:$0xf]  ;;  %v10636_v9 = vor.u32 %v12604_v47, %v10633_v48  ;;  %7943 = vmatpush.bf16.msrb.mxu2 %v11724_v40  ;;  %v12559_v48 = vld [vmem:[%s20386_s1 + $0xfb8] sm:$0xf] }
 0x44f   : > { %v11145_v55 = vld [vmem:[%s20386_s1 + $0x4f0] sm:$0xf0]  ;;  %v13061_v30 = vld [vmem:[%s20386_s1 + $0xef4] sm:$0xf0] }
 0x450   : > { %v12860_v39 = vld [vmem:[%s20386_s1 + $0x8b4] sm:$0xf]  ;;  %v11148_v13 = vor.u32 %v12732_v50, %v11145_v55  ;;  %7956 = vmatpush.bf16.msrb.mxu3 %v12236_v52  ;;  %7918 = vmatpush.bf16.msrb.mxu0 %v10636_v9  ;;  %v13093_v50 = vld [vmem:[%s20386_s1 + $0xff4] sm:$0xf0]  ;;  %v11024_v55 = vor.u32 %v12709_v63, %v11023_v29  ;;  %v8078_v9 = vperm.slane %v19357_v61, 6 }
 0x451   : > { %v11657_v54 = vld [vmem:[%s20386_s1 + $0x8f0] sm:$0xf0]  ;;  %v12560_v62 = vor.u32 %v13093_v50, %v12559_v48  ;;  %v10895_v61 = vld [vmem:[%s20386_s1 + $0x2b8] sm:$0xf] }
 0x452   : > { %v12988_v6 = vld [vmem:[%s20386_s1 + $0xcb4] sm:$0xf]  ;;  %v11660_v44 = vor.u32 %v12860_v39, %v11657_v54  ;;  %7931 = vmatpush.bf16.msrb.mxu1 %v11148_v13  ;;  %v13644_v39 = vpop.eup %13643  ;;  %v8149_v54 = vsel %vm8146_vm7, %v19688_v37, %v8144_v31  ;;  %v12821_v37 = vld [vmem:[%s20386_s1 + $0x774] sm:$0xf0]  ;;  %v8106_v13 = vadd.f32 %v8074_v51, %v18484_v24  ;;  %v8110_v29 = vadd.f32 %v8078_v9, %v19280_v8 }
 0x453   : > { %v12169_v34 = vld [vmem:[%s20386_s1 + $0xcf0] sm:$0xf0]  ;;  %v11407_v24 = vld [vmem:[%s20386_s1 + $0x6b8] sm:$0xf] }
 0x454   : > { %v12588_v26 = vld [vmem:[%s20386_s1 + $0x34] sm:$0xf]  ;;  %v12172_v21 = vor.u32 %v12988_v6, %v12169_v34  ;;  %7944 = vmatpush.bf16.msrb.mxu2 %v11660_v44  ;;  %v12693_v6 = vld [vmem:[%s20386_s1 + $0x374] sm:$0xf0]  ;;  %v8360_v34 = vmul.f32 %v13644_v39, %v8149_v54  ;;  %v12567_v33 = vmul.f32 -1.442695, %v8106_v13 }
 0x455   : > { %v10569_v12 = vld [vmem:[%s20386_s1 + $0x70] sm:$0xf0]  ;;  %v12431_v63 = vld [vmem:[%s20386_s1 + $0xeb8] sm:$0xf]  ;;  %v12571_v51 = vmul.f32 -1.442695, %v8110_v29 }
 0x456   : > { %v12716_v46 = vld [vmem:[%s20386_s1 + $0x434] sm:$0xf]  ;;  %v10572_v32 = vor.u32 %v12588_v26, %v10569_v12  ;;  %7957 = vmatpush.bf16.msrb.mxu3 %v12172_v21  ;;  %v12495_v26 = vld [vmem:[%s20386_s1 + $0xf38] sm:$0xf]  ;;  %v19857_v44 = vadd.f32 %v8360_v34, %v8356_v4  ;;  %13649 = vpow2.f32 %v12567_v33 }
 0x457   : > { %v11081_v18 = vld [vmem:[%s20386_s1 + $0x470] sm:$0xf0]  ;;  %v13077_v12 = vld [vmem:[%s20386_s1 + $0xf74] sm:$0xf0]  ;;  %13651 = vpow2.f32 %v12571_v51  ;;  %v8236_v51 = vand.u32 2147483647, %v19762_v10 }
 0x458   : > { %v12844_v19 = vld [vmem:[%s20386_s1 + $0x834] sm:$0xf]  ;;  %v11084_v40 = vor.u32 %v12716_v46, %v11081_v18  ;;  %7919 = vmatpush.bf16.msrb.mxu0 %v10572_v32  ;;  %v10960_v46 = vor.u32 %v12693_v6, %v10959_v36  ;;  %v19862_v18 = vpop.eup %13645  ;;  %v12677_v21 = vld [vmem:[%s20386_s1 + $0x2f4] sm:$0xf0]  ;;  %8376 = vst [vmem:[#allocation3] sm:$0xff] %v19857_v44  ;;  %v7726_v36 = vpop.f32.mrf.mxu1  ;;  %v8162_v6 = vand.u32 2147483648, %v19741_v57 }
 0x459   : > { %v11593_v22 = vld [vmem:[%s20386_s1 + $0x870] sm:$0xf0]  ;;  %v8228_v31 = vmul.f32 %v19862_v18, %v19762_v10  ;;  %v10896_v8 = vor.u32 %v12677_v21, %v10895_v61  ;;  %v19893_v32 = vpop.eup %13647  ;;  %v12661_v43 = vld [vmem:[%s20386_s1 + $0x274] sm:$0xf0]  ;;  %vm8233_vm9 = vweird.f32 %v19862_v18  ;;  %vm20025_vm14 = vcmp.eq.f32.partialorder %v8236_v51, 8.507059e+37 }
 0x45a   : > { %v12972_v23 = vld [vmem:[%s20386_s1 + $0xc34] sm:$0xf]  ;;  %v11596_v47 = vor.u32 %v12844_v19, %v11593_v22  ;;  %7932 = vmatpush.bf16.msrb.mxu1 %v11084_v40  ;;  %v11472_v19 = vor.u32 %v12821_v37, %v11471_v0  ;;  %v12805_v22 = vld [vmem:[%s20386_s1 + $0x6f4] sm:$0xf0]  ;;  %v12432_v40 = vor.u32 %v13061_v30, %v12431_v63  ;;  %v8152_v54 = vmul.f32 %v19893_v32, %v19741_v57  ;;  %v7739_v30 = vpop.f32.mrf.mxu2  ;;  %vm20018_vm13 = vmor %vm8232_vm11, %vm8233_vm9 }
 0x45b   : > { %v12105_v27 = vld [vmem:[%s20386_s1 + $0xc70] sm:$0xf0]  ;;  %7920 = vmatmul.bf16.vlgmr.msrb.gmra.mxu0 %v17170_v60  ;;  %v11408_v15 = vor.u32 %v12805_v22, %v11407_v24  ;;  %v11343_v14 = vld [vmem:[%s20386_s1 + $0x638] sm:$0xf]  ;;  %vm8157_vm8 = vweird.f32 %v19893_v32  ;;  %v12957_v51 = vld [vmem:[%s20386_s1 + $0xbbc] sm:$0xf] }
 0x45c   : > { %v12108_v52 = vor.u32 %v12972_v23, %v12105_v27  ;;  %7945 = vmatpush.bf16.msrb.mxu2 %v11596_v47  ;;  %7964 = vmatpush.bf16.msra.mxu0 %v11024_v55  ;;  %v12496_v23 = vor.u32 %v13077_v12, %v12495_v26  ;;  %v11919_v27 = vld [vmem:[%s20386_s1 + $0xab8] sm:$0xf]  ;;  %vm20006_vm12 = vmor %vm8156_vm10, %vm8157_vm8 }
 0x45d   : > { %7933 = vmatmul.bf16.vlgmr.msrb.gmra.mxu1 %v17183_v2  ;;  %v11920_v38 = vor.u32 %v12933_v28, %v11919_v27  ;;  %v12789_v47 = vld [vmem:[%s20386_s1 + $0x674] sm:$0xf0] }
 0x45e   : > { %7958 = vmatpush.bf16.msrb.mxu3 %v12108_v52  ;;  %7977 = vmatpush.bf16.msra.mxu1 %v11536_v58  ;;  %v11855_v48 = vld [vmem:[%s20386_s1 + $0xa38] sm:$0xf]  ;;  %v7713_v52 = vpop.f32.mrf.mxu0  ;;  %v8229_v58 = vsub.f32 1.0, %v8228_v31  ;;  %v11344_v4 = vor.u32 %v12789_v47, %v11343_v14 }
 0x45f   : > { %7946 = vmatmul.bf16.vlgmr.msrb.gmra.mxu2 %v17181_v1  ;;  %v12917_v50 = vld [vmem:[%s20386_s1 + $0xa74] sm:$0xf0]  ;;  %v7714_v0 = vadd.f32 %v7713_v52, %v16689_v45 }
 0x460   : > { %7990 = vmatpush.bf16.msra.mxu2 %v12048_v3  ;;  %7965 = vmatpush.bf16.msra.mxu0 %v10960_v46  ;;  %v12367_v55 = vld [vmem:[%s20386_s1 + $0xe38] sm:$0xf]  ;;  %v10832_v3 = vor.u32 %v12661_v43, %v10831_v41  ;;  %v11856_v34 = vor.u32 %v12917_v50, %v11855_v48  ;;  %v8153_v46 = vsub.f32 1.0, %v8152_v54  ;;  %v8230_v29 = vmul.f32 %v19862_v18, %v8229_v58  ;;  %v7752_v41 = vpop.f32.mrf.mxu3  ;;  %v13650_v48 = vpop.eup %13649 }
 0x461   : > { %7959 = vmatmul.bf16.vlgmr.msrb.gmra.mxu3 %v17191_v5  ;;  %v13045_v39 = vld [vmem:[%s20386_s1 + $0xe74] sm:$0xf0]  ;;  %v7727_v21 = vadd.f32 %v7726_v36, %v7714_v0  ;;  %v8081_v43 = vperm.slane %v19685_v7, 1 }
 0x462   : > { %8003 = vmatpush.bf16.msra.mxu3 %v12560_v62  ;;  %7978 = vmatpush.bf16.msra.mxu1 %v11472_v19  ;;  %v10767_v62 = vld [vmem:[%s20386_s1 + $0x1b8] sm:$0xf]  ;;  %v12368_v11 = vor.u32 %v13045_v39, %v12367_v55  ;;  %v8160_v19 = vand.u32 2147483647, %v19741_v57  ;;  %v8154_v50 = vmul.f32 %v19893_v32, %v8153_v46  ;;  %v7728_v55 = vpop.f32.mrf.mxu1  ;;  %v13652_v39 = vpop.eup %13651  ;;  %v12813_v57 = vld [vmem:[%s20386_s1 + $0x73c] sm:$0xf] }
 0x463   : > { %v12645_v37 = vld [vmem:[%s20386_s1 + $0x1f4] sm:$0xf0]  ;;  %v20022_v46 = vadd.f32 1.0, %v13652_v39 }
 0x464   : > { %7991 = vmatpush.bf16.msra.mxu2 %v11984_v20  ;;  %7966 = vmatpush.bf16.msra.mxu0 %v10896_v8  ;;  %v11279_v35 = vld [vmem:[%s20386_s1 + $0x5b8] sm:$0xf]  ;;  %v10768_v61 = vor.u32 %v12645_v37, %v10767_v62  ;;  %v19948_v20 = vor.u32 1.1754944e-38, %v8162_v6  ;;  %vm8161_vm15 = vcmp.eq.f32.partialorder %v8160_v19, 8.507059e+37 }
 0x465   : > { %v12773_v45 = vld [vmem:[%s20386_s1 + $0x5f4] sm:$0xf0]  ;;  %vm8247_vm1 = vweird.f32 %v20022_v46 }
 0x466   : > { %8004 = vmatpush.bf16.msra.mxu3 %v12496_v23  ;;  %7979 = vmatpush.bf16.msra.mxu1 %v11408_v15  ;;  %v11791_v9 = vld [vmem:[%s20386_s1 + $0x9b8] sm:$0xf]  ;;  %v11280_v24 = vor.u32 %v12773_v45, %v11279_v35  ;;  %v8238_v15 = vand.u32 2147483648, %v19762_v10  ;;  %v7715_v47 = vpop.f32.mrf.mxu0  ;;  %v12497_v10 = vld [vmem:[%s20386_s1 + $0xf78] sm:$0xf0] }
 0x467   : > { %v12901_v26 = vld [vmem:[%s20386_s1 + $0x9f4] sm:$0xf0] }
 0x468   : > { %7992 = vmatpush.bf16.msra.mxu2 %v11920_v38  ;;  %v12303_v12 = vld [vmem:[%s20386_s1 + $0xdb8] sm:$0xf]  ;;  %7967 = vmatpush.bf16.msra.mxu0 %v10832_v3  ;;  %v11792_v22 = vor.u32 %v12901_v26, %v11791_v9  ;;  %v7740_v38 = vadd.f32 %v7739_v30, %v7727_v21  ;;  %v8239_v45 = vor.u32 1.1754944e-38, %v8238_v15  ;;  %v12941_v26 = vld [vmem:[%s20386_s1 + $0xb3c] sm:$0xf] }
 0x469   : > { %v13029_v13 = vld [vmem:[%s20386_s1 + $0xdf4] sm:$0xf0] }
 0x46a   : > { %8005 = vmatpush.bf16.msra.mxu3 %v12432_v40  ;;  %7980 = vmatpush.bf16.msra.mxu1 %v11344_v4  ;;  %v10703_v23 = vld [vmem:[%s20386_s1 + $0x138] sm:$0xf]  ;;  %v12304_v63 = vor.u32 %v13029_v13, %v12303_v12  ;;  %v7753_v54 = vadd.f32 %v7752_v41, %v7740_v38  ;;  %v8231_v4 = vadd.f32 %v19862_v18, %v8230_v29  ;;  %v7741_v41 = vpop.f32.mrf.mxu2 }
 0x46b   : > { %v12629_v27 = vld [vmem:[%s20386_s1 + $0x174] sm:$0xf0]  ;;  %v12433_v41 = vld [vmem:[%s20386_s1 + $0xef8] sm:$0xf0] }
 0x46c   : > { %7993 = vmatpush.bf16.msra.mxu2 %v11856_v34  ;;  %v11215_v28 = vld [vmem:[%s20386_s1 + $0x538] sm:$0xf]  ;;  %7968 = vmatpush.bf16.msra.mxu0 %v10768_v61  ;;  %v10704_v52 = vor.u32 %v12629_v27, %v10703_v23  ;;  %v8113_v9 = vadd.f32 %v8081_v43, %v7753_v54  ;;  %v8155_v61 = vadd.f32 %v19893_v32, %v8154_v50  ;;  %v12701_v43 = vld [vmem:[%s20386_s1 + $0x3bc] sm:$0xf] }
 0x46d   : > { %v12757_v33 = vld [vmem:[%s20386_s1 + $0x574] sm:$0xf0]  ;;  %v11537_v50 = vld [vmem:[%s20386_s1 + $0x7f8] sm:$0xf0] }
 0x46e   : > { %8006 = vmatpush.bf16.msra.mxu3 %v12368_v11  ;;  %v11727_v31 = vld [vmem:[%s20386_s1 + $0x938] sm:$0xf]  ;;  %7981 = vmatpush.bf16.msra.mxu1 %v11280_v24  ;;  %v11216_v58 = vor.u32 %v12757_v33, %v11215_v28  ;;  %v20001_v11 = vadd.f32 1.0, %v13650_v48  ;;  %13653 = vtanh.f32 %v8113_v9  ;;  %v8235_v33 = vsel %vm20018_vm13, %v19862_v18, %v8231_v4  ;;  %v11025_v18 = vld [vmem:[%s20386_s1 + $0x3f8] sm:$0xf0] }
 0x46f   : > { %v12885_v8 = vld [vmem:[%s20386_s1 + $0x974] sm:$0xf0]  ;;  %v8159_v47 = vsel %vm20006_vm12, %v19893_v32, %v8155_v61  ;;  %13655 = vrcp.f32 %v20022_v46  ;;  %v8240_v55 = vsel %vm20025_vm14, %v8239_v45, %v8235_v33  ;;  %v11473_v9 = vld [vmem:[%s20386_s1 + $0x778] sm:$0xf0]  ;;  %v13695_v61 = vld [vmem:[%s20388_s3] sm:$0xff] }
 0x470   : > { %v12239_v14 = vld [vmem:[%s20386_s1 + $0xd38] sm:$0xf]  ;;  %7994 = vmatpush.bf16.msra.mxu2 %v11792_v22  ;;  %v11728_v3 = vor.u32 %v12885_v8, %v11727_v31  ;;  %7969 = vmatpush.bf16.msra.mxu0 %v10704_v52  ;;  %v12049_v52 = vld [vmem:[%s20386_s1 + $0xbf8] sm:$0xf0]  ;;  %v8164_v4 = vsel %vm8161_vm15, %v19948_v20, %v8159_v47  ;;  %13657 = vrcp.f32 %v20001_v11  ;;  %v8079_v21 = vperm.slane %v13695_v61, 7 }
 0x471   : > { %v13013_v40 = vld [vmem:[%s20386_s1 + $0xd74] sm:$0xf0]  ;;  %v11409_v33 = vld [vmem:[%s20386_s1 + $0x6f8] sm:$0xf0]  ;;  %vm8171_vm4 = vweird.f32 %v20001_v11 }
 0x472   : > { %v10639_v36 = vld [vmem:[%s20386_s1 + $0xb8] sm:$0xf]  ;;  %8007 = vmatpush.bf16.msra.mxu3 %v12304_v63  ;;  %v12240_v34 = vor.u32 %v13013_v40, %v12239_v14  ;;  %7982 = vmatpush.bf16.msra.mxu1 %v11216_v58  ;;  %v12829_v14 = vld [vmem:[%s20386_s1 + $0x7bc] sm:$0xf]  ;;  %v7754_v40 = vpop.f32.mrf.mxu3 }
 0x473   : > { %v12613_v6 = vld [vmem:[%s20386_s1 + $0xf4] sm:$0xf0]  ;;  %v13085_v58 = vld [vmem:[%s20386_s1 + $0xfbc] sm:$0xf]  ;;  %v8111_v40 = vadd.f32 %v8079_v21, %v19488_v42 }
 0x474   : > { %v11151_v0 = vld [vmem:[%s20386_s1 + $0x4b8] sm:$0xf]  ;;  %v10640_v24 = vor.u32 %v12613_v6, %v10639_v36  ;;  %7995 = vmatpush.bf16.msra.mxu2 %v11728_v3  ;;  %v12561_v3 = vld [vmem:[%s20386_s1 + $0xff8] sm:$0xf0]  ;;  %v11028_v6 = vor.u32 %v12701_v43, %v11025_v18  ;;  %v8075_v18 = vperm.slane %v13695_v61, 3 }
 0x475   : > { %v12741_v62 = vld [vmem:[%s20386_s1 + $0x4f4] sm:$0xf0]  ;;  %v12564_v20 = vor.u32 %v13085_v58, %v12561_v3  ;;  %v12781_v42 = vld [vmem:[%s20386_s1 + $0x63c] sm:$0xf]  ;;  %v7765_v3 = vpop.f32.mrf.mxu0 }
 0x476   : > { %v11663_v37 = vld [vmem:[%s20386_s1 + $0x8b8] sm:$0xf]  ;;  %v11152_v27 = vor.u32 %v12741_v62, %v11151_v0  ;;  %8008 = vmatpush.bf16.msra.mxu3 %v12240_v34  ;;  %7970 = vmatpush.bf16.msra.mxu0 %v10640_v24  ;;  %v13654_v0 = vpop.eup %13653  ;;  %v11540_v34 = vor.u32 %v12829_v14, %v11537_v50  ;;  %v12052_v62 = vor.u32 %v12957_v51, %v12049_v52  ;;  %v12653_v51 = vld [vmem:[%s20386_s1 + $0x23c] sm:$0xf] }
 0x477   : > { %v12869_v35 = vld [vmem:[%s20386_s1 + $0x8f4] sm:$0xf0]  ;;  %v8361_v45 = vmul.f32 %v13654_v0, %v8164_v4  ;;  %v10833_v52 = vld [vmem:[%s20386_s1 + $0x278] sm:$0xf0]  ;;  %v8107_v0 = vadd.f32 %v8075_v18, %v18683_v56 }
 0x478   : > { %v12175_v12 = vld [vmem:[%s20386_s1 + $0xcb8] sm:$0xf]  ;;  %v11664_v28 = vor.u32 %v12869_v35, %v11663_v37  ;;  %7983 = vmatpush.bf16.msra.mxu1 %v11152_v27  ;;  %v12685_v37 = vld [vmem:[%s20386_s1 + $0x33c] sm:$0xf]  ;;  %v20122_v27 = vpop.eup %13655 }
 0x479   : > { %v12997_v13 = vld [vmem:[%s20386_s1 + $0xcf4] sm:$0xf0]  ;;  %v10961_v35 = vld [vmem:[%s20386_s1 + $0x378] sm:$0xf0]  ;;  %v20149_v43 = vpop.eup %13657  ;;  %v8243_v14 = vmul.f32 %v20122_v27, %v20022_v46  ;;  %v12568_v21 = vmul.f32 -1.442695, %v8107_v0  ;;  %vm8248_vm0 = vweird.f32 %v20122_v27 }
 0x47a   : > { %v10575_v22 = vld [vmem:[%s20386_s1 + $0x38] sm:$0xf]  ;;  %v12176_v31 = vor.u32 %v12997_v13, %v12175_v12  ;;  %7996 = vmatpush.bf16.msra.mxu2 %v11664_v28  ;;  %v11985_v12 = vld [vmem:[%s20386_s1 + $0xb78] sm:$0xf0]  ;;  %v11476_v28 = vor.u32 %v12813_v57, %v11473_v9  ;;  %v8167_v58 = vmul.f32 %v20149_v43, %v20001_v11  ;;  %vm20266_vm2 = vmor %vm8247_vm1, %vm8248_vm0  ;;  %vm8172_vm3 = vweird.f32 %v20149_v43 }
 0x47b   : > { %v12597_v23 = vld [vmem:[%s20386_s1 + $0x74] sm:$0xf0]  ;;  %v13069_v13 = vld [vmem:[%s20386_s1 + $0xf3c] sm:$0xf]  ;;  %v8244_v4 = vsub.f32 1.0, %v8243_v14  ;;  %vm20299_vm5 = vmor %vm8171_vm4, %vm8172_vm3 }
 0x47c   : > { %v11087_v29 = vld [vmem:[%s20386_s1 + $0x438] sm:$0xf]  ;;  %v10576_v48 = vor.u32 %v12597_v23, %v10575_v22  ;;  %8009 = vmatpush.bf16.msra.mxu3 %v12176_v31  ;;  %v10964_v22 = vor.u32 %v12685_v37, %v10961_v35  ;;  %v12669_v23 = vld [vmem:[%s20386_s1 + $0x2bc] sm:$0xf]  ;;  %v12500_v31 = vor.u32 %v13069_v13, %v12497_v10  ;;  %v7778_v37 = vpop.f32.mrf.mxu1  ;;  %v7766_v35 = vadd.f32 %v7765_v3, %v16887_v53 }
 0x47d   : > { %v12725_v63 = vld [vmem:[%s20386_s1 + $0x474] sm:$0xf0]  ;;  %v12765_v56 = vld [vmem:[%s20386_s1 + $0x5bc] sm:$0xf]  ;;  %v8168_v61 = vsub.f32 1.0, %v8167_v58 }
 0x47e   : > { %v11599_v30 = vld [vmem:[%s20386_s1 + $0x838] sm:$0xf]  ;;  %v11088_v39 = vor.u32 %v12725_v63, %v11087_v29  ;;  %7971 = vmatpush.bf16.msra.mxu0 %v10576_v48  ;;  %v11988_v29 = vor.u32 %v12941_v26, %v11985_v12  ;;  %v10897_v63 = vld [vmem:[%s20386_s1 + $0x2f8] sm:$0xf0] }
 0x47f   : > { %v12853_v8 = vld [vmem:[%s20386_s1 + $0x874] sm:$0xf0]  ;;  %v10900_v47 = vor.u32 %v12669_v23, %v10897_v63  ;;  %v11281_v53 = vld [vmem:[%s20386_s1 + $0x5f8] sm:$0xf0]  ;;  %v7779_v23 = vadd.f32 %v7778_v37, %v7766_v35  ;;  %v8253_v37 = vand.u32 2147483648, %v20022_v46 }
 0x480   : > { %v12111_v15 = vld [vmem:[%s20386_s1 + $0xc38] sm:$0xf]  ;;  %v11600_v54 = vor.u32 %v12853_v8, %v11599_v30  ;;  %7984 = vmatpush.bf16.msra.mxu1 %v11088_v39  ;;  %v12797_v30 = vld [vmem:[%s20386_s1 + $0x6bc] sm:$0xf] }
 0x481   : > { %v12981_v38 = vld [vmem:[%s20386_s1 + $0xc74] sm:$0xf0]  ;;  %7972 = vmatmul.bf16.vlgmr.msra.gmra.mxu0 %v17170_v60  ;;  %v12925_v8 = vld [vmem:[%s20386_s1 + $0xabc] sm:$0xf]  ;;  %v11412_v48 = vor.u32 %v12797_v30, %v11409_v33 }
 0x482   : > { %v8353_v32 = vld [vmem:[#allocation3 + $0x18] sm:$0xff]  ;;  %v12112_v36 = vor.u32 %v12981_v38, %v12111_v15  ;;  %7997 = vmatpush.bf16.msra.mxu2 %v11600_v54  ;;  %8016 = vmatpush.bf16.msrb.mxu0 %v11028_v6 }
 0x483   : > { %v8357_v19 = vmul.f32 %v8353_v32, %v8240_v55  ;;  %v11921_v15 = vld [vmem:[%s20386_s1 + $0xaf8] sm:$0xf0]  ;;  %7985 = vmatmul.bf16.vlgmr.msra.gmra.mxu1 %v17183_v2 }
 0x484   : > { %8010 = vmatpush.bf16.msra.mxu3 %v12112_v36  ;;  %8029 = vmatpush.bf16.msrb.mxu1 %v11540_v34  ;;  %v13053_v38 = vld [vmem:[%s20386_s1 + $0xebc] sm:$0xf]  ;;  %v11924_v50 = vor.u32 %v12925_v8, %v11921_v15  ;;  %v12572_v34 = vmul.f32 -1.442695, %v8111_v40  ;;  %v7791_v15 = vpop.f32.mrf.mxu2  ;;  %v7804_v40 = vpop.f32.mrf.mxu3 }
 0x485   : > { %v20117_v24 = vadd.f32 %v8361_v45, %v8357_v19  ;;  %7998 = vmatmul.bf16.vlgmr.msra.gmra.mxu2 %v17181_v1  ;;  %v12436_v55 = vor.u32 %v13053_v38, %v12433_v41  ;;  %v11345_v32 = vld [vmem:[%s20386_s1 + $0x678] sm:$0xf0]  ;;  %v7792_v14 = vadd.f32 %v7791_v15, %v7779_v23 }
 0x486   : > { %8042 = vmatpush.bf16.msrb.mxu2 %v12052_v62  ;;  %8017 = vmatpush.bf16.msrb.mxu0 %v10964_v22  ;;  %v12909_v39 = vld [vmem:[%s20386_s1 + $0xa3c] sm:$0xf]  ;;  %v10836_v62 = vor.u32 %v12653_v51, %v10833_v52  ;;  %v11348_v57 = vor.u32 %v12781_v42, %v11345_v32  ;;  %13659 = vpow2.f32 %v12572_v34  ;;  %v7767_v51 = vpop.f32.mrf.mxu0  ;;  %v8169_v52 = vmul.f32 %v20149_v43, %v8168_v61  ;;  %v7780_v32 = vpop.f32.mrf.mxu1 }
 0x487   : > { %8377 = vst [vmem:[#allocation3 + $0x18] sm:$0xff] %v20117_v24  ;;  %8011 = vmatmul.bf16.vlgmr.msra.gmra.mxu3 %v17191_v5  ;;  %v11857_v54 = vld [vmem:[%s20386_s1 + $0xa78] sm:$0xf0]  ;;  %13661 = vpow2.f32 %v12568_v21  ;;  %v8175_v42 = vand.u32 2147483647, %v20001_v11 }
 0x488   : > { %8055 = vmatpush.bf16.msrb.mxu3 %v12564_v20  ;;  %8030 = vmatpush.bf16.msrb.mxu1 %v11476_v28  ;;  %v13037_v36 = vld [vmem:[%s20386_s1 + $0xe3c] sm:$0xf]  ;;  %v11860_v19 = vor.u32 %v12909_v39, %v11857_v54  ;;  %v11284_v28 = vor.u32 %v12765_v56, %v11281_v53  ;;  %v8251_v53 = vand.u32 2147483647, %v20022_v46 }
 0x489   : > { %v12369_v6 = vld [vmem:[%s20386_s1 + $0xe78] sm:$0xf0]  ;;  %vm8176_vm7 = vcmp.eq.f32.partialorder %v8175_v42, 8.507059e+37 }
 0x48a   : > { %8043 = vmatpush.bf16.msrb.mxu2 %v11988_v29  ;;  %8018 = vmatpush.bf16.msrb.mxu0 %v10900_v47  ;;  %v12637_v45 = vld [vmem:[%s20386_s1 + $0x1bc] sm:$0xf]  ;;  %v12372_v9 = vor.u32 %v13037_v36, %v12369_v6  ;;  %v8082_v47 = vperm.slane %v19685_v7, 2  ;;  %v7805_v7 = vadd.f32 %v7804_v40, %v7792_v14  ;;  %vm8252_vm6 = vcmp.eq.f32.partialorder %v8251_v53, 8.507059e+37 }
 0x48b   : > { %v10769_v20 = vld [vmem:[%s20386_s1 + $0x1f8] sm:$0xf0] }
 0x48c   : > { %8056 = vmatpush.bf16.msrb.mxu3 %v12500_v31  ;;  %8031 = vmatpush.bf16.msrb.mxu1 %v11412_v48  ;;  %v12893_v26 = vld [vmem:[%s20386_s1 + $0x9bc] sm:$0xf]  ;;  %v10772_v22 = vor.u32 %v12637_v45, %v10769_v20  ;;  %v8245_v31 = vmul.f32 %v20122_v27, %v8244_v4  ;;  %v8114_v35 = vadd.f32 %v8082_v47, %v7805_v7  ;;  %v13660_v20 = vpop.eup %13659 }
 0x48d   : > { %v11793_v12 = vld [vmem:[%s20386_s1 + $0x9f8] sm:$0xf0]  ;;  %v13662_v46 = vpop.eup %13661 }
 0x48e   : > { %8044 = vmatpush.bf16.msrb.mxu2 %v11924_v50  ;;  %v13021_v13 = vld [vmem:[%s20386_s1 + $0xdbc] sm:$0xf]  ;;  %8019 = vmatpush.bf16.msrb.mxu0 %v10836_v62  ;;  %v11796_v29 = vor.u32 %v12893_v26, %v11793_v12  ;;  %v8246_v6 = vadd.f32 %v20122_v27, %v8245_v31  ;;  %13663 = vtanh.f32 %v8114_v35  ;;  %v20295_v31 = vadd.f32 1.0, %v13660_v20 }
 0x48f   : > { %v12305_v10 = vld [vmem:[%s20386_s1 + $0xdf8] sm:$0xf0]  ;;  %v20312_v40 = vadd.f32 1.0, %v13662_v46 }
 0x490   : > { %8057 = vmatpush.bf16.msrb.mxu3 %v12436_v55  ;;  %8032 = vmatpush.bf16.msrb.mxu1 %v11348_v57  ;;  %v12621_v63 = vld [vmem:[%s20386_s1 + $0x13c] sm:$0xf]  ;;  %v12308_v8 = vor.u32 %v13021_v13, %v12305_v10  ;;  %v8177_v57 = vand.u32 2147483648, %v20001_v11  ;;  %13665 = vrcp.f32 %v20295_v31  ;;  %v8268_v20 = vand.u32 2147483648, %v20295_v31 }
 0x491   : > { %v10705_v30 = vld [vmem:[%s20386_s1 + $0x178] sm:$0xf0]  ;;  %13667 = vrcp.f32 %v20312_v40  ;;  %vm8262_vm9 = vweird.f32 %v20295_v31  ;;  %v8266_v53 = vand.u32 2147483647, %v20295_v31  ;;  %vm8186_vm12 = vweird.f32 %v20312_v40 }
 0x492   : > { %8045 = vmatpush.bf16.msrb.mxu2 %v11860_v19  ;;  %v12749_v33 = vld [vmem:[%s20386_s1 + $0x53c] sm:$0xf]  ;;  %8020 = vmatpush.bf16.msrb.mxu0 %v10772_v22  ;;  %v10708_v55 = vor.u32 %v12621_v63, %v10705_v30  ;;  %v8250_v22 = vsel %vm20266_vm2, %v20122_v27, %v8246_v6  ;;  %v7793_v30 = vpop.f32.mrf.mxu2 }
 0x493   : > { %v11217_v38 = vld [vmem:[%s20386_s1 + $0x578] sm:$0xf0]  ;;  %vm8267_vm14 = vcmp.eq.f32.partialorder %v8266_v53, 8.507059e+37 }
 0x494   : > { %8058 = vmatpush.bf16.msrb.mxu3 %v12372_v9  ;;  %v12877_v41 = vld [vmem:[%s20386_s1 + $0x93c] sm:$0xf]  ;;  %8033 = vmatpush.bf16.msrb.mxu1 %v11284_v28  ;;  %v11220_v39 = vor.u32 %v12749_v33, %v11217_v38  ;;  %v8170_v9 = vadd.f32 %v20149_v43, %v8169_v52  ;;  %v8254_v33 = vor.u32 1.1754944e-38, %v8253_v37  ;;  %v7806_v38 = vpop.f32.mrf.mxu3 }
 0x495   : > { %v11729_v18 = vld [vmem:[%s20386_s1 + $0x978] sm:$0xf0] }
 0x496   : > { %v13005_v48 = vld [vmem:[%s20386_s1 + $0xd3c] sm:$0xf]  ;;  %8046 = vmatpush.bf16.msrb.mxu2 %v11796_v29  ;;  %v11732_v54 = vor.u32 %v12877_v41, %v11729_v18  ;;  %8021 = vmatpush.bf16.msrb.mxu0 %v10708_v55  ;;  %v8174_v41 = vsel %vm20299_vm5, %v20149_v43, %v8170_v9  ;;  %v8178_v18 = vor.u32 1.1754944e-38, %v8177_v57  ;;  %v8255_v47 = vsel %vm8252_vm6, %v8254_v33, %v8250_v22  ;;  %v13664_v55 = vpop.eup %13663 }
 0x497   : > { %v12241_v50 = vld [vmem:[%s20386_s1 + $0xd78] sm:$0xf0]  ;;  %v13666_v11 = vpop.eup %13665 }
 0x498   : > { %v12605_v58 = vld [vmem:[%s20386_s1 + $0xbc] sm:$0xf]  ;;  %8059 = vmatpush.bf16.msrb.mxu3 %v12308_v8  ;;  %v12244_v0 = vor.u32 %v13005_v48, %v12241_v50  ;;  %8034 = vmatpush.bf16.msrb.mxu1 %v11220_v39  ;;  %v8354_v48 = vld [vmem:[#allocation3 + $0x8] sm:$0xff]  ;;  %v8179_v43 = vsel %vm8176_vm7, %v8178_v18, %v8174_v41  ;;  %v13668_v42 = vpop.eup %13667  ;;  %vm8263_vm8 = vweird.f32 %v13666_v11 }
 0x499   : > { %v10641_v3 = vld [vmem:[%s20386_s1 + $0xf8] sm:$0xf0]  ;;  %v8358_v32 = vmul.f32 %v8354_v48, %v8255_v47  ;;  %v8362_v7 = vmul.f32 %v13664_v55, %v8179_v43  ;;  %vm8187_vm10 = vweird.f32 %v13668_v42  ;;  %vm8264_vm11 = vmor %vm8262_vm9, %vm8263_vm8 }
 0x49a   : > { %v12733_v36 = vld [vmem:[%s20386_s1 + $0x4bc] sm:$0xf]  ;;  %v10644_v26 = vor.u32 %v12605_v58, %v10641_v3  ;;  %8047 = vmatpush.bf16.msrb.mxu2 %v11732_v54  ;;  %v8258_v54 = vmul.f32 %v13666_v11, %v20295_v31  ;;  %v7817_v58 = vpop.f32.mrf.mxu0  ;;  %v8182_v3 = vmul.f32 %v13668_v42, %v20312_v40  ;;  %vm8188_vm13 = vmor %vm8186_vm12, %vm8187_vm10 }
 0x49b   : > { %v11153_v4 = vld [vmem:[%s20386_s1 + $0x4f8] sm:$0xf0]  ;;  %v20318_v39 = vadd.f32 %v8362_v7, %v8358_v32  ;;  %v7818_v6 = vadd.f32 %v7817_v58, %v17085_v59 }
 0x49c   : > { %v12861_v34 = vld [vmem:[%s20386_s1 + $0x8bc] sm:$0xf]  ;;  %v11156_v12 = vor.u32 %v12733_v36, %v11153_v4  ;;  %8060 = vmatpush.bf16.msrb.mxu3 %v12244_v0  ;;  %8022 = vmatpush.bf16.msrb.mxu0 %v10644_v26  ;;  %v7830_v36 = vpop.f32.mrf.mxu1  ;;  %v8259_v0 = vsub.f32 1.0, %v8258_v54  ;;  %v7856_v37 = vpop.f32.mrf.mxu3  ;;  %v8192_v26 = vand.u32 2147483648, %v20312_v40 }
 0x49d   : > { %v11665_v62 = vld [vmem:[%s20386_s1 + $0x8f8] sm:$0xf0]  ;;  %8378 = vst [vmem:[#allocation3 + $0x8] sm:$0xff] %v20318_v39  ;;  %v7831_v4 = vadd.f32 %v7830_v36, %v7818_v6 }
 0x49e   : > { %v12989_v19 = vld [vmem:[%s20386_s1 + $0xcbc] sm:$0xf]  ;;  %v11668_v13 = vor.u32 %v12861_v34, %v11665_v62  ;;  %8035 = vmatpush.bf16.msrb.mxu1 %v11156_v12  ;;  %v8260_v34 = vmul.f32 %v13666_v11, %v8259_v0  ;;  %v7843_v62 = vpop.f32.mrf.mxu2  ;;  %v8190_v12 = vand.u32 2147483647, %v20312_v40  ;;  %v8193_v22 = vor.u32 1.1754944e-38, %v8192_v26 }
 0x49f   : > { %v12177_v45 = vld [vmem:[%s20386_s1 + $0xcf8] sm:$0xf0] }
 0x4a0   : > { %v12589_v10 = vld [vmem:[%s20386_s1 + $0x3c] sm:$0xf]  ;;  %v12180_v23 = vor.u32 %v12989_v19, %v12177_v45  ;;  %8048 = vmatpush.bf16.msrb.mxu2 %v11668_v13  ;;  %v8261_v59 = vadd.f32 %v13666_v11, %v8260_v34  ;;  %vm8191_vm15 = vcmp.eq.f32.partialorder %v8190_v12, 8.507059e+37 }
 0x4a1   : > { %v10577_v61 = vld [vmem:[%s20386_s1 + $0x78] sm:$0xf0] }
 0x4a2   : > { %v12717_v21 = vld [vmem:[%s20386_s1 + $0x43c] sm:$0xf]  ;;  %v10580_v14 = vor.u32 %v12589_v10, %v10577_v61  ;;  %8061 = vmatpush.bf16.msrb.mxu3 %v12180_v23  ;;  %v7819_v35 = vpop.f32.mrf.mxu0  ;;  %v8265_v13 = vsel %vm8264_vm11, %v13666_v11, %v8261_v59  ;;  %v8269_v61 = vor.u32 1.1754944e-38, %v8268_v20 }
 0x4a3   : > { %v11089_v28 = vld [vmem:[%s20386_s1 + $0x478] sm:$0xf0] }
 0x4a4   : > { %v12845_v29 = vld [vmem:[%s20386_s1 + $0x83c] sm:$0xf]  ;;  %v11092_v50 = vor.u32 %v12717_v21, %v11089_v28  ;;  %8023 = vmatpush.bf16.msrb.mxu0 %v10580_v14  ;;  %v7832_v19 = vpop.f32.mrf.mxu1  ;;  %v7858_v21 = vpop.f32.mrf.mxu3  ;;  %v8270_v23 = vsel %vm8267_vm14, %v8269_v61, %v8265_v13  ;;  %v8355_v28 = vld [vmem:[#allocation3 + $0x10] sm:$0xff] }
 0x4a5   : > { %v11601_v63 = vld [vmem:[%s20386_s1 + $0x878] sm:$0xf0]  ;;  %v8359_v30 = vmul.f32 %v8355_v28, %v8270_v23 }
 0x4a6   : > { %v12973_v8 = vld [vmem:[%s20386_s1 + $0xc3c] sm:$0xf]  ;;  %v11604_v51 = vor.u32 %v12845_v29, %v11601_v63  ;;  %8036 = vmatpush.bf16.msrb.mxu1 %v11092_v50  ;;  %v7845_v10 = vpop.f32.mrf.mxu2 }
 0x4a7   : > { %v12113_v15 = vld [vmem:[%s20386_s1 + $0xc78] sm:$0xf0]  ;;  %8024 = vmatmul.bf16.vlgmr.msrb.gmra.mxu0 %v17170_v60  ;;  %v8183_v60 = vsub.f32 1.0, %v8182_v3 }
 0x4a8   : > { %v12116_v52 = vor.u32 %v12973_v8, %v12113_v15  ;;  %8049 = vmatpush.bf16.msrb.mxu2 %v11604_v51 }
 0x4a9   : > { %8037 = vmatmul.bf16.vlgmr.msrb.gmra.mxu1 %v17183_v2  ;;  %v7844_v2 = vadd.f32 %v7843_v62, %v7831_v4  ;;  %v8184_v57 = vmul.f32 %v13668_v42, %v8183_v60 }
 0x4aa   : > { %8062 = vmatpush.bf16.msrb.mxu3 %v12116_v52 }
 0x4ab   : > { %8050 = vmatmul.bf16.vlgmr.msrb.gmra.mxu2 %v17181_v1  ;;  %v20331_v1 = vld [vmem:[%s20388_s3 + $0x8] sm:$0xff]  ;;  %v7857_v45 = vadd.f32 %v7856_v37, %v7844_v2  ;;  %v8185_v9 = vadd.f32 %v13668_v42, %v8184_v57 }
 0x4ac   : > { %v8084_v40 = vperm.slane %v20331_v1, 4  ;;  %v8085_v37 = vperm.slane %v20331_v1, 5 }
 0x4ad   : > { %8063 = vmatmul.bf16.vlgmr.msrb.gmra.mxu3 %v17191_v5  ;;  %v8083_v5 = vperm.slane %v20331_v1, 3  ;;  %v8189_v46 = vsel %vm8188_vm13, %v13668_v42, %v8185_v9 }
 0x4ae   : > { %v8194_v63 = vsel %vm8191_vm15, %v8193_v22, %v8189_v46 }
 0x4af   : > { %v8115_v56 = vadd.f32 %v8083_v5, %v7857_v45 }
 0x4b1   : > { %13669 = vtanh.f32 %v8115_v56 }
 0x4b2   : > { %v7869_v27 = vpop.f32.mrf.mxu0 }
 0x4b3   : > { %v7870_v15 = vadd.f32 %v7869_v27, %v17293_v16 }
 0x4b4   : > { %v7882_v8 = vpop.f32.mrf.mxu1 }
 0x4b5   : > { %v7883_v38 = vadd.f32 %v7882_v8, %v7870_v15  ;;  %v8086_v15 = vperm.slane %v20331_v1, 6 }
 0x4b7   : > { %v13670_v29 = vpop.eup %13669 }
 0x4b8   : > { %v8363_v33 = vmul.f32 %v13670_v29, %v8194_v63 }
 0x4ba   : > { %v20340_v31 = vadd.f32 %v8363_v33, %v8359_v30  ;;  %v7871_v47 = vpop.f32.mrf.mxu0 }
 0x4bc   : > { %8379 = vst [vmem:[#allocation3 + $0x10] sm:$0xff] %v20340_v31  ;;  %v7895_v41 = vpop.f32.mrf.mxu2  ;;  %v7884_v48 = vpop.f32.mrf.mxu1 }
 0x4bd   : > { %v7896_v18 = vadd.f32 %v7895_v41, %v7883_v38 }
 0x4be   : > { %v7908_v14 = vpop.f32.mrf.mxu3 }
 0x4bf   : > { %v7909_v50 = vadd.f32 %v7908_v14, %v7896_v18 }
 0x4c1   : > { %v8116_v51 = vadd.f32 %v8084_v40, %v7909_v50 }
 0x4c3   : > { %v12573_v52 = vmul.f32 -1.442695, %v8116_v51 }
 0x4c4   : > { %v7897_v55 = vpop.f32.mrf.mxu2 }
 0x4c5   : > { %13671 = vpow2.f32 %v12573_v52 }
 0x4c6   : > { %v7910_v43 = vpop.f32.mrf.mxu3 }
 0x4cb   : > { %v13672_v32 = vpop.eup %13671 }
 0x4cc   : > { %v8288_v7 = vadd.f32 1.0, %v13672_v32 }
 0x4ce   : > { %13673 = vrcp.f32 %v8288_v7  ;;  %v8303_v36 = vand.u32 2147483648, %v8288_v7  ;;  %v8301_v0 = vand.u32 2147483647, %v8288_v7  ;;  %vm8297_vm1 = vweird.f32 %v8288_v7 }
 0x4cf   : > { %13675 = vtanh.f32 %v19857_v44 }
 0x4d0   : > { %v8304_v35 = vor.u32 1.1754944e-38, %v8303_v36  ;;  %vm8302_vm3 = vcmp.eq.f32.partialorder %v8301_v0, 8.507059e+37 }
 0x4d4   : > { %v13674_v42 = vpop.eup %13673 }
 0x4d5   : > { %v8293_v54 = vmul.f32 %v13674_v42, %v8288_v7  ;;  %vm8298_vm0 = vweird.f32 %v13674_v42  ;;  %v13676_v44 = vpop.eup %13675 }
 0x4d6   : > { %vm8299_vm2 = vmor %vm8297_vm1, %vm8298_vm0 }
 0x4d7   : > { %v8294_v3 = vsub.f32 1.0, %v8293_v54 }
 0x4d8   : > { %v7921_v11 = vpop.f32.mrf.mxu0 }
 0x4d9   : > { %v7922_v58 = vadd.f32 %v7921_v11, %v17491_v25  ;;  %v8295_v6 = vmul.f32 %v13674_v42, %v8294_v3 }
 0x4da   : > { %v7934_v16 = vpop.f32.mrf.mxu1 }
 0x4db   : > { %v7935_v60 = vadd.f32 %v7934_v16, %v7922_v58  ;;  %v8296_v34 = vadd.f32 %v13674_v42, %v8295_v6 }
 0x4dd   : > { %v8300_v25 = vsel %vm8299_vm2, %v13674_v42, %v8296_v34  ;;  %v8087_v34 = vperm.slane %v20331_v1, 7 }
 0x4de   : > { %v8305_v45 = vsel %vm8302_vm3, %v8304_v35, %v8300_v25 }
 0x4df   : > { %v20348_v59 = vmul.f32 %v13676_v44, %v8305_v45 }
 0x4e0   : > { %v7923_v5 = vpop.f32.mrf.mxu0 }
 0x4e1   : > { %8380 = vst [vmem:[#allocation2 + $0x10] sm:$0xff] %v20348_v59 }
 0x4e2   : > { %v7947_v4 = vpop.f32.mrf.mxu2  ;;  %v7936_v57 = vpop.f32.mrf.mxu1 }
 0x4e3   : > { %v7948_v62 = vadd.f32 %v7947_v4, %v7935_v60 }
 0x4e4   : > { %v7960_v2 = vpop.f32.mrf.mxu3 }
 0x4e5   : > { %v7961_v19 = vadd.f32 %v7960_v2, %v7948_v62 }
 0x4e7   : > { %v8117_v20 = vadd.f32 %v8085_v37, %v7961_v19 }
 0x4e9   : > { %v12574_v56 = vmul.f32 -1.442695, %v8117_v20 }
 0x4ea   : > { %v7949_v9 = vpop.f32.mrf.mxu2 }
 0x4eb   : > { %13677 = vpow2.f32 %v12574_v56 }
 0x4ec   : > { %v7962_v53 = vpop.f32.mrf.mxu3 }
 0x4f1   : > { %v13678_v26 = vpop.eup %13677 }
 0x4f2   : > { %v8289_v12 = vadd.f32 1.0, %v13678_v26 }
 0x4f4   : > { %13679 = vrcp.f32 %v8289_v12  ;;  %v8318_v23 = vand.u32 2147483648, %v8289_v12  ;;  %v8316_v29 = vand.u32 2147483647, %v8289_v12  ;;  %vm8312_vm5 = vweird.f32 %v8289_v12 }
 0x4f5   : > { %13681 = vtanh.f32 %v20117_v24 }
 0x4f6   : > { %v8319_v41 = vor.u32 1.1754944e-38, %v8318_v23  ;;  %vm8317_vm7 = vcmp.eq.f32.partialorder %v8316_v29, 8.507059e+37 }
 0x4fa   : > { %v13680_v10 = vpop.eup %13679 }
 0x4fb   : > { %v8308_v21 = vmul.f32 %v13680_v10, %v8289_v12  ;;  %vm8313_vm4 = vweird.f32 %v13680_v10  ;;  %v13682_v24 = vpop.eup %13681 }
 0x4fc   : > { %vm8314_vm6 = vmor %vm8312_vm5, %vm8313_vm4 }
 0x4fd   : > { %v8309_v22 = vsub.f32 1.0, %v8308_v21 }
 0x4fe   : > { %v7973_v13 = vpop.f32.mrf.mxu0 }
 0x4ff   : > { %v7974_v46 = vadd.f32 %v7973_v13, %v17689_v49  ;;  %v8310_v28 = vmul.f32 %v13680_v10, %v8309_v22 }
 0x500   : > { %v7986_v61 = vpop.f32.mrf.mxu1 }
 0x501   : > { %v7987_v63 = vadd.f32 %v7986_v61, %v7974_v46  ;;  %v8311_v33 = vadd.f32 %v13680_v10, %v8310_v28 }
 0x503   : > { %v8315_v49 = vsel %vm8314_vm6, %v13680_v10, %v8311_v33 }
 0x504   : > { %v8320_v40 = vsel %vm8317_vm7, %v8319_v41, %v8315_v49 }
 0x505   : > { %v20354_v47 = vmul.f32 %v13682_v24, %v8320_v40 }
 0x506   : > { %v7975_v38 = vpop.f32.mrf.mxu0 }
 0x507   : > { %8381 = vst [vmem:[#allocation2] sm:$0xff] %v20354_v47 }
 0x508   : > { %v7999_v30 = vpop.f32.mrf.mxu2  ;;  %v7988_v18 = vpop.f32.mrf.mxu1 }
 0x509   : > { %v8000_v27 = vadd.f32 %v7999_v30, %v7987_v63 }
 0x50a   : > { %v8012_v8 = vpop.f32.mrf.mxu3 }
 0x50b   : > { %v8013_v14 = vadd.f32 %v8012_v8, %v8000_v27 }
 0x50d   : > { %v8118_v48 = vadd.f32 %v8086_v15, %v8013_v14 }
 0x50f   : > { %v12575_v50 = vmul.f32 -1.442695, %v8118_v48 }
 0x510   : > { %v8001_v51 = vpop.f32.mrf.mxu2 }
 0x511   : > { %13683 = vpow2.f32 %v12575_v50 }
 0x512   : > { %v8014_v52 = vpop.f32.mrf.mxu3 }
 0x517   : > { %v13684_v55 = vpop.eup %13683 }
 0x518   : > { %v8290_v43 = vadd.f32 1.0, %v13684_v55 }
 0x51a   : > { %13685 = vrcp.f32 %v8290_v43  ;;  %v8333_v58 = vand.u32 2147483648, %v8290_v43  ;;  %v8331_v6 = vand.u32 2147483647, %v8290_v43  ;;  %vm8327_vm9 = vweird.f32 %v8290_v43 }
 0x51b   : > { %13687 = vtanh.f32 %v20318_v39 }
 0x51c   : > { %vm8332_vm11 = vcmp.eq.f32.partialorder %v8331_v6, 8.507059e+37 }
 0x520   : > { %v13686_v11 = vpop.eup %13685 }
 0x521   : > { %v8323_v16 = vmul.f32 %v13686_v11, %v8290_v43  ;;  %vm8328_vm8 = vweird.f32 %v13686_v11  ;;  %v13688_v39 = vpop.eup %13687 }
 0x522   : > { %vm8329_vm10 = vmor %vm8327_vm9, %vm8328_vm8 }
 0x523   : > { %v8324_v54 = vsub.f32 1.0, %v8323_v16 }
 0x524   : > { %v8025_v32 = vpop.f32.mrf.mxu0 }
 0x525   : > { %v8026_v42 = vadd.f32 %v8025_v32, %v17896_v17  ;;  %v8325_v36 = vmul.f32 %v13686_v11, %v8324_v54  ;;  %v8334_v17 = vor.u32 1.1754944e-38, %v8333_v58 }
 0x526   : > { %v8038_v7 = vpop.f32.mrf.mxu1 }
 0x527   : > { %v8039_v3 = vadd.f32 %v8038_v7, %v8026_v42  ;;  %v8326_v2 = vadd.f32 %v13686_v11, %v8325_v36 }
 0x529   : > { %v8330_v35 = vsel %vm8329_vm10, %v13686_v11, %v8326_v2 }
 0x52a   : > { %v8335_v57 = vsel %vm8332_vm11, %v8334_v17, %v8330_v35 }
 0x52b   : > { %v8374_v19 = vmul.f32 %v13688_v39, %v8335_v57 }
 0x52c   : > { %v8027_v62 = vpop.f32.mrf.mxu0 }
 0x52d   : > { %8382 = vst [vmem:[#allocation2 + $0x18] sm:$0xff] %v8374_v19 }
 0x52e   : > { %v8051_v0 = vpop.f32.mrf.mxu2  ;;  %v8040_v37 = vpop.f32.mrf.mxu1 }
 0x52f   : > { %v8052_v60 = vadd.f32 %v8051_v0, %v8039_v3 }
 0x530   : > { %v8064_v4 = vpop.f32.mrf.mxu3 }
 0x531   : > { %v8065_v5 = vadd.f32 %v8064_v4, %v8052_v60 }
 0x533   : > { %v8119_v25 = vadd.f32 %v8087_v34, %v8065_v5 }
 0x535   : > { %v12576_v44 = vmul.f32 -1.442695, %v8119_v25 }
 0x536   : > { %v8053_v45 = vpop.f32.mrf.mxu2 }
 0x537   : > { %13689 = vpow2.f32 %v12576_v44 }
 0x538   : > { %v8066_v20 = vpop.f32.mrf.mxu3 }
 0x53d   : > { %v13690_v56 = vpop.eup %13689 }
 0x53e   : > { %v8291_v1 = vadd.f32 1.0, %v13690_v56 }
 0x540   : > { %13691 = vrcp.f32 %v8291_v1  ;;  %v8348_v12 = vand.u32 2147483648, %v8291_v1  ;;  %v8346_v10 = vand.u32 2147483647, %v8291_v1  ;;  %vm8342_vm13 = vweird.f32 %v8291_v1 }
 0x541   : > { %13693 = vtanh.f32 %v20340_v31 }
 0x542   : > { %v8349_v21 = vor.u32 1.1754944e-38, %v8348_v12  ;;  %vm8347_vm15 = vcmp.eq.f32.partialorder %v8346_v10, 8.507059e+37 }
 0x546   : > { %v13692_v9 = vpop.eup %13691 }
 0x547   : > { %v8338_v53 = vmul.f32 %v13692_v9, %v8291_v1  ;;  %vm8343_vm12 = vweird.f32 %v13692_v9  ;;  %v13694_v22 = vpop.eup %13693 }
 0x548   : > { %vm8344_vm14 = vmor %vm8342_vm13, %vm8343_vm12 }
 0x549   : > { %v8339_v26 = vsub.f32 1.0, %v8338_v53 }
 0x54b   : > { %v8340_v13 = vmul.f32 %v13692_v9, %v8339_v26 }
 0x54d   : > { %v8341_v61 = vadd.f32 %v13692_v9, %v8340_v13 }
 0x54f   : > { %v8345_v46 = vsel %vm8344_vm14, %v13692_v9, %v8341_v61  ;;  %8387 = sbr.rel (%p12577_p6) target bundleno = 1368 (0x558), region = 44 }
 0x550   : > { %v8350_v23 = vsel %vm8347_vm15, %v8349_v21, %v8345_v46 }
 0x551   : > { %v8375_v28 = vmul.f32 %v13694_v22, %v8350_v23 }
 0x553   : > { %8383 = vst [vmem:[#allocation2 + $0x8] sm:$0xff] %v8375_v28 }
 0x554   : > { %8388 = vst [vmem:[%s20389_s4] sm:$0xff] %v20348_v59 }
 0x555   : > { %8389 = vst [vmem:[%s20389_s4 + $0x8] sm:$0xff] %v20354_v47 }
 0x556   : > { %8390 = vst [vmem:[%s20389_s4 + $0x10] sm:$0xff] %v8374_v19 }
 0x557   : > { %8391 = vst [vmem:[%s20389_s4 + $0x18] sm:$0xff] %v8375_v28 }
 0x558 PF: > { %s14_s17 = sadd.s32 1, %s13719_s17   ;;  %s20406_s15 = smov %s13715_s16 }
 0x559   : > { %p11_p7 = scmp.ge.s32.totalorder %s14_s17, 10   ;;  %s20407_s16 = smov %s20409_s18 }
 0x55b   :  { %13 = sbr.rel (!%p11_p7) target bundleno = 2 (0x2), region = 74 }

</bundles_post_ra>
